<compile_context>
chip_gen: v7x
topology: tpu7x:2x2x1
jax: 0.10.0
libtpu: 0.0.40
codegen_flags: <defaults>
</compile_context>

<pallas_src>
import functools

import numpy as np
import jax
import jax.numpy as jnp
from jax.experimental import pallas as pl
from jax.experimental.pallas import tpu as pltpu

BN_EPS = 1e-5


def _conv_out(size):
    """Output size of Conv2d(kernel=3, stride=2, padding=1)."""
    return (size + 1) // 2


# ----------------------------------------------------------------------------
# Fused kernel
# ----------------------------------------------------------------------------
def _protonet_kernel(
    # inputs
    xpad_ref,                                   # (Cin, R1+ext1) bf16, padded x
    we_ref, be_ref,                             # encoder: (9,C,C) bf16, (C,1) f32
    wse_ref, wsx_ref, bs_ref,                   # seg split weights / bias
    w1_ref, b1_ref, g1_ref, t1_ref,             # h_conv1 + h_batch_norm1
    w2_ref, b2_ref, g2_ref, t2_ref,             # h_conv2 + h_batch_norm2
    w3_ref, b3_ref, g3_ref, t3_ref,             # h_conv3 + h_batch_norm3
    mvalid1_ref, msel1_ref, msel2_ref, msel3_ref,   # (1, R) validity masks
    # output
    out_ref,                                    # (64, N) f32
    # scratch
    epad_ref, mpad_ref, p2_ref, p3_ref,         # padded activations (bf16)
    a1_ref, a2_ref, a3_ref,                     # post BN/ReLU activations (f32)
    *, N, H, W,
):
    f32, bf16 = jnp.float32, jnp.bfloat16

    # ---- static geometry: flat index = n*Hp*Wp + i*Wp + j (padded grids) ----
    Hp, Wp = H + 2, W + 2
    P1, R1 = Hp * Wp, N * Hp * Wp
    Hc1, Wc1 = _conv_out(H), _conv_out(W)        # conv1 output (8, 8)
    Hq, Wq = Hc1 // 2, Wc1 // 2                  # pool1 output (4, 4)
    Hp2, Wp2 = Hq + 2, Wq + 2
    P2, R2 = Hp2 * Wp2, N * Hp2 * Wp2
    Hc2, Wc2 = _conv_out(Hq), _conv_out(Wq)      # conv2 output (2, 2)
    Hr, Wr = Hc2 // 2, Wc2 // 2                  # pool2 output (1, 1)
    Hp3, Wp3 = Hr + 2, Wr + 2
    P3, R3 = Hp3 * Wp3, N * Hp3 * Wp3
    Hc3, Wc3 = _conv_out(Hr), _conv_out(Wr)      # conv3 output (1, 1)

    def conv_dense(src_ref, w_ref, wp, r_len):
        """Shift-and-matmul 3x3 conv over a flat padded buffer.

        Result column r is the conv output whose 3x3 window top-left corner is
        flat padded position r.  Columns whose window crosses a row / image
        boundary are garbage; they are masked or simply never selected later.
        """
        acc = None
        for di in range(3):
            for dj in range(3):
                t = di * 3 + dj
                o = di * wp + dj
                d = jnp.dot(w_ref[t], src_ref[:, o:o + r_len],
                            preferred_element_type=f32)
                acc = d if acc is None else acc + d
        return acc

    def bn_relu(y, msel, count, gamma, beta):
        """Training-mode BatchNorm over the `count` valid columns flagged by
        `msel` (biased variance), folded into one scale/shift, then ReLU."""
        inv = 1.0 / count
        mu = jnp.sum(y * msel, axis=1, keepdims=True) * inv
        var = jnp.sum(((y - mu) ** 2) * msel, axis=1, keepdims=True) * inv
        scale = gamma * jax.lax.rsqrt(var + BN_EPS)
        shift = beta - mu * scale
        return jnp.maximum(y * scale + shift, 0.0)

    # ---- zero the padded VMEM activation buffers (so borders act as pad=1) --
    for ref in (epad_ref, mpad_ref, p2_ref, p3_ref):
        ref[...] = jnp.zeros(ref.shape, bf16)

    mvalid1 = mvalid1_ref[...]                   # (1, R1)

    # ---- e = encoder(x): 3x3, stride 1, same padding ------------------------
    e_dense = conv_dense(xpad_ref, we_ref, Wp, R1) + be_ref[...]
    # valid output (i, j) belongs at padded position (i+1, j+1) == flat r+Wp+1;
    # masking zeroes the garbage columns so all borders of epad stay zero.
    epad_ref[:, Wp + 1:Wp + 1 + R1] = (e_dense * mvalid1).astype(bf16)

    # ---- m = seg(cat(e, x)): split-weight form (no concat materialized) -----
    m_dense = (conv_dense(epad_ref, wse_ref, Wp, R1)
               + conv_dense(xpad_ref, wsx_ref, Wp, R1)
               + bs_ref[...])
    mpad_ref[:, Wp + 1:Wp + 1 + R1] = (m_dense * mvalid1).astype(bf16)

    # ---- h_conv1 (stride 2) + BN + ReLU + MaxPool(2) -------------------------
    c1 = conv_dense(mpad_ref, w1_ref, Wp, R1) + b1_ref[...]
    a1_ref[...] = bn_relu(c1, msel1_ref[...], N * Hc1 * Wc1,
                          g1_ref[...], t1_ref[...])
    # conv1 output (h, w) lives at dense lane (2h)*Wp + 2w, so the 2x2 pool
    # window of pooled (u, v) covers lane offsets {0, 2, 2Wp, 2Wp+2} around
    # base = 4u*Wp + 4v.  Pooled values go straight into conv2's padded buffer.
    for n in range(N):
        for u in range(Hq):
            for v in range(Wq):
                s = n * P1 + 4 * u * Wp + 4 * v
                mx = jnp.maximum(
                    jnp.maximum(a1_ref[:, s:s + 1], a1_ref[:, s + 2:s + 3]),
                    jnp.maximum(a1_ref[:, s + 2 * Wp:s + 2 * Wp + 1],
                                a1_ref[:, s + 2 * Wp + 2:s + 2 * Wp + 3]))
                d = n * P2 + (u + 1) * Wp2 + (v + 1)
                p2_ref[:, d:d + 1] = mx.astype(bf16)

    # ---- h_conv2 (stride 2) + BN + ReLU + MaxPool(2) -------------------------
    c2 = conv_dense(p2_ref, w2_ref, Wp2, R2) + b2_ref[...]
    a2_ref[...] = bn_relu(c2, msel2_ref[...], N * Hc2 * Wc2,
                          g2_ref[...], t2_ref[...])
    for n in range(N):
        for u in range(Hr):
            for v in range(Wr):
                s = n * P2 + 4 * u * Wp2 + 4 * v
                mx = jnp.maximum(
                    jnp.maximum(a2_ref[:, s:s + 1], a2_ref[:, s + 2:s + 3]),
                    jnp.maximum(a2_ref[:, s + 2 * Wp2:s + 2 * Wp2 + 1],
                                a2_ref[:, s + 2 * Wp2 + 2:s + 2 * Wp2 + 3]))
                d = n * P3 + (u + 1) * Wp3 + (v + 1)
                p3_ref[:, d:d + 1] = mx.astype(bf16)

    # ---- h_conv3 (stride 2) + BN + ReLU --------------------------------------
    c3 = conv_dense(p3_ref, w3_ref, Wp3, R3) + b3_ref[...]
    a3_ref[...] = bn_relu(c3, msel3_ref[...], N * Hc3 * Wc3,
                          g3_ref[...], t3_ref[...])
    # conv3 output is 1x1 spatial: per image it sits at dense lane n*P3.
    for n in range(N):
        out_ref[:, n:n + 1] = a3_ref[:, n * P3:n * P3 + 1]


# ----------------------------------------------------------------------------
# Host-side helpers (tiny layout transforms / constant masks)
# ----------------------------------------------------------------------------
def _tap_weights(w):
    """(3, 3, Cin, Cout) f32 -> (9, Cout, Cin) bf16 (per-tap transposed)."""
    kh, kw, cin, cout = w.shape
    return jnp.transpose(w.reshape(kh * kw, cin, cout), (0, 2, 1)).astype(jnp.bfloat16)


def _col(v):
    return v.reshape(-1, 1).astype(jnp.float32)


def _image_masks(n, h_in, w_in):
    """Masks over the flat padded grid (1, n*(h+2)*(w+2)) as f32 constants.

    valid: positions that are real stride-1 conv outputs (i < h_in, j < w_in).
    sel:   positions that are real stride-2 conv outputs (even i, j in range).
    """
    hp, wp = h_in + 2, w_in + 2
    ii = np.arange(hp)[:, None]
    jj = np.arange(wp)[None, :]
    valid = ((ii < h_in) & (jj < w_in)).astype(np.float32)
    hc, wc = (h_in + 1) // 2, (w_in + 1) // 2
    sel = (((ii % 2) == 0) & (ii < 2 * hc) &
           ((jj % 2) == 0) & (jj < 2 * wc)).astype(np.float32)
    tile = lambda m: np.tile(m.reshape(-1), n)[None, :]
    return jnp.asarray(tile(valid)), jnp.asarray(tile(sel))


# ----------------------------------------------------------------------------
# Parameters (deterministic synthetic init, PyTorch-equivalent structure)
# ----------------------------------------------------------------------------
def init_params(key, c_in):
    def conv_p(k, cin, cout, scale=0.1):
        k1, k2 = jax.random.split(k)
        w = scale * jax.random.normal(k1, (3, 3, cin, cout), jnp.float32)
        b = scale * jax.random.normal(k2, (cout,), jnp.float32)
        return w, b

    def bn_p(k, c):
        k1, k2 = jax.random.split(k)
        gamma = 1.0 + 0.1 * jax.random.normal(k1, (c,), jnp.float32)
        beta = 0.1 * jax.random.normal(k2, (c,), jnp.float32)
        return gamma, beta

    keys = jax.random.split(key, 8)
    params = {}
    params["enc"] = conv_p(keys[0], c_in, c_in)          # encoder: Cin -> Cin
    params["seg"] = conv_p(keys[1], 2 * c_in, 2)         # seg: 2*Cin -> 2
    params["h_conv1"] = conv_p(keys[2], 2, 16)
    params["h_bn1"] = bn_p(keys[3], 16)
    params["h_conv2"] = conv_p(keys[4], 16, 32)
    params["h_bn2"] = bn_p(keys[5], 32)
    params["h_conv3"] = conv_p(keys[6], 32, 64)
    params["h_bn3"] = bn_p(keys[7], 64)
    return params


# ----------------------------------------------------------------------------
# Forward pass (mirrors ProtoNetv2.forward)
# ----------------------------------------------------------------------------
@jax.jit
def protonet_v2_forward(params, x_nchw):
    n, c, h, w = x_nchw.shape
    hp, wp = h + 2, w + 2
    r1, ext1 = n * hp * wp, 2 * wp + 2

    hq, wq = _conv_out(h) // 2, _conv_out(w) // 2        # pool1 out (4, 4)
    hp2, wp2 = hq + 2, wq + 2
    r2, ext2 = n * hp2 * wp2, 2 * wp2 + 2
    hr, wr = _conv_out(hq) // 2, _conv_out(wq) // 2      # pool2 out (1, 1)
    hp3, wp3 = hr + 2, wr + 2
    r3, ext3 = n * hp3 * wp3, 2 * wp3 + 2
    assert _conv_out(hr) == 1 and _conv_out(wr) == 1     # final flatten is (N, 64)

    # input laid out as (channels, flat zero-padded spatial), bf16
    xp = jnp.pad(x_nchw, ((0, 0), (0, 0), (1, 1), (1, 1)))
    xpad = jnp.transpose(xp, (1, 0, 2, 3)).reshape(c, r1)
    xpad = jnp.pad(xpad, ((0, 0), (0, ext1))).astype(jnp.bfloat16)

    w_enc, b_enc = params["enc"]
    w_seg, b_seg = params["seg"]
    w1, b1 = params["h_conv1"]; g1, t1 = params["h_bn1"]
    w2, b2 = params["h_conv2"]; g2, t2 = params["h_bn2"]
    w3, b3 = params["h_conv3"]; g3, t3 = params["h_bn3"]

    we = _tap_weights(w_enc)
    wse = _tap_weights(w_seg[:, :, :c, :])   # concat channels [0:c]  = encoder out
    wsx = _tap_weights(w_seg[:, :, c:, :])   # concat channels [c:2c] = raw input x
    w1t, w2t, w3t = _tap_weights(w1), _tap_weights(w2), _tap_weights(w3)

    mvalid1, msel1 = _image_masks(n, h, w)
    _, msel2 = _image_masks(n, hq, wq)
    _, msel3 = _image_masks(n, hr, wr)

    c_seg, c1o, c2o, c3o = w_seg.shape[-1], w1.shape[-1], w2.shape[-1], w3.shape[-1]
    kernel = functools.partial(_protonet_kernel, N=n, H=h, W=w)
    vmem = pl.BlockSpec(memory_space=pltpu.MemorySpace.VMEM)

    args = (xpad,
            we, _col(b_enc),
            wse, wsx, _col(b_seg),
            w1t, _col(b1), _col(g1), _col(t1),
            w2t, _col(b2), _col(g2), _col(t2),
            w3t, _col(b3), _col(g3), _col(t3),
            mvalid1, msel1, msel2, msel3)

    out = pl.pallas_call(
        kernel,
        out_shape=jax.ShapeDtypeStruct((c3o, n), jnp.float32),
        in_specs=[vmem] * len(args),
        out_specs=vmem,
        scratch_shapes=[
            pltpu.VMEM((c, r1 + ext1), jnp.bfloat16),      # encoder out, padded
            pltpu.VMEM((c_seg, r1 + ext1), jnp.bfloat16),  # seg out, padded
            pltpu.VMEM((c1o, r2 + ext2), jnp.bfloat16),    # pool1 out, padded
            pltpu.VMEM((c2o, r3 + ext3), jnp.bfloat16),    # pool2 out, padded
            pltpu.VMEM((c1o, r1), jnp.float32),            # conv1 post BN/ReLU
            pltpu.VMEM((c2o, r2), jnp.float32),            # conv2 post BN/ReLU
            pltpu.VMEM((c3o, r3), jnp.float32),            # conv3 post BN/ReLU
        ],
    )(*args)

    # nn.Flatten() on the NCHW (N, 64, 1, 1) classifier output -> (N, 64)
    return out.T


if __name__ == "__main__":
    key = jax.random.PRNGKey(0)
    k_x, k_p = jax.random.split(key)

    N, C, H, W = 2, 4, 16, 16
    x = jax.random.normal(k_x, (N, C, H, W), jnp.float32)
    params = init_params(k_p, C)

    out = protonet_v2_forward(params, x)
    out = jax.block_until_ready(out)

    assert out.shape == (N, 64), out.shape
    assert bool(jnp.all(jnp.isfinite(out)))
    print("KERNEL_OK")
</pallas_src>

<mosaic_0001>
module attributes {stable_mosaic.version = 11 : i64} {
  func.func @_protonet_kernel(%arg0: memref<4x686xbf16, #tpu.memory_space<vmem>>, %arg1: memref<9x4x4xbf16, #tpu.memory_space<vmem>>, %arg2: memref<4x1xf32, #tpu.memory_space<vmem>>, %arg3: memref<9x2x4xbf16, #tpu.memory_space<vmem>>, %arg4: memref<9x2x4xbf16, #tpu.memory_space<vmem>>, %arg5: memref<2x1xf32, #tpu.memory_space<vmem>>, %arg6: memref<9x16x2xbf16, #tpu.memory_space<vmem>>, %arg7: memref<16x1xf32, #tpu.memory_space<vmem>>, %arg8: memref<16x1xf32, #tpu.memory_space<vmem>>, %arg9: memref<16x1xf32, #tpu.memory_space<vmem>>, %arg10: memref<9x32x16xbf16, #tpu.memory_space<vmem>>, %arg11: memref<32x1xf32, #tpu.memory_space<vmem>>, %arg12: memref<32x1xf32, #tpu.memory_space<vmem>>, %arg13: memref<32x1xf32, #tpu.memory_space<vmem>>, %arg14: memref<9x64x32xbf16, #tpu.memory_space<vmem>>, %arg15: memref<64x1xf32, #tpu.memory_space<vmem>>, %arg16: memref<64x1xf32, #tpu.memory_space<vmem>>, %arg17: memref<64x1xf32, #tpu.memory_space<vmem>>, %arg18: memref<1x648xf32, #tpu.memory_space<vmem>>, %arg19: memref<1x648xf32, #tpu.memory_space<vmem>>, %arg20: memref<1x72xf32, #tpu.memory_space<vmem>>, %arg21: memref<1x18xf32, #tpu.memory_space<vmem>>, %arg22: memref<64x2xf32, #tpu.memory_space<vmem>>, %arg23: memref<4x686xbf16, #tpu.memory_space<vmem>>, %arg24: memref<2x686xbf16, #tpu.memory_space<vmem>>, %arg25: memref<16x86xbf16, #tpu.memory_space<vmem>>, %arg26: memref<32x26xbf16, #tpu.memory_space<vmem>>, %arg27: memref<16x648xf32, #tpu.memory_space<vmem>>, %arg28: memref<32x72xf32, #tpu.memory_space<vmem>>, %arg29: memref<64x18xf32, #tpu.memory_space<vmem>>) attributes {dimension_semantics = [], scalar_prefetch = 0 : i64, scratch_operands = 7 : i64, tpu.core_type = #tpu.core_type<tc>} {
    %cst = arith.constant 0.000000e+00 : bf16
    %0 = vector.broadcast %cst : bf16 to vector<4x686xbf16>
    %c0 = arith.constant 0 : index
    %c0_0 = arith.constant 0 : index
    %1 = vector.load %arg23[%c0, %c0_0] : memref<4x686xbf16, #tpu.memory_space<vmem>>, vector<4x686xbf16>
    tpu.vector_store %arg23[%c0, %c0_0], %0 {strides = array<i32>} : memref<4x686xbf16, #tpu.memory_space<vmem>>, vector<4x686xbf16>,
    %cst_1 = arith.constant 0.000000e+00 : bf16
    %2 = vector.broadcast %cst_1 : bf16 to vector<2x686xbf16>
    %c0_2 = arith.constant 0 : index
    %c0_3 = arith.constant 0 : index
    %3 = vector.load %arg24[%c0_2, %c0_3] : memref<2x686xbf16, #tpu.memory_space<vmem>>, vector<2x686xbf16>
    tpu.vector_store %arg24[%c0_2, %c0_3], %2 {strides = array<i32>} : memref<2x686xbf16, #tpu.memory_space<vmem>>, vector<2x686xbf16>,
    %cst_4 = arith.constant 0.000000e+00 : bf16
    %4 = vector.broadcast %cst_4 : bf16 to vector<16x86xbf16>
    %c0_5 = arith.constant 0 : index
    %c0_6 = arith.constant 0 : index
    %5 = vector.load %arg25[%c0_5, %c0_6] : memref<16x86xbf16, #tpu.memory_space<vmem>>, vector<16x86xbf16>
    tpu.vector_store %arg25[%c0_5, %c0_6], %4 {strides = array<i32>} : memref<16x86xbf16, #tpu.memory_space<vmem>>, vector<16x86xbf16>,
    %cst_7 = arith.constant 0.000000e+00 : bf16
    %6 = vector.broadcast %cst_7 : bf16 to vector<32x26xbf16>
    %c0_8 = arith.constant 0 : index
    %c0_9 = arith.constant 0 : index
    %7 = vector.load %arg26[%c0_8, %c0_9] : memref<32x26xbf16, #tpu.memory_space<vmem>>, vector<32x26xbf16>
    tpu.vector_store %arg26[%c0_8, %c0_9], %6 {strides = array<i32>} : memref<32x26xbf16, #tpu.memory_space<vmem>>, vector<32x26xbf16>,
    %c0_10 = arith.constant 0 : index
    %c0_11 = arith.constant 0 : index
    %8 = vector.load %arg18[%c0_10, %c0_11] : memref<1x648xf32, #tpu.memory_space<vmem>>, vector<1x648xf32>
    %c0_12 = arith.constant 0 : index
    %c0_13 = arith.constant 0 : index
    %c0_14 = arith.constant 0 : index
    %9 = vector.load %arg1[%c0_12, %c0_13, %c0_14] : memref<9x4x4xbf16, #tpu.memory_space<vmem>>, vector<1x4x4xbf16>
    %10 = vector.shape_cast %9 : vector<1x4x4xbf16> to vector<4x4xbf16>
    %c0_15 = arith.constant 0 : index
    %c0_16 = arith.constant 0 : index
    %11 = vector.load %arg0[%c0_15, %c0_16] : memref<4x686xbf16, #tpu.memory_space<vmem>>, vector<4x648xbf16>
    %cst_17 = arith.constant dense<0.000000e+00> : vector<4x648xf32>
    %12 = tpu.matmul %10, %11, %cst_17 {dimension_numbers = #tpu.dot_dimension_numbers<[1], [0], [0], [1], [0, 0, 1, 1], [], []>} : vector<4x4xbf16>, vector<4x648xbf16>, vector<4x648xf32> -> vector<4x648xf32>
    %c1 = arith.constant 1 : index
    %c0_18 = arith.constant 0 : index
    %c0_19 = arith.constant 0 : index
    %13 = vector.load %arg1[%c1, %c0_18, %c0_19] : memref<9x4x4xbf16, #tpu.memory_space<vmem>>, vector<1x4x4xbf16>
    %14 = vector.shape_cast %13 : vector<1x4x4xbf16> to vector<4x4xbf16>
    %c0_20 = arith.constant 0 : index
    %c1_21 = arith.constant 1 : index
    %15 = vector.load %arg0[%c0_20, %c1_21] : memref<4x686xbf16, #tpu.memory_space<vmem>>, vector<4x648xbf16>
    %cst_22 = arith.constant dense<0.000000e+00> : vector<4x648xf32>
    %16 = tpu.matmul %14, %15, %cst_22 {dimension_numbers = #tpu.dot_dimension_numbers<[1], [0], [0], [1], [0, 0, 1, 1], [], []>} : vector<4x4xbf16>, vector<4x648xbf16>, vector<4x648xf32> -> vector<4x648xf32>
    %17 = arith.addf %12, %16 : vector<4x648xf32>
    %c2 = arith.constant 2 : index
    %c0_23 = arith.constant 0 : index
    %c0_24 = arith.constant 0 : index
    %18 = vector.load %arg1[%c2, %c0_23, %c0_24] : memref<9x4x4xbf16, #tpu.memory_space<vmem>>, vector<1x4x4xbf16>
    %19 = vector.shape_cast %18 : vector<1x4x4xbf16> to vector<4x4xbf16>
    %c0_25 = arith.constant 0 : index
    %c2_26 = arith.constant 2 : index
    %20 = vector.load %arg0[%c0_25, %c2_26] : memref<4x686xbf16, #tpu.memory_space<vmem>>, vector<4x648xbf16>
    %cst_27 = arith.constant dense<0.000000e+00> : vector<4x648xf32>
    %21 = tpu.matmul %19, %20, %cst_27 {dimension_numbers = #tpu.dot_dimension_numbers<[1], [0], [0], [1], [0, 0, 1, 1], [], []>} : vector<4x4xbf16>, vector<4x648xbf16>, vector<4x648xf32> -> vector<4x648xf32>
    %22 = arith.addf %17, %21 : vector<4x648xf32>
    %c3 = arith.constant 3 : index
    %c0_28 = arith.constant 0 : index
    %c0_29 = arith.constant 0 : index
    %23 = vector.load %arg1[%c3, %c0_28, %c0_29] : memref<9x4x4xbf16, #tpu.memory_space<vmem>>, vector<1x4x4xbf16>
    %24 = vector.shape_cast %23 : vector<1x4x4xbf16> to vector<4x4xbf16>
    %c0_30 = arith.constant 0 : index
    %c18 = arith.constant 18 : index
    %25 = vector.load %arg0[%c0_30, %c18] : memref<4x686xbf16, #tpu.memory_space<vmem>>, vector<4x648xbf16>
    %cst_31 = arith.constant dense<0.000000e+00> : vector<4x648xf32>
    %26 = tpu.matmul %24, %25, %cst_31 {dimension_numbers = #tpu.dot_dimension_numbers<[1], [0], [0], [1], [0, 0, 1, 1], [], []>} : vector<4x4xbf16>, vector<4x648xbf16>, vector<4x648xf32> -> vector<4x648xf32>
    %27 = arith.addf %22, %26 : vector<4x648xf32>
    %c4 = arith.constant 4 : index
    %c0_32 = arith.constant 0 : index
    %c0_33 = arith.constant 0 : index
    %28 = vector.load %arg1[%c4, %c0_32, %c0_33] : memref<9x4x4xbf16, #tpu.memory_space<vmem>>, vector<1x4x4xbf16>
    %29 = vector.shape_cast %28 : vector<1x4x4xbf16> to vector<4x4xbf16>
    %c0_34 = arith.constant 0 : index
    %c19 = arith.constant 19 : index
    %30 = vector.load %arg0[%c0_34, %c19] : memref<4x686xbf16, #tpu.memory_space<vmem>>, vector<4x648xbf16>
    %cst_35 = arith.constant dense<0.000000e+00> : vector<4x648xf32>
    %31 = tpu.matmul %29, %30, %cst_35 {dimension_numbers = #tpu.dot_dimension_numbers<[1], [0], [0], [1], [0, 0, 1, 1], [], []>} : vector<4x4xbf16>, vector<4x648xbf16>, vector<4x648xf32> -> vector<4x648xf32>
    %32 = arith.addf %27, %31 : vector<4x648xf32>
    %c5 = arith.constant 5 : index
    %c0_36 = arith.constant 0 : index
    %c0_37 = arith.constant 0 : index
    %33 = vector.load %arg1[%c5, %c0_36, %c0_37] : memref<9x4x4xbf16, #tpu.memory_space<vmem>>, vector<1x4x4xbf16>
    %34 = vector.shape_cast %33 : vector<1x4x4xbf16> to vector<4x4xbf16>
    %c0_38 = arith.constant 0 : index
    %c20 = arith.constant 20 : index
    %35 = vector.load %arg0[%c0_38, %c20] : memref<4x686xbf16, #tpu.memory_space<vmem>>, vector<4x648xbf16>
    %cst_39 = arith.constant dense<0.000000e+00> : vector<4x648xf32>
    %36 = tpu.matmul %34, %35, %cst_39 {dimension_numbers = #tpu.dot_dimension_numbers<[1], [0], [0], [1], [0, 0, 1, 1], [], []>} : vector<4x4xbf16>, vector<4x648xbf16>, vector<4x648xf32> -> vector<4x648xf32>
    %37 = arith.addf %32, %36 : vector<4x648xf32>
    %c6 = arith.constant 6 : index
    %c0_40 = arith.constant 0 : index
    %c0_41 = arith.constant 0 : index
    %38 = vector.load %arg1[%c6, %c0_40, %c0_41] : memref<9x4x4xbf16, #tpu.memory_space<vmem>>, vector<1x4x4xbf16>
    %39 = vector.shape_cast %38 : vector<1x4x4xbf16> to vector<4x4xbf16>
    %c0_42 = arith.constant 0 : index
    %c36 = arith.constant 36 : index
    %40 = vector.load %arg0[%c0_42, %c36] : memref<4x686xbf16, #tpu.memory_space<vmem>>, vector<4x648xbf16>
    %cst_43 = arith.constant dense<0.000000e+00> : vector<4x648xf32>
    %41 = tpu.matmul %39, %40, %cst_43 {dimension_numbers = #tpu.dot_dimension_numbers<[1], [0], [0], [1], [0, 0, 1, 1], [], []>} : vector<4x4xbf16>, vector<4x648xbf16>, vector<4x648xf32> -> vector<4x648xf32>
    %42 = arith.addf %37, %41 : vector<4x648xf32>
    %c7 = arith.constant 7 : index
    %c0_44 = arith.constant 0 : index
    %c0_45 = arith.constant 0 : index
    %43 = vector.load %arg1[%c7, %c0_44, %c0_45] : memref<9x4x4xbf16, #tpu.memory_space<vmem>>, vector<1x4x4xbf16>
    %44 = vector.shape_cast %43 : vector<1x4x4xbf16> to vector<4x4xbf16>
    %c0_46 = arith.constant 0 : index
    %c37 = arith.constant 37 : index
    %45 = vector.load %arg0[%c0_46, %c37] : memref<4x686xbf16, #tpu.memory_space<vmem>>, vector<4x648xbf16>
    %cst_47 = arith.constant dense<0.000000e+00> : vector<4x648xf32>
    %46 = tpu.matmul %44, %45, %cst_47 {dimension_numbers = #tpu.dot_dimension_numbers<[1], [0], [0], [1], [0, 0, 1, 1], [], []>} : vector<4x4xbf16>, vector<4x648xbf16>, vector<4x648xf32> -> vector<4x648xf32>
    %47 = arith.addf %42, %46 : vector<4x648xf32>
    %c8 = arith.constant 8 : index
    %c0_48 = arith.constant 0 : index
    %c0_49 = arith.constant 0 : index
    %48 = vector.load %arg1[%c8, %c0_48, %c0_49] : memref<9x4x4xbf16, #tpu.memory_space<vmem>>, vector<1x4x4xbf16>
    %49 = vector.shape_cast %48 : vector<1x4x4xbf16> to vector<4x4xbf16>
    %c0_50 = arith.constant 0 : index
    %c38 = arith.constant 38 : index
    %50 = vector.load %arg0[%c0_50, %c38] : memref<4x686xbf16, #tpu.memory_space<vmem>>, vector<4x648xbf16>
    %cst_51 = arith.constant dense<0.000000e+00> : vector<4x648xf32>
    %51 = tpu.matmul %49, %50, %cst_51 {dimension_numbers = #tpu.dot_dimension_numbers<[1], [0], [0], [1], [0, 0, 1, 1], [], []>} : vector<4x4xbf16>, vector<4x648xbf16>, vector<4x648xf32> -> vector<4x648xf32>
    %52 = arith.addf %47, %51 : vector<4x648xf32>
    %c0_52 = arith.constant 0 : index
    %c0_53 = arith.constant 0 : index
    %53 = vector.load %arg2[%c0_52, %c0_53] : memref<4x1xf32, #tpu.memory_space<vmem>>, vector<4x1xf32>
    %54 = vector.broadcast %53 : vector<4x1xf32> to vector<4x648xf32>
    %55 = arith.addf %52, %54 : vector<4x648xf32>
    %56 = vector.broadcast %8 : vector<1x648xf32> to vector<4x648xf32>
    %57 = arith.mulf %55, %56 : vector<4x648xf32>
    %58 = arith.truncf %57 : vector<4x648xf32> to vector<4x648xbf16>
    %c0_54 = arith.constant 0 : index
    %c19_55 = arith.constant 19 : index
    %59 = vector.load %arg23[%c0_54, %c19_55] : memref<4x686xbf16, #tpu.memory_space<vmem>>, vector<4x648xbf16>
    tpu.vector_store %arg23[%c0_54, %c19_55], %58 {strides = array<i32>} : memref<4x686xbf16, #tpu.memory_space<vmem>>, vector<4x648xbf16>,
    %c0_56 = arith.constant 0 : index
    %c0_57 = arith.constant 0 : index
    %c0_58 = arith.constant 0 : index
    %60 = vector.load %arg3[%c0_56, %c0_57, %c0_58] : memref<9x2x4xbf16, #tpu.memory_space<vmem>>, vector<1x2x4xbf16>
    %61 = vector.shape_cast %60 : vector<1x2x4xbf16> to vector<2x4xbf16>
    %c0_59 = arith.constant 0 : index
    %c0_60 = arith.constant 0 : index
    %62 = vector.load %arg23[%c0_59, %c0_60] : memref<4x686xbf16, #tpu.memory_space<vmem>>, vector<4x648xbf16>
    %cst_61 = arith.constant dense<0.000000e+00> : vector<2x648xf32>
    %63 = tpu.matmul %61, %62, %cst_61 {dimension_numbers = #tpu.dot_dimension_numbers<[1], [0], [0], [1], [0, 0, 1, 1], [], []>} : vector<2x4xbf16>, vector<4x648xbf16>, vector<2x648xf32> -> vector<2x648xf32>
    %c1_62 = arith.constant 1 : index
    %c0_63 = arith.constant 0 : index
    %c0_64 = arith.constant 0 : index
    %64 = vector.load %arg3[%c1_62, %c0_63, %c0_64] : memref<9x2x4xbf16, #tpu.memory_space<vmem>>, vector<1x2x4xbf16>
    %65 = vector.shape_cast %64 : vector<1x2x4xbf16> to vector<2x4xbf16>
    %c0_65 = arith.constant 0 : index
    %c1_66 = arith.constant 1 : index
    %66 = vector.load %arg23[%c0_65, %c1_66] : memref<4x686xbf16, #tpu.memory_space<vmem>>, vector<4x648xbf16>
    %cst_67 = arith.constant dense<0.000000e+00> : vector<2x648xf32>
    %67 = tpu.matmul %65, %66, %cst_67 {dimension_numbers = #tpu.dot_dimension_numbers<[1], [0], [0], [1], [0, 0, 1, 1], [], []>} : vector<2x4xbf16>, vector<4x648xbf16>, vector<2x648xf32> -> vector<2x648xf32>
    %68 = arith.addf %63, %67 : vector<2x648xf32>
    %c2_68 = arith.constant 2 : index
    %c0_69 = arith.constant 0 : index
    %c0_70 = arith.constant 0 : index
    %69 = vector.load %arg3[%c2_68, %c0_69, %c0_70] : memref<9x2x4xbf16, #tpu.memory_space<vmem>>, vector<1x2x4xbf16>
    %70 = vector.shape_cast %69 : vector<1x2x4xbf16> to vector<2x4xbf16>
    %c0_71 = arith.constant 0 : index
    %c2_72 = arith.constant 2 : index
    %71 = vector.load %arg23[%c0_71, %c2_72] : memref<4x686xbf16, #tpu.memory_space<vmem>>, vector<4x648xbf16>
    %cst_73 = arith.constant dense<0.000000e+00> : vector<2x648xf32>
    %72 = tpu.matmul %70, %71, %cst_73 {dimension_numbers = #tpu.dot_dimension_numbers<[1], [0], [0], [1], [0, 0, 1, 1], [], []>} : vector<2x4xbf16>, vector<4x648xbf16>, vector<2x648xf32> -> vector<2x648xf32>
    %73 = arith.addf %68, %72 : vector<2x648xf32>
    %c3_74 = arith.constant 3 : index
    %c0_75 = arith.constant 0 : index
    %c0_76 = arith.constant 0 : index
    %74 = vector.load %arg3[%c3_74, %c0_75, %c0_76] : memref<9x2x4xbf16, #tpu.memory_space<vmem>>, vector<1x2x4xbf16>
    %75 = vector.shape_cast %74 : vector<1x2x4xbf16> to vector<2x4xbf16>
    %c0_77 = arith.constant 0 : index
    %c18_78 = arith.constant 18 : index
    %76 = vector.load %arg23[%c0_77, %c18_78] : memref<4x686xbf16, #tpu.memory_space<vmem>>, vector<4x648xbf16>
    %cst_79 = arith.constant dense<0.000000e+00> : vector<2x648xf32>
    %77 = tpu.matmul %75, %76, %cst_79 {dimension_numbers = #tpu.dot_dimension_numbers<[1], [0], [0], [1], [0, 0, 1, 1], [], []>} : vector<2x4xbf16>, vector<4x648xbf16>, vector<2x648xf32> -> vector<2x648xf32>
    %78 = arith.addf %73, %77 : vector<2x648xf32>
    %c4_80 = arith.constant 4 : index
    %c0_81 = arith.constant 0 : index
    %c0_82 = arith.constant 0 : index
    %79 = vector.load %arg3[%c4_80, %c0_81, %c0_82] : memref<9x2x4xbf16, #tpu.memory_space<vmem>>, vector<1x2x4xbf16>
    %80 = vector.shape_cast %79 : vector<1x2x4xbf16> to vector<2x4xbf16>
    %c0_83 = arith.constant 0 : index
    %c19_84 = arith.constant 19 : index
    %81 = vector.load %arg23[%c0_83, %c19_84] : memref<4x686xbf16, #tpu.memory_space<vmem>>, vector<4x648xbf16>
    %cst_85 = arith.constant dense<0.000000e+00> : vector<2x648xf32>
    %82 = tpu.matmul %80, %81, %cst_85 {dimension_numbers = #tpu.dot_dimension_numbers<[1], [0], [0], [1], [0, 0, 1, 1], [], []>} : vector<2x4xbf16>, vector<4x648xbf16>, vector<2x648xf32> -> vector<2x648xf32>
    %83 = arith.addf %78, %82 : vector<2x648xf32>
    %c5_86 = arith.constant 5 : index
    %c0_87 = arith.constant 0 : index
    %c0_88 = arith.constant 0 : index
    %84 = vector.load %arg3[%c5_86, %c0_87, %c0_88] : memref<9x2x4xbf16, #tpu.memory_space<vmem>>, vector<1x2x4xbf16>
    %85 = vector.shape_cast %84 : vector<1x2x4xbf16> to vector<2x4xbf16>
    %c0_89 = arith.constant 0 : index
    %c20_90 = arith.constant 20 : index
    %86 = vector.load %arg23[%c0_89, %c20_90] : memref<4x686xbf16, #tpu.memory_space<vmem>>, vector<4x648xbf16>
    %cst_91 = arith.constant dense<0.000000e+00> : vector<2x648xf32>
    %87 = tpu.matmul %85, %86, %cst_91 {dimension_numbers = #tpu.dot_dimension_numbers<[1], [0], [0], [1], [0, 0, 1, 1], [], []>} : vector<2x4xbf16>, vector<4x648xbf16>, vector<2x648xf32> -> vector<2x648xf32>
    %88 = arith.addf %83, %87 : vector<2x648xf32>
    %c6_92 = arith.constant 6 : index
    %c0_93 = arith.constant 0 : index
    %c0_94 = arith.constant 0 : index
    %89 = vector.load %arg3[%c6_92, %c0_93, %c0_94] : memref<9x2x4xbf16, #tpu.memory_space<vmem>>, vector<1x2x4xbf16>
    %90 = vector.shape_cast %89 : vector<1x2x4xbf16> to vector<2x4xbf16>
    %c0_95 = arith.constant 0 : index
    %c36_96 = arith.constant 36 : index
    %91 = vector.load %arg23[%c0_95, %c36_96] : memref<4x686xbf16, #tpu.memory_space<vmem>>, vector<4x648xbf16>
    %cst_97 = arith.constant dense<0.000000e+00> : vector<2x648xf32>
    %92 = tpu.matmul %90, %91, %cst_97 {dimension_numbers = #tpu.dot_dimension_numbers<[1], [0], [0], [1], [0, 0, 1, 1], [], []>} : vector<2x4xbf16>, vector<4x648xbf16>, vector<2x648xf32> -> vector<2x648xf32>
    %93 = arith.addf %88, %92 : vector<2x648xf32>
    %c7_98 = arith.constant 7 : index
    %c0_99 = arith.constant 0 : index
    %c0_100 = arith.constant 0 : index
    %94 = vector.load %arg3[%c7_98, %c0_99, %c0_100] : memref<9x2x4xbf16, #tpu.memory_space<vmem>>, vector<1x2x4xbf16>
    %95 = vector.shape_cast %94 : vector<1x2x4xbf16> to vector<2x4xbf16>
    %c0_101 = arith.constant 0 : index
    %c37_102 = arith.constant 37 : index
    %96 = vector.load %arg23[%c0_101, %c37_102] : memref<4x686xbf16, #tpu.memory_space<vmem>>, vector<4x648xbf16>
    %cst_103 = arith.constant dense<0.000000e+00> : vector<2x648xf32>
    %97 = tpu.matmul %95, %96, %cst_103 {dimension_numbers = #tpu.dot_dimension_numbers<[1], [0], [0], [1], [0, 0, 1, 1], [], []>} : vector<2x4xbf16>, vector<4x648xbf16>, vector<2x648xf32> -> vector<2x648xf32>
    %98 = arith.addf %93, %97 : vector<2x648xf32>
    %c8_104 = arith.constant 8 : index
    %c0_105 = arith.constant 0 : index
    %c0_106 = arith.constant 0 : index
    %99 = vector.load %arg3[%c8_104, %c0_105, %c0_106] : memref<9x2x4xbf16, #tpu.memory_space<vmem>>, vector<1x2x4xbf16>
    %100 = vector.shape_cast %99 : vector<1x2x4xbf16> to vector<2x4xbf16>
    %c0_107 = arith.constant 0 : index
    %c38_108 = arith.constant 38 : index
    %101 = vector.load %arg23[%c0_107, %c38_108] : memref<4x686xbf16, #tpu.memory_space<vmem>>, vector<4x648xbf16>
    %cst_109 = arith.constant dense<0.000000e+00> : vector<2x648xf32>
    %102 = tpu.matmul %100, %101, %cst_109 {dimension_numbers = #tpu.dot_dimension_numbers<[1], [0], [0], [1], [0, 0, 1, 1], [], []>} : vector<2x4xbf16>, vector<4x648xbf16>, vector<2x648xf32> -> vector<2x648xf32>
    %103 = arith.addf %98, %102 : vector<2x648xf32>
    %c0_110 = arith.constant 0 : index
    %c0_111 = arith.constant 0 : index
    %c0_112 = arith.constant 0 : index
    %104 = vector.load %arg4[%c0_110, %c0_111, %c0_112] : memref<9x2x4xbf16, #tpu.memory_space<vmem>>, vector<1x2x4xbf16>
    %105 = vector.shape_cast %104 : vector<1x2x4xbf16> to vector<2x4xbf16>
    %c0_113 = arith.constant 0 : index
    %c0_114 = arith.constant 0 : index
    %106 = vector.load %arg0[%c0_113, %c0_114] : memref<4x686xbf16, #tpu.memory_space<vmem>>, vector<4x648xbf16>
    %cst_115 = arith.constant dense<0.000000e+00> : vector<2x648xf32>
    %107 = tpu.matmul %105, %106, %cst_115 {dimension_numbers = #tpu.dot_dimension_numbers<[1], [0], [0], [1], [0, 0, 1, 1], [], []>} : vector<2x4xbf16>, vector<4x648xbf16>, vector<2x648xf32> -> vector<2x648xf32>
    %c1_116 = arith.constant 1 : index
    %c0_117 = arith.constant 0 : index
    %c0_118 = arith.constant 0 : index
    %108 = vector.load %arg4[%c1_116, %c0_117, %c0_118] : memref<9x2x4xbf16, #tpu.memory_space<vmem>>, vector<1x2x4xbf16>
    %109 = vector.shape_cast %108 : vector<1x2x4xbf16> to vector<2x4xbf16>
    %c0_119 = arith.constant 0 : index
    %c1_120 = arith.constant 1 : index
    %110 = vector.load %arg0[%c0_119, %c1_120] : memref<4x686xbf16, #tpu.memory_space<vmem>>, vector<4x648xbf16>
    %cst_121 = arith.constant dense<0.000000e+00> : vector<2x648xf32>
    %111 = tpu.matmul %109, %110, %cst_121 {dimension_numbers = #tpu.dot_dimension_numbers<[1], [0], [0], [1], [0, 0, 1, 1], [], []>} : vector<2x4xbf16>, vector<4x648xbf16>, vector<2x648xf32> -> vector<2x648xf32>
    %112 = arith.addf %107, %111 : vector<2x648xf32>
    %c2_122 = arith.constant 2 : index
    %c0_123 = arith.constant 0 : index
    %c0_124 = arith.constant 0 : index
    %113 = vector.load %arg4[%c2_122, %c0_123, %c0_124] : memref<9x2x4xbf16, #tpu.memory_space<vmem>>, vector<1x2x4xbf16>
    %114 = vector.shape_cast %113 : vector<1x2x4xbf16> to vector<2x4xbf16>
    %c0_125 = arith.constant 0 : index
    %c2_126 = arith.constant 2 : index
    %115 = vector.load %arg0[%c0_125, %c2_126] : memref<4x686xbf16, #tpu.memory_space<vmem>>, vector<4x648xbf16>
    %cst_127 = arith.constant dense<0.000000e+00> : vector<2x648xf32>
    %116 = tpu.matmul %114, %115, %cst_127 {dimension_numbers = #tpu.dot_dimension_numbers<[1], [0], [0], [1], [0, 0, 1, 1], [], []>} : vector<2x4xbf16>, vector<4x648xbf16>, vector<2x648xf32> -> vector<2x648xf32>
    %117 = arith.addf %112, %116 : vector<2x648xf32>
    %c3_128 = arith.constant 3 : index
    %c0_129 = arith.constant 0 : index
    %c0_130 = arith.constant 0 : index
    %118 = vector.load %arg4[%c3_128, %c0_129, %c0_130] : memref<9x2x4xbf16, #tpu.memory_space<vmem>>, vector<1x2x4xbf16>
    %119 = vector.shape_cast %118 : vector<1x2x4xbf16> to vector<2x4xbf16>
    %c0_131 = arith.constant 0 : index
    %c18_132 = arith.constant 18 : index
    %120 = vector.load %arg0[%c0_131, %c18_132] : memref<4x686xbf16, #tpu.memory_space<vmem>>, vector<4x648xbf16>
    %cst_133 = arith.constant dense<0.000000e+00> : vector<2x648xf32>
    %121 = tpu.matmul %119, %120, %cst_133 {dimension_numbers = #tpu.dot_dimension_numbers<[1], [0], [0], [1], [0, 0, 1, 1], [], []>} : vector<2x4xbf16>, vector<4x648xbf16>, vector<2x648xf32> -> vector<2x648xf32>
    %122 = arith.addf %117, %121 : vector<2x648xf32>
    %c4_134 = arith.constant 4 : index
    %c0_135 = arith.constant 0 : index
    %c0_136 = arith.constant 0 : index
    %123 = vector.load %arg4[%c4_134, %c0_135, %c0_136] : memref<9x2x4xbf16, #tpu.memory_space<vmem>>, vector<1x2x4xbf16>
    %124 = vector.shape_cast %123 : vector<1x2x4xbf16> to vector<2x4xbf16>
    %c0_137 = arith.constant 0 : index
    %c19_138 = arith.constant 19 : index
    %125 = vector.load %arg0[%c0_137, %c19_138] : memref<4x686xbf16, #tpu.memory_space<vmem>>, vector<4x648xbf16>
    %cst_139 = arith.constant dense<0.000000e+00> : vector<2x648xf32>
    %126 = tpu.matmul %124, %125, %cst_139 {dimension_numbers = #tpu.dot_dimension_numbers<[1], [0], [0], [1], [0, 0, 1, 1], [], []>} : vector<2x4xbf16>, vector<4x648xbf16>, vector<2x648xf32> -> vector<2x648xf32>
    %127 = arith.addf %122, %126 : vector<2x648xf32>
    %c5_140 = arith.constant 5 : index
    %c0_141 = arith.constant 0 : index
    %c0_142 = arith.constant 0 : index
    %128 = vector.load %arg4[%c5_140, %c0_141, %c0_142] : memref<9x2x4xbf16, #tpu.memory_space<vmem>>, vector<1x2x4xbf16>
    %129 = vector.shape_cast %128 : vector<1x2x4xbf16> to vector<2x4xbf16>
    %c0_143 = arith.constant 0 : index
    %c20_144 = arith.constant 20 : index
    %130 = vector.load %arg0[%c0_143, %c20_144] : memref<4x686xbf16, #tpu.memory_space<vmem>>, vector<4x648xbf16>
    %cst_145 = arith.constant dense<0.000000e+00> : vector<2x648xf32>
    %131 = tpu.matmul %129, %130, %cst_145 {dimension_numbers = #tpu.dot_dimension_numbers<[1], [0], [0], [1], [0, 0, 1, 1], [], []>} : vector<2x4xbf16>, vector<4x648xbf16>, vector<2x648xf32> -> vector<2x648xf32>
    %132 = arith.addf %127, %131 : vector<2x648xf32>
    %c6_146 = arith.constant 6 : index
    %c0_147 = arith.constant 0 : index
    %c0_148 = arith.constant 0 : index
    %133 = vector.load %arg4[%c6_146, %c0_147, %c0_148] : memref<9x2x4xbf16, #tpu.memory_space<vmem>>, vector<1x2x4xbf16>
    %134 = vector.shape_cast %133 : vector<1x2x4xbf16> to vector<2x4xbf16>
    %c0_149 = arith.constant 0 : index
    %c36_150 = arith.constant 36 : index
    %135 = vector.load %arg0[%c0_149, %c36_150] : memref<4x686xbf16, #tpu.memory_space<vmem>>, vector<4x648xbf16>
    %cst_151 = arith.constant dense<0.000000e+00> : vector<2x648xf32>
    %136 = tpu.matmul %134, %135, %cst_151 {dimension_numbers = #tpu.dot_dimension_numbers<[1], [0], [0], [1], [0, 0, 1, 1], [], []>} : vector<2x4xbf16>, vector<4x648xbf16>, vector<2x648xf32> -> vector<2x648xf32>
    %137 = arith.addf %132, %136 : vector<2x648xf32>
    %c7_152 = arith.constant 7 : index
    %c0_153 = arith.constant 0 : index
    %c0_154 = arith.constant 0 : index
    %138 = vector.load %arg4[%c7_152, %c0_153, %c0_154] : memref<9x2x4xbf16, #tpu.memory_space<vmem>>, vector<1x2x4xbf16>
    %139 = vector.shape_cast %138 : vector<1x2x4xbf16> to vector<2x4xbf16>
    %c0_155 = arith.constant 0 : index
    %c37_156 = arith.constant 37 : index
    %140 = vector.load %arg0[%c0_155, %c37_156] : memref<4x686xbf16, #tpu.memory_space<vmem>>, vector<4x648xbf16>
    %cst_157 = arith.constant dense<0.000000e+00> : vector<2x648xf32>
    %141 = tpu.matmul %139, %140, %cst_157 {dimension_numbers = #tpu.dot_dimension_numbers<[1], [0], [0], [1], [0, 0, 1, 1], [], []>} : vector<2x4xbf16>, vector<4x648xbf16>, vector<2x648xf32> -> vector<2x648xf32>
    %142 = arith.addf %137, %141 : vector<2x648xf32>
    %c8_158 = arith.constant 8 : index
    %c0_159 = arith.constant 0 : index
    %c0_160 = arith.constant 0 : index
    %143 = vector.load %arg4[%c8_158, %c0_159, %c0_160] : memref<9x2x4xbf16, #tpu.memory_space<vmem>>, vector<1x2x4xbf16>
    %144 = vector.shape_cast %143 : vector<1x2x4xbf16> to vector<2x4xbf16>
    %c0_161 = arith.constant 0 : index
    %c38_162 = arith.constant 38 : index
    %145 = vector.load %arg0[%c0_161, %c38_162] : memref<4x686xbf16, #tpu.memory_space<vmem>>, vector<4x648xbf16>
    %cst_163 = arith.constant dense<0.000000e+00> : vector<2x648xf32>
    %146 = tpu.matmul %144, %145, %cst_163 {dimension_numbers = #tpu.dot_dimension_numbers<[1], [0], [0], [1], [0, 0, 1, 1], [], []>} : vector<2x4xbf16>, vector<4x648xbf16>, vector<2x648xf32> -> vector<2x648xf32>
    %147 = arith.addf %142, %146 : vector<2x648xf32>
    %148 = arith.addf %103, %147 : vector<2x648xf32>
    %c0_164 = arith.constant 0 : index
    %c0_165 = arith.constant 0 : index
    %149 = vector.load %arg5[%c0_164, %c0_165] : memref<2x1xf32, #tpu.memory_space<vmem>>, vector<2x1xf32>
    %150 = vector.broadcast %149 : vector<2x1xf32> to vector<2x648xf32>
    %151 = arith.addf %148, %150 : vector<2x648xf32>
    %152 = vector.broadcast %8 : vector<1x648xf32> to vector<2x648xf32>
    %153 = arith.mulf %151, %152 : vector<2x648xf32>
    %154 = arith.truncf %153 : vector<2x648xf32> to vector<2x648xbf16>
    %c0_166 = arith.constant 0 : index
    %c19_167 = arith.constant 19 : index
    %155 = vector.load %arg24[%c0_166, %c19_167] : memref<2x686xbf16, #tpu.memory_space<vmem>>, vector<2x648xbf16>
    tpu.vector_store %arg24[%c0_166, %c19_167], %154 {strides = array<i32>} : memref<2x686xbf16, #tpu.memory_space<vmem>>, vector<2x648xbf16>,
    %c0_168 = arith.constant 0 : index
    %c0_169 = arith.constant 0 : index
    %c0_170 = arith.constant 0 : index
    %156 = vector.load %arg6[%c0_168, %c0_169, %c0_170] : memref<9x16x2xbf16, #tpu.memory_space<vmem>>, vector<1x16x2xbf16>
    %157 = vector.shape_cast %156 : vector<1x16x2xbf16> to vector<16x2xbf16>
    %c0_171 = arith.constant 0 : index
    %c0_172 = arith.constant 0 : index
    %158 = vector.load %arg24[%c0_171, %c0_172] : memref<2x686xbf16, #tpu.memory_space<vmem>>, vector<2x648xbf16>
    %cst_173 = arith.constant dense<0.000000e+00> : vector<16x648xf32>
    %159 = tpu.matmul %157, %158, %cst_173 {dimension_numbers = #tpu.dot_dimension_numbers<[1], [0], [0], [1], [0, 0, 1, 1], [], []>} : vector<16x2xbf16>, vector<2x648xbf16>, vector<16x648xf32> -> vector<16x648xf32>
    %c1_174 = arith.constant 1 : index
    %c0_175 = arith.constant 0 : index
    %c0_176 = arith.constant 0 : index
    %160 = vector.load %arg6[%c1_174, %c0_175, %c0_176] : memref<9x16x2xbf16, #tpu.memory_space<vmem>>, vector<1x16x2xbf16>
    %161 = vector.shape_cast %160 : vector<1x16x2xbf16> to vector<16x2xbf16>
    %c0_177 = arith.constant 0 : index
    %c1_178 = arith.constant 1 : index
    %162 = vector.load %arg24[%c0_177, %c1_178] : memref<2x686xbf16, #tpu.memory_space<vmem>>, vector<2x648xbf16>
    %cst_179 = arith.constant dense<0.000000e+00> : vector<16x648xf32>
    %163 = tpu.matmul %161, %162, %cst_179 {dimension_numbers = #tpu.dot_dimension_numbers<[1], [0], [0], [1], [0, 0, 1, 1], [], []>} : vector<16x2xbf16>, vector<2x648xbf16>, vector<16x648xf32> -> vector<16x648xf32>
    %164 = arith.addf %159, %163 : vector<16x648xf32>
    %c2_180 = arith.constant 2 : index
    %c0_181 = arith.constant 0 : index
    %c0_182 = arith.constant 0 : index
    %165 = vector.load %arg6[%c2_180, %c0_181, %c0_182] : memref<9x16x2xbf16, #tpu.memory_space<vmem>>, vector<1x16x2xbf16>
    %166 = vector.shape_cast %165 : vector<1x16x2xbf16> to vector<16x2xbf16>
    %c0_183 = arith.constant 0 : index
    %c2_184 = arith.constant 2 : index
    %167 = vector.load %arg24[%c0_183, %c2_184] : memref<2x686xbf16, #tpu.memory_space<vmem>>, vector<2x648xbf16>
    %cst_185 = arith.constant dense<0.000000e+00> : vector<16x648xf32>
    %168 = tpu.matmul %166, %167, %cst_185 {dimension_numbers = #tpu.dot_dimension_numbers<[1], [0], [0], [1], [0, 0, 1, 1], [], []>} : vector<16x2xbf16>, vector<2x648xbf16>, vector<16x648xf32> -> vector<16x648xf32>
    %169 = arith.addf %164, %168 : vector<16x648xf32>
    %c3_186 = arith.constant 3 : index
    %c0_187 = arith.constant 0 : index
    %c0_188 = arith.constant 0 : index
    %170 = vector.load %arg6[%c3_186, %c0_187, %c0_188] : memref<9x16x2xbf16, #tpu.memory_space<vmem>>, vector<1x16x2xbf16>
    %171 = vector.shape_cast %170 : vector<1x16x2xbf16> to vector<16x2xbf16>
    %c0_189 = arith.constant 0 : index
    %c18_190 = arith.constant 18 : index
    %172 = vector.load %arg24[%c0_189, %c18_190] : memref<2x686xbf16, #tpu.memory_space<vmem>>, vector<2x648xbf16>
    %cst_191 = arith.constant dense<0.000000e+00> : vector<16x648xf32>
    %173 = tpu.matmul %171, %172, %cst_191 {dimension_numbers = #tpu.dot_dimension_numbers<[1], [0], [0], [1], [0, 0, 1, 1], [], []>} : vector<16x2xbf16>, vector<2x648xbf16>, vector<16x648xf32> -> vector<16x648xf32>
    %174 = arith.addf %169, %173 : vector<16x648xf32>
    %c4_192 = arith.constant 4 : index
    %c0_193 = arith.constant 0 : index
    %c0_194 = arith.constant 0 : index
    %175 = vector.load %arg6[%c4_192, %c0_193, %c0_194] : memref<9x16x2xbf16, #tpu.memory_space<vmem>>, vector<1x16x2xbf16>
    %176 = vector.shape_cast %175 : vector<1x16x2xbf16> to vector<16x2xbf16>
    %c0_195 = arith.constant 0 : index
    %c19_196 = arith.constant 19 : index
    %177 = vector.load %arg24[%c0_195, %c19_196] : memref<2x686xbf16, #tpu.memory_space<vmem>>, vector<2x648xbf16>
    %cst_197 = arith.constant dense<0.000000e+00> : vector<16x648xf32>
    %178 = tpu.matmul %176, %177, %cst_197 {dimension_numbers = #tpu.dot_dimension_numbers<[1], [0], [0], [1], [0, 0, 1, 1], [], []>} : vector<16x2xbf16>, vector<2x648xbf16>, vector<16x648xf32> -> vector<16x648xf32>
    %179 = arith.addf %174, %178 : vector<16x648xf32>
    %c5_198 = arith.constant 5 : index
    %c0_199 = arith.constant 0 : index
    %c0_200 = arith.constant 0 : index
    %180 = vector.load %arg6[%c5_198, %c0_199, %c0_200] : memref<9x16x2xbf16, #tpu.memory_space<vmem>>, vector<1x16x2xbf16>
    %181 = vector.shape_cast %180 : vector<1x16x2xbf16> to vector<16x2xbf16>
    %c0_201 = arith.constant 0 : index
    %c20_202 = arith.constant 20 : index
    %182 = vector.load %arg24[%c0_201, %c20_202] : memref<2x686xbf16, #tpu.memory_space<vmem>>, vector<2x648xbf16>
    %cst_203 = arith.constant dense<0.000000e+00> : vector<16x648xf32>
    %183 = tpu.matmul %181, %182, %cst_203 {dimension_numbers = #tpu.dot_dimension_numbers<[1], [0], [0], [1], [0, 0, 1, 1], [], []>} : vector<16x2xbf16>, vector<2x648xbf16>, vector<16x648xf32> -> vector<16x648xf32>
    %184 = arith.addf %179, %183 : vector<16x648xf32>
    %c6_204 = arith.constant 6 : index
    %c0_205 = arith.constant 0 : index
    %c0_206 = arith.constant 0 : index
    %185 = vector.load %arg6[%c6_204, %c0_205, %c0_206] : memref<9x16x2xbf16, #tpu.memory_space<vmem>>, vector<1x16x2xbf16>
    %186 = vector.shape_cast %185 : vector<1x16x2xbf16> to vector<16x2xbf16>
    %c0_207 = arith.constant 0 : index
    %c36_208 = arith.constant 36 : index
    %187 = vector.load %arg24[%c0_207, %c36_208] : memref<2x686xbf16, #tpu.memory_space<vmem>>, vector<2x648xbf16>
    %cst_209 = arith.constant dense<0.000000e+00> : vector<16x648xf32>
    %188 = tpu.matmul %186, %187, %cst_209 {dimension_numbers = #tpu.dot_dimension_numbers<[1], [0], [0], [1], [0, 0, 1, 1], [], []>} : vector<16x2xbf16>, vector<2x648xbf16>, vector<16x648xf32> -> vector<16x648xf32>
    %189 = arith.addf %184, %188 : vector<16x648xf32>
    %c7_210 = arith.constant 7 : index
    %c0_211 = arith.constant 0 : index
    %c0_212 = arith.constant 0 : index
    %190 = vector.load %arg6[%c7_210, %c0_211, %c0_212] : memref<9x16x2xbf16, #tpu.memory_space<vmem>>, vector<1x16x2xbf16>
    %191 = vector.shape_cast %190 : vector<1x16x2xbf16> to vector<16x2xbf16>
    %c0_213 = arith.constant 0 : index
    %c37_214 = arith.constant 37 : index
    %192 = vector.load %arg24[%c0_213, %c37_214] : memref<2x686xbf16, #tpu.memory_space<vmem>>, vector<2x648xbf16>
    %cst_215 = arith.constant dense<0.000000e+00> : vector<16x648xf32>
    %193 = tpu.matmul %191, %192, %cst_215 {dimension_numbers = #tpu.dot_dimension_numbers<[1], [0], [0], [1], [0, 0, 1, 1], [], []>} : vector<16x2xbf16>, vector<2x648xbf16>, vector<16x648xf32> -> vector<16x648xf32>
    %194 = arith.addf %189, %193 : vector<16x648xf32>
    %c8_216 = arith.constant 8 : index
    %c0_217 = arith.constant 0 : index
    %c0_218 = arith.constant 0 : index
    %195 = vector.load %arg6[%c8_216, %c0_217, %c0_218] : memref<9x16x2xbf16, #tpu.memory_space<vmem>>, vector<1x16x2xbf16>
    %196 = vector.shape_cast %195 : vector<1x16x2xbf16> to vector<16x2xbf16>
    %c0_219 = arith.constant 0 : index
    %c38_220 = arith.constant 38 : index
    %197 = vector.load %arg24[%c0_219, %c38_220] : memref<2x686xbf16, #tpu.memory_space<vmem>>, vector<2x648xbf16>
    %cst_221 = arith.constant dense<0.000000e+00> : vector<16x648xf32>
    %198 = tpu.matmul %196, %197, %cst_221 {dimension_numbers = #tpu.dot_dimension_numbers<[1], [0], [0], [1], [0, 0, 1, 1], [], []>} : vector<16x2xbf16>, vector<2x648xbf16>, vector<16x648xf32> -> vector<16x648xf32>
    %199 = arith.addf %194, %198 : vector<16x648xf32>
    %c0_222 = arith.constant 0 : index
    %c0_223 = arith.constant 0 : index
    %200 = vector.load %arg7[%c0_222, %c0_223] : memref<16x1xf32, #tpu.memory_space<vmem>>, vector<16x1xf32>
    %201 = vector.broadcast %200 : vector<16x1xf32> to vector<16x648xf32>
    %202 = arith.addf %199, %201 : vector<16x648xf32>
    %c0_224 = arith.constant 0 : index
    %c0_225 = arith.constant 0 : index
    %203 = vector.load %arg19[%c0_224, %c0_225] : memref<1x648xf32, #tpu.memory_space<vmem>>, vector<1x648xf32>
    %c0_226 = arith.constant 0 : index
    %c0_227 = arith.constant 0 : index
    %204 = vector.load %arg8[%c0_226, %c0_227] : memref<16x1xf32, #tpu.memory_space<vmem>>, vector<16x1xf32>
    %c0_228 = arith.constant 0 : index
    %c0_229 = arith.constant 0 : index
    %205 = vector.load %arg9[%c0_228, %c0_229] : memref<16x1xf32, #tpu.memory_space<vmem>>, vector<16x1xf32>
    %206 = vector.broadcast %203 : vector<1x648xf32> to vector<16x648xf32>
    %207 = arith.mulf %202, %206 : vector<16x648xf32>
    %cst_230 = arith.constant dense<0.000000e+00> : vector<16xf32>
    %208 = vector.multi_reduction <add>, %207, %cst_230 [1] : vector<16x648xf32> to vector<16xf32>
    %209 = vector.shape_cast %208 : vector<16xf32> to vector<16x1xf32>
    %cst_231 = arith.constant 7.812500e-03 : f32
    %210 = vector.broadcast %cst_231 : f32 to vector<16x1xf32>
    %211 = arith.mulf %209, %210 : vector<16x1xf32>
    %212 = vector.broadcast %211 : vector<16x1xf32> to vector<16x648xf32>
    %213 = arith.subf %202, %212 : vector<16x648xf32>
    %214 = arith.mulf %213, %213 : vector<16x648xf32>
    %215 = vector.broadcast %203 : vector<1x648xf32> to vector<16x648xf32>
    %216 = arith.mulf %214, %215 : vector<16x648xf32>
    %cst_232 = arith.constant dense<0.000000e+00> : vector<16xf32>
    %217 = vector.multi_reduction <add>, %216, %cst_232 [1] : vector<16x648xf32> to vector<16xf32>
    %218 = vector.shape_cast %217 : vector<16xf32> to vector<16x1xf32>
    %cst_233 = arith.constant 7.812500e-03 : f32
    %219 = vector.broadcast %cst_233 : f32 to vector<16x1xf32>
    %220 = arith.mulf %218, %219 : vector<16x1xf32>
    %cst_234 = arith.constant 9.99999974E-6 : f32
    %221 = vector.broadcast %cst_234 : f32 to vector<16x1xf32>
    %222 = arith.addf %220, %221 : vector<16x1xf32>
    %223 = math.rsqrt %222 : vector<16x1xf32>
    %224 = arith.mulf %204, %223 : vector<16x1xf32>
    %225 = arith.mulf %211, %224 : vector<16x1xf32>
    %226 = arith.subf %205, %225 : vector<16x1xf32>
    %227 = vector.broadcast %224 : vector<16x1xf32> to vector<16x648xf32>
    %228 = arith.mulf %202, %227 : vector<16x648xf32>
    %229 = vector.broadcast %226 : vector<16x1xf32> to vector<16x648xf32>
    %230 = arith.addf %228, %229 : vector<16x648xf32>
    %cst_235 = arith.constant 0.000000e+00 : f32
    %231 = vector.broadcast %cst_235 : f32 to vector<16x648xf32>
    %232 = arith.maximumf %230, %231 : vector<16x648xf32>
    %c0_236 = arith.constant 0 : index
    %c0_237 = arith.constant 0 : index
    %233 = vector.load %arg27[%c0_236, %c0_237] : memref<16x648xf32, #tpu.memory_space<vmem>>, vector<16x648xf32>
    tpu.vector_store %arg27[%c0_236, %c0_237], %232 {strides = array<i32>} : memref<16x648xf32, #tpu.memory_space<vmem>>, vector<16x648xf32>,
    %c0_238 = arith.constant 0 : index
    %c0_239 = arith.constant 0 : index
    %234 = vector.load %arg27[%c0_238, %c0_239] : memref<16x648xf32, #tpu.memory_space<vmem>>, vector<16x1xf32>
    %c0_240 = arith.constant 0 : index
    %c2_241 = arith.constant 2 : index
    %235 = vector.load %arg27[%c0_240, %c2_241] : memref<16x648xf32, #tpu.memory_space<vmem>>, vector<16x1xf32>
    %236 = arith.maximumf %234, %235 : vector<16x1xf32>
    %c0_242 = arith.constant 0 : index
    %c36_243 = arith.constant 36 : index
    %237 = vector.load %arg27[%c0_242, %c36_243] : memref<16x648xf32, #tpu.memory_space<vmem>>, vector<16x1xf32>
    %c0_244 = arith.constant 0 : index
    %c38_245 = arith.constant 38 : index
    %238 = vector.load %arg27[%c0_244, %c38_245] : memref<16x648xf32, #tpu.memory_space<vmem>>, vector<16x1xf32>
    %239 = arith.maximumf %237, %238 : vector<16x1xf32>
    %240 = arith.maximumf %236, %239 : vector<16x1xf32>
    %241 = arith.truncf %240 : vector<16x1xf32> to vector<16x1xbf16>
    %c0_246 = arith.constant 0 : index
    %c7_247 = arith.constant 7 : index
    %242 = vector.load %arg25[%c0_246, %c7_247] : memref<16x86xbf16, #tpu.memory_space<vmem>>, vector<16x1xbf16>
    tpu.vector_store %arg25[%c0_246, %c7_247], %241 {strides = array<i32>} : memref<16x86xbf16, #tpu.memory_space<vmem>>, vector<16x1xbf16>,
    %c0_248 = arith.constant 0 : index
    %c4_249 = arith.constant 4 : index
    %243 = vector.load %arg27[%c0_248, %c4_249] : memref<16x648xf32, #tpu.memory_space<vmem>>, vector<16x1xf32>
    %c0_250 = arith.constant 0 : index
    %c6_251 = arith.constant 6 : index
    %244 = vector.load %arg27[%c0_250, %c6_251] : memref<16x648xf32, #tpu.memory_space<vmem>>, vector<16x1xf32>
    %245 = arith.maximumf %243, %244 : vector<16x1xf32>
    %c0_252 = arith.constant 0 : index
    %c40 = arith.constant 40 : index
    %246 = vector.load %arg27[%c0_252, %c40] : memref<16x648xf32, #tpu.memory_space<vmem>>, vector<16x1xf32>
    %c0_253 = arith.constant 0 : index
    %c42 = arith.constant 42 : index
    %247 = vector.load %arg27[%c0_253, %c42] : memref<16x648xf32, #tpu.memory_space<vmem>>, vector<16x1xf32>
    %248 = arith.maximumf %246, %247 : vector<16x1xf32>
    %249 = arith.maximumf %245, %248 : vector<16x1xf32>
    %250 = arith.truncf %249 : vector<16x1xf32> to vector<16x1xbf16>
    %c0_254 = arith.constant 0 : index
    %c8_255 = arith.constant 8 : index
    %251 = vector.load %arg25[%c0_254, %c8_255] : memref<16x86xbf16, #tpu.memory_space<vmem>>, vector<16x1xbf16>
    tpu.vector_store %arg25[%c0_254, %c8_255], %250 {strides = array<i32>} : memref<16x86xbf16, #tpu.memory_space<vmem>>, vector<16x1xbf16>,
    %c0_256 = arith.constant 0 : index
    %c8_257 = arith.constant 8 : index
    %252 = vector.load %arg27[%c0_256, %c8_257] : memref<16x648xf32, #tpu.memory_space<vmem>>, vector<16x1xf32>
    %c0_258 = arith.constant 0 : index
    %c10 = arith.constant 10 : index
    %253 = vector.load %arg27[%c0_258, %c10] : memref<16x648xf32, #tpu.memory_space<vmem>>, vector<16x1xf32>
    %254 = arith.maximumf %252, %253 : vector<16x1xf32>
    %c0_259 = arith.constant 0 : index
    %c44 = arith.constant 44 : index
    %255 = vector.load %arg27[%c0_259, %c44] : memref<16x648xf32, #tpu.memory_space<vmem>>, vector<16x1xf32>
    %c0_260 = arith.constant 0 : index
    %c46 = arith.constant 46 : index
    %256 = vector.load %arg27[%c0_260, %c46] : memref<16x648xf32, #tpu.memory_space<vmem>>, vector<16x1xf32>
    %257 = arith.maximumf %255, %256 : vector<16x1xf32>
    %258 = arith.maximumf %254, %257 : vector<16x1xf32>
    %259 = arith.truncf %258 : vector<16x1xf32> to vector<16x1xbf16>
    %c0_261 = arith.constant 0 : index
    %c9 = arith.constant 9 : index
    %260 = vector.load %arg25[%c0_261, %c9] : memref<16x86xbf16, #tpu.memory_space<vmem>>, vector<16x1xbf16>
    tpu.vector_store %arg25[%c0_261, %c9], %259 {strides = array<i32>} : memref<16x86xbf16, #tpu.memory_space<vmem>>, vector<16x1xbf16>,
    %c0_262 = arith.constant 0 : index
    %c12 = arith.constant 12 : index
    %261 = vector.load %arg27[%c0_262, %c12] : memref<16x648xf32, #tpu.memory_space<vmem>>, vector<16x1xf32>
    %c0_263 = arith.constant 0 : index
    %c14 = arith.constant 14 : index
    %262 = vector.load %arg27[%c0_263, %c14] : memref<16x648xf32, #tpu.memory_space<vmem>>, vector<16x1xf32>
    %263 = arith.maximumf %261, %262 : vector<16x1xf32>
    %c0_264 = arith.constant 0 : index
    %c48 = arith.constant 48 : index
    %264 = vector.load %arg27[%c0_264, %c48] : memref<16x648xf32, #tpu.memory_space<vmem>>, vector<16x1xf32>
    %c0_265 = arith.constant 0 : index
    %c50 = arith.constant 50 : index
    %265 = vector.load %arg27[%c0_265, %c50] : memref<16x648xf32, #tpu.memory_space<vmem>>, vector<16x1xf32>
    %266 = arith.maximumf %264, %265 : vector<16x1xf32>
    %267 = arith.maximumf %263, %266 : vector<16x1xf32>
    %268 = arith.truncf %267 : vector<16x1xf32> to vector<16x1xbf16>
    %c0_266 = arith.constant 0 : index
    %c10_267 = arith.constant 10 : index
    %269 = vector.load %arg25[%c0_266, %c10_267] : memref<16x86xbf16, #tpu.memory_space<vmem>>, vector<16x1xbf16>
    tpu.vector_store %arg25[%c0_266, %c10_267], %268 {strides = array<i32>} : memref<16x86xbf16, #tpu.memory_space<vmem>>, vector<16x1xbf16>,
    %c0_268 = arith.constant 0 : index
    %c72 = arith.constant 72 : index
    %270 = vector.load %arg27[%c0_268, %c72] : memref<16x648xf32, #tpu.memory_space<vmem>>, vector<16x1xf32>
    %c0_269 = arith.constant 0 : index
    %c74 = arith.constant 74 : index
    %271 = vector.load %arg27[%c0_269, %c74] : memref<16x648xf32, #tpu.memory_space<vmem>>, vector<16x1xf32>
    %272 = arith.maximumf %270, %271 : vector<16x1xf32>
    %c0_270 = arith.constant 0 : index
    %c108 = arith.constant 108 : index
    %273 = vector.load %arg27[%c0_270, %c108] : memref<16x648xf32, #tpu.memory_space<vmem>>, vector<16x1xf32>
    %c0_271 = arith.constant 0 : index
    %c110 = arith.constant 110 : index
    %274 = vector.load %arg27[%c0_271, %c110] : memref<16x648xf32, #tpu.memory_space<vmem>>, vector<16x1xf32>
    %275 = arith.maximumf %273, %274 : vector<16x1xf32>
    %276 = arith.maximumf %272, %275 : vector<16x1xf32>
    %277 = arith.truncf %276 : vector<16x1xf32> to vector<16x1xbf16>
    %c0_272 = arith.constant 0 : index
    %c13 = arith.constant 13 : index
    %278 = vector.load %arg25[%c0_272, %c13] : memref<16x86xbf16, #tpu.memory_space<vmem>>, vector<16x1xbf16>
    tpu.vector_store %arg25[%c0_272, %c13], %277 {strides = array<i32>} : memref<16x86xbf16, #tpu.memory_space<vmem>>, vector<16x1xbf16>,
    %c0_273 = arith.constant 0 : index
    %c76 = arith.constant 76 : index
    %279 = vector.load %arg27[%c0_273, %c76] : memref<16x648xf32, #tpu.memory_space<vmem>>, vector<16x1xf32>
    %c0_274 = arith.constant 0 : index
    %c78 = arith.constant 78 : index
    %280 = vector.load %arg27[%c0_274, %c78] : memref<16x648xf32, #tpu.memory_space<vmem>>, vector<16x1xf32>
    %281 = arith.maximumf %279, %280 : vector<16x1xf32>
    %c0_275 = arith.constant 0 : index
    %c112 = arith.constant 112 : index
    %282 = vector.load %arg27[%c0_275, %c112] : memref<16x648xf32, #tpu.memory_space<vmem>>, vector<16x1xf32>
    %c0_276 = arith.constant 0 : index
    %c114 = arith.constant 114 : index
    %283 = vector.load %arg27[%c0_276, %c114] : memref<16x648xf32, #tpu.memory_space<vmem>>, vector<16x1xf32>
    %284 = arith.maximumf %282, %283 : vector<16x1xf32>
    %285 = arith.maximumf %281, %284 : vector<16x1xf32>
    %286 = arith.truncf %285 : vector<16x1xf32> to vector<16x1xbf16>
    %c0_277 = arith.constant 0 : index
    %c14_278 = arith.constant 14 : index
    %287 = vector.load %arg25[%c0_277, %c14_278] : memref<16x86xbf16, #tpu.memory_space<vmem>>, vector<16x1xbf16>
    tpu.vector_store %arg25[%c0_277, %c14_278], %286 {strides = array<i32>} : memref<16x86xbf16, #tpu.memory_space<vmem>>, vector<16x1xbf16>,
    %c0_279 = arith.constant 0 : index
    %c80 = arith.constant 80 : index
    %288 = vector.load %arg27[%c0_279, %c80] : memref<16x648xf32, #tpu.memory_space<vmem>>, vector<16x1xf32>
    %c0_280 = arith.constant 0 : index
    %c82 = arith.constant 82 : index
    %289 = vector.load %arg27[%c0_280, %c82] : memref<16x648xf32, #tpu.memory_space<vmem>>, vector<16x1xf32>
    %290 = arith.maximumf %288, %289 : vector<16x1xf32>
    %c0_281 = arith.constant 0 : index
    %c116 = arith.constant 116 : index
    %291 = vector.load %arg27[%c0_281, %c116] : memref<16x648xf32, #tpu.memory_space<vmem>>, vector<16x1xf32>
    %c0_282 = arith.constant 0 : index
    %c118 = arith.constant 118 : index
    %292 = vector.load %arg27[%c0_282, %c118] : memref<16x648xf32, #tpu.memory_space<vmem>>, vector<16x1xf32>
    %293 = arith.maximumf %291, %292 : vector<16x1xf32>
    %294 = arith.maximumf %290, %293 : vector<16x1xf32>
    %295 = arith.truncf %294 : vector<16x1xf32> to vector<16x1xbf16>
    %c0_283 = arith.constant 0 : index
    %c15 = arith.constant 15 : index
    %296 = vector.load %arg25[%c0_283, %c15] : memref<16x86xbf16, #tpu.memory_space<vmem>>, vector<16x1xbf16>
    tpu.vector_store %arg25[%c0_283, %c15], %295 {strides = array<i32>} : memref<16x86xbf16, #tpu.memory_space<vmem>>, vector<16x1xbf16>,
    %c0_284 = arith.constant 0 : index
    %c84 = arith.constant 84 : index
    %297 = vector.load %arg27[%c0_284, %c84] : memref<16x648xf32, #tpu.memory_space<vmem>>, vector<16x1xf32>
    %c0_285 = arith.constant 0 : index
    %c86 = arith.constant 86 : index
    %298 = vector.load %arg27[%c0_285, %c86] : memref<16x648xf32, #tpu.memory_space<vmem>>, vector<16x1xf32>
    %299 = arith.maximumf %297, %298 : vector<16x1xf32>
    %c0_286 = arith.constant 0 : index
    %c120 = arith.constant 120 : index
    %300 = vector.load %arg27[%c0_286, %c120] : memref<16x648xf32, #tpu.memory_space<vmem>>, vector<16x1xf32>
    %c0_287 = arith.constant 0 : index
    %c122 = arith.constant 122 : index
    %301 = vector.load %arg27[%c0_287, %c122] : memref<16x648xf32, #tpu.memory_space<vmem>>, vector<16x1xf32>
    %302 = arith.maximumf %300, %301 : vector<16x1xf32>
    %303 = arith.maximumf %299, %302 : vector<16x1xf32>
    %304 = arith.truncf %303 : vector<16x1xf32> to vector<16x1xbf16>
    %c0_288 = arith.constant 0 : index
    %c16 = arith.constant 16 : index
    %305 = vector.load %arg25[%c0_288, %c16] : memref<16x86xbf16, #tpu.memory_space<vmem>>, vector<16x1xbf16>
    tpu.vector_store %arg25[%c0_288, %c16], %304 {strides = array<i32>} : memref<16x86xbf16, #tpu.memory_space<vmem>>, vector<16x1xbf16>,
    %c0_289 = arith.constant 0 : index
    %c144 = arith.constant 144 : index
    %306 = vector.load %arg27[%c0_289, %c144] : memref<16x648xf32, #tpu.memory_space<vmem>>, vector<16x1xf32>
    %c0_290 = arith.constant 0 : index
    %c146 = arith.constant 146 : index
    %307 = vector.load %arg27[%c0_290, %c146] : memref<16x648xf32, #tpu.memory_space<vmem>>, vector<16x1xf32>
    %308 = arith.maximumf %306, %307 : vector<16x1xf32>
    %c0_291 = arith.constant 0 : index
    %c180 = arith.constant 180 : index
    %309 = vector.load %arg27[%c0_291, %c180] : memref<16x648xf32, #tpu.memory_space<vmem>>, vector<16x1xf32>
    %c0_292 = arith.constant 0 : index
    %c182 = arith.constant 182 : index
    %310 = vector.load %arg27[%c0_292, %c182] : memref<16x648xf32, #tpu.memory_space<vmem>>, vector<16x1xf32>
    %311 = arith.maximumf %309, %310 : vector<16x1xf32>
    %312 = arith.maximumf %308, %311 : vector<16x1xf32>
    %313 = arith.truncf %312 : vector<16x1xf32> to vector<16x1xbf16>
    %c0_293 = arith.constant 0 : index
    %c19_294 = arith.constant 19 : index
    %314 = vector.load %arg25[%c0_293, %c19_294] : memref<16x86xbf16, #tpu.memory_space<vmem>>, vector<16x1xbf16>
    tpu.vector_store %arg25[%c0_293, %c19_294], %313 {strides = array<i32>} : memref<16x86xbf16, #tpu.memory_space<vmem>>, vector<16x1xbf16>,
    %c0_295 = arith.constant 0 : index
    %c148 = arith.constant 148 : index
    %315 = vector.load %arg27[%c0_295, %c148] : memref<16x648xf32, #tpu.memory_space<vmem>>, vector<16x1xf32>
    %c0_296 = arith.constant 0 : index
    %c150 = arith.constant 150 : index
    %316 = vector.load %arg27[%c0_296, %c150] : memref<16x648xf32, #tpu.memory_space<vmem>>, vector<16x1xf32>
    %317 = arith.maximumf %315, %316 : vector<16x1xf32>
    %c0_297 = arith.constant 0 : index
    %c184 = arith.constant 184 : index
    %318 = vector.load %arg27[%c0_297, %c184] : memref<16x648xf32, #tpu.memory_space<vmem>>, vector<16x1xf32>
    %c0_298 = arith.constant 0 : index
    %c186 = arith.constant 186 : index
    %319 = vector.load %arg27[%c0_298, %c186] : memref<16x648xf32, #tpu.memory_space<vmem>>, vector<16x1xf32>
    %320 = arith.maximumf %318, %319 : vector<16x1xf32>
    %321 = arith.maximumf %317, %320 : vector<16x1xf32>
    %322 = arith.truncf %321 : vector<16x1xf32> to vector<16x1xbf16>
    %c0_299 = arith.constant 0 : index
    %c20_300 = arith.constant 20 : index
    %323 = vector.load %arg25[%c0_299, %c20_300] : memref<16x86xbf16, #tpu.memory_space<vmem>>, vector<16x1xbf16>
    tpu.vector_store %arg25[%c0_299, %c20_300], %322 {strides = array<i32>} : memref<16x86xbf16, #tpu.memory_space<vmem>>, vector<16x1xbf16>,
    %c0_301 = arith.constant 0 : index
    %c152 = arith.constant 152 : index
    %324 = vector.load %arg27[%c0_301, %c152] : memref<16x648xf32, #tpu.memory_space<vmem>>, vector<16x1xf32>
    %c0_302 = arith.constant 0 : index
    %c154 = arith.constant 154 : index
    %325 = vector.load %arg27[%c0_302, %c154] : memref<16x648xf32, #tpu.memory_space<vmem>>, vector<16x1xf32>
    %326 = arith.maximumf %324, %325 : vector<16x1xf32>
    %c0_303 = arith.constant 0 : index
    %c188 = arith.constant 188 : index
    %327 = vector.load %arg27[%c0_303, %c188] : memref<16x648xf32, #tpu.memory_space<vmem>>, vector<16x1xf32>
    %c0_304 = arith.constant 0 : index
    %c190 = arith.constant 190 : index
    %328 = vector.load %arg27[%c0_304, %c190] : memref<16x648xf32, #tpu.memory_space<vmem>>, vector<16x1xf32>
    %329 = arith.maximumf %327, %328 : vector<16x1xf32>
    %330 = arith.maximumf %326, %329 : vector<16x1xf32>
    %331 = arith.truncf %330 : vector<16x1xf32> to vector<16x1xbf16>
    %c0_305 = arith.constant 0 : index
    %c21 = arith.constant 21 : index
    %332 = vector.load %arg25[%c0_305, %c21] : memref<16x86xbf16, #tpu.memory_space<vmem>>, vector<16x1xbf16>
    tpu.vector_store %arg25[%c0_305, %c21], %331 {strides = array<i32>} : memref<16x86xbf16, #tpu.memory_space<vmem>>, vector<16x1xbf16>,
    %c0_306 = arith.constant 0 : index
    %c156 = arith.constant 156 : index
    %333 = vector.load %arg27[%c0_306, %c156] : memref<16x648xf32, #tpu.memory_space<vmem>>, vector<16x1xf32>
    %c0_307 = arith.constant 0 : index
    %c158 = arith.constant 158 : index
    %334 = vector.load %arg27[%c0_307, %c158] : memref<16x648xf32, #tpu.memory_space<vmem>>, vector<16x1xf32>
    %335 = arith.maximumf %333, %334 : vector<16x1xf32>
    %c0_308 = arith.constant 0 : index
    %c192 = arith.constant 192 : index
    %336 = vector.load %arg27[%c0_308, %c192] : memref<16x648xf32, #tpu.memory_space<vmem>>, vector<16x1xf32>
    %c0_309 = arith.constant 0 : index
    %c194 = arith.constant 194 : index
    %337 = vector.load %arg27[%c0_309, %c194] : memref<16x648xf32, #tpu.memory_space<vmem>>, vector<16x1xf32>
    %338 = arith.maximumf %336, %337 : vector<16x1xf32>
    %339 = arith.maximumf %335, %338 : vector<16x1xf32>
    %340 = arith.truncf %339 : vector<16x1xf32> to vector<16x1xbf16>
    %c0_310 = arith.constant 0 : index
    %c22 = arith.constant 22 : index
    %341 = vector.load %arg25[%c0_310, %c22] : memref<16x86xbf16, #tpu.memory_space<vmem>>, vector<16x1xbf16>
    tpu.vector_store %arg25[%c0_310, %c22], %340 {strides = array<i32>} : memref<16x86xbf16, #tpu.memory_space<vmem>>, vector<16x1xbf16>,
    %c0_311 = arith.constant 0 : index
    %c216 = arith.constant 216 : index
    %342 = vector.load %arg27[%c0_311, %c216] : memref<16x648xf32, #tpu.memory_space<vmem>>, vector<16x1xf32>
    %c0_312 = arith.constant 0 : index
    %c218 = arith.constant 218 : index
    %343 = vector.load %arg27[%c0_312, %c218] : memref<16x648xf32, #tpu.memory_space<vmem>>, vector<16x1xf32>
    %344 = arith.maximumf %342, %343 : vector<16x1xf32>
    %c0_313 = arith.constant 0 : index
    %c252 = arith.constant 252 : index
    %345 = vector.load %arg27[%c0_313, %c252] : memref<16x648xf32, #tpu.memory_space<vmem>>, vector<16x1xf32>
    %c0_314 = arith.constant 0 : index
    %c254 = arith.constant 254 : index
    %346 = vector.load %arg27[%c0_314, %c254] : memref<16x648xf32, #tpu.memory_space<vmem>>, vector<16x1xf32>
    %347 = arith.maximumf %345, %346 : vector<16x1xf32>
    %348 = arith.maximumf %344, %347 : vector<16x1xf32>
    %349 = arith.truncf %348 : vector<16x1xf32> to vector<16x1xbf16>
    %c0_315 = arith.constant 0 : index
    %c25 = arith.constant 25 : index
    %350 = vector.load %arg25[%c0_315, %c25] : memref<16x86xbf16, #tpu.memory_space<vmem>>, vector<16x1xbf16>
    tpu.vector_store %arg25[%c0_315, %c25], %349 {strides = array<i32>} : memref<16x86xbf16, #tpu.memory_space<vmem>>, vector<16x1xbf16>,
    %c0_316 = arith.constant 0 : index
    %c220 = arith.constant 220 : index
    %351 = vector.load %arg27[%c0_316, %c220] : memref<16x648xf32, #tpu.memory_space<vmem>>, vector<16x1xf32>
    %c0_317 = arith.constant 0 : index
    %c222 = arith.constant 222 : index
    %352 = vector.load %arg27[%c0_317, %c222] : memref<16x648xf32, #tpu.memory_space<vmem>>, vector<16x1xf32>
    %353 = arith.maximumf %351, %352 : vector<16x1xf32>
    %c0_318 = arith.constant 0 : index
    %c256 = arith.constant 256 : index
    %354 = vector.load %arg27[%c0_318, %c256] : memref<16x648xf32, #tpu.memory_space<vmem>>, vector<16x1xf32>
    %c0_319 = arith.constant 0 : index
    %c258 = arith.constant 258 : index
    %355 = vector.load %arg27[%c0_319, %c258] : memref<16x648xf32, #tpu.memory_space<vmem>>, vector<16x1xf32>
    %356 = arith.maximumf %354, %355 : vector<16x1xf32>
    %357 = arith.maximumf %353, %356 : vector<16x1xf32>
    %358 = arith.truncf %357 : vector<16x1xf32> to vector<16x1xbf16>
    %c0_320 = arith.constant 0 : index
    %c26 = arith.constant 26 : index
    %359 = vector.load %arg25[%c0_320, %c26] : memref<16x86xbf16, #tpu.memory_space<vmem>>, vector<16x1xbf16>
    tpu.vector_store %arg25[%c0_320, %c26], %358 {strides = array<i32>} : memref<16x86xbf16, #tpu.memory_space<vmem>>, vector<16x1xbf16>,
    %c0_321 = arith.constant 0 : index
    %c224 = arith.constant 224 : index
    %360 = vector.load %arg27[%c0_321, %c224] : memref<16x648xf32, #tpu.memory_space<vmem>>, vector<16x1xf32>
    %c0_322 = arith.constant 0 : index
    %c226 = arith.constant 226 : index
    %361 = vector.load %arg27[%c0_322, %c226] : memref<16x648xf32, #tpu.memory_space<vmem>>, vector<16x1xf32>
    %362 = arith.maximumf %360, %361 : vector<16x1xf32>
    %c0_323 = arith.constant 0 : index
    %c260 = arith.constant 260 : index
    %363 = vector.load %arg27[%c0_323, %c260] : memref<16x648xf32, #tpu.memory_space<vmem>>, vector<16x1xf32>
    %c0_324 = arith.constant 0 : index
    %c262 = arith.constant 262 : index
    %364 = vector.load %arg27[%c0_324, %c262] : memref<16x648xf32, #tpu.memory_space<vmem>>, vector<16x1xf32>
    %365 = arith.maximumf %363, %364 : vector<16x1xf32>
    %366 = arith.maximumf %362, %365 : vector<16x1xf32>
    %367 = arith.truncf %366 : vector<16x1xf32> to vector<16x1xbf16>
    %c0_325 = arith.constant 0 : index
    %c27 = arith.constant 27 : index
    %368 = vector.load %arg25[%c0_325, %c27] : memref<16x86xbf16, #tpu.memory_space<vmem>>, vector<16x1xbf16>
    tpu.vector_store %arg25[%c0_325, %c27], %367 {strides = array<i32>} : memref<16x86xbf16, #tpu.memory_space<vmem>>, vector<16x1xbf16>,
    %c0_326 = arith.constant 0 : index
    %c228 = arith.constant 228 : index
    %369 = vector.load %arg27[%c0_326, %c228] : memref<16x648xf32, #tpu.memory_space<vmem>>, vector<16x1xf32>
    %c0_327 = arith.constant 0 : index
    %c230 = arith.constant 230 : index
    %370 = vector.load %arg27[%c0_327, %c230] : memref<16x648xf32, #tpu.memory_space<vmem>>, vector<16x1xf32>
    %371 = arith.maximumf %369, %370 : vector<16x1xf32>
    %c0_328 = arith.constant 0 : index
    %c264 = arith.constant 264 : index
    %372 = vector.load %arg27[%c0_328, %c264] : memref<16x648xf32, #tpu.memory_space<vmem>>, vector<16x1xf32>
    %c0_329 = arith.constant 0 : index
    %c266 = arith.constant 266 : index
    %373 = vector.load %arg27[%c0_329, %c266] : memref<16x648xf32, #tpu.memory_space<vmem>>, vector<16x1xf32>
    %374 = arith.maximumf %372, %373 : vector<16x1xf32>
    %375 = arith.maximumf %371, %374 : vector<16x1xf32>
    %376 = arith.truncf %375 : vector<16x1xf32> to vector<16x1xbf16>
    %c0_330 = arith.constant 0 : index
    %c28 = arith.constant 28 : index
    %377 = vector.load %arg25[%c0_330, %c28] : memref<16x86xbf16, #tpu.memory_space<vmem>>, vector<16x1xbf16>
    tpu.vector_store %arg25[%c0_330, %c28], %376 {strides = array<i32>} : memref<16x86xbf16, #tpu.memory_space<vmem>>, vector<16x1xbf16>,
    %c0_331 = arith.constant 0 : index
    %c324 = arith.constant 324 : index
    %378 = vector.load %arg27[%c0_331, %c324] : memref<16x648xf32, #tpu.memory_space<vmem>>, vector<16x1xf32>
    %c0_332 = arith.constant 0 : index
    %c326 = arith.constant 326 : index
    %379 = vector.load %arg27[%c0_332, %c326] : memref<16x648xf32, #tpu.memory_space<vmem>>, vector<16x1xf32>
    %380 = arith.maximumf %378, %379 : vector<16x1xf32>
    %c0_333 = arith.constant 0 : index
    %c360 = arith.constant 360 : index
    %381 = vector.load %arg27[%c0_333, %c360] : memref<16x648xf32, #tpu.memory_space<vmem>>, vector<16x1xf32>
    %c0_334 = arith.constant 0 : index
    %c362 = arith.constant 362 : index
    %382 = vector.load %arg27[%c0_334, %c362] : memref<16x648xf32, #tpu.memory_space<vmem>>, vector<16x1xf32>
    %383 = arith.maximumf %381, %382 : vector<16x1xf32>
    %384 = arith.maximumf %380, %383 : vector<16x1xf32>
    %385 = arith.truncf %384 : vector<16x1xf32> to vector<16x1xbf16>
    %c0_335 = arith.constant 0 : index
    %c43 = arith.constant 43 : index
    %386 = vector.load %arg25[%c0_335, %c43] : memref<16x86xbf16, #tpu.memory_space<vmem>>, vector<16x1xbf16>
    tpu.vector_store %arg25[%c0_335, %c43], %385 {strides = array<i32>} : memref<16x86xbf16, #tpu.memory_space<vmem>>, vector<16x1xbf16>,
    %c0_336 = arith.constant 0 : index
    %c328 = arith.constant 328 : index
    %387 = vector.load %arg27[%c0_336, %c328] : memref<16x648xf32, #tpu.memory_space<vmem>>, vector<16x1xf32>
    %c0_337 = arith.constant 0 : index
    %c330 = arith.constant 330 : index
    %388 = vector.load %arg27[%c0_337, %c330] : memref<16x648xf32, #tpu.memory_space<vmem>>, vector<16x1xf32>
    %389 = arith.maximumf %387, %388 : vector<16x1xf32>
    %c0_338 = arith.constant 0 : index
    %c364 = arith.constant 364 : index
    %390 = vector.load %arg27[%c0_338, %c364] : memref<16x648xf32, #tpu.memory_space<vmem>>, vector<16x1xf32>
    %c0_339 = arith.constant 0 : index
    %c366 = arith.constant 366 : index
    %391 = vector.load %arg27[%c0_339, %c366] : memref<16x648xf32, #tpu.memory_space<vmem>>, vector<16x1xf32>
    %392 = arith.maximumf %390, %391 : vector<16x1xf32>
    %393 = arith.maximumf %389, %392 : vector<16x1xf32>
    %394 = arith.truncf %393 : vector<16x1xf32> to vector<16x1xbf16>
    %c0_340 = arith.constant 0 : index
    %c44_341 = arith.constant 44 : index
    %395 = vector.load %arg25[%c0_340, %c44_341] : memref<16x86xbf16, #tpu.memory_space<vmem>>, vector<16x1xbf16>
    tpu.vector_store %arg25[%c0_340, %c44_341], %394 {strides = array<i32>} : memref<16x86xbf16, #tpu.memory_space<vmem>>, vector<16x1xbf16>,
    %c0_342 = arith.constant 0 : index
    %c332 = arith.constant 332 : index
    %396 = vector.load %arg27[%c0_342, %c332] : memref<16x648xf32, #tpu.memory_space<vmem>>, vector<16x1xf32>
    %c0_343 = arith.constant 0 : index
    %c334 = arith.constant 334 : index
    %397 = vector.load %arg27[%c0_343, %c334] : memref<16x648xf32, #tpu.memory_space<vmem>>, vector<16x1xf32>
    %398 = arith.maximumf %396, %397 : vector<16x1xf32>
    %c0_344 = arith.constant 0 : index
    %c368 = arith.constant 368 : index
    %399 = vector.load %arg27[%c0_344, %c368] : memref<16x648xf32, #tpu.memory_space<vmem>>, vector<16x1xf32>
    %c0_345 = arith.constant 0 : index
    %c370 = arith.constant 370 : index
    %400 = vector.load %arg27[%c0_345, %c370] : memref<16x648xf32, #tpu.memory_space<vmem>>, vector<16x1xf32>
    %401 = arith.maximumf %399, %400 : vector<16x1xf32>
    %402 = arith.maximumf %398, %401 : vector<16x1xf32>
    %403 = arith.truncf %402 : vector<16x1xf32> to vector<16x1xbf16>
    %c0_346 = arith.constant 0 : index
    %c45 = arith.constant 45 : index
    %404 = vector.load %arg25[%c0_346, %c45] : memref<16x86xbf16, #tpu.memory_space<vmem>>, vector<16x1xbf16>
    tpu.vector_store %arg25[%c0_346, %c45], %403 {strides = array<i32>} : memref<16x86xbf16, #tpu.memory_space<vmem>>, vector<16x1xbf16>,
    %c0_347 = arith.constant 0 : index
    %c336 = arith.constant 336 : index
    %405 = vector.load %arg27[%c0_347, %c336] : memref<16x648xf32, #tpu.memory_space<vmem>>, vector<16x1xf32>
    %c0_348 = arith.constant 0 : index
    %c338 = arith.constant 338 : index
    %406 = vector.load %arg27[%c0_348, %c338] : memref<16x648xf32, #tpu.memory_space<vmem>>, vector<16x1xf32>
    %407 = arith.maximumf %405, %406 : vector<16x1xf32>
    %c0_349 = arith.constant 0 : index
    %c372 = arith.constant 372 : index
    %408 = vector.load %arg27[%c0_349, %c372] : memref<16x648xf32, #tpu.memory_space<vmem>>, vector<16x1xf32>
    %c0_350 = arith.constant 0 : index
    %c374 = arith.constant 374 : index
    %409 = vector.load %arg27[%c0_350, %c374] : memref<16x648xf32, #tpu.memory_space<vmem>>, vector<16x1xf32>
    %410 = arith.maximumf %408, %409 : vector<16x1xf32>
    %411 = arith.maximumf %407, %410 : vector<16x1xf32>
    %412 = arith.truncf %411 : vector<16x1xf32> to vector<16x1xbf16>
    %c0_351 = arith.constant 0 : index
    %c46_352 = arith.constant 46 : index
    %413 = vector.load %arg25[%c0_351, %c46_352] : memref<16x86xbf16, #tpu.memory_space<vmem>>, vector<16x1xbf16>
    tpu.vector_store %arg25[%c0_351, %c46_352], %412 {strides = array<i32>} : memref<16x86xbf16, #tpu.memory_space<vmem>>, vector<16x1xbf16>,
    %c0_353 = arith.constant 0 : index
    %c396 = arith.constant 396 : index
    %414 = vector.load %arg27[%c0_353, %c396] : memref<16x648xf32, #tpu.memory_space<vmem>>, vector<16x1xf32>
    %c0_354 = arith.constant 0 : index
    %c398 = arith.constant 398 : index
    %415 = vector.load %arg27[%c0_354, %c398] : memref<16x648xf32, #tpu.memory_space<vmem>>, vector<16x1xf32>
    %416 = arith.maximumf %414, %415 : vector<16x1xf32>
    %c0_355 = arith.constant 0 : index
    %c432 = arith.constant 432 : index
    %417 = vector.load %arg27[%c0_355, %c432] : memref<16x648xf32, #tpu.memory_space<vmem>>, vector<16x1xf32>
    %c0_356 = arith.constant 0 : index
    %c434 = arith.constant 434 : index
    %418 = vector.load %arg27[%c0_356, %c434] : memref<16x648xf32, #tpu.memory_space<vmem>>, vector<16x1xf32>
    %419 = arith.maximumf %417, %418 : vector<16x1xf32>
    %420 = arith.maximumf %416, %419 : vector<16x1xf32>
    %421 = arith.truncf %420 : vector<16x1xf32> to vector<16x1xbf16>
    %c0_357 = arith.constant 0 : index
    %c49 = arith.constant 49 : index
    %422 = vector.load %arg25[%c0_357, %c49] : memref<16x86xbf16, #tpu.memory_space<vmem>>, vector<16x1xbf16>
    tpu.vector_store %arg25[%c0_357, %c49], %421 {strides = array<i32>} : memref<16x86xbf16, #tpu.memory_space<vmem>>, vector<16x1xbf16>,
    %c0_358 = arith.constant 0 : index
    %c400 = arith.constant 400 : index
    %423 = vector.load %arg27[%c0_358, %c400] : memref<16x648xf32, #tpu.memory_space<vmem>>, vector<16x1xf32>
    %c0_359 = arith.constant 0 : index
    %c402 = arith.constant 402 : index
    %424 = vector.load %arg27[%c0_359, %c402] : memref<16x648xf32, #tpu.memory_space<vmem>>, vector<16x1xf32>
    %425 = arith.maximumf %423, %424 : vector<16x1xf32>
    %c0_360 = arith.constant 0 : index
    %c436 = arith.constant 436 : index
    %426 = vector.load %arg27[%c0_360, %c436] : memref<16x648xf32, #tpu.memory_space<vmem>>, vector<16x1xf32>
    %c0_361 = arith.constant 0 : index
    %c438 = arith.constant 438 : index
    %427 = vector.load %arg27[%c0_361, %c438] : memref<16x648xf32, #tpu.memory_space<vmem>>, vector<16x1xf32>
    %428 = arith.maximumf %426, %427 : vector<16x1xf32>
    %429 = arith.maximumf %425, %428 : vector<16x1xf32>
    %430 = arith.truncf %429 : vector<16x1xf32> to vector<16x1xbf16>
    %c0_362 = arith.constant 0 : index
    %c50_363 = arith.constant 50 : index
    %431 = vector.load %arg25[%c0_362, %c50_363] : memref<16x86xbf16, #tpu.memory_space<vmem>>, vector<16x1xbf16>
    tpu.vector_store %arg25[%c0_362, %c50_363], %430 {strides = array<i32>} : memref<16x86xbf16, #tpu.memory_space<vmem>>, vector<16x1xbf16>,
    %c0_364 = arith.constant 0 : index
    %c404 = arith.constant 404 : index
    %432 = vector.load %arg27[%c0_364, %c404] : memref<16x648xf32, #tpu.memory_space<vmem>>, vector<16x1xf32>
    %c0_365 = arith.constant 0 : index
    %c406 = arith.constant 406 : index
    %433 = vector.load %arg27[%c0_365, %c406] : memref<16x648xf32, #tpu.memory_space<vmem>>, vector<16x1xf32>
    %434 = arith.maximumf %432, %433 : vector<16x1xf32>
    %c0_366 = arith.constant 0 : index
    %c440 = arith.constant 440 : index
    %435 = vector.load %arg27[%c0_366, %c440] : memref<16x648xf32, #tpu.memory_space<vmem>>, vector<16x1xf32>
    %c0_367 = arith.constant 0 : index
    %c442 = arith.constant 442 : index
    %436 = vector.load %arg27[%c0_367, %c442] : memref<16x648xf32, #tpu.memory_space<vmem>>, vector<16x1xf32>
    %437 = arith.maximumf %435, %436 : vector<16x1xf32>
    %438 = arith.maximumf %434, %437 : vector<16x1xf32>
    %439 = arith.truncf %438 : vector<16x1xf32> to vector<16x1xbf16>
    %c0_368 = arith.constant 0 : index
    %c51 = arith.constant 51 : index
    %440 = vector.load %arg25[%c0_368, %c51] : memref<16x86xbf16, #tpu.memory_space<vmem>>, vector<16x1xbf16>
    tpu.vector_store %arg25[%c0_368, %c51], %439 {strides = array<i32>} : memref<16x86xbf16, #tpu.memory_space<vmem>>, vector<16x1xbf16>,
    %c0_369 = arith.constant 0 : index
    %c408 = arith.constant 408 : index
    %441 = vector.load %arg27[%c0_369, %c408] : memref<16x648xf32, #tpu.memory_space<vmem>>, vector<16x1xf32>
    %c0_370 = arith.constant 0 : index
    %c410 = arith.constant 410 : index
    %442 = vector.load %arg27[%c0_370, %c410] : memref<16x648xf32, #tpu.memory_space<vmem>>, vector<16x1xf32>
    %443 = arith.maximumf %441, %442 : vector<16x1xf32>
    %c0_371 = arith.constant 0 : index
    %c444 = arith.constant 444 : index
    %444 = vector.load %arg27[%c0_371, %c444] : memref<16x648xf32, #tpu.memory_space<vmem>>, vector<16x1xf32>
    %c0_372 = arith.constant 0 : index
    %c446 = arith.constant 446 : index
    %445 = vector.load %arg27[%c0_372, %c446] : memref<16x648xf32, #tpu.memory_space<vmem>>, vector<16x1xf32>
    %446 = arith.maximumf %444, %445 : vector<16x1xf32>
    %447 = arith.maximumf %443, %446 : vector<16x1xf32>
    %448 = arith.truncf %447 : vector<16x1xf32> to vector<16x1xbf16>
    %c0_373 = arith.constant 0 : index
    %c52 = arith.constant 52 : index
    %449 = vector.load %arg25[%c0_373, %c52] : memref<16x86xbf16, #tpu.memory_space<vmem>>, vector<16x1xbf16>
    tpu.vector_store %arg25[%c0_373, %c52], %448 {strides = array<i32>} : memref<16x86xbf16, #tpu.memory_space<vmem>>, vector<16x1xbf16>,
    %c0_374 = arith.constant 0 : index
    %c468 = arith.constant 468 : index
    %450 = vector.load %arg27[%c0_374, %c468] : memref<16x648xf32, #tpu.memory_space<vmem>>, vector<16x1xf32>
    %c0_375 = arith.constant 0 : index
    %c470 = arith.constant 470 : index
    %451 = vector.load %arg27[%c0_375, %c470] : memref<16x648xf32, #tpu.memory_space<vmem>>, vector<16x1xf32>
    %452 = arith.maximumf %450, %451 : vector<16x1xf32>
    %c0_376 = arith.constant 0 : index
    %c504 = arith.constant 504 : index
    %453 = vector.load %arg27[%c0_376, %c504] : memref<16x648xf32, #tpu.memory_space<vmem>>, vector<16x1xf32>
    %c0_377 = arith.constant 0 : index
    %c506 = arith.constant 506 : index
    %454 = vector.load %arg27[%c0_377, %c506] : memref<16x648xf32, #tpu.memory_space<vmem>>, vector<16x1xf32>
    %455 = arith.maximumf %453, %454 : vector<16x1xf32>
    %456 = arith.maximumf %452, %455 : vector<16x1xf32>
    %457 = arith.truncf %456 : vector<16x1xf32> to vector<16x1xbf16>
    %c0_378 = arith.constant 0 : index
    %c55 = arith.constant 55 : index
    %458 = vector.load %arg25[%c0_378, %c55] : memref<16x86xbf16, #tpu.memory_space<vmem>>, vector<16x1xbf16>
    tpu.vector_store %arg25[%c0_378, %c55], %457 {strides = array<i32>} : memref<16x86xbf16, #tpu.memory_space<vmem>>, vector<16x1xbf16>,
    %c0_379 = arith.constant 0 : index
    %c472 = arith.constant 472 : index
    %459 = vector.load %arg27[%c0_379, %c472] : memref<16x648xf32, #tpu.memory_space<vmem>>, vector<16x1xf32>
    %c0_380 = arith.constant 0 : index
    %c474 = arith.constant 474 : index
    %460 = vector.load %arg27[%c0_380, %c474] : memref<16x648xf32, #tpu.memory_space<vmem>>, vector<16x1xf32>
    %461 = arith.maximumf %459, %460 : vector<16x1xf32>
    %c0_381 = arith.constant 0 : index
    %c508 = arith.constant 508 : index
    %462 = vector.load %arg27[%c0_381, %c508] : memref<16x648xf32, #tpu.memory_space<vmem>>, vector<16x1xf32>
    %c0_382 = arith.constant 0 : index
    %c510 = arith.constant 510 : index
    %463 = vector.load %arg27[%c0_382, %c510] : memref<16x648xf32, #tpu.memory_space<vmem>>, vector<16x1xf32>
    %464 = arith.maximumf %462, %463 : vector<16x1xf32>
    %465 = arith.maximumf %461, %464 : vector<16x1xf32>
    %466 = arith.truncf %465 : vector<16x1xf32> to vector<16x1xbf16>
    %c0_383 = arith.constant 0 : index
    %c56 = arith.constant 56 : index
    %467 = vector.load %arg25[%c0_383, %c56] : memref<16x86xbf16, #tpu.memory_space<vmem>>, vector<16x1xbf16>
    tpu.vector_store %arg25[%c0_383, %c56], %466 {strides = array<i32>} : memref<16x86xbf16, #tpu.memory_space<vmem>>, vector<16x1xbf16>,
    %c0_384 = arith.constant 0 : index
    %c476 = arith.constant 476 : index
    %468 = vector.load %arg27[%c0_384, %c476] : memref<16x648xf32, #tpu.memory_space<vmem>>, vector<16x1xf32>
    %c0_385 = arith.constant 0 : index
    %c478 = arith.constant 478 : index
    %469 = vector.load %arg27[%c0_385, %c478] : memref<16x648xf32, #tpu.memory_space<vmem>>, vector<16x1xf32>
    %470 = arith.maximumf %468, %469 : vector<16x1xf32>
    %c0_386 = arith.constant 0 : index
    %c512 = arith.constant 512 : index
    %471 = vector.load %arg27[%c0_386, %c512] : memref<16x648xf32, #tpu.memory_space<vmem>>, vector<16x1xf32>
    %c0_387 = arith.constant 0 : index
    %c514 = arith.constant 514 : index
    %472 = vector.load %arg27[%c0_387, %c514] : memref<16x648xf32, #tpu.memory_space<vmem>>, vector<16x1xf32>
    %473 = arith.maximumf %471, %472 : vector<16x1xf32>
    %474 = arith.maximumf %470, %473 : vector<16x1xf32>
    %475 = arith.truncf %474 : vector<16x1xf32> to vector<16x1xbf16>
    %c0_388 = arith.constant 0 : index
    %c57 = arith.constant 57 : index
    %476 = vector.load %arg25[%c0_388, %c57] : memref<16x86xbf16, #tpu.memory_space<vmem>>, vector<16x1xbf16>
    tpu.vector_store %arg25[%c0_388, %c57], %475 {strides = array<i32>} : memref<16x86xbf16, #tpu.memory_space<vmem>>, vector<16x1xbf16>,
    %c0_389 = arith.constant 0 : index
    %c480 = arith.constant 480 : index
    %477 = vector.load %arg27[%c0_389, %c480] : memref<16x648xf32, #tpu.memory_space<vmem>>, vector<16x1xf32>
    %c0_390 = arith.constant 0 : index
    %c482 = arith.constant 482 : index
    %478 = vector.load %arg27[%c0_390, %c482] : memref<16x648xf32, #tpu.memory_space<vmem>>, vector<16x1xf32>
    %479 = arith.maximumf %477, %478 : vector<16x1xf32>
    %c0_391 = arith.constant 0 : index
    %c516 = arith.constant 516 : index
    %480 = vector.load %arg27[%c0_391, %c516] : memref<16x648xf32, #tpu.memory_space<vmem>>, vector<16x1xf32>
    %c0_392 = arith.constant 0 : index
    %c518 = arith.constant 518 : index
    %481 = vector.load %arg27[%c0_392, %c518] : memref<16x648xf32, #tpu.memory_space<vmem>>, vector<16x1xf32>
    %482 = arith.maximumf %480, %481 : vector<16x1xf32>
    %483 = arith.maximumf %479, %482 : vector<16x1xf32>
    %484 = arith.truncf %483 : vector<16x1xf32> to vector<16x1xbf16>
    %c0_393 = arith.constant 0 : index
    %c58 = arith.constant 58 : index
    %485 = vector.load %arg25[%c0_393, %c58] : memref<16x86xbf16, #tpu.memory_space<vmem>>, vector<16x1xbf16>
    tpu.vector_store %arg25[%c0_393, %c58], %484 {strides = array<i32>} : memref<16x86xbf16, #tpu.memory_space<vmem>>, vector<16x1xbf16>,
    %c0_394 = arith.constant 0 : index
    %c540 = arith.constant 540 : index
    %486 = vector.load %arg27[%c0_394, %c540] : memref<16x648xf32, #tpu.memory_space<vmem>>, vector<16x1xf32>
    %c0_395 = arith.constant 0 : index
    %c542 = arith.constant 542 : index
    %487 = vector.load %arg27[%c0_395, %c542] : memref<16x648xf32, #tpu.memory_space<vmem>>, vector<16x1xf32>
    %488 = arith.maximumf %486, %487 : vector<16x1xf32>
    %c0_396 = arith.constant 0 : index
    %c576 = arith.constant 576 : index
    %489 = vector.load %arg27[%c0_396, %c576] : memref<16x648xf32, #tpu.memory_space<vmem>>, vector<16x1xf32>
    %c0_397 = arith.constant 0 : index
    %c578 = arith.constant 578 : index
    %490 = vector.load %arg27[%c0_397, %c578] : memref<16x648xf32, #tpu.memory_space<vmem>>, vector<16x1xf32>
    %491 = arith.maximumf %489, %490 : vector<16x1xf32>
    %492 = arith.maximumf %488, %491 : vector<16x1xf32>
    %493 = arith.truncf %492 : vector<16x1xf32> to vector<16x1xbf16>
    %c0_398 = arith.constant 0 : index
    %c61 = arith.constant 61 : index
    %494 = vector.load %arg25[%c0_398, %c61] : memref<16x86xbf16, #tpu.memory_space<vmem>>, vector<16x1xbf16>
    tpu.vector_store %arg25[%c0_398, %c61], %493 {strides = array<i32>} : memref<16x86xbf16, #tpu.memory_space<vmem>>, vector<16x1xbf16>,
    %c0_399 = arith.constant 0 : index
    %c544 = arith.constant 544 : index
    %495 = vector.load %arg27[%c0_399, %c544] : memref<16x648xf32, #tpu.memory_space<vmem>>, vector<16x1xf32>
    %c0_400 = arith.constant 0 : index
    %c546 = arith.constant 546 : index
    %496 = vector.load %arg27[%c0_400, %c546] : memref<16x648xf32, #tpu.memory_space<vmem>>, vector<16x1xf32>
    %497 = arith.maximumf %495, %496 : vector<16x1xf32>
    %c0_401 = arith.constant 0 : index
    %c580 = arith.constant 580 : index
    %498 = vector.load %arg27[%c0_401, %c580] : memref<16x648xf32, #tpu.memory_space<vmem>>, vector<16x1xf32>
    %c0_402 = arith.constant 0 : index
    %c582 = arith.constant 582 : index
    %499 = vector.load %arg27[%c0_402, %c582] : memref<16x648xf32, #tpu.memory_space<vmem>>, vector<16x1xf32>
    %500 = arith.maximumf %498, %499 : vector<16x1xf32>
    %501 = arith.maximumf %497, %500 : vector<16x1xf32>
    %502 = arith.truncf %501 : vector<16x1xf32> to vector<16x1xbf16>
    %c0_403 = arith.constant 0 : index
    %c62 = arith.constant 62 : index
    %503 = vector.load %arg25[%c0_403, %c62] : memref<16x86xbf16, #tpu.memory_space<vmem>>, vector<16x1xbf16>
    tpu.vector_store %arg25[%c0_403, %c62], %502 {strides = array<i32>} : memref<16x86xbf16, #tpu.memory_space<vmem>>, vector<16x1xbf16>,
    %c0_404 = arith.constant 0 : index
    %c548 = arith.constant 548 : index
    %504 = vector.load %arg27[%c0_404, %c548] : memref<16x648xf32, #tpu.memory_space<vmem>>, vector<16x1xf32>
    %c0_405 = arith.constant 0 : index
    %c550 = arith.constant 550 : index
    %505 = vector.load %arg27[%c0_405, %c550] : memref<16x648xf32, #tpu.memory_space<vmem>>, vector<16x1xf32>
    %506 = arith.maximumf %504, %505 : vector<16x1xf32>
    %c0_406 = arith.constant 0 : index
    %c584 = arith.constant 584 : index
    %507 = vector.load %arg27[%c0_406, %c584] : memref<16x648xf32, #tpu.memory_space<vmem>>, vector<16x1xf32>
    %c0_407 = arith.constant 0 : index
    %c586 = arith.constant 586 : index
    %508 = vector.load %arg27[%c0_407, %c586] : memref<16x648xf32, #tpu.memory_space<vmem>>, vector<16x1xf32>
    %509 = arith.maximumf %507, %508 : vector<16x1xf32>
    %510 = arith.maximumf %506, %509 : vector<16x1xf32>
    %511 = arith.truncf %510 : vector<16x1xf32> to vector<16x1xbf16>
    %c0_408 = arith.constant 0 : index
    %c63 = arith.constant 63 : index
    %512 = vector.load %arg25[%c0_408, %c63] : memref<16x86xbf16, #tpu.memory_space<vmem>>, vector<16x1xbf16>
    tpu.vector_store %arg25[%c0_408, %c63], %511 {strides = array<i32>} : memref<16x86xbf16, #tpu.memory_space<vmem>>, vector<16x1xbf16>,
    %c0_409 = arith.constant 0 : index
    %c552 = arith.constant 552 : index
    %513 = vector.load %arg27[%c0_409, %c552] : memref<16x648xf32, #tpu.memory_space<vmem>>, vector<16x1xf32>
    %c0_410 = arith.constant 0 : index
    %c554 = arith.constant 554 : index
    %514 = vector.load %arg27[%c0_410, %c554] : memref<16x648xf32, #tpu.memory_space<vmem>>, vector<16x1xf32>
    %515 = arith.maximumf %513, %514 : vector<16x1xf32>
    %c0_411 = arith.constant 0 : index
    %c588 = arith.constant 588 : index
    %516 = vector.load %arg27[%c0_411, %c588] : memref<16x648xf32, #tpu.memory_space<vmem>>, vector<16x1xf32>
    %c0_412 = arith.constant 0 : index
    %c590 = arith.constant 590 : index
    %517 = vector.load %arg27[%c0_412, %c590] : memref<16x648xf32, #tpu.memory_space<vmem>>, vector<16x1xf32>
    %518 = arith.maximumf %516, %517 : vector<16x1xf32>
    %519 = arith.maximumf %515, %518 : vector<16x1xf32>
    %520 = arith.truncf %519 : vector<16x1xf32> to vector<16x1xbf16>
    %c0_413 = arith.constant 0 : index
    %c64 = arith.constant 64 : index
    %521 = vector.load %arg25[%c0_413, %c64] : memref<16x86xbf16, #tpu.memory_space<vmem>>, vector<16x1xbf16>
    tpu.vector_store %arg25[%c0_413, %c64], %520 {strides = array<i32>} : memref<16x86xbf16, #tpu.memory_space<vmem>>, vector<16x1xbf16>,
    %c0_414 = arith.constant 0 : index
    %c0_415 = arith.constant 0 : index
    %c0_416 = arith.constant 0 : index
    %522 = vector.load %arg10[%c0_414, %c0_415, %c0_416] : memref<9x32x16xbf16, #tpu.memory_space<vmem>>, vector<1x32x16xbf16>
    %523 = vector.shape_cast %522 : vector<1x32x16xbf16> to vector<32x16xbf16>
    %c0_417 = arith.constant 0 : index
    %c0_418 = arith.constant 0 : index
    %524 = vector.load %arg25[%c0_417, %c0_418] : memref<16x86xbf16, #tpu.memory_space<vmem>>, vector<16x72xbf16>
    %cst_419 = arith.constant dense<0.000000e+00> : vector<32x72xf32>
    %525 = tpu.matmul %523, %524, %cst_419 {dimension_numbers = #tpu.dot_dimension_numbers<[1], [0], [0], [1], [0, 0, 1, 1], [], []>} : vector<32x16xbf16>, vector<16x72xbf16>, vector<32x72xf32> -> vector<32x72xf32>
    %c1_420 = arith.constant 1 : index
    %c0_421 = arith.constant 0 : index
    %c0_422 = arith.constant 0 : index
    %526 = vector.load %arg10[%c1_420, %c0_421, %c0_422] : memref<9x32x16xbf16, #tpu.memory_space<vmem>>, vector<1x32x16xbf16>
    %527 = vector.shape_cast %526 : vector<1x32x16xbf16> to vector<32x16xbf16>
    %c0_423 = arith.constant 0 : index
    %c1_424 = arith.constant 1 : index
    %528 = vector.load %arg25[%c0_423, %c1_424] : memref<16x86xbf16, #tpu.memory_space<vmem>>, vector<16x72xbf16>
    %cst_425 = arith.constant dense<0.000000e+00> : vector<32x72xf32>
    %529 = tpu.matmul %527, %528, %cst_425 {dimension_numbers = #tpu.dot_dimension_numbers<[1], [0], [0], [1], [0, 0, 1, 1], [], []>} : vector<32x16xbf16>, vector<16x72xbf16>, vector<32x72xf32> -> vector<32x72xf32>
    %530 = arith.addf %525, %529 : vector<32x72xf32>
    %c2_426 = arith.constant 2 : index
    %c0_427 = arith.constant 0 : index
    %c0_428 = arith.constant 0 : index
    %531 = vector.load %arg10[%c2_426, %c0_427, %c0_428] : memref<9x32x16xbf16, #tpu.memory_space<vmem>>, vector<1x32x16xbf16>
    %532 = vector.shape_cast %531 : vector<1x32x16xbf16> to vector<32x16xbf16>
    %c0_429 = arith.constant 0 : index
    %c2_430 = arith.constant 2 : index
    %533 = vector.load %arg25[%c0_429, %c2_430] : memref<16x86xbf16, #tpu.memory_space<vmem>>, vector<16x72xbf16>
    %cst_431 = arith.constant dense<0.000000e+00> : vector<32x72xf32>
    %534 = tpu.matmul %532, %533, %cst_431 {dimension_numbers = #tpu.dot_dimension_numbers<[1], [0], [0], [1], [0, 0, 1, 1], [], []>} : vector<32x16xbf16>, vector<16x72xbf16>, vector<32x72xf32> -> vector<32x72xf32>
    %535 = arith.addf %530, %534 : vector<32x72xf32>
    %c3_432 = arith.constant 3 : index
    %c0_433 = arith.constant 0 : index
    %c0_434 = arith.constant 0 : index
    %536 = vector.load %arg10[%c3_432, %c0_433, %c0_434] : memref<9x32x16xbf16, #tpu.memory_space<vmem>>, vector<1x32x16xbf16>
    %537 = vector.shape_cast %536 : vector<1x32x16xbf16> to vector<32x16xbf16>
    %c0_435 = arith.constant 0 : index
    %c6_436 = arith.constant 6 : index
    %538 = vector.load %arg25[%c0_435, %c6_436] : memref<16x86xbf16, #tpu.memory_space<vmem>>, vector<16x72xbf16>
    %cst_437 = arith.constant dense<0.000000e+00> : vector<32x72xf32>
    %539 = tpu.matmul %537, %538, %cst_437 {dimension_numbers = #tpu.dot_dimension_numbers<[1], [0], [0], [1], [0, 0, 1, 1], [], []>} : vector<32x16xbf16>, vector<16x72xbf16>, vector<32x72xf32> -> vector<32x72xf32>
    %540 = arith.addf %535, %539 : vector<32x72xf32>
    %c4_438 = arith.constant 4 : index
    %c0_439 = arith.constant 0 : index
    %c0_440 = arith.constant 0 : index
    %541 = vector.load %arg10[%c4_438, %c0_439, %c0_440] : memref<9x32x16xbf16, #tpu.memory_space<vmem>>, vector<1x32x16xbf16>
    %542 = vector.shape_cast %541 : vector<1x32x16xbf16> to vector<32x16xbf16>
    %c0_441 = arith.constant 0 : index
    %c7_442 = arith.constant 7 : index
    %543 = vector.load %arg25[%c0_441, %c7_442] : memref<16x86xbf16, #tpu.memory_space<vmem>>, vector<16x72xbf16>
    %cst_443 = arith.constant dense<0.000000e+00> : vector<32x72xf32>
    %544 = tpu.matmul %542, %543, %cst_443 {dimension_numbers = #tpu.dot_dimension_numbers<[1], [0], [0], [1], [0, 0, 1, 1], [], []>} : vector<32x16xbf16>, vector<16x72xbf16>, vector<32x72xf32> -> vector<32x72xf32>
    %545 = arith.addf %540, %544 : vector<32x72xf32>
    %c5_444 = arith.constant 5 : index
    %c0_445 = arith.constant 0 : index
    %c0_446 = arith.constant 0 : index
    %546 = vector.load %arg10[%c5_444, %c0_445, %c0_446] : memref<9x32x16xbf16, #tpu.memory_space<vmem>>, vector<1x32x16xbf16>
    %547 = vector.shape_cast %546 : vector<1x32x16xbf16> to vector<32x16xbf16>
    %c0_447 = arith.constant 0 : index
    %c8_448 = arith.constant 8 : index
    %548 = vector.load %arg25[%c0_447, %c8_448] : memref<16x86xbf16, #tpu.memory_space<vmem>>, vector<16x72xbf16>
    %cst_449 = arith.constant dense<0.000000e+00> : vector<32x72xf32>
    %549 = tpu.matmul %547, %548, %cst_449 {dimension_numbers = #tpu.dot_dimension_numbers<[1], [0], [0], [1], [0, 0, 1, 1], [], []>} : vector<32x16xbf16>, vector<16x72xbf16>, vector<32x72xf32> -> vector<32x72xf32>
    %550 = arith.addf %545, %549 : vector<32x72xf32>
    %c6_450 = arith.constant 6 : index
    %c0_451 = arith.constant 0 : index
    %c0_452 = arith.constant 0 : index
    %551 = vector.load %arg10[%c6_450, %c0_451, %c0_452] : memref<9x32x16xbf16, #tpu.memory_space<vmem>>, vector<1x32x16xbf16>
    %552 = vector.shape_cast %551 : vector<1x32x16xbf16> to vector<32x16xbf16>
    %c0_453 = arith.constant 0 : index
    %c12_454 = arith.constant 12 : index
    %553 = vector.load %arg25[%c0_453, %c12_454] : memref<16x86xbf16, #tpu.memory_space<vmem>>, vector<16x72xbf16>
    %cst_455 = arith.constant dense<0.000000e+00> : vector<32x72xf32>
    %554 = tpu.matmul %552, %553, %cst_455 {dimension_numbers = #tpu.dot_dimension_numbers<[1], [0], [0], [1], [0, 0, 1, 1], [], []>} : vector<32x16xbf16>, vector<16x72xbf16>, vector<32x72xf32> -> vector<32x72xf32>
    %555 = arith.addf %550, %554 : vector<32x72xf32>
    %c7_456 = arith.constant 7 : index
    %c0_457 = arith.constant 0 : index
    %c0_458 = arith.constant 0 : index
    %556 = vector.load %arg10[%c7_456, %c0_457, %c0_458] : memref<9x32x16xbf16, #tpu.memory_space<vmem>>, vector<1x32x16xbf16>
    %557 = vector.shape_cast %556 : vector<1x32x16xbf16> to vector<32x16xbf16>
    %c0_459 = arith.constant 0 : index
    %c13_460 = arith.constant 13 : index
    %558 = vector.load %arg25[%c0_459, %c13_460] : memref<16x86xbf16, #tpu.memory_space<vmem>>, vector<16x72xbf16>
    %cst_461 = arith.constant dense<0.000000e+00> : vector<32x72xf32>
    %559 = tpu.matmul %557, %558, %cst_461 {dimension_numbers = #tpu.dot_dimension_numbers<[1], [0], [0], [1], [0, 0, 1, 1], [], []>} : vector<32x16xbf16>, vector<16x72xbf16>, vector<32x72xf32> -> vector<32x72xf32>
    %560 = arith.addf %555, %559 : vector<32x72xf32>
    %c8_462 = arith.constant 8 : index
    %c0_463 = arith.constant 0 : index
    %c0_464 = arith.constant 0 : index
    %561 = vector.load %arg10[%c8_462, %c0_463, %c0_464] : memref<9x32x16xbf16, #tpu.memory_space<vmem>>, vector<1x32x16xbf16>
    %562 = vector.shape_cast %561 : vector<1x32x16xbf16> to vector<32x16xbf16>
    %c0_465 = arith.constant 0 : index
    %c14_466 = arith.constant 14 : index
    %563 = vector.load %arg25[%c0_465, %c14_466] : memref<16x86xbf16, #tpu.memory_space<vmem>>, vector<16x72xbf16>
    %cst_467 = arith.constant dense<0.000000e+00> : vector<32x72xf32>
    %564 = tpu.matmul %562, %563, %cst_467 {dimension_numbers = #tpu.dot_dimension_numbers<[1], [0], [0], [1], [0, 0, 1, 1], [], []>} : vector<32x16xbf16>, vector<16x72xbf16>, vector<32x72xf32> -> vector<32x72xf32>
    %565 = arith.addf %560, %564 : vector<32x72xf32>
    %c0_468 = arith.constant 0 : index
    %c0_469 = arith.constant 0 : index
    %566 = vector.load %arg11[%c0_468, %c0_469] : memref<32x1xf32, #tpu.memory_space<vmem>>, vector<32x1xf32>
    %567 = vector.broadcast %566 : vector<32x1xf32> to vector<32x72xf32>
    %568 = arith.addf %565, %567 : vector<32x72xf32>
    %c0_470 = arith.constant 0 : index
    %c0_471 = arith.constant 0 : index
    %569 = vector.load %arg20[%c0_470, %c0_471] : memref<1x72xf32, #tpu.memory_space<vmem>>, vector<1x72xf32>
    %c0_472 = arith.constant 0 : index
    %c0_473 = arith.constant 0 : index
    %570 = vector.load %arg12[%c0_472, %c0_473] : memref<32x1xf32, #tpu.memory_space<vmem>>, vector<32x1xf32>
    %c0_474 = arith.constant 0 : index
    %c0_475 = arith.constant 0 : index
    %571 = vector.load %arg13[%c0_474, %c0_475] : memref<32x1xf32, #tpu.memory_space<vmem>>, vector<32x1xf32>
    %572 = vector.broadcast %569 : vector<1x72xf32> to vector<32x72xf32>
    %573 = arith.mulf %568, %572 : vector<32x72xf32>
    %cst_476 = arith.constant dense<0.000000e+00> : vector<32xf32>
    %574 = vector.multi_reduction <add>, %573, %cst_476 [1] : vector<32x72xf32> to vector<32xf32>
    %575 = vector.shape_cast %574 : vector<32xf32> to vector<32x1xf32>
    %cst_477 = arith.constant 1.250000e-01 : f32
    %576 = vector.broadcast %cst_477 : f32 to vector<32x1xf32>
    %577 = arith.mulf %575, %576 : vector<32x1xf32>
    %578 = vector.broadcast %577 : vector<32x1xf32> to vector<32x72xf32>
    %579 = arith.subf %568, %578 : vector<32x72xf32>
    %580 = arith.mulf %579, %579 : vector<32x72xf32>
    %581 = vector.broadcast %569 : vector<1x72xf32> to vector<32x72xf32>
    %582 = arith.mulf %580, %581 : vector<32x72xf32>
    %cst_478 = arith.constant dense<0.000000e+00> : vector<32xf32>
    %583 = vector.multi_reduction <add>, %582, %cst_478 [1] : vector<32x72xf32> to vector<32xf32>
    %584 = vector.shape_cast %583 : vector<32xf32> to vector<32x1xf32>
    %cst_479 = arith.constant 1.250000e-01 : f32
    %585 = vector.broadcast %cst_479 : f32 to vector<32x1xf32>
    %586 = arith.mulf %584, %585 : vector<32x1xf32>
    %cst_480 = arith.constant 9.99999974E-6 : f32
    %587 = vector.broadcast %cst_480 : f32 to vector<32x1xf32>
    %588 = arith.addf %586, %587 : vector<32x1xf32>
    %589 = math.rsqrt %588 : vector<32x1xf32>
    %590 = arith.mulf %570, %589 : vector<32x1xf32>
    %591 = arith.mulf %577, %590 : vector<32x1xf32>
    %592 = arith.subf %571, %591 : vector<32x1xf32>
    %593 = vector.broadcast %590 : vector<32x1xf32> to vector<32x72xf32>
    %594 = arith.mulf %568, %593 : vector<32x72xf32>
    %595 = vector.broadcast %592 : vector<32x1xf32> to vector<32x72xf32>
    %596 = arith.addf %594, %595 : vector<32x72xf32>
    %cst_481 = arith.constant 0.000000e+00 : f32
    %597 = vector.broadcast %cst_481 : f32 to vector<32x72xf32>
    %598 = arith.maximumf %596, %597 : vector<32x72xf32>
    %c0_482 = arith.constant 0 : index
    %c0_483 = arith.constant 0 : index
    %599 = vector.load %arg28[%c0_482, %c0_483] : memref<32x72xf32, #tpu.memory_space<vmem>>, vector<32x72xf32>
    tpu.vector_store %arg28[%c0_482, %c0_483], %598 {strides = array<i32>} : memref<32x72xf32, #tpu.memory_space<vmem>>, vector<32x72xf32>,
    %c0_484 = arith.constant 0 : index
    %c0_485 = arith.constant 0 : index
    %600 = vector.load %arg28[%c0_484, %c0_485] : memref<32x72xf32, #tpu.memory_space<vmem>>, vector<32x1xf32>
    %c0_486 = arith.constant 0 : index
    %c2_487 = arith.constant 2 : index
    %601 = vector.load %arg28[%c0_486, %c2_487] : memref<32x72xf32, #tpu.memory_space<vmem>>, vector<32x1xf32>
    %602 = arith.maximumf %600, %601 : vector<32x1xf32>
    %c0_488 = arith.constant 0 : index
    %c12_489 = arith.constant 12 : index
    %603 = vector.load %arg28[%c0_488, %c12_489] : memref<32x72xf32, #tpu.memory_space<vmem>>, vector<32x1xf32>
    %c0_490 = arith.constant 0 : index
    %c14_491 = arith.constant 14 : index
    %604 = vector.load %arg28[%c0_490, %c14_491] : memref<32x72xf32, #tpu.memory_space<vmem>>, vector<32x1xf32>
    %605 = arith.maximumf %603, %604 : vector<32x1xf32>
    %606 = arith.maximumf %602, %605 : vector<32x1xf32>
    %607 = arith.truncf %606 : vector<32x1xf32> to vector<32x1xbf16>
    %c0_492 = arith.constant 0 : index
    %c4_493 = arith.constant 4 : index
    %608 = vector.load %arg26[%c0_492, %c4_493] : memref<32x26xbf16, #tpu.memory_space<vmem>>, vector<32x1xbf16>
    tpu.vector_store %arg26[%c0_492, %c4_493], %607 {strides = array<i32>} : memref<32x26xbf16, #tpu.memory_space<vmem>>, vector<32x1xbf16>,
    %c0_494 = arith.constant 0 : index
    %c36_495 = arith.constant 36 : index
    %609 = vector.load %arg28[%c0_494, %c36_495] : memref<32x72xf32, #tpu.memory_space<vmem>>, vector<32x1xf32>
    %c0_496 = arith.constant 0 : index
    %c38_497 = arith.constant 38 : index
    %610 = vector.load %arg28[%c0_496, %c38_497] : memref<32x72xf32, #tpu.memory_space<vmem>>, vector<32x1xf32>
    %611 = arith.maximumf %609, %610 : vector<32x1xf32>
    %c0_498 = arith.constant 0 : index
    %c48_499 = arith.constant 48 : index
    %612 = vector.load %arg28[%c0_498, %c48_499] : memref<32x72xf32, #tpu.memory_space<vmem>>, vector<32x1xf32>
    %c0_500 = arith.constant 0 : index
    %c50_501 = arith.constant 50 : index
    %613 = vector.load %arg28[%c0_500, %c50_501] : memref<32x72xf32, #tpu.memory_space<vmem>>, vector<32x1xf32>
    %614 = arith.maximumf %612, %613 : vector<32x1xf32>
    %615 = arith.maximumf %611, %614 : vector<32x1xf32>
    %616 = arith.truncf %615 : vector<32x1xf32> to vector<32x1xbf16>
    %c0_502 = arith.constant 0 : index
    %c13_503 = arith.constant 13 : index
    %617 = vector.load %arg26[%c0_502, %c13_503] : memref<32x26xbf16, #tpu.memory_space<vmem>>, vector<32x1xbf16>
    tpu.vector_store %arg26[%c0_502, %c13_503], %616 {strides = array<i32>} : memref<32x26xbf16, #tpu.memory_space<vmem>>, vector<32x1xbf16>,
    %c0_504 = arith.constant 0 : index
    %c0_505 = arith.constant 0 : index
    %c0_506 = arith.constant 0 : index
    %618 = vector.load %arg14[%c0_504, %c0_505, %c0_506] : memref<9x64x32xbf16, #tpu.memory_space<vmem>>, vector<1x64x32xbf16>
    %619 = vector.shape_cast %618 : vector<1x64x32xbf16> to vector<64x32xbf16>
    %c0_507 = arith.constant 0 : index
    %c0_508 = arith.constant 0 : index
    %620 = vector.load %arg26[%c0_507, %c0_508] : memref<32x26xbf16, #tpu.memory_space<vmem>>, vector<32x18xbf16>
    %cst_509 = arith.constant dense<0.000000e+00> : vector<64x18xf32>
    %621 = tpu.matmul %619, %620, %cst_509 {dimension_numbers = #tpu.dot_dimension_numbers<[1], [0], [0], [1], [0, 0, 1, 1], [], []>} : vector<64x32xbf16>, vector<32x18xbf16>, vector<64x18xf32> -> vector<64x18xf32>
    %c1_510 = arith.constant 1 : index
    %c0_511 = arith.constant 0 : index
    %c0_512 = arith.constant 0 : index
    %622 = vector.load %arg14[%c1_510, %c0_511, %c0_512] : memref<9x64x32xbf16, #tpu.memory_space<vmem>>, vector<1x64x32xbf16>
    %623 = vector.shape_cast %622 : vector<1x64x32xbf16> to vector<64x32xbf16>
    %c0_513 = arith.constant 0 : index
    %c1_514 = arith.constant 1 : index
    %624 = vector.load %arg26[%c0_513, %c1_514] : memref<32x26xbf16, #tpu.memory_space<vmem>>, vector<32x18xbf16>
    %cst_515 = arith.constant dense<0.000000e+00> : vector<64x18xf32>
    %625 = tpu.matmul %623, %624, %cst_515 {dimension_numbers = #tpu.dot_dimension_numbers<[1], [0], [0], [1], [0, 0, 1, 1], [], []>} : vector<64x32xbf16>, vector<32x18xbf16>, vector<64x18xf32> -> vector<64x18xf32>
    %626 = arith.addf %621, %625 : vector<64x18xf32>
    %c2_516 = arith.constant 2 : index
    %c0_517 = arith.constant 0 : index
    %c0_518 = arith.constant 0 : index
    %627 = vector.load %arg14[%c2_516, %c0_517, %c0_518] : memref<9x64x32xbf16, #tpu.memory_space<vmem>>, vector<1x64x32xbf16>
    %628 = vector.shape_cast %627 : vector<1x64x32xbf16> to vector<64x32xbf16>
    %c0_519 = arith.constant 0 : index
    %c2_520 = arith.constant 2 : index
    %629 = vector.load %arg26[%c0_519, %c2_520] : memref<32x26xbf16, #tpu.memory_space<vmem>>, vector<32x18xbf16>
    %cst_521 = arith.constant dense<0.000000e+00> : vector<64x18xf32>
    %630 = tpu.matmul %628, %629, %cst_521 {dimension_numbers = #tpu.dot_dimension_numbers<[1], [0], [0], [1], [0, 0, 1, 1], [], []>} : vector<64x32xbf16>, vector<32x18xbf16>, vector<64x18xf32> -> vector<64x18xf32>
    %631 = arith.addf %626, %630 : vector<64x18xf32>
    %c3_522 = arith.constant 3 : index
    %c0_523 = arith.constant 0 : index
    %c0_524 = arith.constant 0 : index
    %632 = vector.load %arg14[%c3_522, %c0_523, %c0_524] : memref<9x64x32xbf16, #tpu.memory_space<vmem>>, vector<1x64x32xbf16>
    %633 = vector.shape_cast %632 : vector<1x64x32xbf16> to vector<64x32xbf16>
    %c0_525 = arith.constant 0 : index
    %c3_526 = arith.constant 3 : index
    %634 = vector.load %arg26[%c0_525, %c3_526] : memref<32x26xbf16, #tpu.memory_space<vmem>>, vector<32x18xbf16>
    %cst_527 = arith.constant dense<0.000000e+00> : vector<64x18xf32>
    %635 = tpu.matmul %633, %634, %cst_527 {dimension_numbers = #tpu.dot_dimension_numbers<[1], [0], [0], [1], [0, 0, 1, 1], [], []>} : vector<64x32xbf16>, vector<32x18xbf16>, vector<64x18xf32> -> vector<64x18xf32>
    %636 = arith.addf %631, %635 : vector<64x18xf32>
    %c4_528 = arith.constant 4 : index
    %c0_529 = arith.constant 0 : index
    %c0_530 = arith.constant 0 : index
    %637 = vector.load %arg14[%c4_528, %c0_529, %c0_530] : memref<9x64x32xbf16, #tpu.memory_space<vmem>>, vector<1x64x32xbf16>
    %638 = vector.shape_cast %637 : vector<1x64x32xbf16> to vector<64x32xbf16>
    %c0_531 = arith.constant 0 : index
    %c4_532 = arith.constant 4 : index
    %639 = vector.load %arg26[%c0_531, %c4_532] : memref<32x26xbf16, #tpu.memory_space<vmem>>, vector<32x18xbf16>
    %cst_533 = arith.constant dense<0.000000e+00> : vector<64x18xf32>
    %640 = tpu.matmul %638, %639, %cst_533 {dimension_numbers = #tpu.dot_dimension_numbers<[1], [0], [0], [1], [0, 0, 1, 1], [], []>} : vector<64x32xbf16>, vector<32x18xbf16>, vector<64x18xf32> -> vector<64x18xf32>
    %641 = arith.addf %636, %640 : vector<64x18xf32>
    %c5_534 = arith.constant 5 : index
    %c0_535 = arith.constant 0 : index
    %c0_536 = arith.constant 0 : index
    %642 = vector.load %arg14[%c5_534, %c0_535, %c0_536] : memref<9x64x32xbf16, #tpu.memory_space<vmem>>, vector<1x64x32xbf16>
    %643 = vector.shape_cast %642 : vector<1x64x32xbf16> to vector<64x32xbf16>
    %c0_537 = arith.constant 0 : index
    %c5_538 = arith.constant 5 : index
    %644 = vector.load %arg26[%c0_537, %c5_538] : memref<32x26xbf16, #tpu.memory_space<vmem>>, vector<32x18xbf16>
    %cst_539 = arith.constant dense<0.000000e+00> : vector<64x18xf32>
    %645 = tpu.matmul %643, %644, %cst_539 {dimension_numbers = #tpu.dot_dimension_numbers<[1], [0], [0], [1], [0, 0, 1, 1], [], []>} : vector<64x32xbf16>, vector<32x18xbf16>, vector<64x18xf32> -> vector<64x18xf32>
    %646 = arith.addf %641, %645 : vector<64x18xf32>
    %c6_540 = arith.constant 6 : index
    %c0_541 = arith.constant 0 : index
    %c0_542 = arith.constant 0 : index
    %647 = vector.load %arg14[%c6_540, %c0_541, %c0_542] : memref<9x64x32xbf16, #tpu.memory_space<vmem>>, vector<1x64x32xbf16>
    %648 = vector.shape_cast %647 : vector<1x64x32xbf16> to vector<64x32xbf16>
    %c0_543 = arith.constant 0 : index
    %c6_544 = arith.constant 6 : index
    %649 = vector.load %arg26[%c0_543, %c6_544] : memref<32x26xbf16, #tpu.memory_space<vmem>>, vector<32x18xbf16>
    %cst_545 = arith.constant dense<0.000000e+00> : vector<64x18xf32>
    %650 = tpu.matmul %648, %649, %cst_545 {dimension_numbers = #tpu.dot_dimension_numbers<[1], [0], [0], [1], [0, 0, 1, 1], [], []>} : vector<64x32xbf16>, vector<32x18xbf16>, vector<64x18xf32> -> vector<64x18xf32>
    %651 = arith.addf %646, %650 : vector<64x18xf32>
    %c7_546 = arith.constant 7 : index
    %c0_547 = arith.constant 0 : index
    %c0_548 = arith.constant 0 : index
    %652 = vector.load %arg14[%c7_546, %c0_547, %c0_548] : memref<9x64x32xbf16, #tpu.memory_space<vmem>>, vector<1x64x32xbf16>
    %653 = vector.shape_cast %652 : vector<1x64x32xbf16> to vector<64x32xbf16>
    %c0_549 = arith.constant 0 : index
    %c7_550 = arith.constant 7 : index
    %654 = vector.load %arg26[%c0_549, %c7_550] : memref<32x26xbf16, #tpu.memory_space<vmem>>, vector<32x18xbf16>
    %cst_551 = arith.constant dense<0.000000e+00> : vector<64x18xf32>
    %655 = tpu.matmul %653, %654, %cst_551 {dimension_numbers = #tpu.dot_dimension_numbers<[1], [0], [0], [1], [0, 0, 1, 1], [], []>} : vector<64x32xbf16>, vector<32x18xbf16>, vector<64x18xf32> -> vector<64x18xf32>
    %656 = arith.addf %651, %655 : vector<64x18xf32>
    %c8_552 = arith.constant 8 : index
    %c0_553 = arith.constant 0 : index
    %c0_554 = arith.constant 0 : index
    %657 = vector.load %arg14[%c8_552, %c0_553, %c0_554] : memref<9x64x32xbf16, #tpu.memory_space<vmem>>, vector<1x64x32xbf16>
    %658 = vector.shape_cast %657 : vector<1x64x32xbf16> to vector<64x32xbf16>
    %c0_555 = arith.constant 0 : index
    %c8_556 = arith.constant 8 : index
    %659 = vector.load %arg26[%c0_555, %c8_556] : memref<32x26xbf16, #tpu.memory_space<vmem>>, vector<32x18xbf16>
    %cst_557 = arith.constant dense<0.000000e+00> : vector<64x18xf32>
    %660 = tpu.matmul %658, %659, %cst_557 {dimension_numbers = #tpu.dot_dimension_numbers<[1], [0], [0], [1], [0, 0, 1, 1], [], []>} : vector<64x32xbf16>, vector<32x18xbf16>, vector<64x18xf32> -> vector<64x18xf32>
    %661 = arith.addf %656, %660 : vector<64x18xf32>
    %c0_558 = arith.constant 0 : index
    %c0_559 = arith.constant 0 : index
    %662 = vector.load %arg15[%c0_558, %c0_559] : memref<64x1xf32, #tpu.memory_space<vmem>>, vector<64x1xf32>
    %663 = vector.broadcast %662 : vector<64x1xf32> to vector<64x18xf32>
    %664 = arith.addf %661, %663 : vector<64x18xf32>
    %c0_560 = arith.constant 0 : index
    %c0_561 = arith.constant 0 : index
    %665 = vector.load %arg21[%c0_560, %c0_561] : memref<1x18xf32, #tpu.memory_space<vmem>>, vector<1x18xf32>
    %c0_562 = arith.constant 0 : index
    %c0_563 = arith.constant 0 : index
    %666 = vector.load %arg16[%c0_562, %c0_563] : memref<64x1xf32, #tpu.memory_space<vmem>>, vector<64x1xf32>
    %c0_564 = arith.constant 0 : index
    %c0_565 = arith.constant 0 : index
    %667 = vector.load %arg17[%c0_564, %c0_565] : memref<64x1xf32, #tpu.memory_space<vmem>>, vector<64x1xf32>
    %668 = vector.broadcast %665 : vector<1x18xf32> to vector<64x18xf32>
    %669 = arith.mulf %664, %668 : vector<64x18xf32>
    %cst_566 = arith.constant dense<0.000000e+00> : vector<64xf32>
    %670 = vector.multi_reduction <add>, %669, %cst_566 [1] : vector<64x18xf32> to vector<64xf32>
    %671 = vector.shape_cast %670 : vector<64xf32> to vector<64x1xf32>
    %cst_567 = arith.constant 5.000000e-01 : f32
    %672 = vector.broadcast %cst_567 : f32 to vector<64x1xf32>
    %673 = arith.mulf %671, %672 : vector<64x1xf32>
    %674 = vector.broadcast %673 : vector<64x1xf32> to vector<64x18xf32>
    %675 = arith.subf %664, %674 : vector<64x18xf32>
    %676 = arith.mulf %675, %675 : vector<64x18xf32>
    %677 = vector.broadcast %665 : vector<1x18xf32> to vector<64x18xf32>
    %678 = arith.mulf %676, %677 : vector<64x18xf32>
    %cst_568 = arith.constant dense<0.000000e+00> : vector<64xf32>
    %679 = vector.multi_reduction <add>, %678, %cst_568 [1] : vector<64x18xf32> to vector<64xf32>
    %680 = vector.shape_cast %679 : vector<64xf32> to vector<64x1xf32>
    %cst_569 = arith.constant 5.000000e-01 : f32
    %681 = vector.broadcast %cst_569 : f32 to vector<64x1xf32>
    %682 = arith.mulf %680, %681 : vector<64x1xf32>
    %cst_570 = arith.constant 9.99999974E-6 : f32
    %683 = vector.broadcast %cst_570 : f32 to vector<64x1xf32>
    %684 = arith.addf %682, %683 : vector<64x1xf32>
    %685 = math.rsqrt %684 : vector<64x1xf32>
    %686 = arith.mulf %666, %685 : vector<64x1xf32>
    %687 = arith.mulf %673, %686 : vector<64x1xf32>
    %688 = arith.subf %667, %687 : vector<64x1xf32>
    %689 = vector.broadcast %686 : vector<64x1xf32> to vector<64x18xf32>
    %690 = arith.mulf %664, %689 : vector<64x18xf32>
    %691 = vector.broadcast %688 : vector<64x1xf32> to vector<64x18xf32>
    %692 = arith.addf %690, %691 : vector<64x18xf32>
    %cst_571 = arith.constant 0.000000e+00 : f32
    %693 = vector.broadcast %cst_571 : f32 to vector<64x18xf32>
    %694 = arith.maximumf %692, %693 : vector<64x18xf32>
    %c0_572 = arith.constant 0 : index
    %c0_573 = arith.constant 0 : index
    %695 = vector.load %arg29[%c0_572, %c0_573] : memref<64x18xf32, #tpu.memory_space<vmem>>, vector<64x18xf32>
    tpu.vector_store %arg29[%c0_572, %c0_573], %694 {strides = array<i32>} : memref<64x18xf32, #tpu.memory_space<vmem>>, vector<64x18xf32>,
    %c0_574 = arith.constant 0 : index
    %c0_575 = arith.constant 0 : index
    %696 = vector.load %arg29[%c0_574, %c0_575] : memref<64x18xf32, #tpu.memory_space<vmem>>, vector<64x1xf32>
    %c0_576 = arith.constant 0 : index
    %c0_577 = arith.constant 0 : index
    %697 = vector.load %arg22[%c0_576, %c0_577] : memref<64x2xf32, #tpu.memory_space<vmem>>, vector<64x1xf32>
    tpu.vector_store %arg22[%c0_576, %c0_577], %696 {strides = array<i32>} : memref<64x2xf32, #tpu.memory_space<vmem>>, vector<64x1xf32>,
    %c0_578 = arith.constant 0 : index
    %c9_579 = arith.constant 9 : index
    %698 = vector.load %arg29[%c0_578, %c9_579] : memref<64x18xf32, #tpu.memory_space<vmem>>, vector<64x1xf32>
    %c0_580 = arith.constant 0 : index
    %c1_581 = arith.constant 1 : index
    %699 = vector.load %arg22[%c0_580, %c1_581] : memref<64x2xf32, #tpu.memory_space<vmem>>, vector<64x1xf32>
    tpu.vector_store %arg22[%c0_580, %c1_581], %698 {strides = array<i32>} : memref<64x2xf32, #tpu.memory_space<vmem>>, vector<64x1xf32>,
    return
  }
}

</mosaic_0001>

<bundles_post_ra>
// kernel: protonet_v2_forward.1
= control target key start
LH: loop header
LB: loop body
LE: loop exit
PB: predicated region body
PF: predicated region fallthrough
CT: control target
= control target key end

     0   :  { %v106_v0 = vlaneseq  ;;  %v12613_v2 = vmov 1983009808   ;;  %v15328_v7 = vmov 0   ;;  %s12615_s30 = smov 127   ;;  %s12616_s23 = smov 126   ;;  %vm139_vm0 = vcmask 1039360   ;;  %s15294_s0 = inlined_call_operand.vmem [shape: bf16[4,686], index: 0, kind: input, shape index: {}]   ;;  %s15295_s2 = inlined_call_operand.vmem [shape: f32[4,1], index: 2, kind: input, shape index: {}]   ;;  %s15296_s1 = inlined_call_operand.vmem [shape: bf16[9,4,4], index: 1, kind: input, shape index: {}]   ;;  %s15297_s18 = inlined_call_operand.vmem [shape: f32[1,648], index: 18, kind: input, shape index: {}]   ;;  %s15298_s3 = inlined_call_operand.vmem [shape: bf16[9,2,4], index: 3, kind: input, shape index: {}]   ;;  %s15299_s5 = inlined_call_operand.vmem [shape: f32[2,1], index: 5, kind: input, shape index: {}]   ;;  %s15300_s4 = inlined_call_operand.vmem [shape: bf16[9,2,4], index: 4, kind: input, shape index: {}]   ;;  %s15301_s6 = inlined_call_operand.vmem [shape: bf16[9,16,2], index: 6, kind: input, shape index: {}]   ;;  %s15302_s7 = inlined_call_operand.vmem [shape: f32[16,1], index: 7, kind: input, shape index: {}]   ;;  %s15303_s19 = inlined_call_operand.vmem [shape: f32[1,648], index: 19, kind: input, shape index: {}]   ;;  %s15304_s8 = inlined_call_operand.vmem [shape: f32[16,1], index: 8, kind: input, shape index: {}]   ;;  %s15305_s9 = inlined_call_operand.vmem [shape: f32[16,1], index: 9, kind: input, shape index: {}]   ;;  %s15306_s10 = inlined_call_operand.vmem [shape: bf16[9,32,16], index: 10, kind: input, shape index: {}]   ;;  %s15307_s11 = inlined_call_operand.vmem [shape: f32[32,1], index: 11, kind: input, shape index: {}]   ;;  %s15308_s20 = inlined_call_operand.vmem [shape: f32[1,72], index: 20, kind: input, shape index: {}]   ;;  %s15309_s12 = inlined_call_operand.vmem [shape: f32[32,1], index: 12, kind: input, shape index: {}]   ;;  %s15310_s13 = inlined_call_operand.vmem [shape: f32[32,1], index: 13, kind: input, shape index: {}]   ;;  %s15311_s14 = inlined_call_operand.vmem [shape: bf16[9,64,32], index: 14, kind: input, shape index: {}]   ;;  %s15312_s15 = inlined_call_operand.vmem [shape: f32[64,1], index: 15, kind: input, shape index: {}]   ;;  %s15313_s21 = inlined_call_operand.vmem [shape: f32[1,18], index: 21, kind: input, shape index: {}]   ;;  %s15314_s16 = inlined_call_operand.vmem [shape: f32[64,1], index: 16, kind: input, shape index: {}]   ;;  %s15315_s17 = inlined_call_operand.vmem [shape: f32[64,1], index: 17, kind: input, shape index: {}]   ;;  %s15316_s22 = inlined_call_operand.vmem [shape: f32[64,2], index: 22, kind: output, shape index: {}]  }
   0x1   :  { %15348 = sst [smem:[#allocation26_spill]] %s15294_s0  ;;  %v104_v3 = vunpack.c.l.s4 %v12613_v2  ;;  %199 = vmatprep.mubr.bf16.mxu0 %v15328_v7  ;;  %72 = vst [vmem:[#allocation2] sm:$0xff] %v15328_v7  ;;  %240 = vmatprep.mubr.bf16.mxu1 %v15328_v7  ;;  %s12619_s24 = smov 108   ;;  %vm73_vm1 = vcmask 1041408   ;;  %vm145_vm2 = vcmask 31744   ;;  %vm15327_vm3 = vcmask 1031168  }
   0x2   :  { %15349 = sst [smem:[#allocation27_spill]] %s15295_s2  ;;  %s15355_s29 = sld [smem:[#allocation26_spill]]  ;;  %v12780_v4 = vshrl.u32 %v106_v0, 7  ;;  %12123 = vset.pattern.permute.xlu0 %v15328_v7  ;;  %12124 = vset.pattern.permute.xlu1 %v15328_v7  ;;  %vm15326_vm4 = vcmask 900096   ;;  %vm15325_vm5 = vcmask 891904   ;;  %vm15324_vm6 = vcmask 883712  }
   0x3   :  { %15350 = sst [smem:[#allocation28_spill]] %s15296_s1  ;;  %v105_v5 = vunpack.c.0.s8 %v104_v3  ;;  %s12617_s2 = smov 110   ;;  %vm15323_vm7 = vcmask 752640   ;;  %vm15322_vm8 = vcmask 744448   ;;  %vm15321_vm9 = vcmask 736256  }
   0x4   :  { %15351 = sst [smem:[#allocation29_spill]] %s15297_s18  ;;  %s12621_s25 = smov 91   ;;  %vm74_vm10 = vcmask 371714   ;;  %vm1926_vm12 = vcmask 1041560   ;;  %vm1927_vm13 = vcmask 1043458   ;;  %vm1929_vm15 = vcmask 1045508  }
   0x5   :  { %15352 = sst [smem:[#allocation30_spill]] %s15298_s3  ;;  %v12786_v8 = vsub.s32 %v105_v5, %v12780_v4  ;;  %s12622_s26 = smov 90   ;;  %vm75_vm11 = vmor %vm74_vm10, %vm73_vm1 }
   0x6   :  { %15353 = sst [smem:[#allocation31_spill]] %s15299_s5  ;;  %s12618_s5 = smov 109   ;;  %76 = vst.msk [vmem:[#allocation2 + $0x8] sm:$0xf] %vm75_vm11, %v15328_v7  ;;  %vm1928_vm14 = vmor %vm1927_vm13, %vm1926_vm12  ;;  %vm1931_vm11 = vcmask 1047558   ;;  %vm15364_vm13 = vcmask 752640  }
   0x7   :  { %15354 = sst [smem:[#allocation32_spill]] %s15300_s4  ;;  %s12620_s4 = smov 92   ;;  %vm1930_vm10 = vmor %vm1929_vm15, %vm1928_vm14 }
   0x8   :  { %v96_v1 = vld [vmem:[%s15355_s29] sm:$0xff]  ;;  %v12811_v13 = vld.sshfl [vmem:[%s15355_s29 + $0x8] sm:$0x33 pattern:$0x76325410]  ;;  %s15356_s18 = sld [smem:[#allocation27_spill]]  ;;  %vm15366_vm15 = vmmov %vm15364_vm13 }
   0x9   :  { %v102_v6 = vcombine.high %v96_v1, %v96_v1  ;;  %v12791_v9 = vrot.slane %v96_v1, %v12786_v8  ;;  %v12819_v14 = vcombine.high %v12811_v13, %v12811_v13  ;;  %s15357_s0 = sld [smem:[#allocation28_spill]]  ;;  %v306_v39 = vsel %vm73_vm1, %v12811_v13, 0  ;;  %s12623_s28 = smov 19  }
   0xa   :  { %s15359_s3 = sld [smem:[#allocation30_spill]]  ;;  %s15368_s27 = sld [smem:[#allocation31_spill]] }
   0xb   :  { %v12794_v10 = vrot.slane %v102_v6, %v12786_v8  ;;  %127 = vrot.lane.b32.xlu0 %v12791_v9, %s12615_s30  ;;  %v12802_v11 = vcombine.high %v12791_v9, %v12791_v9  ;;  %v294_v31 = vsel %vm73_vm1, %v12791_v9, 0  ;;  %s15381_s1 = sld [smem:[#allocation32_spill]] }
   0xd   :  { %131 = vrot.lane.b32.xlu1 %v12794_v10, %s12615_s30  ;;  %v12806_v12 = vcombine.high %v12794_v10, %v12794_v10  ;;  %v300_v34 = vsel %vm73_vm1, %v12794_v10, 0 }
   0xe   :  { %v1827_v15 = vld [vmem:[%s15356_s18] sm:$0xf]  ;;  %s15358_s18 = sld [smem:[#allocation29_spill]] }
   0xf   :  { %129 = vrot.lane.b32.xlu0 %v12802_v11, %s12615_s30  ;;  %v11138_v23 = vld [vmem:[%s15357_s0 + $0x2] sm:$0x3]  ;;  %v95_v38 = vld [vmem:[%s15357_s0] sm:$0x3]  ;;  %v11152_v53 = vld [vmem:[%s15357_s0 + $0x4] sm:$0x3] }
  0x10   :  { %v11160_v5 = vld [vmem:[%s15357_s0 + $0x6] sm:$0x3] }
  0x11   :  { %133 = vrot.lane.b32.xlu1 %v12806_v12, %s12615_s30 }
  0x13   :  { %135 = vrot.lane.b32.xlu0 %v12811_v13, %s12615_s30 }
  0x15   :  { %137 = vrot.lane.b32.xlu1 %v12819_v14, %s12615_s30 }
  0x17   :  { %465 = vrot.lane.b32.xlu0 %v12791_v9, %s12616_s23 }
  0x19   :  { %467 = vrot.lane.b32.xlu1 %v12802_v11, %s12616_s23 }
  0x1b   :  { %469 = vrot.lane.b32.xlu0 %v12794_v10, %s12616_s23 }
  0x1d   :  { %471 = vrot.lane.b32.xlu1 %v12806_v12, %s12616_s23 }
  0x1f   :  { %473 = vrot.lane.b32.xlu0 %v12811_v13, %s12616_s23 }
  0x21   :  { %475 = vrot.lane.b32.xlu1 %v12819_v14, %s12616_s23 }
  0x23   :  { %664 = vrot.lane.b32.xlu0 %v12791_v9, %s12617_s2 }
  0x25   :  { %666 = vrot.lane.b32.xlu1 %v12802_v11, %s12617_s2 }
  0x27   :  { %668 = vrot.lane.b32.xlu0 %v12794_v10, %s12617_s2 }
  0x29   :  { %670 = vrot.lane.b32.xlu1 %v12806_v12, %s12617_s2 }
  0x2b   :  { %672 = vrot.lane.b32.xlu0 %v12811_v13, %s12617_s2 }
  0x2d   :  { %674 = vrot.lane.b32.xlu1 %v12819_v14, %s12617_s2 }
  0x2f   :  { %863 = vrot.lane.b32.xlu0 %v12791_v9, %s12618_s5 }
  0x31   :  { %865 = vrot.lane.b32.xlu1 %v12802_v11, %s12618_s5 }
  0x33   :  { %867 = vrot.lane.b32.xlu0 %v12794_v10, %s12618_s5 }
  0x35   :  { %869 = vrot.lane.b32.xlu1 %v12806_v12, %s12618_s5 }
  0x37   :  { %871 = vrot.lane.b32.xlu0 %v12811_v13, %s12618_s5 }
  0x39   :  { %873 = vrot.lane.b32.xlu1 %v12819_v14, %s12618_s5 }
  0x3b   :  { %1062 = vrot.lane.b32.xlu0 %v12791_v9, %s12619_s24 }
  0x3d   :  { %1064 = vrot.lane.b32.xlu1 %v12802_v11, %s12619_s24 }
  0x3f   :  { %1066 = vrot.lane.b32.xlu0 %v12794_v10, %s12619_s24 }
  0x41   :  { %1068 = vrot.lane.b32.xlu1 %v12806_v12, %s12619_s24 }
  0x43   :  { %1070 = vrot.lane.b32.xlu0 %v12811_v13, %s12619_s24 }
  0x45   :  { %1072 = vrot.lane.b32.xlu1 %v12819_v14, %s12619_s24 }
  0x47   :  { %1261 = vrot.lane.b32.xlu0 %v12791_v9, %s12620_s4 }
  0x49   :  { %1263 = vrot.lane.b32.xlu1 %v12802_v11, %s12620_s4 }
  0x4b   :  { %1265 = vrot.lane.b32.xlu0 %v12794_v10, %s12620_s4 }
  0x4d   :  { %1267 = vrot.lane.b32.xlu1 %v12806_v12, %s12620_s4 }
  0x4f   :  { %1269 = vrot.lane.b32.xlu0 %v12811_v13, %s12620_s4 }
  0x51   :  { %1271 = vrot.lane.b32.xlu1 %v12819_v14, %s12620_s4 }
  0x53   :  { %1460 = vrot.lane.b32.xlu0 %v12791_v9, %s12621_s25 }
  0x55   :  { %1462 = vrot.lane.b32.xlu1 %v12802_v11, %s12621_s25 }
  0x57   :  { %1464 = vrot.lane.b32.xlu0 %v12794_v10, %s12621_s25 }
  0x59   :  { %1466 = vrot.lane.b32.xlu1 %v12806_v12, %s12621_s25 }
  0x5b   :  { %1468 = vrot.lane.b32.xlu0 %v12811_v13, %s12621_s25 }
  0x5d   :  { %1470 = vrot.lane.b32.xlu1 %v12819_v14, %s12621_s25 }
  0x5f   :  { %1659 = vrot.lane.b32.xlu0 %v12791_v9, %s12622_s26 }
  0x61   :  { %1661 = vrot.lane.b32.xlu1 %v12802_v11, %s12622_s26 }
  0x63   :  { %1663 = vrot.lane.b32.xlu0 %v12794_v10, %s12622_s26 }
  0x65   :  { %1665 = vrot.lane.b32.xlu1 %v12806_v12, %s12622_s26 }
  0x67   :  { %1667 = vrot.lane.b32.xlu0 %v12811_v13, %s12622_s26 }
  0x69   :  { %1669 = vrot.lane.b32.xlu1 %v12819_v14, %s12622_s26 }
  0x6b   :  { %1830 = vperm.xlu0 %12123, %v1827_v15  }
  0x7d   :  { %v128_v16 = vpop.permute.xlu0 %127 }
  0x7f   :  { %v132_v17 = vpop.permute.xlu1 %131 }
  0x81   :  { %v130_v18 = vpop.permute.xlu0 %129 }
  0x82   :  { %v141_v20 = vsel %vm139_vm0, %v130_v18, %v132_v17  ;;  %v140_v21 = vsel %vm139_vm0, %v128_v16, %v130_v18 }
  0x83   :  { %v134_v19 = vpop.permute.xlu1 %133  ;;  %11140 = vmatprep.subr.msk.bf16.mxu0 %vm73_vm1, %v141_v20  ;;  %v150_v22 = vsel %vm73_vm1, %v140_v21, 0 }
  0x84   :  { %168 = vmatpush1.bf16.msra.mxu0 %v150_v22  ;;  %v142_v24 = vsel %vm139_vm0, %v132_v17, %v134_v19  ;;  %v11168_v22 = vld [vmem:[%s15357_s0 + $0x8] sm:$0x3] }
  0x85   :  { %v136_v25 = vpop.permute.xlu0 %135  ;;  %v156_v29 = vsel %vm73_vm1, %v142_v24, 0 }
  0x86   :  { %v143_v28 = vsel %vm139_vm0, %v134_v19, %v136_v25 }
  0x87   :  { %v138_v26 = vpop.permute.xlu1 %137  ;;  %11141 = vmatmul.mubr.msk.bf16.vlgmr.msra.gmra.mrb[0].mxu0 %vm145_vm2, %v11138_v23  ;;  %11142 = vmatprep.subr.msk.bf16.mxu1 %vm73_vm1, %v143_v28 }
  0x88   :  { %v144_v27 = vsel %vm139_vm0, %v136_v25, %v138_v26  ;;  %11144 = vmatprep.subr.msk.bf16.mxu0 %vm73_vm1, %v138_v26  ;;  %209 = vmatpush1.bf16.msra.mxu1 %v156_v29 }
  0x89   :  { %v162_v30 = vsel %vm73_vm1, %v144_v27, 0  ;;  %281 = vmatprep.mubr.bf16.mxu0 %v15328_v7  ;;  %11146 = vmatprep.subr.msk.bf16.mxu1 %vm73_vm1, %v12802_v11  ;;  %v466_v32 = vpop.permute.xlu0 %465 }
  0x8a   :  { %250 = vmatpush1.bf16.msra.mxu0 %v162_v30 }
  0x8b   :  { %v468_v33 = vpop.permute.xlu1 %467  ;;  %11148 = vmatprep.subr.msk.bf16.mxu0 %vm73_vm1, %v12806_v12  ;;  %11143 = vmatmul.mubr.msk.bf16.vlgmr.msra.gmra.mrb[0].mxu1 %vm145_vm2, %v11138_v23 }
  0x8c   :  { %312 = vmatpush1.bf16.msra.mxu1 %v294_v31  ;;  %343 = vmatprep.mubr.bf16.mxu1 %v15328_v7  ;;  %v478_v42 = vsel %vm15327_vm3, %v466_v32, %v468_v33 }
  0x8d   :  { %v470_v35 = vpop.permute.xlu0 %469  ;;  %11150 = vmatprep.subr.msk.bf16.mxu1 %vm73_vm1, %v12819_v14  ;;  %v487_v44 = vsel %vm73_vm1, %v478_v42, 0 }
  0x8e   :  { %v479_v37 = vsel %vm15327_vm3, %v468_v33, %v470_v35 }
  0x8f   :  { %v472_v36 = vpop.permute.xlu1 %471  ;;  %11145 = vmatmul.mubr.msk.bf16.vlgmr.msra.gmra.mrb[4].mxu0 %vm145_vm2, %v11138_v23 }
  0x90   :  { %353 = vmatpush1.bf16.msra.mxu0 %v300_v34  ;;  %384 = vmatprep.mubr.bf16.mxu0 %v15328_v7  ;;  %v480_v47 = vsel %vm15327_vm3, %v470_v35, %v472_v36 }
  0x91   :  { %11154 = vmatprep.subr.msk.bf16.mxu0 %vm73_vm1, %v479_v37  ;;  %v474_v40 = vpop.permute.xlu0 %473  ;;  %v493_v48 = vsel %vm73_vm1, %v480_v47, 0  ;;  %v11176_v37 = vld [vmem:[%s15357_s0 + $0xa] sm:$0x3] }
  0x92   :  { %v481_v43 = vsel %vm15327_vm3, %v472_v36, %v474_v40 }
  0x93   :  { %v476_v41 = vpop.permute.xlu1 %475  ;;  %11147 = vmatmul.mubr.msk.bf16.vlgmr.msra.gmra.mrb[4].mxu1 %vm145_vm2, %v95_v38 }
  0x94   :  { %394 = vmatpush1.bf16.msra.mxu1 %v306_v39  ;;  %425 = vmatprep.mubr.bf16.mxu1 %v15328_v7  ;;  %v482_v51 = vsel %vm15327_vm3, %v474_v40, %v476_v41 }
  0x95   :  { %11156 = vmatprep.subr.msk.bf16.mxu1 %vm73_vm1, %v481_v43  ;;  %v665_v45 = vpop.permute.xlu0 %664  ;;  %v499_v54 = vsel %vm73_vm1, %v482_v51, 0 }
  0x97   :  { %v667_v46 = vpop.permute.xlu1 %666  ;;  %11149 = vmatmul.mubr.msk.bf16.vlgmr.msra.gmra.mrb[8].mxu0 %vm145_vm2, %v95_v38 }
  0x98   :  { %505 = vmatpush1.bf16.msra.mxu0 %v487_v44  ;;  %536 = vmatprep.mubr.bf16.mxu0 %v15328_v7  ;;  %v677_v57 = vsel %vm15326_vm4, %v665_v45, %v667_v46 }
  0x99   :  { %11158 = vmatprep.subr.msk.bf16.mxu0 %vm73_vm1, %v476_v41  ;;  %v669_v49 = vpop.permute.xlu0 %668  ;;  %v686_v59 = vsel %vm73_vm1, %v677_v57, 0 }
  0x9a   :  { %v678_v52 = vsel %vm15326_vm4, %v667_v46, %v669_v49 }
  0x9b   :  { %v671_v50 = vpop.permute.xlu1 %670  ;;  %11151 = vmatmul.mubr.msk.bf16.vlgmr.msra.gmra.mrb[8].mxu1 %vm145_vm2, %v95_v38 }
  0x9c   :  { %546 = vmatpush1.bf16.msra.mxu1 %v493_v48  ;;  %577 = vmatprep.mubr.bf16.mxu1 %v15328_v7  ;;  %v679_v62 = vsel %vm15326_vm4, %v669_v49, %v671_v50 }
  0x9d   :  { %11162 = vmatprep.subr.msk.bf16.mxu1 %vm73_vm1, %v678_v52  ;;  %v673_v55 = vpop.permute.xlu0 %672  ;;  %v692_v63 = vsel %vm73_vm1, %v679_v62, 0  ;;  %v11184_v52 = vld [vmem:[%s15357_s0 + $0xc] sm:$0x3] }
  0x9e   :  { %v680_v58 = vsel %vm15326_vm4, %v671_v50, %v673_v55 }
  0x9f   :  { %v675_v56 = vpop.permute.xlu1 %674  ;;  %11155 = vmatmul.mubr.msk.bf16.vlgmr.msra.gmra.mrb[12].mxu0 %vm145_vm2, %v11152_v53 }
  0xa0   :  { %587 = vmatpush1.bf16.msra.mxu0 %v499_v54  ;;  %618 = vmatprep.mubr.bf16.mxu0 %v15328_v7  ;;  %v681_v2 = vsel %vm15326_vm4, %v673_v55, %v675_v56 }
  0xa1   :  { %11164 = vmatprep.subr.msk.bf16.mxu0 %vm73_vm1, %v680_v58  ;;  %v864_v60 = vpop.permute.xlu0 %863  ;;  %v698_v6 = vsel %vm73_vm1, %v681_v2, 0 }
  0xa3   :  { %v866_v61 = vpop.permute.xlu1 %865  ;;  %11157 = vmatmul.mubr.msk.bf16.vlgmr.msra.gmra.mrb[12].mxu1 %vm145_vm2, %v11152_v53 }
  0xa4   :  { %704 = vmatpush1.bf16.msra.mxu1 %v686_v59  ;;  %735 = vmatprep.mubr.bf16.mxu1 %v15328_v7  ;;  %v876_v11 = vsel %vm15325_vm5, %v864_v60, %v866_v61 }
  0xa5   :  { %11166 = vmatprep.subr.msk.bf16.mxu1 %vm73_vm1, %v675_v56  ;;  %v868_v0 = vpop.permute.xlu0 %867  ;;  %v885_v13 = vsel %vm73_vm1, %v876_v11, 0 }
  0xa6   :  { %v877_v3 = vsel %vm15325_vm5, %v866_v61, %v868_v0 }
  0xa7   :  { %v870_v1 = vpop.permute.xlu1 %869  ;;  %11159 = vmatmul.mubr.msk.bf16.vlgmr.msra.gmra.mrb[16].mxu0 %vm145_vm2, %v11152_v53 }
  0xa8   :  { %745 = vmatpush1.bf16.msra.mxu0 %v692_v63  ;;  %776 = vmatprep.mubr.bf16.mxu0 %v15328_v7  ;;  %v878_v16 = vsel %vm15325_vm5, %v868_v0, %v870_v1 }
  0xa9   :  { %11170 = vmatprep.subr.msk.bf16.mxu0 %vm73_vm1, %v877_v3  ;;  %v872_v9 = vpop.permute.xlu0 %871  ;;  %v891_v17 = vsel %vm73_vm1, %v878_v16, 0  ;;  %v11192_v3 = vld [vmem:[%s15357_s0 + $0xe] sm:$0x3]  ;;  %v11200_v16 = vld [vmem:[%s15357_s0 + $0x10] sm:$0x3]  ;;  %s12635_s0 = smov 65  }
  0xaa   :  { %v879_v12 = vsel %vm15325_vm5, %v870_v1, %v872_v9 }
  0xab   :  { %v874_v10 = vpop.permute.xlu1 %873  ;;  %11163 = vmatmul.mubr.msk.bf16.vlgmr.msra.gmra.mrb[16].mxu1 %vm145_vm2, %v11160_v5 }
  0xac   :  { %786 = vmatpush1.bf16.msra.mxu1 %v698_v6  ;;  %817 = vmatprep.mubr.bf16.mxu1 %v15328_v7  ;;  %v880_v20 = vsel %vm15325_vm5, %v872_v9, %v874_v10 }
  0xad   :  { %11172 = vmatprep.subr.msk.bf16.mxu1 %vm73_vm1, %v879_v12  ;;  %v1063_v14 = vpop.permute.xlu0 %1062  ;;  %v897_v23 = vsel %vm73_vm1, %v880_v20, 0 }
  0xaf   :  { %v1065_v15 = vpop.permute.xlu1 %1064  ;;  %11165 = vmatmul.mubr.msk.bf16.vlgmr.msra.gmra.mrb[20].mxu0 %vm145_vm2, %v11160_v5 }
  0xb0   :  { %903 = vmatpush1.bf16.msra.mxu0 %v885_v13  ;;  %934 = vmatprep.mubr.bf16.mxu0 %v15328_v7  ;;  %v1075_v26 = vsel %vm15324_vm6, %v1063_v14, %v1065_v15 }
  0xb1   :  { %11174 = vmatprep.subr.msk.bf16.mxu0 %vm73_vm1, %v874_v10  ;;  %v1067_v18 = vpop.permute.xlu0 %1066  ;;  %v1084_v28 = vsel %vm73_vm1, %v1075_v26, 0 }
  0xb2   :  { %v1076_v21 = vsel %vm15324_vm6, %v1065_v15, %v1067_v18 }
  0xb3   :  { %v1069_v19 = vpop.permute.xlu1 %1068  ;;  %11167 = vmatmul.mubr.msk.bf16.vlgmr.msra.gmra.mrb[20].mxu1 %vm145_vm2, %v11160_v5 }
  0xb4   :  { %944 = vmatpush1.bf16.msra.mxu1 %v891_v17  ;;  %975 = vmatprep.mubr.bf16.mxu1 %v15328_v7  ;;  %v1077_v31 = vsel %vm15324_vm6, %v1067_v18, %v1069_v19 }
  0xb5   :  { %11178 = vmatprep.subr.msk.bf16.mxu1 %vm73_vm1, %v1076_v21  ;;  %v1071_v24 = vpop.permute.xlu0 %1070  ;;  %v1090_v32 = vsel %vm73_vm1, %v1077_v31, 0 }
  0xb6   :  { %v1078_v27 = vsel %vm15324_vm6, %v1069_v19, %v1071_v24 }
  0xb7   :  { %v1073_v25 = vpop.permute.xlu1 %1072  ;;  %11171 = vmatmul.mubr.msk.bf16.vlgmr.msra.gmra.mrb[24].mxu0 %vm145_vm2, %v11168_v22 }
  0xb8   :  { %985 = vmatpush1.bf16.msra.mxu0 %v897_v23  ;;  %1016 = vmatprep.mubr.bf16.mxu0 %v15328_v7  ;;  %v1079_v35 = vsel %vm15324_vm6, %v1071_v24, %v1073_v25 }
  0xb9   :  { %11180 = vmatprep.subr.msk.bf16.mxu0 %vm73_vm1, %v1078_v27  ;;  %v1262_v29 = vpop.permute.xlu0 %1261  ;;  %v1096_v38 = vsel %vm73_vm1, %v1079_v35, 0 }
  0xbb   :  { %v1264_v30 = vpop.permute.xlu1 %1263  ;;  %11173 = vmatmul.mubr.msk.bf16.vlgmr.msra.gmra.mrb[24].mxu1 %vm145_vm2, %v11168_v22 }
  0xbc   :  { %1102 = vmatpush1.bf16.msra.mxu1 %v1084_v28  ;;  %1133 = vmatprep.mubr.bf16.mxu1 %v15328_v7  ;;  %v1274_v41 = vsel %vm15323_vm7, %v1262_v29, %v1264_v30 }
  0xbd   :  { %11182 = vmatprep.subr.msk.bf16.mxu1 %vm73_vm1, %v1073_v25  ;;  %v1266_v33 = vpop.permute.xlu0 %1265  ;;  %v1283_v43 = vsel %vm73_vm1, %v1274_v41, 0 }
  0xbe   :  { %v1275_v36 = vsel %vm15323_vm7, %v1264_v30, %v1266_v33 }
  0xbf   :  { %v1268_v34 = vpop.permute.xlu1 %1267  ;;  %11175 = vmatmul.mubr.msk.bf16.vlgmr.msra.gmra.mrb[28].mxu0 %vm145_vm2, %v11168_v22 }
  0xc0   :  { %1143 = vmatpush1.bf16.msra.mxu0 %v1090_v32  ;;  %1174 = vmatprep.mubr.bf16.mxu0 %v15328_v7  ;;  %v1276_v46 = vsel %vm15323_vm7, %v1266_v33, %v1268_v34 }
  0xc1   :  { %11186 = vmatprep.subr.msk.bf16.mxu0 %vm73_vm1, %v1275_v36  ;;  %v1270_v39 = vpop.permute.xlu0 %1269  ;;  %v1289_v47 = vsel %vm73_vm1, %v1276_v46, 0 }
  0xc2   :  { %v1277_v42 = vsel %vm15323_vm7, %v1268_v34, %v1270_v39 }
  0xc3   :  { %v1272_v40 = vpop.permute.xlu1 %1271  ;;  %11179 = vmatmul.mubr.msk.bf16.vlgmr.msra.gmra.mrb[28].mxu1 %vm145_vm2, %v11176_v37 }
  0xc4   :  { %1184 = vmatpush1.bf16.msra.mxu1 %v1096_v38  ;;  %1215 = vmatprep.mubr.bf16.mxu1 %v15328_v7  ;;  %v1278_v50 = vsel %vm15323_vm7, %v1270_v39, %v1272_v40  ;;  %vm1934_vm7 = vcmask 216066  }
  0xc5   :  { %11188 = vmatprep.subr.msk.bf16.mxu1 %vm73_vm1, %v1277_v42  ;;  %v1461_v44 = vpop.permute.xlu0 %1460  ;;  %v1295_v53 = vsel %vm73_vm1, %v1278_v50, 0  ;;  %vm1935_vm6 = vmor %vm1934_vm7, %vm73_vm1 }
  0xc7   :  { %v1463_v45 = vpop.permute.xlu1 %1462  ;;  %11181 = vmatmul.mubr.msk.bf16.vlgmr.msra.gmra.mrb[32].mxu0 %vm145_vm2, %v11176_v37 }
  0xc8   :  { %1301 = vmatpush1.bf16.msra.mxu0 %v1283_v43  ;;  %1332 = vmatprep.mubr.bf16.mxu0 %v15328_v7  ;;  %v1473_v56 = vsel %vm15322_vm8, %v1461_v44, %v1463_v45 }
  0xc9   :  { %11190 = vmatprep.subr.msk.bf16.mxu0 %vm73_vm1, %v1272_v40  ;;  %v1465_v48 = vpop.permute.xlu0 %1464  ;;  %v1482_v58 = vsel %vm73_vm1, %v1473_v56, 0 }
  0xca   :  { %v1474_v51 = vsel %vm15322_vm8, %v1463_v45, %v1465_v48 }
  0xcb   :  { %v1467_v49 = vpop.permute.xlu1 %1466  ;;  %11183 = vmatmul.mubr.msk.bf16.vlgmr.msra.gmra.mrb[32].mxu1 %vm145_vm2, %v11176_v37 }
  0xcc   :  { %1342 = vmatpush1.bf16.msra.mxu1 %v1289_v47  ;;  %1373 = vmatprep.mubr.bf16.mxu1 %v15328_v7  ;;  %v1475_v61 = vsel %vm15322_vm8, %v1465_v48, %v1467_v49 }
  0xcd   :  { %11194 = vmatprep.subr.msk.bf16.mxu1 %vm73_vm1, %v1474_v51  ;;  %v1469_v54 = vpop.permute.xlu0 %1468  ;;  %v1488_v62 = vsel %vm73_vm1, %v1475_v61, 0 }
  0xce   :  { %v1476_v57 = vsel %vm15322_vm8, %v1467_v49, %v1469_v54 }
  0xcf   :  { %v1471_v55 = vpop.permute.xlu1 %1470  ;;  %11187 = vmatmul.mubr.msk.bf16.vlgmr.msra.gmra.mrb[36].mxu0 %vm145_vm2, %v11184_v52 }
  0xd0   :  { %1383 = vmatpush1.bf16.msra.mxu0 %v1295_v53  ;;  %1414 = vmatprep.mubr.bf16.mxu0 %v15328_v7  ;;  %v1477_v0 = vsel %vm15322_vm8, %v1469_v54, %v1471_v55  ;;  %vm1932_vm8 = vmor %vm1931_vm11, %vm1930_vm10 }
  0xd1   :  { %11196 = vmatprep.subr.msk.bf16.mxu0 %vm73_vm1, %v1476_v57  ;;  %v1660_v59 = vpop.permute.xlu0 %1659  ;;  %v1494_v5 = vsel %vm73_vm1, %v1477_v0, 0  ;;  %vm15367_vm10 = vmmov %vm15364_vm13 }
  0xd2   :  { %vm15369_vm11 = vmmov %vm15367_vm10 }
  0xd3   :  { %v1662_v60 = vpop.permute.xlu1 %1661  ;;  %11189 = vmatmul.mubr.msk.bf16.vlgmr.msra.gmra.mrb[36].mxu1 %vm145_vm2, %v11184_v52 }
  0xd4   :  { %1500 = vmatpush1.bf16.msra.mxu1 %v1482_v58  ;;  %1531 = vmatprep.mubr.bf16.mxu1 %v15328_v7  ;;  %v1672_v9 = vsel %vm15321_vm9, %v1660_v59, %v1662_v60 }
  0xd5   :  { %11198 = vmatprep.subr.msk.bf16.mxu1 %vm73_vm1, %v1471_v55  ;;  %v1664_v63 = vpop.permute.xlu0 %1663  ;;  %v1681_v11 = vsel %vm73_vm1, %v1672_v9, 0 }
  0xd6   :  { %v1673_v1 = vsel %vm15321_vm9, %v1662_v60, %v1664_v63 }
  0xd7   :  { %11191 = vmatmul.mubr.msk.bf16.vlgmr.msra.gmra.mrb[40].mxu0 %vm145_vm2, %v11184_v52  ;;  %v1666_v2 = vpop.permute.xlu1 %1665 }
  0xd8   :  { %1541 = vmatpush1.bf16.msra.mxu0 %v1488_v62  ;;  %1572 = vmatprep.mubr.bf16.mxu0 %v15328_v7  ;;  %v1674_v12 = vsel %vm15321_vm9, %v1664_v63, %v1666_v2 }
  0xd9   :  { %11202 = vmatprep.subr.msk.bf16.mxu0 %vm73_vm1, %v1673_v1  ;;  %v1668_v6 = vpop.permute.xlu0 %1667  ;;  %v1687_v14 = vsel %vm73_vm1, %v1674_v12, 0 }
  0xda   :  { %v1675_v10 = vsel %vm15321_vm9, %v1666_v2, %v1668_v6 }
  0xdb   :  { %11195 = vmatmul.mubr.msk.bf16.vlgmr.msra.gmra.mrb[40].mxu1 %vm145_vm2, %v11192_v3  ;;  %v1670_v13 = vpop.permute.xlu1 %1669 }
  0xdc   :  { %1582 = vmatpush1.bf16.msra.mxu1 %v1494_v5  ;;  %1613 = vmatprep.mubr.bf16.mxu1 %v15328_v7  ;;  %v1676_v15 = vsel %vm15321_vm9, %v1668_v6, %v1670_v13  ;;  %vm1919_vm9 = vcmask 154624  }
  0xdd   :  { %11204 = vmatprep.subr.msk.bf16.mxu1 %vm73_vm1, %v1675_v10  ;;  %v1693_v17 = vsel %vm73_vm1, %v1676_v15, 0 }
  0xdf   :  { %11197 = vmatmul.mubr.msk.bf16.vlgmr.msra.gmra.mrb[44].mxu0 %vm145_vm2, %v11192_v3 }
  0xe0   :  { %1699 = vmatpush1.bf16.msra.mxu0 %v1681_v11  ;;  %1730 = vmatprep.mubr.bf16.mxu0 %v15328_v7 }
  0xe1   :  { %11206 = vmatprep.subr.msk.bf16.mxu0 %vm73_vm1, %v1670_v13 }
  0xe3   :  { %11199 = vmatmul.mubr.msk.bf16.vlgmr.msra.gmra.mrb[44].mxu1 %vm145_vm2, %v11192_v3 }
  0xe4   :  { %1740 = vmatpush1.bf16.msra.mxu1 %v1687_v14  ;;  %1771 = vmatprep.mubr.bf16.mxu1 %v15328_v7 }
  0xe7   :  { %11203 = vmatmul.mubr.msk.bf16.vlgmr.msra.gmra.mrb[48].mxu0 %vm145_vm2, %v11200_v16 }
  0xe8   :  { %1781 = vmatpush1.bf16.msra.mxu0 %v1693_v17  ;;  %1812 = vmatprep.mubr.bf16.mxu0 %v15328_v7 }
  0xeb   :  { %11205 = vmatmul.mubr.msk.bf16.vlgmr.msra.gmra.mrb[48].mxu1 %vm145_vm2, %v11200_v16 }
  0xec   :  { %2039 = vmatprep.mubr.bf16.mxu1 %v15328_v7 }
  0xef   :  { %11207 = vmatmul.mubr.msk.bf16.vlgmr.msra.gmra.mrb[52].mxu0 %vm145_vm2, %v11200_v16 }
  0xf0   :  { %2080 = vmatprep.mubr.bf16.mxu0 %v15328_v7 }
 0x15a   :  { %v201_v18 = vpop.f32.mrb[0].mxu0 }
 0x15b   :  { %v203_v19 = vpop.f32.mrb[1].mxu0 }
 0x15c   :  { %v205_v20 = vpop.f32.mrb[2].mxu0 }
 0x15d   :  { %v206_v21 = vpop.f32.mrb[3].mxu0 }
 0x15e   :  { %v242_v22 = vpop.f32.mrb[0].mxu1 }
 0x15f   :  { %v244_v23 = vpop.f32.mrb[1].mxu1 }
 0x160   :  { %v246_v24 = vpop.f32.mrb[2].mxu1 }
 0x161   :  { %v247_v25 = vpop.f32.mrb[3].mxu1 }
 0x162   :  { %v283_v26 = vpop.f32.mrb[4].mxu0 }
 0x163   :  { %v285_v27 = vpop.f32.mrb[5].mxu0 }
 0x164   :  { %v287_v28 = vpop.f32.mrb[6].mxu0 }
 0x165   :  { %v288_v29 = vpop.f32.mrb[7].mxu0 }
 0x166   :  { %v345_v30 = vpop.f32.mrb[4].mxu1 }
 0x167   :  { %v346_v31 = vadd.f32 %v345_v30, %v201_v18  ;;  %v347_v32 = vpop.f32.mrb[5].mxu1 }
 0x168   :  { %v348_v33 = vadd.f32 %v347_v32, %v203_v19  ;;  %v349_v34 = vpop.f32.mrb[6].mxu1 }
 0x169   :  { %v350_v35 = vpop.f32.mrb[7].mxu1 }
 0x16a   :  { %v386_v36 = vpop.f32.mrb[8].mxu0 }
 0x16b   :  { %v387_v37 = vadd.f32 %v386_v36, %v242_v22  ;;  %v388_v38 = vpop.f32.mrb[9].mxu0 }
 0x16c   :  { %v389_v39 = vadd.f32 %v388_v38, %v244_v23  ;;  %v390_v40 = vpop.f32.mrb[10].mxu0 }
 0x16d   :  { %v391_v41 = vpop.f32.mrb[11].mxu0 }
 0x16e   :  { %v427_v42 = vpop.f32.mrb[8].mxu1 }
 0x16f   :  { %v428_v43 = vadd.f32 %v427_v42, %v283_v26  ;;  %v429_v44 = vpop.f32.mrb[9].mxu1 }
 0x170   :  { %v430_v45 = vadd.f32 %v429_v44, %v285_v27  ;;  %v431_v46 = vpop.f32.mrb[10].mxu1 }
 0x171   :  { %v432_v47 = vpop.f32.mrb[11].mxu1 }
 0x172   :  { %v538_v48 = vpop.f32.mrb[12].mxu0 }
 0x173   :  { %v627_v49 = vadd.f32 %v538_v48, %v346_v31  ;;  %v540_v50 = vpop.f32.mrb[13].mxu0 }
 0x174   :  { %v628_v51 = vadd.f32 %v540_v50, %v348_v33  ;;  %v542_v52 = vpop.f32.mrb[14].mxu0 }
 0x175   :  { %v543_v53 = vpop.f32.mrb[15].mxu0 }
 0x176   :  { %v579_v54 = vpop.f32.mrb[12].mxu1 }
 0x177   :  { %v629_v55 = vadd.f32 %v579_v54, %v387_v37  ;;  %v581_v56 = vpop.f32.mrb[13].mxu1 }
 0x178   :  { %v630_v57 = vadd.f32 %v581_v56, %v389_v39  ;;  %v583_v58 = vpop.f32.mrb[14].mxu1 }
 0x179   :  { %v584_v59 = vpop.f32.mrb[15].mxu1 }
 0x17a   :  { %v620_v60 = vpop.f32.mrb[16].mxu0 }
 0x17b   :  { %v631_v61 = vadd.f32 %v620_v60, %v428_v43  ;;  %v622_v62 = vpop.f32.mrb[17].mxu0 }
 0x17c   :  { %v632_v63 = vadd.f32 %v622_v62, %v430_v45  ;;  %v624_v0 = vpop.f32.mrb[18].mxu0 }
 0x17d   :  { %v625_v1 = vpop.f32.mrb[19].mxu0 }
 0x17e   :  { %v737_v2 = vpop.f32.mrb[16].mxu1 }
 0x17f   :  { %v826_v3 = vadd.f32 %v737_v2, %v627_v49  ;;  %v739_v5 = vpop.f32.mrb[17].mxu1 }
 0x180   :  { %v827_v6 = vadd.f32 %v739_v5, %v628_v51  ;;  %v741_v9 = vpop.f32.mrb[18].mxu1 }
 0x181   :  { %v742_v10 = vpop.f32.mrb[19].mxu1 }
 0x182   :  { %v778_v11 = vpop.f32.mrb[20].mxu0 }
 0x183   :  { %v828_v12 = vadd.f32 %v778_v11, %v629_v55  ;;  %v780_v13 = vpop.f32.mrb[21].mxu0 }
 0x184   :  { %v829_v14 = vadd.f32 %v780_v13, %v630_v57  ;;  %v782_v15 = vpop.f32.mrb[22].mxu0 }
 0x185   :  { %v783_v16 = vpop.f32.mrb[23].mxu0 }
 0x186   :  { %v819_v17 = vpop.f32.mrb[20].mxu1 }
 0x187   :  { %v830_v18 = vadd.f32 %v819_v17, %v631_v61  ;;  %v821_v19 = vpop.f32.mrb[21].mxu1 }
 0x188   :  { %v831_v20 = vadd.f32 %v821_v19, %v632_v63  ;;  %v823_v21 = vpop.f32.mrb[22].mxu1 }
 0x189   :  { %v824_v22 = vpop.f32.mrb[23].mxu1 }
 0x18a   :  { %v936_v23 = vpop.f32.mrb[24].mxu0 }
 0x18b   :  { %v1025_v24 = vadd.f32 %v936_v23, %v826_v3  ;;  %v938_v25 = vpop.f32.mrb[25].mxu0 }
 0x18c   :  { %v1026_v26 = vadd.f32 %v938_v25, %v827_v6  ;;  %v940_v27 = vpop.f32.mrb[26].mxu0 }
 0x18d   :  { %v941_v28 = vpop.f32.mrb[27].mxu0 }
 0x18e   :  { %v977_v29 = vpop.f32.mrb[24].mxu1 }
 0x18f   :  { %v1027_v30 = vadd.f32 %v977_v29, %v828_v12  ;;  %v979_v31 = vpop.f32.mrb[25].mxu1 }
 0x190   :  { %v1028_v32 = vadd.f32 %v979_v31, %v829_v14  ;;  %v981_v33 = vpop.f32.mrb[26].mxu1  ;;  %v1842_v31 = vsub.s32 0, %v12780_v4 }
 0x191   :  { %v982_v34 = vpop.f32.mrb[27].mxu1 }
 0x192   :  { %v1018_v35 = vpop.f32.mrb[28].mxu0  ;;  %v94_v34 = vld [vmem:[%s15358_s18] sm:$0x3f]  ;;  %s12633_s18 = smov 125  }
 0x193   :  { %v1029_v36 = vadd.f32 %v1018_v35, %v830_v18  ;;  %v1020_v37 = vpop.f32.mrb[29].mxu0  ;;  %v1846_v35 = vsub.s32 1, %v12780_v4 }
 0x194   :  { %v1030_v38 = vadd.f32 %v1020_v37, %v831_v20  ;;  %v1022_v39 = vpop.f32.mrb[30].mxu0 }
 0x195   :  { %v1023_v40 = vpop.f32.mrb[31].mxu0 }
 0x196   :  { %v1135_v41 = vpop.f32.mrb[28].mxu1 }
 0x197   :  { %v1224_v42 = vadd.f32 %v1135_v41, %v1025_v24  ;;  %v1137_v43 = vpop.f32.mrb[29].mxu1  ;;  %v1850_v41 = vsub.s32 2, %v12780_v4 }
 0x198   :  { %v1225_v44 = vadd.f32 %v1137_v43, %v1026_v26  ;;  %v1139_v45 = vpop.f32.mrb[30].mxu1 }
 0x199   :  { %v1140_v46 = vpop.f32.mrb[31].mxu1  ;;  %v1854_v45 = vsub.s32 3, %v12780_v4 }
 0x19a   :  { %v1176_v47 = vpop.f32.mrb[32].mxu0  ;;  %v13106_v46 = vrot.slane %v94_v34, %v1846_v35 }
 0x19b   :  { %v1226_v48 = vadd.f32 %v1176_v47, %v1027_v30  ;;  %v1178_v49 = vpop.f32.mrb[33].mxu0 }
 0x19c   :  { %v1227_v50 = vadd.f32 %v1178_v49, %v1028_v32  ;;  %v1180_v51 = vpop.f32.mrb[34].mxu0 }
 0x19d   :  { %v1181_v52 = vpop.f32.mrb[35].mxu0 }
 0x19e   :  { %v1217_v53 = vpop.f32.mrb[32].mxu1  ;;  %v13110_v52 = vrot.slane %v94_v34, %v1850_v41 }
 0x19f   :  { %v1228_v54 = vadd.f32 %v1217_v53, %v1029_v36  ;;  %v1219_v55 = vpop.f32.mrb[33].mxu1 }
 0x1a0   :  { %v1229_v56 = vadd.f32 %v1219_v55, %v1030_v38  ;;  %v1221_v57 = vpop.f32.mrb[34].mxu1  ;;  %v1831_v38 = vpop.permute.xlu0 %1830 }
 0x1a1   :  { %v1222_v58 = vpop.f32.mrb[35].mxu1  ;;  %v13116_v57 = vrot.slane %v94_v34, %v1854_v45 }
 0x1a2   :  { %v1334_v59 = vpop.f32.mrb[36].mxu0 }
 0x1a3   :  { %v1423_v60 = vadd.f32 %v1334_v59, %v1224_v42  ;;  %v1336_v61 = vpop.f32.mrb[37].mxu0  ;;  %v13101_v42 = vrot.slane %v94_v34, %v1842_v31  ;;  %v1862_v59 = vsub.s32 5, %v12780_v4 }
 0x1a4   :  { %v1424_v62 = vadd.f32 %v1336_v61, %v1225_v44  ;;  %v1338_v63 = vpop.f32.mrb[38].mxu0 }
 0x1a5   :  { %v1339_v0 = vpop.f32.mrb[39].mxu0 }
 0x1a6   :  { %v1375_v1 = vpop.f32.mrb[36].mxu1 }
 0x1a7   :  { %v1425_v2 = vadd.f32 %v1375_v1, %v1226_v48  ;;  %v1377_v3 = vpop.f32.mrb[37].mxu1 }
 0x1a8   :  { %v1426_v5 = vadd.f32 %v1377_v3, %v1227_v50  ;;  %v1379_v6 = vpop.f32.mrb[38].mxu1 }
 0x1a9   :  { %v1380_v9 = vpop.f32.mrb[39].mxu1 }
 0x1aa   :  { %v1416_v10 = vpop.f32.mrb[40].mxu0 }
 0x1ab   :  { %v1427_v11 = vadd.f32 %v1416_v10, %v1228_v54  ;;  %v1418_v12 = vpop.f32.mrb[41].mxu0  ;;  %v1858_v54 = vsub.s32 4, %v12780_v4 }
 0x1ac   :  { %v1428_v13 = vadd.f32 %v1418_v12, %v1229_v56  ;;  %v1420_v14 = vpop.f32.mrb[42].mxu0 }
 0x1ad   :  { %v1421_v15 = vpop.f32.mrb[43].mxu0 }
 0x1ae   :  { %v1533_v16 = vpop.f32.mrb[40].mxu1 }
 0x1af   :  { %v1622_v17 = vadd.f32 %v1533_v16, %v1423_v60  ;;  %v1535_v18 = vpop.f32.mrb[41].mxu1 }
 0x1b0   :  { %v1623_v19 = vadd.f32 %v1535_v18, %v1424_v62  ;;  %v1537_v20 = vpop.f32.mrb[42].mxu1 }
 0x1b1   :  { %v1538_v21 = vpop.f32.mrb[43].mxu1 }
 0x1b2   :  { %v1574_v22 = vpop.f32.mrb[44].mxu0 }
 0x1b3   :  { %v1624_v23 = vadd.f32 %v1574_v22, %v1425_v2  ;;  %v1576_v24 = vpop.f32.mrb[45].mxu0 }
 0x1b4   :  { %v1625_v25 = vadd.f32 %v1576_v24, %v1426_v5  ;;  %v1578_v26 = vpop.f32.mrb[46].mxu0  ;;  %v13123_v5 = vrot.slane %v94_v34, %v1858_v54 }
 0x1b5   :  { %v1579_v27 = vpop.f32.mrb[47].mxu0 }
 0x1b6   :  { %v1615_v28 = vpop.f32.mrb[44].mxu1 }
 0x1b7   :  { %v1626_v29 = vadd.f32 %v1615_v28, %v1427_v11  ;;  %v1617_v30 = vpop.f32.mrb[45].mxu1  ;;  %v13129_v11 = vrot.slane %v94_v34, %v1862_v59 }
 0x1b8   :  { %v1627_v32 = vadd.f32 %v1617_v30, %v1428_v13  ;;  %v1619_v33 = vpop.f32.mrb[46].mxu1 }
 0x1b9   :  { %v1620_v36 = vpop.f32.mrb[47].mxu1 }
 0x1ba   :  { %v1732_v37 = vpop.f32.mrb[48].mxu0 }
 0x1bb   :  { %v1821_v39 = vadd.f32 %v1732_v37, %v1622_v17  ;;  %v1734_v40 = vpop.f32.mrb[49].mxu0 }
 0x1bc   :  { %v1822_v43 = vadd.f32 %v1734_v40, %v1623_v19  ;;  %v1736_v44 = vpop.f32.mrb[50].mxu0 }
 0x1bd   :  { %v1737_v47 = vpop.f32.mrb[51].mxu0  ;;  %v1833_v48 = vadd.f32 %v1831_v38, %v1821_v39 }
 0x1be   :  { %v1773_v49 = vpop.f32.mrb[48].mxu1  ;;  %v1834_v50 = vadd.f32 %v1831_v38, %v1822_v43  ;;  %v3661_v43 = vld [vmem:[%s15355_s29] sm:$0xff] }
 0x1bf   :  { %v1823_v51 = vadd.f32 %v1773_v49, %v1624_v23  ;;  %v1775_v53 = vpop.f32.mrb[49].mxu1  ;;  %v1870_v55 = vmul.f32 %v13101_v42, %v1833_v48  ;;  %v13261_v44 = vrot.slane %v3661_v43, %v12786_v8  ;;  %v3667_v47 = vcombine.high %v3661_v43, %v3661_v43 }
 0x1c0   :  { %v1824_v56 = vadd.f32 %v1775_v53, %v1625_v25  ;;  %v1777_v58 = vpop.f32.mrb[50].mxu1  ;;  %v1871_v60 = vmul.f32 %v13106_v46, %v1834_v50 }
 0x1c1   :  { %v1835_v61 = vadd.f32 %v1831_v38, %v1823_v51  ;;  %v1778_v62 = vpop.f32.mrb[51].mxu1  ;;  %v13267_v48 = vcombine.high %v13261_v44, %v13261_v44  ;;  %v13272_v49 = vrot.slane %v3667_v47, %v12786_v8  ;;  %v13285_v51 = vld.sshfl [vmem:[%s15355_s29 + $0x8] sm:$0x33 pattern:$0x76325410]  ;;  %s12630_s29 = smov 63  }
 0x1c2   :  { %v1836_v63 = vadd.f32 %v1831_v38, %v1824_v56  ;;  %v1814_v0 = vpop.f32.mrb[52].mxu0  ;;  %v11208_v1 = vpack.c.bf16 %v1871_v60, %v1870_v55  ;;  %v13289_v53 = vcombine.high %v13285_v51, %v13285_v51 }
 0x1c3   :  { %v1872_v2 = vmul.f32 %v13110_v52, %v1835_v61  ;;  %v1825_v3 = vadd.f32 %v1814_v0, %v1626_v29  ;;  %v1816_v6 = vpop.f32.mrb[53].mxu0  ;;  %v13278_v50 = vcombine.high %v13272_v49, %v13272_v49 }
 0x1c4   :  { %v1873_v9 = vmul.f32 %v13116_v57, %v1836_v63  ;;  %v1826_v10 = vadd.f32 %v1816_v6, %v1627_v32  ;;  %v1818_v12 = vpop.f32.mrb[54].mxu0  ;;  %v1896_v19 = vrot.slane %v11208_v1, %v12786_v8  ;;  %v11211_v63 = vld [vmem:[%s15359_s3 + $0x1] sm:$0x1] }
 0x1c5   :  { %v1837_v13 = vadd.f32 %v1831_v38, %v1825_v3  ;;  %v1819_v14 = vpop.f32.mrb[55].mxu0 }
 0x1c6   :  { %v11209_v15 = vpack.c.bf16 %v1873_v9, %v1872_v2  ;;  %v1838_v16 = vadd.f32 %v1831_v38, %v1826_v10 }
 0x1c7   :  { %v1874_v17 = vmul.f32 %v13123_v5, %v1837_v13 }
 0x1c8   :  { %v1875_v18 = vmul.f32 %v13129_v11, %v1838_v16  ;;  %v1903_v20 = vrot.slane %v11209_v15, %v12786_v8 }
 0x1ca   :  { %v1904_v21 = vcombine.low %v1896_v19, %v1903_v20  ;;  %v11210_v22 = vpack.c.bf16 %v1875_v18, %v1874_v17  ;;  %v1937_v20 = vld [vmem:[%s15359_s3] sm:$0x1] }
 0x1cc   :  { %1913 = vrot.lane.b32.xlu1 %v1904_v21, %s12623_s28  ;;  %v1912_v23 = vrot.slane %v11210_v22, %v12786_v8 }
 0x1d0   :  { %1915 = vrot.lane.b32.xlu1 %v1912_v23, %s12623_s28 }
 0x23e   :  { %v1914_v24 = vpop.permute.xlu1 %1913 }
 0x23f   :  { %v1917_v25 = vrot.slane %v1914_v24, 6 }
 0x241   :  { %v1920_v26 = vsel %vm1919_vm9, %v1917_v25, %v1914_v24 }
 0x242   :  { %1933 = vst.msk [vmem:[#allocation2] sm:$0xff] %vm1932_vm8, %v1920_v26  ;;  %v1916_v27 = vpop.permute.xlu1 %1915 }
 0x243   :  { %v1918_v28 = vrot.slane %v1916_v27, 6 }
 0x245   :  { %v1922_v29 = vsel %vm73_vm1, %v1917_v25, %v1918_v28 }
 0x246   :  { %v1923_v30 = vsel %vm1919_vm9, %v1922_v29, %v1916_v27 }
 0x247   :  { %1936 = vst.msk [vmem:[#allocation2 + $0x8] sm:$0xf] %vm1935_vm6, %v1923_v30  ;;  %vm15360_vm6 = vcmask 883712  }
 0x248   :  { %vm15361_vm7 = vmmov %vm15360_vm6 }
 0x249   :  { %v1938_v32 = vld [vmem:[#allocation2] sm:$0xff]  ;;  %vm15362_vm8 = vmmov %vm15360_vm6 }
 0x24a   :  { %v13144_v33 = vrot.slane %v1938_v32, %v12786_v8  ;;  %v1944_v34 = vcombine.high %v1938_v32, %v1938_v32  ;;  %vm15363_vm12 = vmmov %vm15360_vm6 }
 0x24b   :  { %vm15365_vm14 = vmmov %vm15360_vm6 }
 0x24c   :  { %1969 = vrot.lane.b32.xlu0 %v13144_v33, %s12615_s30  ;;  %v13150_v36 = vcombine.high %v13144_v33, %v13144_v33  ;;  %v13153_v37 = vrot.slane %v1944_v34, %v12786_v8  ;;  %v2134_v14 = vsel %vm73_vm1, %v13144_v33, 0 }
 0x24e   :  { %1971 = vrot.lane.b32.xlu1 %v13150_v36, %s12615_s30  ;;  %v13161_v38 = vcombine.high %v13153_v37, %v13153_v37  ;;  %v13163_v39 = vld.sshfl [vmem:[#allocation2 + $0x8] sm:$0x33 pattern:$0x76325410]  ;;  %v2140_v17 = vsel %vm73_vm1, %v13153_v37, 0 }
 0x24f   :  { %v13171_v40 = vcombine.high %v13163_v39, %v13163_v39  ;;  %v2146_v24 = vsel %vm73_vm1, %v13163_v39, 0 }
 0x250   :  { %1973 = vrot.lane.b32.xlu0 %v13153_v37, %s12615_s30 }
 0x252   :  { %1975 = vrot.lane.b32.xlu1 %v13161_v38, %s12615_s30 }
 0x254   :  { %1977 = vrot.lane.b32.xlu0 %v13163_v39, %s12615_s30 }
 0x256   :  { %1979 = vrot.lane.b32.xlu1 %v13171_v40, %s12615_s30 }
 0x258   :  { %2305 = vrot.lane.b32.xlu0 %v13144_v33, %s12616_s23 }
 0x25a   :  { %2307 = vrot.lane.b32.xlu1 %v13150_v36, %s12616_s23 }
 0x25c   :  { %2309 = vrot.lane.b32.xlu0 %v13153_v37, %s12616_s23 }
 0x25e   :  { %2311 = vrot.lane.b32.xlu1 %v13161_v38, %s12616_s23 }
 0x260   :  { %2313 = vrot.lane.b32.xlu0 %v13163_v39, %s12616_s23 }
 0x262   :  { %2315 = vrot.lane.b32.xlu1 %v13171_v40, %s12616_s23 }
 0x264   :  { %2503 = vrot.lane.b32.xlu0 %v13144_v33, %s12617_s2 }
 0x266   :  { %2505 = vrot.lane.b32.xlu1 %v13150_v36, %s12617_s2 }
 0x268   :  { %2507 = vrot.lane.b32.xlu0 %v13153_v37, %s12617_s2 }
 0x26a   :  { %2509 = vrot.lane.b32.xlu1 %v13161_v38, %s12617_s2 }
 0x26c   :  { %2511 = vrot.lane.b32.xlu0 %v13163_v39, %s12617_s2 }
 0x26e   :  { %2513 = vrot.lane.b32.xlu1 %v13171_v40, %s12617_s2 }
 0x270   :  { %2701 = vrot.lane.b32.xlu0 %v13144_v33, %s12618_s5 }
 0x272   :  { %2703 = vrot.lane.b32.xlu1 %v13150_v36, %s12618_s5 }
 0x274   :  { %2705 = vrot.lane.b32.xlu0 %v13153_v37, %s12618_s5 }
 0x276   :  { %2707 = vrot.lane.b32.xlu1 %v13161_v38, %s12618_s5 }
 0x278   :  { %2709 = vrot.lane.b32.xlu0 %v13163_v39, %s12618_s5 }
 0x27a   :  { %2711 = vrot.lane.b32.xlu1 %v13171_v40, %s12618_s5 }
 0x27c   :  { %2899 = vrot.lane.b32.xlu0 %v13144_v33, %s12619_s24 }
 0x27e   :  { %2901 = vrot.lane.b32.xlu1 %v13150_v36, %s12619_s24 }
 0x280   :  { %2903 = vrot.lane.b32.xlu0 %v13153_v37, %s12619_s24 }
 0x282   :  { %2905 = vrot.lane.b32.xlu1 %v13161_v38, %s12619_s24 }
 0x284   :  { %2907 = vrot.lane.b32.xlu0 %v13163_v39, %s12619_s24 }
 0x286   :  { %2909 = vrot.lane.b32.xlu1 %v13171_v40, %s12619_s24 }
 0x288   :  { %3097 = vrot.lane.b32.xlu0 %v13144_v33, %s12620_s4 }
 0x28a   :  { %3099 = vrot.lane.b32.xlu1 %v13150_v36, %s12620_s4 }
 0x28c   :  { %3101 = vrot.lane.b32.xlu0 %v13153_v37, %s12620_s4 }
 0x28e   :  { %3103 = vrot.lane.b32.xlu1 %v13161_v38, %s12620_s4 }
 0x290   :  { %3105 = vrot.lane.b32.xlu0 %v13163_v39, %s12620_s4 }
 0x292   :  { %3107 = vrot.lane.b32.xlu1 %v13171_v40, %s12620_s4 }
 0x294   :  { %3295 = vrot.lane.b32.xlu0 %v13144_v33, %s12621_s25 }
 0x296   :  { %3297 = vrot.lane.b32.xlu1 %v13150_v36, %s12621_s25 }
 0x298   :  { %3299 = vrot.lane.b32.xlu0 %v13153_v37, %s12621_s25 }
 0x29a   :  { %3301 = vrot.lane.b32.xlu1 %v13161_v38, %s12621_s25 }
 0x29c   :  { %3303 = vrot.lane.b32.xlu0 %v13163_v39, %s12621_s25 }
 0x29e   :  { %3305 = vrot.lane.b32.xlu1 %v13171_v40, %s12621_s25 }
 0x2a0   :  { %3493 = vrot.lane.b32.xlu0 %v13144_v33, %s12622_s26 }
 0x2a2   :  { %3495 = vrot.lane.b32.xlu1 %v13150_v36, %s12622_s26 }
 0x2a4   :  { %3497 = vrot.lane.b32.xlu0 %v13153_v37, %s12622_s26 }
 0x2a6   :  { %3499 = vrot.lane.b32.xlu1 %v13161_v38, %s12622_s26 }
 0x2a8   :  { %3501 = vrot.lane.b32.xlu0 %v13163_v39, %s12622_s26 }
 0x2aa   :  { %3503 = vrot.lane.b32.xlu1 %v13171_v40, %s12622_s26 }
 0x2ac   :  { %3692 = vrot.lane.b32.xlu0 %v13261_v44, %s12615_s30 }
 0x2ae   :  { %3694 = vrot.lane.b32.xlu1 %v13267_v48, %s12615_s30 }
 0x2b0   :  { %3696 = vrot.lane.b32.xlu0 %v13272_v49, %s12615_s30 }
 0x2b2   :  { %3698 = vrot.lane.b32.xlu1 %v13278_v50, %s12615_s30 }
 0x2b4   :  { %3700 = vrot.lane.b32.xlu0 %v13285_v51, %s12615_s30 }
 0x2b6   :  { %3702 = vrot.lane.b32.xlu1 %v13289_v53, %s12615_s30 }
 0x2b8   :  { %4028 = vrot.lane.b32.xlu0 %v13261_v44, %s12616_s23 }
 0x2ba   :  { %4030 = vrot.lane.b32.xlu1 %v13267_v48, %s12616_s23 }
 0x2bc   :  { %4032 = vrot.lane.b32.xlu0 %v13272_v49, %s12616_s23 }
 0x2be   :  { %v1970_v8 = vpop.permute.xlu0 %1969  ;;  %4034 = vrot.lane.b32.xlu1 %v13278_v50, %s12616_s23 }
 0x2c0   :  { %4036 = vrot.lane.b32.xlu0 %v13285_v51, %s12616_s23  ;;  %v1972_v55 = vpop.permute.xlu1 %1971 }
 0x2c1   :  { %v1981_v56 = vsel %vm139_vm0, %v1970_v8, %v1972_v55 }
 0x2c2   :  { %v1974_v58 = vpop.permute.xlu0 %1973  ;;  %4038 = vrot.lane.b32.xlu1 %v13289_v53, %s12616_s23  ;;  %v1990_v62 = vsel %vm73_vm1, %v1981_v56, 0 }
 0x2c3   :  { %v1982_v60 = vsel %vm139_vm0, %v1972_v55, %v1974_v58 }
 0x2c4   :  { %4226 = vrot.lane.b32.xlu0 %v13261_v44, %s12617_s2  ;;  %11213 = vmatprep.subr.msk.bf16.mxu1 %vm73_vm1, %v1982_v60  ;;  %v1976_v61 = vpop.permute.xlu1 %1975 }
 0x2c5   :  { %2008 = vmatpush1.bf16.msra.mxu1 %v1990_v62  ;;  %v1983_v0 = vsel %vm139_vm0, %v1974_v58, %v1976_v61 }
 0x2c6   :  { %v1978_v1 = vpop.permute.xlu0 %1977  ;;  %4228 = vrot.lane.b32.xlu1 %v13267_v48, %s12617_s2  ;;  %v1996_v9 = vsel %vm73_vm1, %v1983_v0, 0 }
 0x2c7   :  { %v1984_v2 = vsel %vm139_vm0, %v1976_v61, %v1978_v1 }
 0x2c8   :  { %4230 = vrot.lane.b32.xlu0 %v13272_v49, %s12617_s2  ;;  %11214 = vmatmul.mubr.msk.bf16.vlgmr.msra.gmra.mrb[52].mxu1 %vm145_vm2, %v11211_v63  ;;  %v1980_v3 = vpop.permute.xlu1 %1979 }
 0x2c9   :  { %11215 = vmatprep.subr.msk.bf16.mxu0 %vm73_vm1, %v1984_v2  ;;  %v1985_v6 = vsel %vm139_vm0, %v1978_v1, %v1980_v3  ;;  %11217 = vmatprep.subr.msk.bf16.mxu1 %vm73_vm1, %v1980_v3  ;;  %v11233_v1 = vld [vmem:[%s15359_s3 + $0x3] sm:$0x1] }
 0x2ca   :  { %2049 = vmatpush1.bf16.msra.mxu0 %v1996_v9  ;;  %v2306_v10 = vpop.permute.xlu0 %2305  ;;  %v2002_v12 = vsel %vm73_vm1, %v1985_v6, 0  ;;  %2121 = vmatprep.mubr.bf16.mxu1 %v15328_v7 }
 0x2cb   :  { %11219 = vmatprep.subr.msk.bf16.mxu0 %vm73_vm1, %v13150_v36  ;;  %2090 = vmatpush1.bf16.msra.mxu1 %v2002_v12  ;;  %v11225_v36 = vld [vmem:[%s15359_s3 + $0x2] sm:$0x1] }
 0x2cc   :  { %4234 = vrot.lane.b32.xlu0 %v13285_v51, %s12617_s2  ;;  %11221 = vmatprep.subr.msk.bf16.mxu1 %vm73_vm1, %v13161_v38  ;;  %v2308_v13 = vpop.permute.xlu1 %2307 }
 0x2cd   :  { %11216 = vmatmul.mubr.msk.bf16.vlgmr.msra.gmra.mrb[56].mxu0 %vm145_vm2, %v11211_v63  ;;  %4232 = vrot.lane.b32.xlu1 %v13278_v50, %s12617_s2  ;;  %v2317_v23 = vsel %vm15327_vm3, %v2306_v10, %v2308_v13 }
 0x2ce   :  { %2152 = vmatpush1.bf16.msra.mxu0 %v2134_v14  ;;  %v2310_v15 = vpop.permute.xlu0 %2309  ;;  %2183 = vmatprep.mubr.bf16.mxu0 %v15328_v7  ;;  %v2326_v26 = vsel %vm73_vm1, %v2317_v23, 0 }
 0x2cf   :  { %11223 = vmatprep.subr.msk.bf16.mxu0 %vm73_vm1, %v13171_v40  ;;  %v2318_v16 = vsel %vm15327_vm3, %v2308_v13, %v2310_v15 }
 0x2d0   :  { %4424 = vrot.lane.b32.xlu0 %v13261_v44, %s12618_s5  ;;  %11218 = vmatmul.mubr.msk.bf16.vlgmr.msra.gmra.mrb[56].mxu1 %vm145_vm2, %v11211_v63  ;;  %v2312_v18 = vpop.permute.xlu1 %2311 }
 0x2d1   :  { %2193 = vmatpush1.bf16.msra.mxu1 %v2140_v17  ;;  %2224 = vmatprep.mubr.bf16.mxu1 %v15328_v7  ;;  %v2319_v28 = vsel %vm15327_vm3, %v2310_v15, %v2312_v18 }
 0x2d2   :  { %11227 = vmatprep.subr.msk.bf16.mxu1 %vm73_vm1, %v2318_v16  ;;  %v2314_v19 = vpop.permute.xlu0 %2313  ;;  %4236 = vrot.lane.b32.xlu1 %v13289_v53, %s12617_s2  ;;  %v2332_v34 = vsel %vm73_vm1, %v2319_v28, 0 }
 0x2d3   :  { %v2320_v22 = vsel %vm15327_vm3, %v2312_v18, %v2314_v19 }
 0x2d4   :  { %4428 = vrot.lane.b32.xlu0 %v13272_v49, %s12618_s5  ;;  %v2316_v21 = vpop.permute.xlu1 %2315 }
 0x2d5   :  { %11220 = vmatmul.mubr.msk.bf16.vlgmr.msra.gmra.mrb[60].mxu0 %vm145_vm2, %v1937_v20  ;;  %v2321_v33 = vsel %vm15327_vm3, %v2314_v19, %v2316_v21 }
 0x2d6   :  { %2234 = vmatpush1.bf16.msra.mxu0 %v2146_v24  ;;  %v2504_v25 = vpop.permute.xlu0 %2503  ;;  %2265 = vmatprep.mubr.bf16.mxu0 %v15328_v7  ;;  %v2338_v39 = vsel %vm73_vm1, %v2321_v33, 0 }
 0x2d7   :  { %11229 = vmatprep.subr.msk.bf16.mxu0 %vm73_vm1, %v2320_v22  ;;  %4426 = vrot.lane.b32.xlu1 %v13267_v48, %s12618_s5 }
 0x2d8   :  { %4432 = vrot.lane.b32.xlu0 %v13285_v51, %s12618_s5  ;;  %11222 = vmatmul.mubr.msk.bf16.vlgmr.msra.gmra.mrb[60].mxu1 %vm145_vm2, %v1937_v20  ;;  %v2506_v27 = vpop.permute.xlu1 %2505 }
 0x2d9   :  { %2344 = vmatpush1.bf16.msra.mxu1 %v2326_v26  ;;  %2375 = vmatprep.mubr.bf16.mxu1 %v15328_v7  ;;  %v2515_v43 = vsel %vm15326_vm4, %v2504_v25, %v2506_v27 }
 0x2da   :  { %11231 = vmatprep.subr.msk.bf16.mxu1 %vm73_vm1, %v2316_v21  ;;  %v2508_v29 = vpop.permute.xlu0 %2507  ;;  %v2524_v56 = vsel %vm73_vm1, %v2515_v43, 0 }
 0x2db   :  { %4430 = vrot.lane.b32.xlu1 %v13278_v50, %s12618_s5  ;;  %v2516_v32 = vsel %vm15326_vm4, %v2506_v27, %v2508_v29 }
 0x2dc   :  { %4622 = vrot.lane.b32.xlu0 %v13261_v44, %s12619_s24  ;;  %v2510_v30 = vpop.permute.xlu1 %2509 }
 0x2dd   :  { %11224 = vmatmul.mubr.msk.bf16.vlgmr.msra.gmra.mrb[64].mxu0 %vm145_vm2, %v1937_v20  ;;  %v2517_v55 = vsel %vm15326_vm4, %v2508_v29, %v2510_v30  ;;  %v11241_v20 = vld [vmem:[%s15359_s3 + $0x4] sm:$0x1] }
 0x2de   :  { %2385 = vmatpush1.bf16.msra.mxu0 %v2332_v34  ;;  %v2512_v37 = vpop.permute.xlu0 %2511  ;;  %2416 = vmatprep.mubr.bf16.mxu0 %v15328_v7  ;;  %v2530_v61 = vsel %vm73_vm1, %v2517_v55, 0 }
 0x2df   :  { %11235 = vmatprep.subr.msk.bf16.mxu0 %vm73_vm1, %v2516_v32  ;;  %v2518_v38 = vsel %vm15326_vm4, %v2510_v30, %v2512_v37  ;;  %4434 = vrot.lane.b32.xlu1 %v13289_v53, %s12618_s5 }
 0x2e0   :  { %4626 = vrot.lane.b32.xlu0 %v13272_v49, %s12619_s24  ;;  %11228 = vmatmul.mubr.msk.bf16.vlgmr.msra.gmra.mrb[64].mxu1 %vm145_vm2, %v11225_v36  ;;  %v2514_v40 = vpop.permute.xlu1 %2513 }
 0x2e1   :  { %2426 = vmatpush1.bf16.msra.mxu1 %v2338_v39  ;;  %2457 = vmatprep.mubr.bf16.mxu1 %v15328_v7  ;;  %v2519_v63 = vsel %vm15326_vm4, %v2512_v37, %v2514_v40 }
 0x2e2   :  { %11237 = vmatprep.subr.msk.bf16.mxu1 %vm73_vm1, %v2518_v38  ;;  %v2702_v47 = vpop.permute.xlu0 %2701  ;;  %v2536_v9 = vsel %vm73_vm1, %v2519_v63, 0  ;;  %v11249_v38 = vld [vmem:[%s15359_s3 + $0x5] sm:$0x1] }
 0x2e3   :  { %4624 = vrot.lane.b32.xlu1 %v13267_v48, %s12619_s24 }
 0x2e4   :  { %4630 = vrot.lane.b32.xlu0 %v13285_v51, %s12619_s24  ;;  %v2704_v8 = vpop.permute.xlu1 %2703 }
 0x2e5   :  { %11230 = vmatmul.mubr.msk.bf16.vlgmr.msra.gmra.mrb[68].mxu0 %vm145_vm2, %v11225_v36  ;;  %v2713_v6 = vsel %vm15325_vm5, %v2702_v47, %v2704_v8 }
 0x2e6   :  { %2542 = vmatpush1.bf16.msra.mxu0 %v2524_v56  ;;  %v2706_v58 = vpop.permute.xlu0 %2705  ;;  %2573 = vmatprep.mubr.bf16.mxu0 %v15328_v7  ;;  %v2722_v12 = vsel %vm73_vm1, %v2713_v6, 0 }
 0x2e7   :  { %11239 = vmatprep.subr.msk.bf16.mxu0 %vm73_vm1, %v2514_v40  ;;  %v2714_v60 = vsel %vm15325_vm5, %v2704_v8, %v2706_v58  ;;  %4628 = vrot.lane.b32.xlu1 %v13278_v50, %s12619_s24 }
 0x2e8   :  { %4820 = vrot.lane.b32.xlu0 %v13261_v44, %s12620_s4  ;;  %11232 = vmatmul.mubr.msk.bf16.vlgmr.msra.gmra.mrb[68].mxu1 %vm145_vm2, %v11225_v36  ;;  %v2708_v62 = vpop.permute.xlu1 %2707 }
 0x2e9   :  { %2583 = vmatpush1.bf16.msra.mxu1 %v2530_v61  ;;  %2614 = vmatprep.mubr.bf16.mxu1 %v15328_v7  ;;  %v2715_v14 = vsel %vm15325_vm5, %v2706_v58, %v2708_v62  ;;  %v5389_v58 = vld [vmem:[%s15368_s27] sm:$0x3]  ;;  %s12628_s27 = smov 66  }
 0x2ea   :  { %11243 = vmatprep.subr.msk.bf16.mxu1 %vm73_vm1, %v2714_v60  ;;  %v2710_v0 = vpop.permute.xlu0 %2709  ;;  %v2728_v19 = vsel %vm73_vm1, %v2715_v14, 0 }
 0x2eb   :  { %4632 = vrot.lane.b32.xlu1 %v13289_v53, %s12619_s24  ;;  %v2716_v3 = vsel %vm15325_vm5, %v2708_v62, %v2710_v0 }
 0x2ec   :  { %4824 = vrot.lane.b32.xlu0 %v13272_v49, %s12620_s4  ;;  %v2712_v2 = vpop.permute.xlu1 %2711 }
 0x2ed   :  { %11236 = vmatmul.mubr.msk.bf16.vlgmr.msra.gmra.mrb[72].mxu0 %vm145_vm2, %v11233_v1  ;;  %v2717_v18 = vsel %vm15325_vm5, %v2710_v0, %v2712_v2 }
 0x2ee   :  { %2624 = vmatpush1.bf16.msra.mxu0 %v2536_v9  ;;  %v2900_v10 = vpop.permute.xlu0 %2899  ;;  %2655 = vmatprep.mubr.bf16.mxu0 %v15328_v7  ;;  %v2734_v23 = vsel %vm73_vm1, %v2717_v18, 0 }
 0x2ef   :  { %11245 = vmatprep.subr.msk.bf16.mxu0 %vm73_vm1, %v2716_v3  ;;  %4822 = vrot.lane.b32.xlu1 %v13267_v48, %s12620_s4 }
 0x2f0   :  { %4828 = vrot.lane.b32.xlu0 %v13285_v51, %s12620_s4  ;;  %11238 = vmatmul.mubr.msk.bf16.vlgmr.msra.gmra.mrb[72].mxu1 %vm145_vm2, %v11233_v1  ;;  %v2902_v13 = vpop.permute.xlu1 %2901 }
 0x2f1   :  { %2740 = vmatpush1.bf16.msra.mxu1 %v2722_v12  ;;  %2771 = vmatprep.mubr.bf16.mxu1 %v15328_v7  ;;  %v2911_v25 = vsel %vm15362_vm8, %v2900_v10, %v2902_v13 }
 0x2f2   :  { %11247 = vmatprep.subr.msk.bf16.mxu1 %vm73_vm1, %v2712_v2  ;;  %v2904_v15 = vpop.permute.xlu0 %2903  ;;  %v2920_v29 = vsel %vm73_vm1, %v2911_v25, 0  ;;  %v11257_v2 = vld [vmem:[%s15359_s3 + $0x6] sm:$0x1] }
 0x2f3   :  { %4826 = vrot.lane.b32.xlu1 %v13278_v50, %s12620_s4  ;;  %v2912_v17 = vsel %vm15360_vm6, %v2902_v13, %v2904_v15  ;;  %vm15370_vm6 = vcmask 744448  }
 0x2f4   :  { %5018 = vrot.lane.b32.xlu0 %v13261_v44, %s12621_s25  ;;  %v2906_v16 = vpop.permute.xlu1 %2905  ;;  %vm15372_vm8 = vmmov %vm15370_vm6 }
 0x2f5   :  { %11240 = vmatmul.mubr.msk.bf16.vlgmr.msra.gmra.mrb[76].mxu0 %vm145_vm2, %v11233_v1  ;;  %v2913_v28 = vsel %vm15363_vm12, %v2904_v15, %v2906_v16  ;;  %vm15373_vm12 = vmmov %vm15370_vm6 }
 0x2f6   :  { %2781 = vmatpush1.bf16.msra.mxu0 %v2728_v19  ;;  %v2908_v21 = vpop.permute.xlu0 %2907  ;;  %2812 = vmatprep.mubr.bf16.mxu0 %v15328_v7  ;;  %v2926_v33 = vsel %vm73_vm1, %v2913_v28, 0 }
 0x2f7   :  { %11251 = vmatprep.subr.msk.bf16.mxu0 %vm73_vm1, %v2912_v17  ;;  %v2914_v22 = vsel %vm15361_vm7, %v2906_v16, %v2908_v21  ;;  %4830 = vrot.lane.b32.xlu1 %v13289_v53, %s12620_s4  ;;  %vm15371_vm7 = vmmov %vm15367_vm10 }
 0x2f8   :  { %5022 = vrot.lane.b32.xlu0 %v13272_v49, %s12621_s25  ;;  %11244 = vmatmul.mubr.msk.bf16.vlgmr.msra.gmra.mrb[76].mxu1 %vm145_vm2, %v11241_v20  ;;  %v2910_v24 = vpop.permute.xlu1 %2909 }
 0x2f9   :  { %2822 = vmatpush1.bf16.msra.mxu1 %v2734_v23  ;;  %2853 = vmatprep.mubr.bf16.mxu1 %v15328_v7  ;;  %v2915_v36 = vsel %vm15365_vm14, %v2908_v21, %v2910_v24  ;;  %vm15375_vm14 = vcmask 736256   ;;  %v11265_v23 = vld [vmem:[%s15359_s3 + $0x7] sm:$0x1] }
 0x2fa   :  { %11253 = vmatprep.subr.msk.bf16.mxu1 %vm73_vm1, %v2914_v22  ;;  %v3098_v26 = vpop.permute.xlu0 %3097  ;;  %v2932_v47 = vsel %vm73_vm1, %v2915_v36, 0 }
 0x2fb   :  { %5020 = vrot.lane.b32.xlu1 %v13267_v48, %s12621_s25 }
 0x2fc   :  { %5026 = vrot.lane.b32.xlu0 %v13285_v51, %s12621_s25  ;;  %v3100_v27 = vpop.permute.xlu1 %3099 }
 0x2fd   :  { %11246 = vmatmul.mubr.msk.bf16.vlgmr.msra.gmra.mrb[80].mxu0 %vm145_vm2, %v11241_v20  ;;  %v3109_v43 = vsel %vm15367_vm10, %v3098_v26, %v3100_v27  ;;  %vm15377_vm10 = vmmov %vm15375_vm14 }
 0x2fe   :  { %2938 = vmatpush1.bf16.msra.mxu0 %v2920_v29  ;;  %v3102_v30 = vpop.permute.xlu0 %3101  ;;  %2969 = vmatprep.mubr.bf16.mxu0 %v15328_v7  ;;  %v3118_v55 = vsel %vm73_vm1, %v3109_v43, 0 }
 0x2ff   :  { %11255 = vmatprep.subr.msk.bf16.mxu0 %vm73_vm1, %v2910_v24  ;;  %v3110_v32 = vsel %vm15364_vm13, %v3100_v27, %v3102_v30  ;;  %5024 = vrot.lane.b32.xlu1 %v13278_v50, %s12621_s25  ;;  %vm15374_vm13 = vmmov %vm15370_vm6 }
 0x300   :  { %5216 = vrot.lane.b32.xlu0 %v13261_v44, %s12622_s26  ;;  %11248 = vmatmul.mubr.msk.bf16.vlgmr.msra.gmra.mrb[80].mxu1 %vm145_vm2, %v11241_v20  ;;  %v3104_v34 = vpop.permute.xlu1 %3103 }
 0x301   :  { %2979 = vmatpush1.bf16.msra.mxu1 %v2926_v33  ;;  %3010 = vmatprep.mubr.bf16.mxu1 %v15328_v7  ;;  %v3111_v60 = vsel %vm15369_vm11, %v3102_v30, %v3104_v34  ;;  %vm15378_vm11 = vmmov %vm15377_vm10 }
 0x302   :  { %11259 = vmatprep.subr.msk.bf16.mxu1 %vm73_vm1, %v3110_v32  ;;  %v3106_v37 = vpop.permute.xlu0 %3105  ;;  %v3124_v1 = vsel %vm73_vm1, %v3111_v60, 0 }
 0x303   :  { %5028 = vrot.lane.b32.xlu1 %v13289_v53, %s12621_s25  ;;  %v3112_v40 = vsel %vm15366_vm15, %v3104_v34, %v3106_v37  ;;  %vm15376_vm15 = vmmov %vm15370_vm6 }
 0x304   :  { %5220 = vrot.lane.b32.xlu0 %v13272_v49, %s12622_s26  ;;  %v3108_v39 = vpop.permute.xlu1 %3107 }
 0x305   :  { %11252 = vmatmul.mubr.msk.bf16.vlgmr.msra.gmra.mrb[84].mxu0 %vm145_vm2, %v11249_v38  ;;  %v3113_v0 = vsel %vm15371_vm7, %v3106_v37, %v3108_v39 }
 0x306   :  { %3020 = vmatpush1.bf16.msra.mxu0 %v2932_v47  ;;  %v3296_v8 = vpop.permute.xlu0 %3295  ;;  %3051 = vmatprep.mubr.bf16.mxu0 %v15328_v7  ;;  %v3130_v9 = vsel %vm73_vm1, %v3113_v0, 0 }
 0x307   :  { %11261 = vmatprep.subr.msk.bf16.mxu0 %vm73_vm1, %v3112_v40  ;;  %5218 = vrot.lane.b32.xlu1 %v13267_v48, %s12622_s26 }
 0x308   :  { %5224 = vrot.lane.b32.xlu0 %v13285_v51, %s12622_s26  ;;  %11254 = vmatmul.mubr.msk.bf16.vlgmr.msra.gmra.mrb[84].mxu1 %vm145_vm2, %v11249_v38  ;;  %v3298_v56 = vpop.permute.xlu1 %3297 }
 0x309   :  { %3136 = vmatpush1.bf16.msra.mxu1 %v3118_v55  ;;  %3167 = vmatprep.mubr.bf16.mxu1 %v15328_v7  ;;  %v3307_v12 = vsel %vm15373_vm12, %v3296_v8, %v3298_v56 }
 0x30a   :  { %11263 = vmatprep.subr.msk.bf16.mxu1 %vm73_vm1, %v3108_v39  ;;  %v3300_v61 = vpop.permute.xlu0 %3299  ;;  %v3316_v16 = vsel %vm73_vm1, %v3307_v12, 0  ;;  %v11273_v39 = vld [vmem:[%s15359_s3 + $0x8] sm:$0x1]  ;;  %s12631_s3 = smov 60  }
 0x30b   :  { %5222 = vrot.lane.b32.xlu1 %v13278_v50, %s12622_s26  ;;  %v3308_v63 = vsel %vm15370_vm6, %v3298_v56, %v3300_v61  ;;  %vm15379_vm6 = vmmov %vm15377_vm10 }
 0x30c   :  { %5392 = vperm.xlu0 %12123, %v5389_v58   ;;  %v3302_v62 = vpop.permute.xlu1 %3301  ;;  %vm15380_vm7 = vmmov %vm15379_vm6 }
 0x30d   :  { %11256 = vmatmul.mubr.msk.bf16.vlgmr.msra.gmra.mrb[88].mxu0 %vm145_vm2, %v11249_v38  ;;  %v3309_v15 = vsel %vm15374_vm13, %v3300_v61, %v3302_v62 }
 0x30e   :  { %3177 = vmatpush1.bf16.msra.mxu0 %v3124_v1  ;;  %v3304_v3 = vpop.permute.xlu0 %3303  ;;  %3208 = vmatprep.mubr.bf16.mxu0 %v15328_v7  ;;  %v3322_v19 = vsel %vm73_vm1, %v3309_v15, 0 }
 0x30f   :  { %11267 = vmatprep.subr.msk.bf16.mxu0 %vm73_vm1, %v3308_v63  ;;  %v3310_v6 = vsel %vm15372_vm8, %v3302_v62, %v3304_v3  ;;  %5226 = vrot.lane.b32.xlu1 %v13289_v53, %s12622_s26  ;;  %vm15382_vm8 = vcmask 883712  }
 0x310   :  { %11260 = vmatmul.mubr.msk.bf16.vlgmr.msra.gmra.mrb[88].mxu1 %vm145_vm2, %v11257_v2  ;;  %v3306_v10 = vpop.permute.xlu1 %3305  ;;  %vm15383_vm12 = vmmov %vm15382_vm8 }
 0x311   :  { %3218 = vmatpush1.bf16.msra.mxu1 %v3130_v9  ;;  %3249 = vmatprep.mubr.bf16.mxu1 %v15328_v7  ;;  %v3311_v21 = vsel %vm15376_vm15, %v3304_v3, %v3306_v10  ;;  %vm15384_vm13 = vmmov %vm15382_vm8 }
 0x312   :  { %11269 = vmatprep.subr.msk.bf16.mxu1 %vm73_vm1, %v3310_v6  ;;  %v3494_v13 = vpop.permute.xlu0 %3493  ;;  %v3328_v27 = vsel %vm73_vm1, %v3311_v21, 0  ;;  %vm15386_vm15 = vmmov %vm15382_vm8 }
 0x314   :  { %v3496_v14 = vpop.permute.xlu1 %3495 }
 0x315   :  { %11262 = vmatmul.mubr.msk.bf16.vlgmr.msra.gmra.mrb[92].mxu0 %vm145_vm2, %v11257_v2  ;;  %v3505_v26 = vsel %vm15378_vm11, %v3494_v13, %v3496_v14 }
 0x316   :  { %3334 = vmatpush1.bf16.msra.mxu0 %v3316_v16  ;;  %v3498_v17 = vpop.permute.xlu0 %3497  ;;  %3365 = vmatprep.mubr.bf16.mxu0 %v15328_v7  ;;  %v3514_v29 = vsel %vm73_vm1, %v3505_v26, 0  ;;  %v11295_v26 = vld [vmem:[%s15381_s1 + $0x2] sm:$0x1] }
 0x317   :  { %11271 = vmatprep.subr.msk.bf16.mxu0 %vm73_vm1, %v3306_v10  ;;  %v3506_v18 = vsel %vm15375_vm14, %v3496_v14, %v3498_v17  ;;  %v3857_v10 = vsel %vm73_vm1, %v13261_v44, 0  ;;  %v3863_v14 = vsel %vm73_vm1, %v13272_v49, 0  ;;  %v3660_v44 = vld [vmem:[%s15381_s1] sm:$0x1]  ;;  %vm15385_vm14 = vmmov %vm15382_vm8 }
 0x318   :  { %11264 = vmatmul.mubr.msk.bf16.vlgmr.msra.gmra.mrb[92].mxu1 %vm145_vm2, %v11257_v2  ;;  %v3500_v20 = vpop.permute.xlu1 %3499  ;;  %v11281_v2 = vld [vmem:[%s15381_s1 + $0x1] sm:$0x1] }
 0x319   :  { %3375 = vmatpush1.bf16.msra.mxu1 %v3322_v19  ;;  %3406 = vmatprep.mubr.bf16.mxu1 %v15328_v7  ;;  %v3507_v32 = vsel %vm15379_vm6, %v3498_v17, %v3500_v20 }
 0x31a   :  { %11275 = vmatprep.subr.msk.bf16.mxu1 %vm73_vm1, %v3506_v18  ;;  %v3502_v22 = vpop.permute.xlu0 %3501  ;;  %v3520_v38 = vsel %vm73_vm1, %v3507_v32, 0 }
 0x31b   :  { %v3508_v25 = vsel %vm15377_vm10, %v3500_v20, %v3502_v22  ;;  %vm15387_vm10 = vcmask 752640  }
 0x31c   :  { %v3504_v24 = vpop.permute.xlu1 %3503  ;;  %vm15388_vm11 = vmmov %vm15387_vm10 }
 0x31d   :  { %11268 = vmatmul.mubr.msk.bf16.vlgmr.msra.gmra.mrb[96].mxu0 %vm145_vm2, %v11265_v23  ;;  %v3509_v37 = vsel %vm15380_vm7, %v3502_v22, %v3504_v24  ;;  %vm15389_vm6 = vmmov %vm15387_vm10 }
 0x31e   :  { %3416 = vmatpush1.bf16.msra.mxu0 %v3328_v27  ;;  %3447 = vmatprep.mubr.bf16.mxu0 %v15328_v7  ;;  %v3693_v28 = vpop.permute.xlu0 %3692  ;;  %v3526_v47 = vsel %vm73_vm1, %v3509_v37, 0  ;;  %vm15390_vm7 = vmmov %vm15389_vm6 }
 0x31f   :  { %11277 = vmatprep.subr.msk.bf16.mxu0 %vm73_vm1, %v3508_v25 }
 0x320   :  { %11270 = vmatmul.mubr.msk.bf16.vlgmr.msra.gmra.mrb[96].mxu1 %vm145_vm2, %v11265_v23  ;;  %v3695_v30 = vpop.permute.xlu1 %3694 }
 0x321   :  { %3532 = vmatpush1.bf16.msra.mxu1 %v3514_v29  ;;  %3563 = vmatprep.mubr.bf16.mxu1 %v15328_v7  ;;  %v3704_v8 = vsel %vm139_vm0, %v3693_v28, %v3695_v30 }
 0x322   :  { %11279 = vmatprep.subr.msk.bf16.mxu1 %vm73_vm1, %v3504_v24  ;;  %v3697_v33 = vpop.permute.xlu0 %3696  ;;  %v3713_v58 = vsel %vm73_vm1, %v3704_v8, 0 }
 0x323   :  { %v3705_v34 = vsel %vm139_vm0, %v3695_v30, %v3697_v33 }
 0x324   :  { %v3699_v36 = vpop.permute.xlu1 %3698 }
 0x325   :  { %11272 = vmatmul.mubr.msk.bf16.vlgmr.msra.gmra.mrb[100].mxu0 %vm145_vm2, %v11265_v23  ;;  %v3706_v60 = vsel %vm139_vm0, %v3697_v33, %v3699_v36 }
 0x326   :  { %3573 = vmatpush1.bf16.msra.mxu0 %v3520_v38  ;;  %3604 = vmatprep.mubr.bf16.mxu0 %v15328_v7  ;;  %v3701_v40 = vpop.permute.xlu0 %3700  ;;  %v3719_v62 = vsel %vm73_vm1, %v3706_v60, 0 }
 0x327   :  { %11283 = vmatprep.subr.msk.bf16.mxu0 %vm73_vm1, %v3705_v34  ;;  %v3707_v43 = vsel %vm139_vm0, %v3699_v36, %v3701_v40 }
 0x328   :  { %11276 = vmatmul.mubr.msk.bf16.vlgmr.msra.gmra.mrb[100].mxu1 %vm145_vm2, %v11273_v39  ;;  %v3703_v55 = vpop.permute.xlu1 %3702 }
 0x329   :  { %3614 = vmatpush1.bf16.msra.mxu1 %v3526_v47  ;;  %3645 = vmatprep.mubr.bf16.mxu1 %v15328_v7  ;;  %v3708_v0 = vsel %vm139_vm0, %v3701_v40, %v3703_v55  ;;  %v11303_v47 = vld [vmem:[%s15381_s1 + $0x3] sm:$0x1] }
 0x32a   :  { %11285 = vmatprep.subr.msk.bf16.mxu1 %vm73_vm1, %v3707_v43  ;;  %v4029_v56 = vpop.permute.xlu0 %4028  ;;  %v3725_v6 = vsel %vm73_vm1, %v3708_v0, 0 }
 0x32c   :  { %v4031_v61 = vpop.permute.xlu1 %4030 }
 0x32d   :  { %11278 = vmatmul.mubr.msk.bf16.vlgmr.msra.gmra.mrb[104].mxu0 %vm145_vm2, %v11273_v39  ;;  %v4040_v17 = vsel %vm15327_vm3, %v4029_v56, %v4031_v61 }
 0x32e   :  { %3731 = vmatpush1.bf16.msra.mxu0 %v3713_v58  ;;  %3762 = vmatprep.mubr.bf16.mxu0 %v15328_v7  ;;  %v4033_v63 = vpop.permute.xlu0 %4032  ;;  %v4049_v19 = vsel %vm73_vm1, %v4040_v17, 0 }
 0x32f   :  { %11287 = vmatprep.subr.msk.bf16.mxu0 %vm73_vm1, %v3703_v55  ;;  %v4041_v15 = vsel %vm15327_vm3, %v4031_v61, %v4033_v63 }
 0x330   :  { %11280 = vmatmul.mubr.msk.bf16.vlgmr.msra.gmra.mrb[104].mxu1 %vm145_vm2, %v11273_v39  ;;  %v4035_v1 = vpop.permute.xlu1 %4034 }
 0x331   :  { %3772 = vmatpush1.bf16.msra.mxu1 %v3719_v62  ;;  %3803 = vmatprep.mubr.bf16.mxu1 %v15328_v7 }
 0x332   :  { %11289 = vmatprep.subr.msk.bf16.mxu1 %vm73_vm1, %v13267_v48  ;;  %v4037_v3 = vpop.permute.xlu0 %4036 }
 0x334   :  { %v4039_v9 = vpop.permute.xlu1 %4038 }
 0x335   :  { %11284 = vmatmul.mubr.msk.bf16.vlgmr.msra.gmra.mrb[108].mxu0 %vm145_vm2, %v11281_v2  ;;  %v4044_v24 = vsel %vm15327_vm3, %v4037_v3, %v4039_v9 }
 0x336   :  { %3813 = vmatpush1.bf16.msra.mxu0 %v3725_v6  ;;  %3844 = vmatprep.mubr.bf16.mxu0 %v15328_v7  ;;  %v4227_v12 = vpop.permute.xlu0 %4226  ;;  %v4061_v28 = vsel %vm73_vm1, %v4044_v24, 0 }
 0x337   :  { %11291 = vmatprep.subr.msk.bf16.mxu0 %vm73_vm1, %v13278_v50  ;;  %v3869_v50 = vsel %vm73_vm1, %v13285_v51, 0  ;;  %v4042_v51 = vsel %vm15327_vm3, %v4033_v63, %v4035_v1 }
 0x338   :  { %11286 = vmatmul.mubr.msk.bf16.vlgmr.msra.gmra.mrb[108].mxu1 %vm145_vm2, %v11281_v2  ;;  %v4229_v48 = vpop.permute.xlu1 %4228  ;;  %v4055_v21 = vsel %vm73_vm1, %v4042_v51, 0  ;;  %v11319_v51 = vld [vmem:[%s15381_s1 + $0x5] sm:$0x1] }
 0x339   :  { %3875 = vmatpush1.bf16.msra.mxu1 %v3857_v10  ;;  %3906 = vmatprep.mubr.bf16.mxu1 %v15328_v7  ;;  %v4238_v29 = vsel %vm15326_vm4, %v4227_v12, %v4229_v48  ;;  %v11311_v12 = vld [vmem:[%s15381_s1 + $0x4] sm:$0x1] }
 0x33a   :  { %11293 = vmatprep.subr.msk.bf16.mxu1 %vm73_vm1, %v13289_v53  ;;  %v4231_v13 = vpop.permute.xlu0 %4230  ;;  %v4043_v53 = vsel %vm15327_vm3, %v4035_v1, %v4037_v3  ;;  %v4247_v33 = vsel %vm73_vm1, %v4238_v29, 0 }
 0x33b   :  { %v4239_v23 = vsel %vm15326_vm4, %v4229_v48, %v4231_v13 }
 0x33d   :  { %11288 = vmatmul.mubr.msk.bf16.vlgmr.msra.gmra.mrb[112].mxu0 %vm145_vm2, %v11281_v2 }
 0x33e   :  { %3916 = vmatpush1.bf16.msra.mxu0 %v3863_v14  ;;  %3947 = vmatprep.mubr.bf16.mxu0 %v15328_v7  ;;  %v4235_v16 = vpop.permute.xlu0 %4234 }
 0x33f   :  { %11297 = vmatprep.subr.msk.bf16.mxu0 %vm73_vm1, %v4041_v15  ;;  %v4233_v49 = vpop.permute.xlu1 %4232 }
 0x340   :  { %11290 = vmatmul.mubr.msk.bf16.vlgmr.msra.gmra.mrb[112].mxu1 %vm145_vm2, %v3660_v44  ;;  %v4241_v30 = vsel %vm15326_vm4, %v4233_v49, %v4235_v16  ;;  %v4240_v36 = vsel %vm15326_vm4, %v4231_v13, %v4233_v49 }
 0x341   :  { %3957 = vmatpush1.bf16.msra.mxu1 %v3869_v50  ;;  %3988 = vmatprep.mubr.bf16.mxu1 %v15328_v7  ;;  %v4253_v39 = vsel %vm73_vm1, %v4240_v36, 0 }
 0x342   :  { %11299 = vmatprep.subr.msk.bf16.mxu1 %vm73_vm1, %v4043_v53  ;;  %v4425_v18 = vpop.permute.xlu0 %4424 }
 0x344   :  { %v4237_v20 = vpop.permute.xlu1 %4236 }
 0x345   :  { %11292 = vmatmul.mubr.msk.bf16.vlgmr.msra.gmra.mrb[116].mxu0 %vm145_vm2, %v3660_v44  ;;  %v4242_v40 = vsel %vm15326_vm4, %v4235_v16, %v4237_v20 }
 0x346   :  { %4067 = vmatpush1.bf16.msra.mxu0 %v4049_v19  ;;  %4098 = vmatprep.mubr.bf16.mxu0 %v15328_v7  ;;  %v4429_v22 = vpop.permute.xlu0 %4428  ;;  %v4259_v55 = vsel %vm73_vm1, %v4242_v40, 0 }
 0x347   :  { %11301 = vmatprep.subr.msk.bf16.mxu0 %vm73_vm1, %v4039_v9 }
 0x348   :  { %11294 = vmatmul.mubr.msk.bf16.vlgmr.msra.gmra.mrb[116].mxu1 %vm145_vm2, %v3660_v44 }
 0x349   :  { %4108 = vmatpush1.bf16.msra.mxu1 %v4055_v21  ;;  %4139 = vmatprep.mubr.bf16.mxu1 %v15328_v7  ;;  %v4427_v25 = vpop.permute.xlu1 %4426 }
 0x34a   :  { %11305 = vmatprep.subr.msk.bf16.mxu1 %vm73_vm1, %v4239_v23  ;;  %v4433_v27 = vpop.permute.xlu0 %4432  ;;  %v4437_v43 = vsel %vm15325_vm5, %v4427_v25, %v4429_v22  ;;  %v4436_v60 = vsel %vm15325_vm5, %v4425_v18, %v4427_v25 }
 0x34b   :  { %v4445_v63 = vsel %vm73_vm1, %v4436_v60, 0 }
 0x34d   :  { %11298 = vmatmul.mubr.msk.bf16.vlgmr.msra.gmra.mrb[120].mxu0 %vm145_vm2, %v11295_v26  ;;  %v4431_v32 = vpop.permute.xlu1 %4430 }
 0x34e   :  { %4149 = vmatpush1.bf16.msra.mxu0 %v4061_v28  ;;  %4180 = vmatprep.mubr.bf16.mxu0 %v15328_v7  ;;  %v4623_v34 = vpop.permute.xlu0 %4622  ;;  %v4439_v58 = vsel %vm15325_vm5, %v4431_v32, %v4433_v27  ;;  %v4438_v0 = vsel %vm15325_vm5, %v4429_v22, %v4431_v32 }
 0x34f   :  { %11307 = vmatprep.subr.msk.bf16.mxu0 %vm73_vm1, %v4241_v30  ;;  %v4451_v2 = vsel %vm73_vm1, %v4438_v0, 0 }
 0x350   :  { %11300 = vmatmul.mubr.msk.bf16.vlgmr.msra.gmra.mrb[120].mxu1 %vm145_vm2, %v11295_v26 }
 0x351   :  { %4265 = vmatpush1.bf16.msra.mxu1 %v4247_v33  ;;  %4296 = vmatprep.mubr.bf16.mxu1 %v15328_v7  ;;  %v4435_v37 = vpop.permute.xlu1 %4434 }
 0x352   :  { %11309 = vmatprep.subr.msk.bf16.mxu1 %vm73_vm1, %v4237_v20  ;;  %v4627_v38 = vpop.permute.xlu0 %4626  ;;  %v4440_v9 = vsel %vm15325_vm5, %v4433_v27, %v4435_v37 }
 0x353   :  { %v4457_v13 = vsel %vm73_vm1, %v4440_v9, 0 }
 0x355   :  { %11302 = vmatmul.mubr.msk.bf16.vlgmr.msra.gmra.mrb[124].mxu0 %vm145_vm2, %v11295_v26  ;;  %v4625_v8 = vpop.permute.xlu1 %4624 }
 0x356   :  { %4306 = vmatpush1.bf16.msra.mxu0 %v4253_v39  ;;  %4337 = vmatprep.mubr.bf16.mxu0 %v15328_v7  ;;  %v4631_v56 = vpop.permute.xlu0 %4630  ;;  %v4635_v6 = vsel %vm15382_vm8, %v4625_v8, %v4627_v38  ;;  %v4634_v14 = vsel %vm15383_vm12, %v4623_v34, %v4625_v8  ;;  %vm15391_vm8 = vcmask 744448   ;;  %vm15392_vm12 = vmmov %vm15389_vm6  ;;  %v11327_v34 = vld [vmem:[%s15381_s1 + $0x6] sm:$0x1] }
 0x357   :  { %11313 = vmatprep.subr.msk.bf16.mxu0 %vm73_vm1, %v4437_v43  ;;  %v4643_v50 = vsel %vm73_vm1, %v4634_v14, 0 }
 0x358   :  { %11306 = vmatmul.mubr.msk.bf16.vlgmr.msra.gmra.mrb[124].mxu1 %vm145_vm2, %v11303_v47 }
 0x359   :  { %4347 = vmatpush1.bf16.msra.mxu1 %v4259_v55  ;;  %4378 = vmatprep.mubr.bf16.mxu1 %v15328_v7  ;;  %v4629_v61 = vpop.permute.xlu1 %4628 }
 0x35a   :  { %11315 = vmatprep.subr.msk.bf16.mxu1 %vm73_vm1, %v4439_v58  ;;  %v4821_v62 = vpop.permute.xlu0 %4820  ;;  %v4637_v15 = vsel %vm15384_vm13, %v4629_v61, %v4631_v56  ;;  %v4636_v16 = vsel %vm15385_vm14, %v4627_v38, %v4629_v61  ;;  %vm15393_vm13 = vmmov %vm15391_vm8  ;;  %v11335_v61 = vld [vmem:[%s15381_s1 + $0x7] sm:$0x1] }
 0x35b   :  { %v4649_v17 = vsel %vm73_vm1, %v4636_v16, 0  ;;  %vm15394_vm14 = vmmov %vm15391_vm8 }
 0x35d   :  { %11308 = vmatmul.mubr.msk.bf16.vlgmr.msra.gmra.mrb[128].mxu0 %vm145_vm2, %v11303_v47  ;;  %v4633_v1 = vpop.permute.xlu1 %4632 }
 0x35e   :  { %4463 = vmatpush1.bf16.msra.mxu0 %v4445_v63  ;;  %4494 = vmatprep.mubr.bf16.mxu0 %v15328_v7  ;;  %v4825_v3 = vpop.permute.xlu0 %4824  ;;  %v4638_v18 = vsel %vm15386_vm15, %v4631_v56, %v4633_v1  ;;  %vm15395_vm15 = vmmov %vm15391_vm8 }
 0x35f   :  { %11317 = vmatprep.subr.msk.bf16.mxu0 %vm73_vm1, %v4435_v37  ;;  %v4655_v21 = vsel %vm73_vm1, %v4638_v18, 0 }
 0x360   :  { %11310 = vmatmul.mubr.msk.bf16.vlgmr.msra.gmra.mrb[128].mxu1 %vm145_vm2, %v11303_v47 }
 0x361   :  { %4504 = vmatpush1.bf16.msra.mxu1 %v4451_v2  ;;  %4535 = vmatprep.mubr.bf16.mxu1 %v15328_v7  ;;  %v4823_v10 = vpop.permute.xlu1 %4822 }
 0x362   :  { %11321 = vmatprep.subr.msk.bf16.mxu1 %vm73_vm1, %v4635_v6  ;;  %v4829_v48 = vpop.permute.xlu0 %4828  ;;  %v4833_v19 = vsel %vm15387_vm10, %v4823_v10, %v4825_v3  ;;  %v4832_v24 = vsel %vm15389_vm6, %v4821_v62, %v4823_v10  ;;  %vm15396_vm10 = vmmov %vm15391_vm8 }
 0x363   :  { %v4841_v26 = vsel %vm73_vm1, %v4832_v24, 0 }
 0x365   :  { %11314 = vmatmul.mubr.msk.bf16.vlgmr.msra.gmra.mrb[132].mxu0 %vm145_vm2, %v11311_v12  ;;  %v4827_v44 = vpop.permute.xlu1 %4826 }
 0x366   :  { %4545 = vmatpush1.bf16.msra.mxu0 %v4457_v13  ;;  %4576 = vmatprep.mubr.bf16.mxu0 %v15328_v7  ;;  %v5019_v53 = vpop.permute.xlu0 %5018  ;;  %v4835_v23 = vsel %vm15388_vm11, %v4827_v44, %v4829_v48  ;;  %v4834_v27 = vsel %vm15390_vm7, %v4825_v3, %v4827_v44  ;;  %vm15397_vm11 = vcmask 736256  }
 0x367   :  { %11323 = vmatprep.subr.msk.bf16.mxu0 %vm73_vm1, %v4637_v15  ;;  %v4847_v29 = vsel %vm73_vm1, %v4834_v27, 0  ;;  %vm15398_vm6 = vmmov %vm15397_vm11 }
 0x368   :  { %11316 = vmatmul.mubr.msk.bf16.vlgmr.msra.gmra.mrb[132].mxu1 %vm145_vm2, %v11311_v12  ;;  %vm15399_vm7 = vmmov %vm15398_vm6 }
 0x369   :  { %4661 = vmatpush1.bf16.msra.mxu1 %v4643_v50  ;;  %4692 = vmatprep.mubr.bf16.mxu1 %v15328_v7  ;;  %v4831_v49 = vpop.permute.xlu1 %4830 }
 0x36a   :  { %11325 = vmatprep.subr.msk.bf16.mxu1 %vm73_vm1, %v4633_v1  ;;  %v5023_v22 = vpop.permute.xlu0 %5022  ;;  %v4836_v32 = vsel %vm15392_vm12, %v4829_v48, %v4831_v49  ;;  %vm15401_vm12 = vmmov %vm15398_vm6 }
 0x36b   :  { %v4853_v37 = vsel %vm73_vm1, %v4836_v32, 0 }
 0x36d   :  { %11318 = vmatmul.mubr.msk.bf16.vlgmr.msra.gmra.mrb[136].mxu0 %vm145_vm2, %v11311_v12  ;;  %v5021_v20 = vpop.permute.xlu1 %5020  ;;  %v11343_v12 = vld [vmem:[%s15381_s1 + $0x8] sm:$0x1]  ;;  %s12641_s1 = smov 94  }
 0x36e   :  { %4702 = vmatpush1.bf16.msra.mxu0 %v4649_v17  ;;  %4733 = vmatprep.mubr.bf16.mxu0 %v15328_v7  ;;  %v5027_v28 = vpop.permute.xlu0 %5026  ;;  %v5031_v30 = vsel %vm15391_vm8, %v5021_v20, %v5023_v22  ;;  %v5030_v38 = vsel %vm15393_vm13, %v5019_v53, %v5021_v20  ;;  %vm15400_vm8 = vmmov %vm15398_vm6  ;;  %vm80_vm13 = vcmask 1042434  }
 0x36f   :  { %11329 = vmatprep.subr.msk.bf16.mxu0 %vm73_vm1, %v4833_v19  ;;  %v5039_v40 = vsel %vm73_vm1, %v5030_v38, 0 }
 0x370   :  { %11322 = vmatmul.mubr.msk.bf16.vlgmr.msra.gmra.mrb[136].mxu1 %vm145_vm2, %v11319_v51 }
 0x371   :  { %4743 = vmatpush1.bf16.msra.mxu1 %v4655_v21  ;;  %4774 = vmatprep.mubr.bf16.mxu1 %v15328_v7  ;;  %v5025_v25 = vpop.permute.xlu1 %5024 }
 0x372   :  { %11331 = vmatprep.subr.msk.bf16.mxu1 %vm73_vm1, %v4835_v23  ;;  %v5217_v36 = vpop.permute.xlu0 %5216  ;;  %v5033_v39 = vsel %vm15394_vm14, %v5025_v25, %v5027_v28  ;;  %v5032_v47 = vsel %vm15395_vm15, %v5023_v22, %v5025_v25  ;;  %vm82_vm15 = vcmask 1043459  }
 0x373   :  { %v5045_v55 = vsel %vm73_vm1, %v5032_v47, 0 }
 0x375   :  { %11324 = vmatmul.mubr.msk.bf16.vlgmr.msra.gmra.mrb[140].mxu0 %vm145_vm2, %v11319_v51  ;;  %v5029_v33 = vpop.permute.xlu1 %5028 }
 0x376   :  { %4859 = vmatpush1.bf16.msra.mxu0 %v4841_v26  ;;  %4890 = vmatprep.mubr.bf16.mxu0 %v15328_v7  ;;  %v5221_v8 = vpop.permute.xlu0 %5220  ;;  %v5034_v56 = vsel %vm15396_vm10, %v5027_v28, %v5029_v33  ;;  %vm84_vm10 = vcmask 1044484  }
 0x377   :  { %11333 = vmatprep.subr.msk.bf16.mxu0 %vm73_vm1, %v4831_v49  ;;  %v5051_v63 = vsel %vm73_vm1, %v5034_v56, 0 }
 0x378   :  { %11326 = vmatmul.mubr.msk.bf16.vlgmr.msra.gmra.mrb[140].mxu1 %vm145_vm2, %v11319_v51 }
 0x379   :  { %4900 = vmatpush1.bf16.msra.mxu1 %v4847_v29  ;;  %4931 = vmatprep.mubr.bf16.mxu1 %v15328_v7  ;;  %v5219_v43 = vpop.permute.xlu1 %5218 }
 0x37a   :  { %11337 = vmatprep.subr.msk.bf16.mxu1 %vm73_vm1, %v5031_v30  ;;  %v5229_v58 = vsel %vm15397_vm11, %v5219_v43, %v5221_v8  ;;  %v5225_v62 = vpop.permute.xlu0 %5224  ;;  %v5228_v1 = vsel %vm15399_vm7, %v5217_v36, %v5219_v43 }
 0x37b   :  { %v5237_v2 = vsel %vm73_vm1, %v5228_v1, 0 }
 0x37d   :  { %11330 = vmatmul.mubr.msk.bf16.vlgmr.msra.gmra.mrb[144].mxu0 %vm145_vm2, %v11327_v34  ;;  %v5223_v60 = vpop.permute.xlu1 %5222 }
 0x37e   :  { %4941 = vmatpush1.bf16.msra.mxu0 %v4853_v37  ;;  %4972 = vmatprep.mubr.bf16.mxu0 %v15328_v7  ;;  %v5231_v0 = vsel %vm15398_vm6, %v5223_v60, %v5225_v62  ;;  %v5230_v3 = vsel %vm15400_vm8, %v5221_v8, %v5223_v60  ;;  %vm86_vm6 = vcmask 373765   ;;  %vm5464_vm8 = vcmask 1040536  }
 0x37f   :  { %11339 = vmatprep.subr.msk.bf16.mxu0 %vm73_vm1, %v5033_v39  ;;  %v5243_v9 = vsel %vm73_vm1, %v5230_v3, 0 }
 0x380   :  { %11332 = vmatmul.mubr.msk.bf16.vlgmr.msra.gmra.mrb[144].mxu1 %vm145_vm2, %v11327_v34 }
 0x381   :  { %5057 = vmatpush1.bf16.msra.mxu1 %v5039_v40  ;;  %5088 = vmatprep.mubr.bf16.mxu1 %v15328_v7  ;;  %v5227_v6 = vpop.permute.xlu1 %5226 }
 0x382   :  { %11341 = vmatprep.subr.msk.bf16.mxu1 %vm73_vm1, %v5029_v33  ;;  %v5232_v10 = vsel %vm15401_vm12, %v5225_v62, %v5227_v6 }
 0x383   :  { %v5249_v48 = vsel %vm73_vm1, %v5232_v10, 0 }
 0x385   :  { %11334 = vmatmul.mubr.msk.bf16.vlgmr.msra.gmra.mrb[148].mxu0 %vm145_vm2, %v11327_v34 }
 0x386   :  { %5098 = vmatpush1.bf16.msra.mxu0 %v5045_v55  ;;  %5129 = vmatprep.mubr.bf16.mxu0 %v15328_v7 }
 0x387   :  { %11345 = vmatprep.subr.msk.bf16.mxu0 %vm73_vm1, %v5229_v58 }
 0x388   :  { %11338 = vmatmul.mubr.msk.bf16.vlgmr.msra.gmra.mrb[148].mxu1 %vm145_vm2, %v11335_v61 }
 0x389   :  { %5139 = vmatpush1.bf16.msra.mxu1 %v5051_v63  ;;  %5170 = vmatprep.mubr.bf16.mxu1 %v15328_v7 }
 0x38a   :  { %11347 = vmatprep.subr.msk.bf16.mxu1 %vm73_vm1, %v5231_v0 }
 0x38d   :  { %11340 = vmatmul.mubr.msk.bf16.vlgmr.msra.gmra.mrb[152].mxu0 %vm145_vm2, %v11335_v61 }
 0x38e   :  { %5255 = vmatpush1.bf16.msra.mxu0 %v5237_v2  ;;  %5286 = vmatprep.mubr.bf16.mxu0 %v15328_v7 }
 0x38f   :  { %11349 = vmatprep.subr.msk.bf16.mxu0 %vm73_vm1, %v5227_v6  ;;  %vm77_vm1 = vcmask 1040384  }
 0x390   :  { %11342 = vmatmul.mubr.msk.bf16.vlgmr.msra.gmra.mrb[152].mxu1 %vm145_vm2, %v11335_v61 }
 0x391   :  { %5296 = vmatpush1.bf16.msra.mxu1 %v5243_v9  ;;  %5327 = vmatprep.mubr.bf16.mxu1 %v15328_v7 }
 0x395   :  { %11346 = vmatmul.mubr.msk.bf16.vlgmr.msra.gmra.mrb[156].mxu0 %vm145_vm2, %v11343_v12 }
 0x396   :  { %5337 = vmatpush1.bf16.msra.mxu0 %v5249_v48  ;;  %5368 = vmatprep.mubr.bf16.mxu0 %v15328_v7 }
 0x398   :  { %11348 = vmatmul.mubr.msk.bf16.vlgmr.msra.gmra.mrb[156].mxu1 %vm145_vm2, %v11343_v12 }
 0x399   :  { %5602 = vmatprep.mubr.bf16.mxu1 %v15328_v7 }
 0x39b   :  { %v2041_v13 = vpop.f32.mrb[52].mxu1 }
 0x39c   :  { %v2043_v14 = vpop.f32.mrb[53].mxu1 }
 0x39d   :  { %11350 = vmatmul.mubr.msk.bf16.vlgmr.msra.gmra.mrb[160].mxu0 %vm145_vm2, %v11343_v12  ;;  %v2045_v15 = vpop.f32.mrb[54].mxu1  ;;  %vm78_vm2 = vcmask 1041409  }
 0x39e   :  { %v2046_v44 = vpop.f32.mrb[55].mxu1  ;;  %5645 = vmatprep.mubr.bf16.mxu0 %v15328_v7  ;;  %vm79_vm14 = vmor %vm78_vm2, %vm77_vm1 }
 0x39f   :  { %vm81_vm11 = vmor %vm80_vm13, %vm79_vm14 }
 0x3a0   :  { %v2082_v50 = vpop.f32.mrb[56].mxu0  ;;  %vm83_vm7 = vmor %vm82_vm15, %vm81_vm11 }
 0x3a1   :  { %v2084_v16 = vpop.f32.mrb[57].mxu0  ;;  %vm85_vm12 = vmor %vm84_vm10, %vm83_vm7 }
 0x3a2   :  { %v2086_v53 = vpop.f32.mrb[58].mxu0  ;;  %vm87_vm5 = vmor %vm86_vm6, %vm85_vm12  ;;  %vm15413_vm12 = vcmask 891904  }
 0x3a3   :  { %v2087_v49 = vpop.f32.mrb[59].mxu0  ;;  %v2123_v17 = vpop.f32.mrb[56].mxu1  ;;  %88 = vst.msk [vmem:[#allocation3] sm:$0x3f] %vm87_vm5, %v15328_v7  ;;  %vm5465_vm4 = vmor %vm78_vm2, %vm5464_vm8  ;;  %vm5548_vm5 = vcmask 15360  }
 0x3a4   :  { %v2125_v18 = vpop.f32.mrb[57].mxu1  ;;  %vm5466_vm3 = vmor %vm80_vm13, %vm5465_vm4 }
 0x3a5   :  { %v2127_v19 = vpop.f32.mrb[58].mxu1  ;;  %vm5467_vm14 = vmor %vm82_vm15, %vm5466_vm3  ;;  %vm5469_vm3 = vcmask 218117  }
 0x3a6   :  { %v2128_v51 = vpop.f32.mrb[59].mxu1  ;;  %vm13768_vm11 = vmor %vm84_vm10, %vm5467_vm14  ;;  %vm15409_vm10 = vcmask 900096  }
 0x3a7   :  { %vm5470_vm4 = vmor %vm5469_vm3, %vm13768_vm11 }
 0x3a8   :  { %v2185_v20 = vpop.f32.mrb[60].mxu0  ;;  %vm15410_vm6 = vmmov %vm15409_vm10 }
 0x3a9   :  { %v2186_v21 = vadd.f32 %v2185_v20, %v2041_v13  ;;  %v2187_v22 = vpop.f32.mrb[61].mxu0  ;;  %vm15411_vm7 = vmmov %vm15410_vm6 }
 0x3aa   :  { %v2188_v23 = vadd.f32 %v2187_v22, %v2043_v14  ;;  %v2189_v24 = vpop.f32.mrb[62].mxu0  ;;  %vm15412_vm8 = vmmov %vm15410_vm6 }
 0x3ab   :  { %v2190_v25 = vpop.f32.mrb[63].mxu0  ;;  %v2226_v26 = vpop.f32.mrb[60].mxu1  ;;  %vm15414_vm14 = vmmov %vm15410_vm6 }
 0x3ac   :  { %v2227_v27 = vadd.f32 %v2226_v26, %v2082_v50  ;;  %v2228_v28 = vpop.f32.mrb[61].mxu1  ;;  %vm15415_vm11 = vmmov %vm15413_vm12 }
 0x3ad   :  { %v2229_v29 = vadd.f32 %v2228_v28, %v2084_v16  ;;  %v2230_v30 = vpop.f32.mrb[62].mxu1  ;;  %vm15416_vm3 = vmmov %vm15415_vm11 }
 0x3ae   :  { %v2231_v32 = vpop.f32.mrb[63].mxu1 }
 0x3b0   :  { %v2267_v33 = vpop.f32.mrb[64].mxu0 }
 0x3b1   :  { %v2268_v34 = vadd.f32 %v2267_v33, %v2123_v17  ;;  %v2269_v36 = vpop.f32.mrb[65].mxu0 }
 0x3b2   :  { %v2270_v37 = vadd.f32 %v2269_v36, %v2125_v18  ;;  %v2271_v38 = vpop.f32.mrb[66].mxu0 }
 0x3b3   :  { %v2272_v39 = vpop.f32.mrb[67].mxu0  ;;  %v2377_v40 = vpop.f32.mrb[64].mxu1 }
 0x3b4   :  { %v2466_v43 = vadd.f32 %v2377_v40, %v2186_v21  ;;  %v2379_v47 = vpop.f32.mrb[65].mxu1 }
 0x3b5   :  { %v2467_v8 = vadd.f32 %v2379_v47, %v2188_v23  ;;  %v2381_v55 = vpop.f32.mrb[66].mxu1 }
 0x3b6   :  { %v2382_v56 = vpop.f32.mrb[67].mxu1 }
 0x3b8   :  { %v2418_v58 = vpop.f32.mrb[68].mxu0 }
 0x3b9   :  { %v2468_v60 = vadd.f32 %v2418_v58, %v2227_v27  ;;  %v2420_v61 = vpop.f32.mrb[69].mxu0 }
 0x3ba   :  { %v2469_v62 = vadd.f32 %v2420_v61, %v2229_v29  ;;  %v2422_v63 = vpop.f32.mrb[70].mxu0 }
 0x3bb   :  { %v2423_v0 = vpop.f32.mrb[71].mxu0  ;;  %v2459_v1 = vpop.f32.mrb[68].mxu1 }
 0x3bc   :  { %v2470_v2 = vadd.f32 %v2459_v1, %v2268_v34  ;;  %v2461_v3 = vpop.f32.mrb[69].mxu1 }
 0x3bd   :  { %v2471_v6 = vadd.f32 %v2461_v3, %v2270_v37  ;;  %v2463_v9 = vpop.f32.mrb[70].mxu1 }
 0x3be   :  { %v2464_v10 = vpop.f32.mrb[71].mxu1 }
 0x3c0   :  { %v2575_v12 = vpop.f32.mrb[72].mxu0 }
 0x3c1   :  { %v2664_v48 = vadd.f32 %v2575_v12, %v2466_v43  ;;  %v2577_v13 = vpop.f32.mrb[73].mxu0 }
 0x3c2   :  { %v2665_v14 = vadd.f32 %v2577_v13, %v2467_v8  ;;  %v2579_v15 = vpop.f32.mrb[74].mxu0 }
 0x3c3   :  { %v2580_v44 = vpop.f32.mrb[75].mxu0  ;;  %v2616_v50 = vpop.f32.mrb[72].mxu1 }
 0x3c4   :  { %v2666_v16 = vadd.f32 %v2616_v50, %v2468_v60  ;;  %v2618_v53 = vpop.f32.mrb[73].mxu1 }
 0x3c5   :  { %v2667_v49 = vadd.f32 %v2618_v53, %v2469_v62  ;;  %v2620_v17 = vpop.f32.mrb[74].mxu1 }
 0x3c6   :  { %v2621_v18 = vpop.f32.mrb[75].mxu1 }
 0x3c8   :  { %v2657_v19 = vpop.f32.mrb[76].mxu0 }
 0x3c9   :  { %v2668_v51 = vadd.f32 %v2657_v19, %v2470_v2  ;;  %v2659_v20 = vpop.f32.mrb[77].mxu0 }
 0x3ca   :  { %v2669_v21 = vadd.f32 %v2659_v20, %v2471_v6  ;;  %v2661_v22 = vpop.f32.mrb[78].mxu0 }
 0x3cb   :  { %v2662_v23 = vpop.f32.mrb[79].mxu0  ;;  %v2773_v24 = vpop.f32.mrb[76].mxu1 }
 0x3cc   :  { %v2862_v25 = vadd.f32 %v2773_v24, %v2664_v48  ;;  %v2775_v26 = vpop.f32.mrb[77].mxu1 }
 0x3cd   :  { %v2863_v27 = vadd.f32 %v2775_v26, %v2665_v14  ;;  %v2777_v28 = vpop.f32.mrb[78].mxu1 }
 0x3ce   :  { %v2778_v29 = vpop.f32.mrb[79].mxu1 }
 0x3d0   :  { %v2814_v30 = vpop.f32.mrb[80].mxu0 }
 0x3d1   :  { %v2864_v32 = vadd.f32 %v2814_v30, %v2666_v16  ;;  %v2816_v33 = vpop.f32.mrb[81].mxu0 }
 0x3d2   :  { %v2865_v34 = vadd.f32 %v2816_v33, %v2667_v49  ;;  %v2818_v36 = vpop.f32.mrb[82].mxu0 }
 0x3d3   :  { %v2819_v37 = vpop.f32.mrb[83].mxu0  ;;  %v2855_v38 = vpop.f32.mrb[80].mxu1 }
 0x3d4   :  { %v2866_v39 = vadd.f32 %v2855_v38, %v2668_v51  ;;  %v2857_v40 = vpop.f32.mrb[81].mxu1 }
 0x3d5   :  { %v2867_v43 = vadd.f32 %v2857_v40, %v2669_v21  ;;  %v2859_v47 = vpop.f32.mrb[82].mxu1 }
 0x3d6   :  { %v2860_v8 = vpop.f32.mrb[83].mxu1 }
 0x3d8   :  { %v2971_v55 = vpop.f32.mrb[84].mxu0 }
 0x3d9   :  { %v3060_v56 = vadd.f32 %v2971_v55, %v2862_v25  ;;  %v2973_v58 = vpop.f32.mrb[85].mxu0 }
 0x3da   :  { %v3061_v60 = vadd.f32 %v2973_v58, %v2863_v27  ;;  %v2975_v61 = vpop.f32.mrb[86].mxu0 }
 0x3db   :  { %v2976_v62 = vpop.f32.mrb[87].mxu0  ;;  %v3012_v63 = vpop.f32.mrb[84].mxu1 }
 0x3dc   :  { %v3062_v0 = vadd.f32 %v3012_v63, %v2864_v32  ;;  %v3014_v1 = vpop.f32.mrb[85].mxu1 }
 0x3dd   :  { %v3063_v2 = vadd.f32 %v3014_v1, %v2865_v34  ;;  %v3016_v3 = vpop.f32.mrb[86].mxu1 }
 0x3de   :  { %v3017_v6 = vpop.f32.mrb[87].mxu1 }
 0x3e0   :  { %v3053_v9 = vpop.f32.mrb[88].mxu0 }
 0x3e1   :  { %v3064_v10 = vadd.f32 %v3053_v9, %v2866_v39  ;;  %v3055_v12 = vpop.f32.mrb[89].mxu0 }
 0x3e2   :  { %v3065_v48 = vadd.f32 %v3055_v12, %v2867_v43  ;;  %v3057_v13 = vpop.f32.mrb[90].mxu0 }
 0x3e3   :  { %v3058_v14 = vpop.f32.mrb[91].mxu0  ;;  %v3169_v15 = vpop.f32.mrb[88].mxu1 }
 0x3e4   :  { %v3258_v44 = vadd.f32 %v3169_v15, %v3060_v56  ;;  %v3171_v50 = vpop.f32.mrb[89].mxu1 }
 0x3e5   :  { %v3259_v16 = vadd.f32 %v3171_v50, %v3061_v60  ;;  %v3173_v53 = vpop.f32.mrb[90].mxu1 }
 0x3e6   :  { %v3174_v49 = vpop.f32.mrb[91].mxu1 }
 0x3e8   :  { %v3210_v17 = vpop.f32.mrb[92].mxu0 }
 0x3e9   :  { %v3260_v18 = vadd.f32 %v3210_v17, %v3062_v0  ;;  %v3212_v19 = vpop.f32.mrb[93].mxu0 }
 0x3ea   :  { %v3261_v51 = vadd.f32 %v3212_v19, %v3063_v2  ;;  %v3214_v20 = vpop.f32.mrb[94].mxu0 }
 0x3eb   :  { %v3215_v21 = vpop.f32.mrb[95].mxu0  ;;  %v3251_v22 = vpop.f32.mrb[92].mxu1 }
 0x3ec   :  { %v3262_v23 = vadd.f32 %v3251_v22, %v3064_v10  ;;  %v3253_v24 = vpop.f32.mrb[93].mxu1 }
 0x3ed   :  { %v3263_v25 = vadd.f32 %v3253_v24, %v3065_v48  ;;  %v3255_v26 = vpop.f32.mrb[94].mxu1 }
 0x3ee   :  { %v3256_v27 = vpop.f32.mrb[95].mxu1 }
 0x3f0   :  { %v3367_v28 = vpop.f32.mrb[96].mxu0 }
 0x3f1   :  { %v3456_v29 = vadd.f32 %v3367_v28, %v3258_v44  ;;  %v3369_v30 = vpop.f32.mrb[97].mxu0 }
 0x3f2   :  { %v3457_v32 = vadd.f32 %v3369_v30, %v3259_v16  ;;  %v3371_v33 = vpop.f32.mrb[98].mxu0 }
 0x3f3   :  { %v3372_v34 = vpop.f32.mrb[99].mxu0  ;;  %v3408_v36 = vpop.f32.mrb[96].mxu1 }
 0x3f4   :  { %v3458_v37 = vadd.f32 %v3408_v36, %v3260_v18  ;;  %v3410_v38 = vpop.f32.mrb[97].mxu1 }
 0x3f5   :  { %v3459_v39 = vadd.f32 %v3410_v38, %v3261_v51  ;;  %v3412_v40 = vpop.f32.mrb[98].mxu1 }
 0x3f6   :  { %v3413_v43 = vpop.f32.mrb[99].mxu1 }
 0x3f8   :  { %v3449_v47 = vpop.f32.mrb[100].mxu0 }
 0x3f9   :  { %v3460_v8 = vadd.f32 %v3449_v47, %v3262_v23  ;;  %v3451_v55 = vpop.f32.mrb[101].mxu0 }
 0x3fa   :  { %v3461_v56 = vadd.f32 %v3451_v55, %v3263_v25  ;;  %v3453_v58 = vpop.f32.mrb[102].mxu0 }
 0x3fb   :  { %v3454_v60 = vpop.f32.mrb[103].mxu0  ;;  %v3565_v61 = vpop.f32.mrb[100].mxu1 }
 0x3fc   :  { %v13746_v62 = vadd.f32 %v3565_v61, %v3456_v29  ;;  %v3567_v63 = vpop.f32.mrb[101].mxu1 }
 0x3fd   :  { %v13748_v0 = vadd.f32 %v3567_v63, %v3457_v32  ;;  %v3569_v1 = vpop.f32.mrb[102].mxu1 }
 0x3fe   :  { %v3570_v2 = vpop.f32.mrb[103].mxu1 }
 0x400   :  { %v3606_v3 = vpop.f32.mrb[104].mxu0 }
 0x401   :  { %v13750_v6 = vadd.f32 %v3606_v3, %v3458_v37  ;;  %v3608_v9 = vpop.f32.mrb[105].mxu0 }
 0x402   :  { %v13752_v10 = vadd.f32 %v3608_v9, %v3459_v39  ;;  %v3610_v12 = vpop.f32.mrb[106].mxu0 }
 0x403   :  { %v3611_v48 = vpop.f32.mrb[107].mxu0  ;;  %v3647_v13 = vpop.f32.mrb[104].mxu1 }
 0x404   :  { %v13756_v14 = vadd.f32 %v3647_v13, %v3460_v8  ;;  %v3649_v15 = vpop.f32.mrb[105].mxu1 }
 0x405   :  { %v13759_v44 = vadd.f32 %v3649_v15, %v3461_v56  ;;  %v3651_v50 = vpop.f32.mrb[106].mxu1 }
 0x406   :  { %v3652_v16 = vpop.f32.mrb[107].mxu1 }
 0x408   :  { %v3764_v53 = vpop.f32.mrb[108].mxu0 }
 0x409   :  { %v3766_v49 = vpop.f32.mrb[109].mxu0 }
 0x40a   :  { %v3768_v17 = vpop.f32.mrb[110].mxu0 }
 0x40b   :  { %v3769_v18 = vpop.f32.mrb[111].mxu0  ;;  %v3805_v19 = vpop.f32.mrb[108].mxu1 }
 0x40c   :  { %v3807_v20 = vpop.f32.mrb[109].mxu1 }
 0x40d   :  { %v3809_v21 = vpop.f32.mrb[110].mxu1 }
 0x40e   :  { %v3810_v22 = vpop.f32.mrb[111].mxu1 }
 0x410   :  { %v3846_v23 = vpop.f32.mrb[112].mxu0 }
 0x411   :  { %v3848_v24 = vpop.f32.mrb[113].mxu0 }
 0x412   :  { %v3850_v25 = vpop.f32.mrb[114].mxu0 }
 0x413   :  { %v3851_v26 = vpop.f32.mrb[115].mxu0  ;;  %v3908_v27 = vpop.f32.mrb[112].mxu1 }
 0x414   :  { %v3909_v28 = vadd.f32 %v3908_v27, %v3764_v53  ;;  %v3910_v29 = vpop.f32.mrb[113].mxu1 }
 0x415   :  { %v3911_v30 = vadd.f32 %v3910_v29, %v3766_v49  ;;  %v3912_v32 = vpop.f32.mrb[114].mxu1 }
 0x416   :  { %v3913_v33 = vpop.f32.mrb[115].mxu1 }
 0x418   :  { %v3949_v34 = vpop.f32.mrb[116].mxu0 }
 0x419   :  { %v3950_v36 = vadd.f32 %v3949_v34, %v3805_v19  ;;  %v3951_v37 = vpop.f32.mrb[117].mxu0 }
 0x41a   :  { %v3952_v38 = vadd.f32 %v3951_v37, %v3807_v20  ;;  %v3953_v39 = vpop.f32.mrb[118].mxu0 }
 0x41b   :  { %v3954_v40 = vpop.f32.mrb[119].mxu0  ;;  %v3990_v43 = vpop.f32.mrb[116].mxu1 }
 0x41c   :  { %v3991_v47 = vadd.f32 %v3990_v43, %v3846_v23  ;;  %v3992_v8 = vpop.f32.mrb[117].mxu1 }
 0x41d   :  { %v3993_v55 = vadd.f32 %v3992_v8, %v3848_v24  ;;  %v3994_v56 = vpop.f32.mrb[118].mxu1 }
 0x41e   :  { %v3995_v58 = vpop.f32.mrb[119].mxu1 }
 0x420   :  { %v4100_v60 = vpop.f32.mrb[120].mxu0 }
 0x421   :  { %v4189_v61 = vadd.f32 %v4100_v60, %v3909_v28  ;;  %v4102_v63 = vpop.f32.mrb[121].mxu0 }
 0x422   :  { %v4190_v1 = vadd.f32 %v4102_v63, %v3911_v30  ;;  %v4104_v2 = vpop.f32.mrb[122].mxu0 }
 0x423   :  { %v4105_v3 = vpop.f32.mrb[123].mxu0  ;;  %v4141_v9 = vpop.f32.mrb[120].mxu1 }
 0x424   :  { %v4191_v12 = vadd.f32 %v4141_v9, %v3950_v36  ;;  %v4143_v48 = vpop.f32.mrb[121].mxu1 }
 0x425   :  { %v4192_v13 = vadd.f32 %v4143_v48, %v3952_v38  ;;  %v4145_v15 = vpop.f32.mrb[122].mxu1 }
 0x426   :  { %v4146_v50 = vpop.f32.mrb[123].mxu1 }
 0x428   :  { %v4182_v16 = vpop.f32.mrb[124].mxu0 }
 0x429   :  { %v4193_v53 = vadd.f32 %v4182_v16, %v3991_v47  ;;  %v4184_v49 = vpop.f32.mrb[125].mxu0 }
 0x42a   :  { %v4194_v17 = vadd.f32 %v4184_v49, %v3993_v55  ;;  %v4186_v18 = vpop.f32.mrb[126].mxu0 }
 0x42b   :  { %v4187_v19 = vpop.f32.mrb[127].mxu0  ;;  %v4298_v20 = vpop.f32.mrb[124].mxu1 }
 0x42c   :  { %v4387_v21 = vadd.f32 %v4298_v20, %v4189_v61  ;;  %v4300_v22 = vpop.f32.mrb[125].mxu1 }
 0x42d   :  { %v4388_v23 = vadd.f32 %v4300_v22, %v4190_v1  ;;  %v4302_v24 = vpop.f32.mrb[126].mxu1 }
 0x42e   :  { %v4303_v25 = vpop.f32.mrb[127].mxu1 }
 0x430   :  { %v4339_v26 = vpop.f32.mrb[128].mxu0 }
 0x431   :  { %v4389_v27 = vadd.f32 %v4339_v26, %v4191_v12  ;;  %v4341_v28 = vpop.f32.mrb[129].mxu0 }
 0x432   :  { %v4390_v29 = vadd.f32 %v4341_v28, %v4192_v13  ;;  %v4343_v30 = vpop.f32.mrb[130].mxu0 }
 0x433   :  { %v4344_v32 = vpop.f32.mrb[131].mxu0  ;;  %v4380_v33 = vpop.f32.mrb[128].mxu1 }
 0x434   :  { %v4391_v34 = vadd.f32 %v4380_v33, %v4193_v53  ;;  %v4382_v36 = vpop.f32.mrb[129].mxu1 }
 0x435   :  { %v4392_v37 = vadd.f32 %v4382_v36, %v4194_v17  ;;  %v4384_v38 = vpop.f32.mrb[130].mxu1 }
 0x436   :  { %v4385_v39 = vpop.f32.mrb[131].mxu1 }
 0x438   :  { %v4496_v40 = vpop.f32.mrb[132].mxu0 }
 0x439   :  { %v4585_v43 = vadd.f32 %v4496_v40, %v4387_v21  ;;  %v4498_v47 = vpop.f32.mrb[133].mxu0 }
 0x43a   :  { %v4586_v8 = vadd.f32 %v4498_v47, %v4388_v23  ;;  %v4500_v55 = vpop.f32.mrb[134].mxu0 }
 0x43b   :  { %v4501_v56 = vpop.f32.mrb[135].mxu0  ;;  %v4537_v58 = vpop.f32.mrb[132].mxu1 }
 0x43c   :  { %v4587_v60 = vadd.f32 %v4537_v58, %v4389_v27  ;;  %v4539_v61 = vpop.f32.mrb[133].mxu1 }
 0x43d   :  { %v4588_v63 = vadd.f32 %v4539_v61, %v4390_v29  ;;  %v4541_v1 = vpop.f32.mrb[134].mxu1 }
 0x43e   :  { %v4542_v2 = vpop.f32.mrb[135].mxu1 }
 0x440   :  { %v4578_v3 = vpop.f32.mrb[136].mxu0 }
 0x441   :  { %v4589_v9 = vadd.f32 %v4578_v3, %v4391_v34  ;;  %v4580_v12 = vpop.f32.mrb[137].mxu0 }
 0x442   :  { %v4590_v48 = vadd.f32 %v4580_v12, %v4392_v37  ;;  %v4582_v13 = vpop.f32.mrb[138].mxu0 }
 0x443   :  { %v4583_v15 = vpop.f32.mrb[139].mxu0  ;;  %v4694_v50 = vpop.f32.mrb[136].mxu1 }
 0x444   :  { %v4783_v16 = vadd.f32 %v4694_v50, %v4585_v43  ;;  %v4696_v53 = vpop.f32.mrb[137].mxu1 }
 0x445   :  { %v4784_v49 = vadd.f32 %v4696_v53, %v4586_v8  ;;  %v4698_v17 = vpop.f32.mrb[138].mxu1 }
 0x446   :  { %v4699_v18 = vpop.f32.mrb[139].mxu1 }
 0x448   :  { %v4735_v19 = vpop.f32.mrb[140].mxu0 }
 0x449   :  { %v4785_v20 = vadd.f32 %v4735_v19, %v4587_v60  ;;  %v4737_v21 = vpop.f32.mrb[141].mxu0 }
 0x44a   :  { %v4786_v22 = vadd.f32 %v4737_v21, %v4588_v63  ;;  %v4739_v23 = vpop.f32.mrb[142].mxu0 }
 0x44b   :  { %v4740_v24 = vpop.f32.mrb[143].mxu0  ;;  %v4776_v25 = vpop.f32.mrb[140].mxu1 }
 0x44c   :  { %v4787_v26 = vadd.f32 %v4776_v25, %v4589_v9  ;;  %v4778_v27 = vpop.f32.mrb[141].mxu1 }
 0x44d   :  { %v4788_v28 = vadd.f32 %v4778_v27, %v4590_v48  ;;  %v4780_v29 = vpop.f32.mrb[142].mxu1 }
 0x44e   :  { %v4781_v30 = vpop.f32.mrb[143].mxu1  ;;  %v12624_v29 = vmov 1966171168  }
 0x44f   :  { %v5423_v30 = vunpack.c.l.s4 %v12624_v29 }
 0x450   :  { %v4892_v32 = vpop.f32.mrb[144].mxu0 }
 0x451   :  { %v4981_v33 = vadd.f32 %v4892_v32, %v4783_v16  ;;  %v4894_v34 = vpop.f32.mrb[145].mxu0 }
 0x452   :  { %v4982_v36 = vadd.f32 %v4894_v34, %v4784_v49  ;;  %v4896_v37 = vpop.f32.mrb[146].mxu0 }
 0x453   :  { %v4897_v38 = vpop.f32.mrb[147].mxu0  ;;  %v4933_v39 = vpop.f32.mrb[144].mxu1 }
 0x454   :  { %v4983_v40 = vadd.f32 %v4933_v39, %v4785_v20  ;;  %v4935_v43 = vpop.f32.mrb[145].mxu1 }
 0x455   :  { %v4984_v47 = vadd.f32 %v4935_v43, %v4786_v22  ;;  %v4937_v8 = vpop.f32.mrb[146].mxu1 }
 0x456   :  { %v4938_v55 = vpop.f32.mrb[147].mxu1 }
 0x458   :  { %v4974_v56 = vpop.f32.mrb[148].mxu0 }
 0x459   :  { %v4985_v58 = vadd.f32 %v4974_v56, %v4787_v26  ;;  %v4976_v60 = vpop.f32.mrb[149].mxu0 }
 0x45a   :  { %v4986_v61 = vadd.f32 %v4976_v60, %v4788_v28  ;;  %v4978_v63 = vpop.f32.mrb[150].mxu0 }
 0x45b   :  { %v4979_v1 = vpop.f32.mrb[151].mxu0  ;;  %v5090_v2 = vpop.f32.mrb[148].mxu1 }
 0x45c   :  { %v5179_v3 = vadd.f32 %v5090_v2, %v4981_v33  ;;  %v5092_v9 = vpop.f32.mrb[149].mxu1 }
 0x45d   :  { %v5180_v12 = vadd.f32 %v5092_v9, %v4982_v36  ;;  %v5094_v48 = vpop.f32.mrb[150].mxu1  ;;  %v5393_v36 = vpop.permute.xlu0 %5392 }
 0x45e   :  { %v5095_v13 = vpop.f32.mrb[151].mxu1 }
 0x460   :  { %v5131_v15 = vpop.f32.mrb[152].mxu0 }
 0x461   :  { %v5181_v50 = vadd.f32 %v5131_v15, %v4983_v40  ;;  %v5133_v16 = vpop.f32.mrb[153].mxu0 }
 0x462   :  { %v5182_v53 = vadd.f32 %v5133_v16, %v4984_v47  ;;  %v5135_v49 = vpop.f32.mrb[154].mxu0 }
 0x463   :  { %v5136_v17 = vpop.f32.mrb[155].mxu0  ;;  %v5172_v18 = vpop.f32.mrb[152].mxu1 }
 0x464   :  { %v5183_v19 = vadd.f32 %v5172_v18, %v4985_v58  ;;  %v5174_v20 = vpop.f32.mrb[153].mxu1  ;;  %v5424_v58 = vunpack.c.0.s8 %v5423_v30 }
 0x465   :  { %v5184_v21 = vadd.f32 %v5174_v20, %v4986_v61  ;;  %v5176_v22 = vpop.f32.mrb[154].mxu1 }
 0x466   :  { %v5177_v23 = vpop.f32.mrb[155].mxu1 }
 0x468   :  { %v5288_v24 = vpop.f32.mrb[156].mxu0 }
 0x469   :  { %v5377_v25 = vadd.f32 %v5288_v24, %v5179_v3  ;;  %v5290_v26 = vpop.f32.mrb[157].mxu0 }
 0x46a   :  { %v5378_v27 = vadd.f32 %v5290_v26, %v5180_v12  ;;  %v5292_v28 = vpop.f32.mrb[158].mxu0 }
 0x46b   :  { %v5383_v32 = vadd.f32 %v5377_v25, %v13746_v62  ;;  %v5293_v33 = vpop.f32.mrb[159].mxu0  ;;  %v5329_v34 = vpop.f32.mrb[156].mxu1 }
 0x46c   :  { %v5384_v37 = vadd.f32 %v5378_v27, %v13748_v0  ;;  %v5379_v38 = vadd.f32 %v5329_v34, %v5181_v50  ;;  %v5331_v39 = vpop.f32.mrb[157].mxu1 }
 0x46d   :  { %v5395_v40 = vadd.f32 %v5393_v36, %v5383_v32  ;;  %v5380_v43 = vadd.f32 %v5331_v39, %v5182_v53  ;;  %v5333_v47 = vpop.f32.mrb[158].mxu1 }
 0x46e   :  { %v5396_v8 = vadd.f32 %v5393_v36, %v5384_v37  ;;  %v5385_v55 = vadd.f32 %v5379_v38, %v13750_v6  ;;  %v5334_v56 = vpop.f32.mrb[159].mxu1  ;;  %v13780_v6 = vsub.s32 %v5424_v58, %v12780_v4 }
 0x46f   :  { %v5401_v60 = vmul.f32 %v5395_v40, %v13101_v42  ;;  %v5386_v61 = vadd.f32 %v5380_v43, %v13752_v10 }
 0x470   :  { %v5402_v62 = vmul.f32 %v5396_v8, %v13106_v46  ;;  %v5397_v63 = vadd.f32 %v5393_v36, %v5385_v55  ;;  %v5370_v1 = vpop.f32.mrb[160].mxu0 }
 0x471   :  { %v5398_v2 = vadd.f32 %v5393_v36, %v5386_v61  ;;  %v5381_v0 = vadd.f32 %v5370_v1, %v5183_v19  ;;  %v5372_v3 = vpop.f32.mrb[161].mxu0 }
 0x472   :  { %v11351_v9 = vpack.c.bf16 %v5402_v62, %v5401_v60  ;;  %v5403_v12 = vmul.f32 %v5397_v63, %v13110_v52  ;;  %v5382_v48 = vadd.f32 %v5372_v3, %v5184_v21  ;;  %v5374_v13 = vpop.f32.mrb[162].mxu0 }
 0x473   :  { %v5404_v15 = vmul.f32 %v5398_v2, %v13116_v57  ;;  %v5387_v42 = vadd.f32 %v5381_v0, %v13756_v14  ;;  %v5375_v10 = vpop.f32.mrb[163].mxu0 }
 0x474   :  { %v5388_v46 = vadd.f32 %v5382_v48, %v13759_v44  ;;  %v5428_v49 = vrot.slane %v11351_v9, %v13780_v6 }
 0x475   :  { %v11352_v50 = vpack.c.bf16 %v5404_v15, %v5403_v12  ;;  %v5399_v16 = vadd.f32 %v5393_v36, %v5387_v42 }
 0x476   :  { %v5400_v53 = vadd.f32 %v5393_v36, %v5388_v46 }
 0x477   :  { %v5435_v17 = vrot.slane %v11352_v50, %v13780_v6  ;;  %v5405_v52 = vmul.f32 %v5399_v16, %v13123_v5 }
 0x478   :  { %v5406_v18 = vmul.f32 %v5400_v53, %v13129_v11 }
 0x479   :  { %v5443_v19 = vcombine.low %v5428_v49, %v5435_v17 }
 0x47a   :  { %v11353_v20 = vpack.c.bf16 %v5406_v18, %v5405_v52 }
 0x47b   :  { %v5450_v14 = vrot.slane %v5443_v19, %v13780_v6 }
 0x47c   :  { %v5442_v57 = vrot.slane %v11353_v20, %v13780_v6 }
 0x47e   :  { %v5457_v21 = vrot.slane %v5442_v57, %v13780_v6 }
 0x480   :  { %v5458_v44 = vcombine.low %v5450_v14, %v5457_v21 }
 0x482   :  { %5459 = vrot.lane.b32.xlu1 %v5458_v44, %s12623_s28  ;;  %s12640_s28 = smov 103  }
 0x4f4   :  { %v5460_v22 = vpop.permute.xlu1 %5459 }
 0x4f5   :  { %v5461_v23 = vrot.slane %v5460_v22, 7 }
 0x4f7   :  { %v5462_v5 = vsel %vm1919_vm9, %v5461_v23, %v5460_v22 }
 0x4f8   :  { %5471 = vst.msk [vmem:[#allocation3] sm:$0x3f] %vm5470_vm4, %v5462_v5  ;;  %vm15417_vm4 = vcmask 883712  }
 0x4ff   :  { %v5474_v11 = vld [vmem:[#allocation3] sm:$0x3f] }
 0x500   :  { %v5491_v24 = vrot.slane %v5474_v11, %v13780_v6  ;;  %v5484_v25 = vcombine.high %v5474_v11, %v5474_v11  ;;  %v5857_v29 = vld [vmem:[#allocation3] sm:$0x3f] }
 0x501   :  { %v5871_v33 = vrot.slane %v5857_v29, %v13780_v6  ;;  %v5864_v38 = vcombine.high %v5857_v29, %v5857_v29  ;;  %v6093_v47 = vld [vmem:[#allocation3] sm:$0x3f] }
 0x502   :  { %v13798_v26 = vrot.slane %v5491_v24, %v13780_v6  ;;  %v5499_v27 = vcombine.high %v5491_v24, %v5491_v24  ;;  %v5498_v28 = vrot.slane %v5484_v25, %v13780_v6  ;;  %v6107_v58 = vrot.slane %v6093_v47, %v13780_v6  ;;  %v6329_v3 = vld [vmem:[#allocation3] sm:$0x3f] }
 0x503   :  { %v5879_v37 = vcombine.high %v5871_v33, %v5871_v33  ;;  %v5887_v39 = vrot.slane %v5871_v33, %v13780_v6  ;;  %v5878_v43 = vrot.slane %v5864_v38, %v13780_v6  ;;  %v6100_v61 = vcombine.high %v6093_v47, %v6093_v47  ;;  %v6565_v49 = vld [vmem:[#allocation3] sm:$0x3f] }
 0x504   :  { %5531 = vrot.lane.b32.xlu0 %v13798_v26, %s12615_s30  ;;  %v13804_v51 = vrot.slane %v5499_v27, %v13780_v6  ;;  %v13810_v30 = vcombine.high %v13798_v26, %v13798_v26  ;;  %v5500_v32 = vcombine.high %v5498_v28, %v5498_v28  ;;  %v13816_v34 = vrot.slane %v5498_v28, %v13780_v6  ;;  %v6801_v11 = vld [vmem:[#allocation3] sm:$0x3f] }
 0x505   :  { %v5901_v40 = vrot.slane %v5879_v37, %v13780_v6  ;;  %v5909_v8 = vcombine.high %v5887_v39, %v5887_v39  ;;  %v5880_v56 = vcombine.high %v5878_v43, %v5878_v43  ;;  %v5894_v60 = vrot.slane %v5878_v43, %v13780_v6  ;;  %v7037_v43 = vld [vmem:[#allocation3] sm:$0x3f] }
 0x506   :  { %5533 = vrot.lane.b32.xlu1 %v13804_v51, %s12615_s30  ;;  %v13821_v36 = vrot.slane %v5500_v32, %v13780_v6  ;;  %v13833_v55 = vcombine.high %v13804_v51, %v13804_v51  ;;  %v6115_v63 = vcombine.high %v6107_v58, %v6107_v58  ;;  %v6123_v1 = vrot.slane %v6107_v58, %v13780_v6 }
 0x507   :  { %v5908_v62 = vrot.slane %v5880_v56, %v13780_v6  ;;  %v6114_v2 = vrot.slane %v6100_v61, %v13780_v6  ;;  %v6343_v13 = vrot.slane %v6329_v3, %v13780_v6  ;;  %v5910_v42 = vcombine.high %v5901_v40, %v5901_v40 }
 0x508   :  { %5535 = vrot.lane.b32.xlu0 %v13810_v30, %s12615_s30  ;;  %v6137_v0 = vrot.slane %v6115_v63, %v13780_v6  ;;  %v6145_v9 = vcombine.high %v6123_v1, %v6123_v1  ;;  %v6336_v46 = vcombine.high %v6329_v3, %v6329_v3  ;;  %v6579_v19 = vrot.slane %v6565_v49, %v13780_v6  ;;  %v7273_v3 = vld [vmem:[#allocation3] sm:$0x3f] }
 0x509   :  { %v6116_v12 = vcombine.high %v6114_v2, %v6114_v2  ;;  %v6130_v48 = vrot.slane %v6114_v2, %v13780_v6  ;;  %v6351_v10 = vcombine.high %v6343_v13, %v6343_v13  ;;  %v6359_v50 = vrot.slane %v6343_v13, %v13780_v6 }
 0x50a   :  { %5539 = vrot.lane.b32.xlu1 %v13816_v34, %s12615_s30  ;;  %v6350_v53 = vrot.slane %v6336_v46, %v13780_v6  ;;  %v6146_v52 = vcombine.high %v6137_v0, %v6137_v0  ;;  %v6587_v14 = vcombine.high %v6579_v19, %v6579_v19  ;;  %v6572_v21 = vcombine.high %v6565_v49, %v6565_v49 }
 0x50b   :  { %v6144_v15 = vrot.slane %v6116_v12, %v13780_v6  ;;  %v6373_v16 = vrot.slane %v6351_v10, %v13780_v6  ;;  %v6381_v17 = vcombine.high %v6359_v50, %v6359_v50  ;;  %v6595_v44 = vrot.slane %v6579_v19, %v13780_v6 }
 0x50c   :  { %5541 = vrot.lane.b32.xlu0 %v13821_v36, %s12615_s30  ;;  %v6352_v18 = vcombine.high %v6350_v53, %v6350_v53  ;;  %v6366_v20 = vrot.slane %v6350_v53, %v13780_v6  ;;  %v6609_v22 = vrot.slane %v6587_v14, %v13780_v6  ;;  %v6586_v23 = vrot.slane %v6572_v21, %v13780_v6 }
 0x50d   :  { %v6617_v5 = vcombine.high %v6595_v44, %v6595_v44  ;;  %v6382_v24 = vcombine.high %v6373_v16, %v6373_v16  ;;  %v6815_v28 = vrot.slane %v6801_v11, %v13780_v6  ;;  %v6808_v32 = vcombine.high %v6801_v11, %v6801_v11 }
 0x50e   :  { %5911 = vrot.lane.b32.xlu1 %v5887_v39, %s12616_s23  ;;  %v6380_v57 = vrot.slane %v6352_v18, %v13780_v6  ;;  %v6588_v25 = vcombine.high %v6586_v23, %v6586_v23  ;;  %v6602_v27 = vrot.slane %v6586_v23, %v13780_v6  ;;  %v6618_v33 = vcombine.high %v6609_v22, %v6609_v22 }
 0x50f   :  { %v6823_v37 = vcombine.high %v6815_v28, %v6815_v28  ;;  %v6831_v38 = vrot.slane %v6815_v28, %v13780_v6  ;;  %v6822_v39 = vrot.slane %v6808_v32, %v13780_v6  ;;  %v7051_v58 = vrot.slane %v7037_v43, %v13780_v6 }
 0x510   :  { %5913 = vrot.lane.b32.xlu0 %v5901_v40, %s12616_s23  ;;  %v6616_v29 = vrot.slane %v6588_v25, %v13780_v6  ;;  %v7044_v63 = vcombine.high %v7037_v43, %v7037_v43  ;;  %v7287_v13 = vrot.slane %v7273_v3, %v13780_v6  ;;  %v7280_v46 = vcombine.high %v7273_v3, %v7273_v3 }
 0x511   :  { %v6845_v40 = vrot.slane %v6823_v37, %v13780_v6  ;;  %v6853_v47 = vcombine.high %v6831_v38, %v6831_v38  ;;  %v6838_v56 = vrot.slane %v6822_v39, %v13780_v6 }
 0x512   :  { %5915 = vrot.lane.b32.xlu1 %v5909_v8, %s12616_s23  ;;  %v6824_v8 = vcombine.high %v6822_v39, %v6822_v39  ;;  %v7295_v10 = vcombine.high %v7287_v13, %v7287_v13  ;;  %v7294_v53 = vrot.slane %v7280_v46, %v13780_v6  ;;  %v5708_v39 = vsel %vm77_vm1, %v13798_v26, 0 }
 0x513   :  { %v6854_v61 = vcombine.high %v6845_v40, %v6845_v40  ;;  %v5714_v26 = vsel %vm77_vm1, %v13810_v30, 0 }
 0x514   :  { %5537 = vrot.lane.b32.xlu0 %v13833_v55, %s12615_s30  ;;  %v7310_v18 = vrot.slane %v7294_v53, %v13780_v6 }
 0x516   :  { %5919 = vrot.lane.b32.xlu1 %v5894_v60, %s12616_s23  ;;  %v6852_v60 = vrot.slane %v6824_v8, %v13780_v6  ;;  %v12522_v8 = vld [vmem:[%s15301_s6] sm:$0xff]  }
 0x518   :  { %5921 = vrot.lane.b32.xlu0 %v5908_v62, %s12616_s23  ;;  %v7059_v62 = vcombine.high %v7051_v58, %v7051_v58 }
 0x51a   :  { %6147 = vrot.lane.b32.xlu1 %v6123_v1, %s12617_s2  ;;  %v7067_v1 = vrot.slane %v7051_v58, %v13780_v6  ;;  %v7081_v2 = vrot.slane %v7059_v62, %v13780_v6 }
 0x51c   :  { %6149 = vrot.lane.b32.xlu0 %v6137_v0, %s12617_s2  ;;  %v7058_v0 = vrot.slane %v7044_v63, %v13780_v6  ;;  %v7090_v12 = vcombine.high %v7081_v2, %v7081_v2 }
 0x51e   :  { %6151 = vrot.lane.b32.xlu1 %v6145_v9, %s12617_s2  ;;  %v7089_v9 = vcombine.high %v7067_v1, %v7067_v1 }
 0x520   :  { %6155 = vrot.lane.b32.xlu0 %v6130_v48, %s12617_s2  ;;  %v7060_v48 = vcombine.high %v7058_v0, %v7058_v0 }
 0x522   :  { %6157 = vrot.lane.b32.xlu1 %v6144_v15, %s12617_s2  ;;  %v7074_v15 = vrot.slane %v7058_v0, %v13780_v6 }
 0x524   :  { %5917 = vrot.lane.b32.xlu0 %v5910_v42, %s12616_s23  ;;  %v7088_v42 = vrot.slane %v7060_v48, %v13780_v6 }
 0x526   :  { %6383 = vrot.lane.b32.xlu1 %v6359_v50, %s12618_s5  ;;  %v7303_v50 = vrot.slane %v7287_v13, %v13780_v6 }
 0x528   :  { %6385 = vrot.lane.b32.xlu0 %v6373_v16, %s12618_s5  ;;  %v7317_v16 = vrot.slane %v7295_v10, %v13780_v6  ;;  %v7325_v49 = vcombine.high %v7303_v50, %v7303_v50 }
 0x52a   :  { %6387 = vrot.lane.b32.xlu1 %v6381_v17, %s12618_s5  ;;  %v7326_v17 = vcombine.high %v7317_v16, %v7317_v16 }
 0x52c   :  { %6153 = vrot.lane.b32.xlu0 %v6146_v52, %s12617_s2  ;;  %v7296_v52 = vcombine.high %v7294_v53, %v7294_v53  ;;  %s12636_s2 = smov 62  }
 0x52e   :  { %6391 = vrot.lane.b32.xlu1 %v6366_v20, %s12618_s5  ;;  %v7324_v19 = vrot.slane %v7296_v52, %v13780_v6  ;;  %v7506_v20 = vld [vmem:[%s15302_s7] sm:$0xff]  ;;  %v12521_v6 = vld [vmem:[%s15301_s6 + $0x8] sm:$0xff]  }
 0x530   :  { %6393 = vrot.lane.b32.xlu0 %v6380_v57, %s12618_s5 }
 0x532   :  { %6619 = vrot.lane.b32.xlu1 %v6595_v44, %s12619_s24 }
 0x534   :  { %6621 = vrot.lane.b32.xlu0 %v6609_v22, %s12619_s24 }
 0x536   :  { %6623 = vrot.lane.b32.xlu1 %v6617_v5, %s12619_s24 }
 0x538   :  { %6389 = vrot.lane.b32.xlu0 %v6382_v24, %s12618_s5  ;;  %s12637_s5 = smov 56  }
 0x53a   :  { %6627 = vrot.lane.b32.xlu1 %v6602_v27, %s12619_s24 }
 0x53c   :  { %6629 = vrot.lane.b32.xlu0 %v6616_v29, %s12619_s24 }
 0x53e   :  { %6625 = vrot.lane.b32.xlu1 %v6618_v33, %s12619_s24  ;;  %s12638_s24 = smov 59  }
 0x540   :  { %6855 = vrot.lane.b32.xlu0 %v6831_v38, %s12620_s4 }
 0x542   :  { %6857 = vrot.lane.b32.xlu1 %v6845_v40, %s12620_s4 }
 0x544   :  { %6859 = vrot.lane.b32.xlu0 %v6853_v47, %s12620_s4 }
 0x546   :  { %6863 = vrot.lane.b32.xlu1 %v6838_v56, %s12620_s4 }
 0x548   :  { %6865 = vrot.lane.b32.xlu0 %v6852_v60, %s12620_s4 }
 0x54a   :  { %6861 = vrot.lane.b32.xlu1 %v6854_v61, %s12620_s4 }
 0x54c   :  { %7091 = vrot.lane.b32.xlu0 %v7067_v1, %s12621_s25 }
 0x54e   :  { %7093 = vrot.lane.b32.xlu1 %v7081_v2, %s12621_s25 }
 0x550   :  { %7095 = vrot.lane.b32.xlu0 %v7089_v9, %s12621_s25 }
 0x552   :  { %7097 = vrot.lane.b32.xlu1 %v7090_v12, %s12621_s25  ;;  %v12523_v12 = vld [vmem:[%s15301_s6 + $0x10] sm:$0xff]  }
 0x554   :  { %7099 = vrot.lane.b32.xlu0 %v7074_v15, %s12621_s25 }
 0x556   :  { %7101 = vrot.lane.b32.xlu1 %v7088_v42, %s12621_s25  ;;  %s12639_s25 = smov 100  }
 0x558   :  { %7327 = vrot.lane.b32.xlu0 %v7303_v50, %s12622_s26 }
 0x55a   :  { %7329 = vrot.lane.b32.xlu1 %v7317_v16, %s12622_s26 }
 0x55c   :  { %7331 = vrot.lane.b32.xlu0 %v7325_v49, %s12622_s26 }
 0x55e   :  { %7333 = vrot.lane.b32.xlu1 %v7326_v17, %s12622_s26 }
 0x560   :  { %7335 = vrot.lane.b32.xlu0 %v7310_v18, %s12622_s26 }
 0x562   :  { %7337 = vrot.lane.b32.xlu1 %v7324_v19, %s12622_s26 }
 0x564   :  { %7510 = vperm.xlu0 %12123, %v7506_v20  }
 0x576   :  { %v5532_v57 = vpop.permute.xlu0 %5531 }
 0x578   :  { %v5534_v14 = vpop.permute.xlu1 %5533 }
 0x579   :  { %v5543_v21 = vsel %vm139_vm0, %v5532_v57, %v5534_v14 }
 0x57a   :  { %v5536_v44 = vpop.permute.xlu0 %5535  ;;  %v5553_v5 = vsel %vm77_vm1, %v5543_v21, 0  ;;  %v12524_v21 = vld [vmem:[%s15301_s6 + $0x18] sm:$0xff]  }
 0x57b   :  { %v5544_v22 = vsel %vm139_vm0, %v5534_v14, %v5536_v44 }
 0x57c   :  { %11357 = vmatprep.subr.msk.bf16.mxu1 %vm77_vm1, %v5544_v22  ;;  %v5540_v23 = vpop.permute.xlu1 %5539 }
 0x57d   :  { %5571 = vmatpush1.bf16.msra.mxu1 %v5553_v5 }
 0x57e   :  { %v5542_v11 = vpop.permute.xlu0 %5541 }
 0x57f   :  { %v5547_v24 = vsel %vm139_vm0, %v5540_v23, %v5542_v11  ;;  %11361 = vmatprep.subr.msk.bf16.mxu1 %vm77_vm1, %v5542_v11 }
 0x580   :  { %11358 = vmatmul.mubr.msk.bf16.vlgmr.msra.gmra.mrb[160].mxu1 %vm5548_vm5, %v12521_v6  ;;  %v5912_v25 = vpop.permute.xlu1 %5911  ;;  %v5565_v27 = vsel %vm77_vm1, %v5547_v24, 0 }
 0x581   :  { %5657 = vmatpush1.bf16.msra.mxu1 %v5565_v27  ;;  %5688 = vmatprep.mubr.bf16.mxu1 %v15328_v7 }
 0x582   :  { %11364 = vmatprep.subr.msk.bf16.mxu1 %vm77_vm1, %v13804_v51  ;;  %v5914_v28 = vpop.permute.xlu0 %5913  ;;  %v7507_v51 = vld [vmem:[%s15302_s7 + $0x8] sm:$0xff]  ;;  %s12629_s7 = smov 69  }
 0x583   :  { %7515 = vperm.xlu1 %12124, %v7507_v51  }
 0x584   :  { %v5916_v29 = vpop.permute.xlu1 %5915 }
 0x586   :  { %v5538_v32 = vpop.permute.xlu0 %5537 }
 0x587   :  { %v5545_v33 = vsel %vm139_vm0, %v5536_v44, %v5538_v32  ;;  %v5546_v37 = vsel %vm139_vm0, %v5538_v32, %v5540_v23  ;;  %vm15404_vm0 = vcmask 1031168  }
 0x588   :  { %v5920_v38 = vpop.permute.xlu1 %5919  ;;  %11359 = vmatprep.subr.msk.bf16.mxu0 %vm77_vm1, %v5546_v37  ;;  %11362 = vmatmul.mubr.msk.bf16.vlgmr.msra.gmra.mrb[164].mxu1 %vm5548_vm5, %v12521_v6  ;;  %v5559_v40 = vsel %vm77_vm1, %v5545_v33, 0  ;;  %v5924_v58 = vsel %vm15404_vm0, %v5914_v28, %v5916_v29  ;;  %vm15405_vm9 = vmmov %vm15404_vm0 }
 0x589   :  { %5726 = vmatpush1.bf16.msra.mxu1 %v5708_v39  ;;  %5614 = vmatpush1.bf16.msra.mxu0 %v5559_v40  ;;  %v5923_v61 = vsel %vm15405_vm9, %v5912_v25, %v5914_v28  ;;  %vm15406_vm2 = vmmov %vm15404_vm0 }
 0x58a   :  { %11368 = vmatprep.subr.msk.bf16.mxu1 %vm77_vm1, %v13821_v36  ;;  %11366 = vmatprep.subr.msk.bf16.mxu0 %vm77_vm1, %v13833_v55  ;;  %v5922_v43 = vpop.permute.xlu0 %5921  ;;  %v5720_v55 = vsel %vm77_vm1, %v13816_v34, 0  ;;  %vm15407_vm13 = vmmov %vm15404_vm0  ;;  %v5932_v34 = vsel %vm77_vm1, %v5923_v61, 0 }
 0x58b   :  { %5757 = vmatprep.mubr.bf16.mxu1 %v15328_v7  ;;  %vm15408_vm15 = vmmov %vm15404_vm0 }
 0x58c   :  { %v6148_v47 = vpop.permute.xlu1 %6147  ;;  %11360 = vmatmul.mubr.msk.bf16.vlgmr.msra.gmra.mrb[164].mxu0 %vm5548_vm5, %v12521_v6  ;;  %v5927_v48 = vsel %vm15408_vm15, %v5920_v38, %v5922_v43  ;;  %vm15418_vm0 = vmmov %vm15416_vm3 }
 0x58d   :  { %5769 = vmatpush1.bf16.msra.mxu0 %v5714_v26  ;;  %5800 = vmatprep.mubr.bf16.mxu0 %v15328_v7  ;;  %v5944_v10 = vsel %vm77_vm1, %v5927_v48, 0  ;;  %vm15419_vm9 = vmmov %vm15417_vm4 }
 0x58e   :  { %v6150_v36 = vpop.permute.xlu0 %6149  ;;  %vm15422_vm15 = vmmov %vm15417_vm4 }
 0x58f   :  { %v6159_v17 = vsel %vm15412_vm8, %v6148_v47, %v6150_v36  ;;  %vm15426_vm8 = vmmov %vm15417_vm4 }
 0x590   :  { %v6152_v56 = vpop.permute.xlu1 %6151  ;;  %11365 = vmatmul.mubr.msk.bf16.vlgmr.msra.gmra.mrb[160].mxu1 %vm5548_vm5, %v12522_v8  ;;  %v6168_v19 = vsel %vm77_vm1, %v6159_v17, 0 }
 0x591   :  { %5812 = vmatpush1.bf16.msra.mxu1 %v5720_v55  ;;  %5843 = vmatprep.mubr.bf16.mxu1 %v15328_v7  ;;  %v6160_v50 = vsel %vm15411_vm7, %v6150_v36, %v6152_v56  ;;  %vm15425_vm7 = vcmask 744448  }
 0x592   :  { %11373 = vmatprep.subr.msk.bf16.mxu1 %vm77_vm1, %v5924_v58  ;;  %v6156_v30 = vpop.permute.xlu0 %6155 }
 0x594   :  { %v6158_v60 = vpop.permute.xlu1 %6157 }
 0x595   :  { %v6163_v44 = vsel %vm15414_vm14, %v6156_v30, %v6158_v60 }
 0x596   :  { %v5918_v62 = vpop.permute.xlu0 %5917  ;;  %v6180_v6 = vsel %vm77_vm1, %v6163_v44, 0 }
 0x597   :  { %v5925_v63 = vsel %vm15406_vm2, %v5916_v29, %v5918_v62  ;;  %v5926_v1 = vsel %vm15407_vm13, %v5918_v62, %v5920_v38  ;;  %v12525_v38 = vld [vmem:[%s15301_s6 + $0x20] sm:$0xff]   ;;  %vm15420_vm2 = vmmov %vm15418_vm0  ;;  %vm15421_vm13 = vcmask 752640  }
 0x598   :  { %v13962_v2 = vpop.permute.xlu1 %6383  ;;  %11367 = vmatmul.mubr.msk.bf16.vlgmr.msra.gmra.mrb[164].mxu0 %vm5548_vm5, %v12522_v8  ;;  %11369 = vmatmul.mubr.msk.bf16.vlgmr.msra.gmra.mrb[164].mxu1 %vm5548_vm5, %v12522_v8  ;;  %v5938_v0 = vsel %vm77_vm1, %v5925_v63, 0 }
 0x599   :  { %5950 = vmatpush1.bf16.msra.mxu1 %v5932_v34  ;;  %11375 = vmatprep.subr.msk.bf16.mxu0 %vm77_vm1, %v5926_v1 }
 0x59a   :  { %5993 = vmatpush1.bf16.msra.mxu0 %v5938_v0  ;;  %11377 = vmatprep.subr.msk.bf16.mxu1 %vm77_vm1, %v5922_v43  ;;  %v6386_v3 = vpop.permute.xlu0 %6385 }
 0x59b   :  { %5981 = vmatprep.mubr.bf16.mxu1 %v15328_v7  ;;  %6024 = vmatprep.mubr.bf16.mxu0 %v15328_v7  ;;  %v6395_v29 = vsel %vm15418_vm0, %v13962_v2, %v6386_v3 }
 0x59c   :  { %v6388_v9 = vpop.permute.xlu1 %6387  ;;  %v6404_v37 = vsel %vm77_vm1, %v6395_v29, 0 }
 0x59d   :  { %v6396_v24 = vsel %vm15416_vm3, %v6386_v3, %v6388_v9 }
 0x59e   :  { %v6154_v13 = vpop.permute.xlu0 %6153 }
 0x59f   :  { %v6162_v15 = vsel %vm15409_vm10, %v6154_v13, %v6156_v30  ;;  %v6161_v46 = vsel %vm15410_vm6, %v6152_v56, %v6154_v13  ;;  %vm15423_vm10 = vmmov %vm15417_vm4 }
 0x5a0   :  { %v6392_v42 = vpop.permute.xlu1 %6391  ;;  %11374 = vmatmul.mubr.msk.bf16.vlgmr.msra.gmra.mrb[160].mxu1 %vm5548_vm5, %v12523_v12  ;;  %11384 = vmatprep.subr.msk.bf16.mxu0 %vm77_vm1, %v6162_v15  ;;  %v6174_v49 = vsel %vm77_vm1, %v6161_v46, 0  ;;  %vm15424_vm6 = vmmov %vm15421_vm13  ;;  %v12527_v15 = vld [vmem:[%s15301_s6 + $0x30] sm:$0xff]  }
 0x5a1   :  { %6036 = vmatpush1.bf16.msra.mxu1 %v5944_v10  ;;  %6067 = vmatprep.mubr.bf16.mxu1 %v15328_v7  ;;  %vm15428_vm14 = vmmov %vm15424_vm6 }
 0x5a2   :  { %11382 = vmatprep.subr.msk.bf16.mxu1 %vm77_vm1, %v6160_v50  ;;  %v6394_v16 = vpop.permute.xlu0 %6393  ;;  %vm15430_vm3 = vmmov %vm15424_vm6 }
 0x5a3   :  { %v6399_v47 = vsel %vm15420_vm2, %v6392_v42, %v6394_v16  ;;  %vm15434_vm2 = vmmov %vm15425_vm7 }
 0x5a4   :  { %v13984_v53 = vpop.permute.xlu1 %6619  ;;  %11376 = vmatmul.mubr.msk.bf16.vlgmr.msra.gmra.mrb[164].mxu0 %vm5548_vm5, %v12523_v12  ;;  %v6416_v56 = vsel %vm77_vm1, %v6399_v47, 0 }
 0x5a5   :  { %6229 = vmatpush1.bf16.msra.mxu0 %v6174_v49  ;;  %6260 = vmatprep.mubr.bf16.mxu0 %v15328_v7 }
 0x5a6   :  { %v6622_v52 = vpop.permute.xlu0 %6621 }
 0x5a7   :  { %v6631_v61 = vsel %vm15423_vm10, %v13984_v53, %v6622_v52 }
 0x5a8   :  { %v6624_v18 = vpop.permute.xlu1 %6623  ;;  %11378 = vmatmul.mubr.msk.bf16.vlgmr.msra.gmra.mrb[164].mxu1 %vm5548_vm5, %v12523_v12  ;;  %v6640_v34 = vsel %vm77_vm1, %v6631_v61, 0 }
 0x5a9   :  { %6186 = vmatpush1.bf16.msra.mxu1 %v6168_v19  ;;  %6217 = vmatprep.mubr.bf16.mxu1 %v15328_v7  ;;  %v6632_v55 = vsel %vm15422_vm15, %v6622_v52, %v6624_v18  ;;  %v12528_v52 = vld [vmem:[%s15301_s6 + $0x38] sm:$0xff]  }
 0x5aa   :  { %11386 = vmatprep.subr.msk.bf16.mxu1 %vm77_vm1, %v6158_v60  ;;  %v6390_v20 = vpop.permute.xlu0 %6389  ;;  %v12526_v60 = vld [vmem:[%s15301_s6 + $0x28] sm:$0xff]  }
 0x5ab   :  { %v6398_v57 = vsel %vm15413_vm12, %v6390_v20, %v6392_v42  ;;  %v6397_v22 = vsel %vm15415_vm11, %v6388_v9, %v6390_v20  ;;  %vm15427_vm12 = vmmov %vm15425_vm7  ;;  %vm15429_vm11 = vcmask 736256  }
 0x5ac   :  { %v13995_v14 = vpop.permute.xlu1 %6627  ;;  %11393 = vmatprep.subr.msk.bf16.mxu0 %vm77_vm1, %v6398_v57  ;;  %v6410_v11 = vsel %vm77_vm1, %v6397_v22, 0  ;;  %vm15432_vm0 = vmmov %vm15429_vm11  ;;  %v12529_v22 = vld [vmem:[%s15301_s6 + $0x40] sm:$0xff]   ;;  %s12632_s6 = smov 3  }
 0x5ad   :  { %vm15436_vm15 = vmmov %vm15432_vm0 }
 0x5ae   :  { %v14003_v23 = vpop.permute.xlu0 %6629  ;;  %vm15437_vm10 = vmmov %vm15432_vm0 }
 0x5af   :  { %v6635_v12 = vsel %vm15426_vm8, %v13995_v14, %v14003_v23  ;;  %vm7785_vm8 = vcmask 72768  }
 0x5b0   :  { %v6626_v5 = vpop.permute.xlu1 %6625  ;;  %11383 = vmatmul.mubr.msk.bf16.vlgmr.msra.gmra.mrb[160].mxu1 %vm5548_vm5, %v12524_v21  ;;  %11385 = vmatmul.mubr.msk.bf16.vlgmr.msra.gmra.mrb[164].mxu0 %vm5548_vm5, %v12524_v21  ;;  %v6652_v13 = vsel %vm77_vm1, %v6635_v12, 0 }
 0x5b1   :  { %6272 = vmatpush1.bf16.msra.mxu1 %v6180_v6  ;;  %6465 = vmatpush1.bf16.msra.mxu0 %v6410_v11  ;;  %v6634_v25 = vsel %vm15417_vm4, %v6626_v5, %v13995_v14  ;;  %v6633_v39 = vsel %vm15419_vm9, %v6624_v18, %v6626_v5  ;;  %vm15431_vm4 = vmmov %vm15430_vm3 }
 0x5b2   :  { %11391 = vmatprep.subr.msk.bf16.mxu1 %vm77_vm1, %v6396_v24  ;;  %11402 = vmatprep.subr.msk.bf16.mxu0 %vm77_vm1, %v6634_v25  ;;  %v14014_v27 = vpop.permute.xlu0 %6855  ;;  %v6646_v43 = vsel %vm77_vm1, %v6633_v39, 0  ;;  %vm15433_vm9 = vmmov %vm15425_vm7 }
 0x5b3   :  { %6303 = vmatprep.mubr.bf16.mxu1 %v15328_v7  ;;  %6496 = vmatprep.mubr.bf16.mxu0 %v15328_v7 }
 0x5b4   :  { %v14018_v28 = vpop.permute.xlu1 %6857 }
 0x5b5   :  { %v6867_v49 = vsel %vm15430_vm3, %v14014_v27, %v14018_v28  ;;  %vm7901_vm3 = vcmask 121968  }
 0x5b6   :  { %v6860_v32 = vpop.permute.xlu0 %6859  ;;  %v6876_v17 = vsel %vm77_vm1, %v6867_v49, 0 }
 0x5b7   :  { %v6868_v10 = vsel %vm15428_vm14, %v14018_v28, %v6860_v32  ;;  %vm7843_vm14 = vcmask 89168  }
 0x5b8   :  { %v14022_v33 = vpop.permute.xlu1 %6863  ;;  %11387 = vmatmul.mubr.msk.bf16.vlgmr.msra.gmra.mrb[164].mxu1 %vm5548_vm5, %v12524_v21 }
 0x5b9   :  { %6422 = vmatpush1.bf16.msra.mxu1 %v6404_v37  ;;  %6453 = vmatprep.mubr.bf16.mxu1 %v15328_v7 }
 0x5ba   :  { %11395 = vmatprep.subr.msk.bf16.mxu1 %vm77_vm1, %v6394_v16  ;;  %v14032_v40 = vpop.permute.xlu0 %6865 }
 0x5bb   :  { %v6871_v18 = vsel %vm15431_vm4, %v14022_v33, %v14032_v40  ;;  %vm7930_vm4 = vcmask 130168  }
 0x5bc   :  { %v6862_v51 = vpop.permute.xlu1 %6861  ;;  %11394 = vmatmul.mubr.msk.bf16.vlgmr.msra.gmra.mrb[164].mxu0 %vm5548_vm5, %v12525_v38  ;;  %v6888_v20 = vsel %vm77_vm1, %v6871_v18, 0 }
 0x5bd   :  { %6701 = vmatpush1.bf16.msra.mxu0 %v6646_v43  ;;  %v6870_v26 = vsel %vm15421_vm13, %v6862_v51, %v14022_v33  ;;  %6732 = vmatprep.mubr.bf16.mxu0 %v15328_v7  ;;  %v6869_v62 = vsel %vm15424_vm6, %v6860_v32, %v6862_v51  ;;  %vm15435_vm13 = vmmov %vm15434_vm2 }
 0x5be   :  { %11411 = vmatprep.subr.msk.bf16.mxu0 %vm77_vm1, %v6870_v26  ;;  %v14041_v8 = vpop.permute.xlu0 %7091  ;;  %v6882_v0 = vsel %vm77_vm1, %v6869_v62, 0  ;;  %vm15438_vm6 = vmmov %vm15432_vm0 }
 0x5c0   :  { %v14043_v36 = vpop.permute.xlu1 %7093  ;;  %11392 = vmatmul.mubr.msk.bf16.vlgmr.msra.gmra.mrb[160].mxu1 %vm5548_vm5, %v12525_v38 }
 0x5c1   :  { %6508 = vmatpush1.bf16.msra.mxu1 %v6416_v56  ;;  %6539 = vmatprep.mubr.bf16.mxu1 %v15328_v7  ;;  %v7103_v21 = vsel %vm15434_vm2, %v14041_v8, %v14043_v36  ;;  %vm8013_vm2 = vcmask 171168  }
 0x5c2   :  { %11400 = vmatprep.subr.msk.bf16.mxu1 %vm77_vm1, %v6632_v55  ;;  %v7096_v58 = vpop.permute.xlu0 %7095  ;;  %v7112_v44 = vsel %vm77_vm1, %v7103_v21, 0 }
 0x5c3   :  { %v7104_v14 = vsel %vm15433_vm9, %v14043_v36, %v7096_v58  ;;  %vm7988_vm9 = vcmask 162968  }
 0x5c4   :  { %v7098_v30 = vpop.permute.xlu1 %7097 }
 0x5c5   :  { %v7105_v42 = vsel %vm15427_vm12, %v7096_v58, %v7098_v30  ;;  %vm7814_vm12 = vcmask 80968  }
 0x5c6   :  { %v7100_v63 = vpop.permute.xlu0 %7099  ;;  %v7118_v53 = vsel %vm77_vm1, %v7105_v42, 0 }
 0x5c7   :  { %v7106_v1 = vsel %vm15425_vm7, %v7098_v30, %v7100_v63  ;;  %vm7756_vm7 = vcmask 64568  }
 0x5c8   :  { %v7102_v2 = vpop.permute.xlu1 %7101  ;;  %11396 = vmatmul.mubr.msk.bf16.vlgmr.msra.gmra.mrb[164].mxu1 %vm5548_vm5, %v12525_v38  ;;  %11403 = vmatmul.mubr.msk.bf16.vlgmr.msra.gmra.mrb[164].mxu0 %vm5548_vm5, %v12526_v60  ;;  %v7530_v38 = vld [vmem:[%s15303_s19] sm:$0x3f]  ;;  %s12634_s19 = smov 122  }
 0x5c9   :  { %6658 = vmatpush1.bf16.msra.mxu1 %v6640_v34  ;;  %6937 = vmatpush1.bf16.msra.mxu0 %v6882_v0  ;;  %v14140_v39 = vrot.slane %v7530_v38, %v1842_v31  ;;  %v14144_v43 = vrot.slane %v7530_v38, %v1846_v35  ;;  %v14150_v36 = vrot.slane %v7530_v38, %v1850_v41 }
 0x5ca   :  { %11404 = vmatprep.subr.msk.bf16.mxu1 %vm77_vm1, %v14003_v23  ;;  %11420 = vmatprep.subr.msk.bf16.mxu0 %vm77_vm1, %v7106_v1  ;;  %v7328_v3 = vpop.permute.xlu0 %7327  ;;  %v7107_v23 = vsel %vm15435_vm13, %v7100_v63, %v7102_v2  ;;  %v14158_v58 = vrot.slane %v7530_v38, %v1854_v45  ;;  %vm8042_vm13 = vcmask 179368  }
 0x5cb   :  { %6689 = vmatprep.mubr.bf16.mxu1 %v15328_v7  ;;  %6968 = vmatprep.mubr.bf16.mxu0 %v15328_v7  ;;  %v7124_v5 = vsel %vm77_vm1, %v7107_v23, 0 }
 0x5cc   :  { %v7330_v9 = vpop.permute.xlu1 %7329 }
 0x5cd   :  { %v7339_v11 = vsel %vm15437_vm10, %v7328_v3, %v7330_v9  ;;  %v14182_v3 = vrot.slane %v7530_v38, %v1858_v54  ;;  %vm8100_vm10 = vcmask 212168  }
 0x5ce   :  { %v7332_v48 = vpop.permute.xlu0 %7331  ;;  %v7348_v24 = vsel %vm77_vm1, %v7339_v11, 0 }
 0x5cf   :  { %v7340_v6 = vsel %vm15436_vm15, %v7330_v9, %v7332_v48  ;;  %v14186_v9 = vrot.slane %v7530_v38, %v1862_v59  ;;  %vm8071_vm15 = vcmask 187568  }
 0x5d0   :  { %11401 = vmatmul.mubr.msk.bf16.vlgmr.msra.gmra.mrb[160].mxu1 %vm5548_vm5, %v12526_v60  ;;  %v7334_v46 = vpop.permute.xlu1 %7333 }
 0x5d1   :  { %6744 = vmatpush1.bf16.msra.mxu1 %v6652_v13  ;;  %6775 = vmatprep.mubr.bf16.mxu1 %v15328_v7  ;;  %v7341_v19 = vsel %vm15432_vm0, %v7332_v48, %v7334_v46  ;;  %vm7959_vm0 = vcmask 138368  }
 0x5d2   :  { %11409 = vmatprep.subr.msk.bf16.mxu1 %vm77_vm1, %v6868_v10  ;;  %v7336_v50 = vpop.permute.xlu0 %7335  ;;  %v7354_v57 = vsel %vm77_vm1, %v7341_v19, 0 }
 0x5d3   :  { %v7342_v16 = vsel %vm15429_vm11, %v7334_v46, %v7336_v50  ;;  %vm7872_vm11 = vcmask 113768  }
 0x5d4   :  { %11412 = vmatmul.mubr.msk.bf16.vlgmr.msra.gmra.mrb[164].mxu0 %vm5548_vm5, %v12527_v15  ;;  %v7338_v25 = vpop.permute.xlu1 %7337 }
 0x5d5   :  { %7173 = vmatpush1.bf16.msra.mxu0 %v7118_v53  ;;  %7204 = vmatprep.mubr.bf16.mxu0 %v15328_v7  ;;  %v7343_v27 = vsel %vm15438_vm6, %v7336_v50, %v7338_v25  ;;  %vm8141_vm6 = vcmask 220368  }
 0x5d6   :  { %11429 = vmatprep.subr.msk.bf16.mxu0 %vm77_vm1, %v7342_v16  ;;  %v7360_v28 = vsel %vm77_vm1, %v7343_v27, 0 }
 0x5d8   :  { %11405 = vmatmul.mubr.msk.bf16.vlgmr.msra.gmra.mrb[164].mxu1 %vm5548_vm5, %v12526_v60 }
 0x5d9   :  { %6894 = vmatpush1.bf16.msra.mxu1 %v6876_v17  ;;  %6925 = vmatprep.mubr.bf16.mxu1 %v15328_v7 }
 0x5da   :  { %11413 = vmatprep.subr.msk.bf16.mxu1 %vm77_vm1, %v14032_v40 }
 0x5e0   :  { %11410 = vmatmul.mubr.msk.bf16.vlgmr.msra.gmra.mrb[160].mxu1 %vm5548_vm5, %v12527_v15  ;;  %11421 = vmatmul.mubr.msk.bf16.vlgmr.msra.gmra.mrb[164].mxu0 %vm5548_vm5, %v12528_v52 }
 0x5e1   :  { %6980 = vmatpush1.bf16.msra.mxu1 %v6888_v20  ;;  %7409 = vmatpush1.bf16.msra.mxu0 %v7354_v57 }
 0x5e2   :  { %11418 = vmatprep.subr.msk.bf16.mxu1 %vm77_vm1, %v7104_v14  ;;  %7011 = vmatprep.mubr.bf16.mxu1 %v15328_v7 }
 0x5e3   :  { %7440 = vmatprep.mubr.bf16.mxu0 %v15328_v7  ;;  %v7511_v40 = vpop.permute.xlu0 %7510 }
 0x5e8   :  { %11414 = vmatmul.mubr.msk.bf16.vlgmr.msra.gmra.mrb[164].mxu1 %vm5548_vm5, %v12527_v15 }
 0x5e9   :  { %7130 = vmatpush1.bf16.msra.mxu1 %v7112_v44  ;;  %7161 = vmatprep.mubr.bf16.mxu1 %v15328_v7 }
 0x5ea   :  { %11422 = vmatprep.subr.msk.bf16.mxu1 %vm77_vm1, %v7102_v2 }
 0x5ec   :  { %11430 = vmatmul.mubr.msk.bf16.vlgmr.msra.gmra.mrb[164].mxu0 %vm5548_vm5, %v12529_v22 }
 0x5f0   :  { %11419 = vmatmul.mubr.msk.bf16.vlgmr.msra.gmra.mrb[160].mxu1 %vm5548_vm5, %v12528_v52 }
 0x5f1   :  { %7216 = vmatpush1.bf16.msra.mxu1 %v7124_v5  ;;  %7247 = vmatprep.mubr.bf16.mxu1 %v15328_v7 }
 0x5f2   :  { %11427 = vmatprep.subr.msk.bf16.mxu1 %vm77_vm1, %v7340_v6 }
 0x5f8   :  { %11423 = vmatmul.mubr.msk.bf16.vlgmr.msra.gmra.mrb[164].mxu1 %vm5548_vm5, %v12528_v52 }
 0x5f9   :  { %7366 = vmatpush1.bf16.msra.mxu1 %v7348_v24  ;;  %7397 = vmatprep.mubr.bf16.mxu1 %v15328_v7 }
 0x5fa   :  { %11431 = vmatprep.subr.msk.bf16.mxu1 %vm77_vm1, %v7338_v25  ;;  %vm7582_vm1 = vcmask 64512  }
 0x600   :  { %11428 = vmatmul.mubr.msk.bf16.vlgmr.msra.gmra.mrb[160].mxu1 %vm5548_vm5, %v12529_v22 }
 0x601   :  { %7452 = vmatpush1.bf16.msra.mxu1 %v7360_v28  ;;  %7483 = vmatprep.mubr.bf16.mxu1 %v15328_v7 }
 0x602   :  { %v7516_v47 = vpop.permute.xlu1 %7515 }
 0x608   :  { %11432 = vmatmul.mubr.msk.bf16.vlgmr.msra.gmra.mrb[164].mxu1 %vm5548_vm5, %v12529_v22  ;;  %vm89_vm5 = vcmask 703488  }
 0x6bf   :  { %v7442_v29 = vpop.f32.mrb[164].mxu0 }
 0x6c0   :  { %v7444_v32 = vpop.f32.mrb[165].mxu0  ;;  %v14152_v56 = vadd.f32 %v7511_v40, %v7442_v29 }
 0x6c1   :  { %v7446_v33 = vpop.f32.mrb[166].mxu0  ;;  %v14164_v61 = vadd.f32 %v7511_v40, %v7444_v32 }
 0x6c2   :  { %v7448_v37 = vpop.f32.mrb[167].mxu0  ;;  %v14166_v62 = vadd.f32 %v7516_v47, %v7446_v33  ;;  %v7568_v45 = vmul.f32 %v14150_v36, %v14152_v56 }
 0x6c3   :  { %v14176_v2 = vadd.f32 %v7516_v47, %v7448_v37  ;;  %v7569_v12 = vmul.f32 %v14158_v58, %v14164_v61 }
 0x6c4   :  { %v7574_v48 = vmul.f32 %v14150_v36, %v14166_v62 }
 0x6c5   :  { %v7575_v54 = vmul.f32 %v14158_v58, %v14176_v2 }
 0x6d3   :  { %v7399_v51 = vpop.f32.mrb[160].mxu1 }
 0x6d4   :  { %v14146_v26 = vadd.f32 %v7511_v40, %v7399_v51  ;;  %v7401_v8 = vpop.f32.mrb[161].mxu1 }
 0x6d5   :  { %v14154_v55 = vadd.f32 %v7511_v40, %v7401_v8  ;;  %v7403_v31 = vpop.f32.mrb[162].mxu1 }
 0x6d6   :  { %v7566_v35 = vmul.f32 %v14140_v39, %v14146_v26  ;;  %v14162_v30 = vadd.f32 %v7516_v47, %v7403_v31  ;;  %v7405_v60 = vpop.f32.mrb[163].mxu1 }
 0x6d7   :  { %v7567_v41 = vmul.f32 %v14144_v43, %v14154_v55  ;;  %v14170_v63 = vadd.f32 %v7516_v47, %v7405_v60 }
 0x6d8   :  { %v7572_v1 = vmul.f32 %v14140_v39, %v14162_v30 }
 0x6d9   :  { %v7578_v34 = vadd.f32 %v7567_v41, %v7566_v35  ;;  %v7573_v0 = vmul.f32 %v14144_v43, %v14170_v63 }
 0x6db   :  { %v7579_v13 = vadd.f32 %v7578_v34, %v7568_v45  ;;  %v7587_v15 = vadd.f32 %v7573_v0, %v7572_v1  ;;  %v7485_v42 = vpop.f32.mrb[164].mxu1 }
 0x6dc   :  { %v14192_v10 = vadd.f32 %v7511_v40, %v7485_v42  ;;  %v7487_v46 = vpop.f32.mrb[165].mxu1 }
 0x6dd   :  { %v7588_v50 = vadd.f32 %v7587_v15, %v7574_v48  ;;  %v7523_v16 = vadd.f32 %v7511_v40, %v7487_v46  ;;  %v7489_v4 = vpop.f32.mrb[166].mxu1  ;;  %v7580_v59 = vadd.f32 %v7579_v13, %v7569_v12 }
 0x6de   :  { %v7570_v53 = vmul.f32 %v14182_v3, %v14192_v10  ;;  %v14198_v49 = vadd.f32 %v7516_v47, %v7489_v4  ;;  %v7491_v17 = vpop.f32.mrb[167].mxu1 }
 0x6df   :  { %v7571_v52 = vmul.f32 %v14186_v9, %v7523_v16  ;;  %v7529_v18 = vadd.f32 %v7516_v47, %v7491_v17  ;;  %v7589_v19 = vadd.f32 %v7588_v50, %v7575_v54 }
 0x6e0   :  { %v7576_v20 = vmul.f32 %v14182_v3, %v14198_v49  ;;  %v7581_v57 = vadd.f32 %v7580_v59, %v7570_v53 }
 0x6e1   :  { %v7577_v14 = vmul.f32 %v14186_v9, %v7529_v18  ;;  %v7583_v21 = vsel %vm7582_vm1, %v7571_v52, 0.0 }
 0x6e2   :  { %v7584_v44 = vadd.f32 %v7583_v21, %v7581_v57  ;;  %v7590_v22 = vadd.f32 %v7589_v19, %v7576_v20 }
 0x6e3   :  { %v7591_v23 = vsel %vm7582_vm1, %v7577_v14, 0.0 }
 0x6e4   :  { %7585 = vadd.xlane.f32.xlu0 %v7584_v44  ;;  %v7592_v5 = vadd.f32 %v7591_v23, %v7590_v22 }
 0x6e6   :  { %7593 = vadd.xlane.f32.xlu1 %v7592_v5 }
 0x771   :  { %v7586_v6 = vpop.xlane.xlu0 %7585 }
 0x772   :  { %v14206_v11 = vmul.f32 0.0078125, %v7586_v6 }
 0x773   :  { %v7594_v24 = vpop.xlane.xlu1 %7593 }
 0x774   :  { %v14208_v25 = vmul.f32 0.0078125, %v7594_v24  ;;  %v7597_v27 = vsub.f32 %v14146_v26, %v14206_v11  ;;  %v7598_v28 = vsub.f32 %v14154_v55, %v14206_v11  ;;  %v7599_v29 = vsub.f32 %v14152_v56, %v14206_v11 }
 0x775   :  { %v7600_v32 = vsub.f32 %v14164_v61, %v14206_v11  ;;  %v7601_v33 = vsub.f32 %v14192_v10, %v14206_v11  ;;  %v7602_v37 = vsub.f32 %v7523_v16, %v14206_v11 }
 0x776   :  { %v7609_v38 = vmul.f32 %v7597_v27, %v7597_v27  ;;  %v7610_v40 = vmul.f32 %v7598_v28, %v7598_v28  ;;  %v7611_v51 = vmul.f32 %v7599_v29, %v7599_v29  ;;  %v7603_v47 = vsub.f32 %v14162_v30, %v14208_v25 }
 0x777   :  { %v7604_v8 = vsub.f32 %v14170_v63, %v14208_v25  ;;  %v7612_v31 = vmul.f32 %v7600_v32, %v7600_v32  ;;  %v7605_v41 = vsub.f32 %v14166_v62, %v14208_v25  ;;  %v7613_v1 = vmul.f32 %v7601_v33, %v7601_v33 }
 0x778   :  { %v7621_v35 = vmul.f32 %v7609_v38, %v14140_v39  ;;  %v7622_v60 = vmul.f32 %v7610_v40, %v14144_v43  ;;  %v7614_v45 = vmul.f32 %v7602_v37, %v7602_v37  ;;  %v7606_v34 = vsub.f32 %v14176_v2, %v14208_v25  ;;  %v7533_v38 = vld [vmem:[%s15305_s9] sm:$0xff] }
 0x779   :  { %v7623_v0 = vmul.f32 %v7611_v51, %v14150_v36  ;;  %v7608_v48 = vsub.f32 %v7529_v18, %v14208_v25  ;;  %v7615_v13 = vmul.f32 %v7603_v47, %v7603_v47  ;;  %v7607_v15 = vsub.f32 %v14198_v49, %v14208_v25  ;;  %v7532_v51 = vld [vmem:[%s15304_s8 + $0x8] sm:$0xff] }
 0x77a   :  { %v7633_v12 = vadd.f32 %v7622_v60, %v7621_v35  ;;  %v7616_v42 = vmul.f32 %v7604_v8, %v7604_v8  ;;  %v7617_v46 = vmul.f32 %v7605_v41, %v7605_v41  ;;  %v7624_v54 = vmul.f32 %v7612_v31, %v14158_v58  ;;  %v7534_v35 = vld [vmem:[%s15305_s9 + $0x8] sm:$0xff]  ;;  %s12626_s9 = smov 7  }
 0x77b   :  { %v7627_v16 = vmul.f32 %v7615_v13, %v14140_v39  ;;  %v7626_v4 = vmul.f32 %v7614_v45, %v14186_v9  ;;  %v7618_v59 = vmul.f32 %v7606_v34, %v7606_v34  ;;  %v7625_v17 = vmul.f32 %v7613_v1, %v14182_v3 }
 0x77c   :  { %v7634_v50 = vadd.f32 %v7633_v12, %v7623_v0  ;;  %v7628_v53 = vmul.f32 %v7616_v42, %v14144_v43  ;;  %v7620_v18 = vmul.f32 %v7608_v48, %v7608_v48  ;;  %v7619_v19 = vmul.f32 %v7607_v15, %v7607_v15 }
 0x77d   :  { %v7629_v20 = vmul.f32 %v7617_v46, %v14150_v36  ;;  %v7637_v21 = vsel %vm7582_vm1, %v7626_v4, 0.0  ;;  %v7630_v44 = vmul.f32 %v7618_v59, %v14158_v58 }
 0x77e   :  { %v7635_v52 = vadd.f32 %v7634_v50, %v7624_v54  ;;  %v7641_v57 = vadd.f32 %v7628_v53, %v7627_v16  ;;  %v7632_v23 = vmul.f32 %v7620_v18, %v14186_v9  ;;  %v7631_v5 = vmul.f32 %v7619_v19, %v14182_v3  ;;  %v7531_v9 = vld [vmem:[%s15304_s8] sm:$0xff]  ;;  %s12625_s8 = smov 4  }
 0x780   :  { %v7636_v14 = vadd.f32 %v7635_v52, %v7625_v17  ;;  %v7642_v22 = vadd.f32 %v7641_v57, %v7629_v20  ;;  %v7645_v24 = vsel %vm7582_vm1, %v7632_v23, 0.0  ;;  %vm8182_vm1 = vcmask 228568  }
 0x782   :  { %v7638_v39 = vadd.f32 %v7637_v21, %v7636_v14  ;;  %v7643_v43 = vadd.f32 %v7642_v22, %v7630_v44 }
 0x784   :  { %7639 = vadd.xlane.f32.xlu0 %v7638_v39  ;;  %v7644_v6 = vadd.f32 %v7643_v43, %v7631_v5 }
 0x786   :  { %v7646_v27 = vadd.f32 %v7645_v24, %v7644_v6 }
 0x788   :  { %7647 = vadd.xlane.f32.xlu0 %v7646_v27 }
 0x811   :  { %v7640_v36 = vpop.xlane.xlu0 %7639 }
 0x812   :  { %v7649_v28 = vmul.f32 0.0078125, %v7640_v36 }
 0x814   :  { %v7651_v29 = vadd.f32 1e-05, %v7649_v28 }
 0x815   :  { %v7648_v32 = vpop.xlane.xlu0 %7647 }
 0x816   :  { %12584 = vrsqrt.f32 %v7651_v29  ;;  %v7650_v33 = vmul.f32 0.0078125, %v7648_v32 }
 0x818   :  { %v7652_v58 = vadd.f32 1e-05, %v7650_v33 }
 0x81a   :  { %12586 = vrsqrt.f32 %v7652_v58 }
 0x820   :  { %v12585_v3 = vpop.eup %12584 }
 0x821   :  { %v7655_v37 = vmul.f32 %v12585_v3, %v7531_v9 }
 0x823   :  { %7663 = vperm.xlu1 %12124, %v7655_v37   ;;  %v7657_v40 = vmul.f32 %v7655_v37, %v14206_v11 }
 0x824   :  { %v12587_v47 = vpop.eup %12586 }
 0x825   :  { %v7659_v8 = vsub.f32 %v7533_v38, %v7657_v40  ;;  %v7656_v31 = vmul.f32 %v12587_v47, %v7532_v51 }
 0x827   :  { %7685 = vperm.xlu1 %12124, %v7659_v8   ;;  %7668 = vperm.xlu0 %12123, %v7656_v31   ;;  %v7658_v60 = vmul.f32 %v7656_v31, %v14208_v25 }
 0x829   :  { %v7660_v41 = vsub.f32 %v7534_v35, %v7658_v60 }
 0x82b   :  { %7690 = vperm.xlu1 %12124, %v7660_v41  }
 0x8a2   :  { %v7664_v1 = vpop.permute.xlu1 %7663 }
 0x8a3   :  { %v7671_v11 = vmul.f32 %v7664_v1, %v14146_v26  ;;  %v7672_v45 = vmul.f32 %v7664_v1, %v14154_v55  ;;  %v7673_v34 = vmul.f32 %v7664_v1, %v14152_v56  ;;  %v7674_v0 = vmul.f32 %v7664_v1, %v14164_v61 }
 0x8a4   :  { %v7675_v12 = vmul.f32 %v7664_v1, %v14192_v10 }
 0x8a6   :  { %v7686_v48 = vpop.permute.xlu1 %7685  ;;  %v7669_v13 = vpop.permute.xlu0 %7668 }
 0x8a7   :  { %v7693_v15 = vadd.f32 %v7686_v48, %v7671_v11  ;;  %v7694_v42 = vadd.f32 %v7686_v48, %v7672_v45  ;;  %v7695_v46 = vadd.f32 %v7686_v48, %v7673_v34  ;;  %v7696_v54 = vadd.f32 %v7686_v48, %v7674_v0 }
 0x8a8   :  { %v7677_v25 = vmul.f32 %v7669_v13, %v14162_v30  ;;  %v7678_v50 = vmul.f32 %v7669_v13, %v14170_v63  ;;  %v7679_v26 = vmul.f32 %v7669_v13, %v14166_v62  ;;  %v7680_v55 = vmul.f32 %v7669_v13, %v14176_v2 }
 0x8a9   :  { %v7697_v16 = vadd.f32 %v7686_v48, %v7675_v12  ;;  %v14269_v56 = vmax.f32 %v7693_v15, 0.0  ;;  %v14271_v61 = vmax.f32 %v7694_v42, 0.0  ;;  %v14273_v10 = vmax.f32 %v7695_v46, 0.0 }
 0x8aa   :  { %v14275_v4 = vmax.f32 %v7696_v54, 0.0  ;;  %v7681_v59 = vmul.f32 %v7669_v13, %v14198_v49  ;;  %v7691_v30 = vpop.permute.xlu1 %7690 }
 0x8ab   :  { %v14278_v53 = vmax.f32 %v7697_v16, 0.0  ;;  %v7699_v63 = vadd.f32 %v7691_v30, %v7677_v25  ;;  %v7700_v62 = vadd.f32 %v7691_v30, %v7678_v50  ;;  %v7701_v17 = vadd.f32 %v7691_v30, %v7679_v26 }
 0x8ac   :  { %15439 = vst [vmem:[#allocation9_spill] sm:$0xff] %v14275_v4  ;;  %7720 = vst [vmem:[#allocation6 + $0x18] sm:$0xff] %v14275_v4  ;;  %v7702_v2 = vadd.f32 %v7691_v30, %v7680_v55  ;;  %v7703_v52 = vadd.f32 %v7691_v30, %v7681_v59 }
 0x8ad   :  { %v14281_v18 = vmax.f32 %v7699_v63, 0.0  ;;  %v14283_v19 = vmax.f32 %v7700_v62, 0.0  ;;  %v14285_v20 = vmax.f32 %v7701_v17, 0.0 }
 0x8ae   :  { %v14287_v57 = vmax.f32 %v7702_v2, 0.0  ;;  %v14289_v14 = vmax.f32 %v7703_v52, 0.0 }
 0x8af   :  { %v12130_v49 = vpack.i.bf16 %v14281_v18, %v14269_v56  ;;  %v12170_v21 = vpack.i.bf16 %v14283_v19, %v14271_v61  ;;  %v12190_v44 = vpack.i.bf16 %v14285_v20, %v14273_v10 }
 0x8b0   :  { %15440 = vst [vmem:[#allocation10_spill] sm:$0xff] %v14287_v57  ;;  %v12220_v22 = vpack.i.bf16 %v14287_v57, %v14275_v4  ;;  %v12250_v39 = vpack.i.bf16 %v14289_v14, %v14278_v53 }
 0x8b1   :  { %12131 = vrot.lane.b32.xlu1 %v12130_v49, %s12616_s23  ;;  %12126 = vrot.lane.b32.xlu0 %v12130_v49, %s12616_s23 }
 0x8b5   :  { %12141 = vrot.lane.b32.xlu1 %v12130_v49, %s12616_s23  ;;  %12136 = vrot.lane.b32.xlu0 %v12130_v49, %s12616_s23 }
 0x8b9   :  { %12151 = vrot.lane.b32.xlu1 %v12130_v49, %s12616_s23  ;;  %12146 = vrot.lane.b32.xlu0 %v12130_v49, %s12616_s23 }
 0x8bd   :  { %12161 = vrot.lane.b32.xlu1 %v12130_v49, %s12616_s23  ;;  %12156 = vrot.lane.b32.xlu0 %v12130_v49, %s12616_s23 }
 0x8c1   :  { %12171 = vrot.lane.b32.xlu1 %v12170_v21, %s12616_s23  ;;  %12166 = vrot.lane.b32.xlu0 %v12170_v21, %s12616_s23 }
 0x8c5   :  { %12181 = vrot.lane.b32.xlu1 %v12170_v21, %s12616_s23  ;;  %12176 = vrot.lane.b32.xlu0 %v12170_v21, %s12616_s23 }
 0x8c9   :  { %12191 = vrot.lane.b32.xlu1 %v12190_v44, %s12616_s23  ;;  %12186 = vrot.lane.b32.xlu0 %v12190_v44, %s12616_s23 }
 0x8cd   :  { %12201 = vrot.lane.b32.xlu1 %v12190_v44, %s12616_s23  ;;  %12196 = vrot.lane.b32.xlu0 %v12190_v44, %s12616_s23 }
 0x8d1   :  { %12211 = vrot.lane.b32.xlu1 %v12190_v44, %s12616_s23  ;;  %12206 = vrot.lane.b32.xlu0 %v12190_v44, %s12616_s23 }
 0x8d5   :  { %12221 = vrot.lane.b32.xlu1 %v12220_v22, %s12616_s23  ;;  %12216 = vrot.lane.b32.xlu0 %v12190_v44, %s12616_s23 }
 0x8d9   :  { %12231 = vrot.lane.b32.xlu1 %v12220_v22, %s12616_s23  ;;  %12226 = vrot.lane.b32.xlu0 %v12220_v22, %s12616_s23 }
 0x8dd   :  { %12241 = vrot.lane.b32.xlu1 %v12220_v22, %s12616_s23  ;;  %12236 = vrot.lane.b32.xlu0 %v12220_v22, %s12616_s23 }
 0x8e1   :  { %12251 = vrot.lane.b32.xlu1 %v12250_v39, %s12616_s23  ;;  %12246 = vrot.lane.b32.xlu0 %v12220_v22, %s12616_s23 }
 0x8e5   :  { %12261 = vrot.lane.b32.xlu1 %v12250_v39, %s12616_s23  ;;  %12256 = vrot.lane.b32.xlu0 %v12250_v39, %s12616_s23 }
 0x8e9   :  { %12271 = vrot.lane.b32.xlu1 %v12250_v39, %s12616_s23  ;;  %12266 = vrot.lane.b32.xlu0 %v12250_v39, %s12616_s23 }
 0x8ed   :  { %12281 = vrot.lane.b32.xlu1 %v12170_v21, %s12616_s23  ;;  %12276 = vrot.lane.b32.xlu0 %v12250_v39, %s12616_s23 }
 0x8f1   :  { %12286 = vrot.lane.b32.xlu1 %v12170_v21, %s12616_s23 }
 0x8f5   :  { %12291 = vrot.lane.b32.xlu1 %v12170_v21, %s12616_s23 }
 0x8f9   :  { %12296 = vrot.lane.b32.xlu1 %v12170_v21, %s12616_s23 }
 0x8fd   :  { %12301 = vrot.lane.b32.xlu1 %v12220_v22, %s12616_s23 }
 0x901   :  { %12306 = vrot.lane.b32.xlu1 %v12220_v22, %s12616_s23 }
 0x923   :  { %v12132_v23 = vpop.permute.xlu1 %12131  ;;  %v12127_v5 = vpop.permute.xlu0 %12126 }
 0x924   :  { %v12134_v43 = vunpack.i.h.bf16 %v12132_v23  ;;  %v12133_v6 = vunpack.i.l.bf16 %v12132_v23  ;;  %v12129_v24 = vunpack.i.h.bf16 %v12127_v5  ;;  %v12128_v27 = vunpack.i.l.bf16 %v12127_v5 }
 0x926   :  { %v14339_v36 = vmax.f32 %v14281_v18, %v12134_v43  ;;  %v14342_v28 = vmax.f32 %v14269_v56, %v12133_v6  ;;  %v14345_v29 = vmax.f32 %v14281_v18, %v12129_v24  ;;  %v14348_v32 = vmax.f32 %v14269_v56, %v12128_v27 }
 0x927   :  { %v12142_v33 = vpop.permute.xlu1 %12141  ;;  %v12137_v58 = vpop.permute.xlu0 %12136 }
 0x928   :  { %v12144_v9 = vunpack.i.h.bf16 %v12142_v33  ;;  %v12143_v3 = vunpack.i.l.bf16 %v12142_v33  ;;  %v12139_v37 = vunpack.i.h.bf16 %v12137_v58  ;;  %v12138_v38 = vunpack.i.l.bf16 %v12137_v58 }
 0x929   :  { %v12315_v40 = vpack.i.bf16 %v14339_v36, %v14342_v28  ;;  %v12310_v51 = vpack.i.bf16 %v14345_v29, %v14348_v32 }
 0x92a   :  { %v14355_v47 = vmax.f32 %v14281_v18, %v12144_v9  ;;  %v14358_v8 = vmax.f32 %v14269_v56, %v12143_v3  ;;  %v14361_v31 = vmax.f32 %v14281_v18, %v12139_v37  ;;  %v14364_v35 = vmax.f32 %v14269_v56, %v12138_v38 }
 0x92b   :  { %12316 = vrot.lane.b32.xlu0 %v12315_v40, %s12620_s4  ;;  %12311 = vrot.lane.b32.xlu1 %v12310_v51, %s12620_s4  ;;  %v12152_v60 = vpop.permute.xlu1 %12151  ;;  %v12147_v41 = vpop.permute.xlu0 %12146 }
 0x92c   :  { %v12154_v1 = vunpack.i.h.bf16 %v12152_v60  ;;  %v12153_v11 = vunpack.i.l.bf16 %v12152_v60  ;;  %v12149_v45 = vunpack.i.h.bf16 %v12147_v41  ;;  %v12148_v34 = vunpack.i.l.bf16 %v12147_v41 }
 0x92d   :  { %v12325_v0 = vpack.i.bf16 %v14355_v47, %v14358_v8  ;;  %v12320_v12 = vpack.i.bf16 %v14361_v31, %v14364_v35 }
 0x92e   :  { %v14373_v48 = vmax.f32 %v14281_v18, %v12154_v1  ;;  %v14376_v13 = vmax.f32 %v14269_v56, %v12153_v11  ;;  %v14379_v15 = vmax.f32 %v14281_v18, %v12149_v45  ;;  %v14382_v42 = vmax.f32 %v14269_v56, %v12148_v34 }
 0x92f   :  { %12326 = vrot.lane.b32.xlu0 %v12325_v0, %s12620_s4  ;;  %12321 = vrot.lane.b32.xlu1 %v12320_v12, %s12620_s4  ;;  %v12162_v46 = vpop.permute.xlu1 %12161  ;;  %v12157_v54 = vpop.permute.xlu0 %12156 }
 0x930   :  { %v12164_v25 = vunpack.i.h.bf16 %v12162_v46  ;;  %v12163_v50 = vunpack.i.l.bf16 %v12162_v46  ;;  %v12159_v26 = vunpack.i.h.bf16 %v12157_v54  ;;  %v12158_v55 = vunpack.i.l.bf16 %v12157_v54 }
 0x931   :  { %v12335_v16 = vpack.i.bf16 %v14373_v48, %v14376_v13  ;;  %v12330_v59 = vpack.i.bf16 %v14379_v15, %v14382_v42 }
 0x932   :  { %v14391_v30 = vmax.f32 %v14281_v18, %v12164_v25  ;;  %v14394_v63 = vmax.f32 %v14269_v56, %v12163_v50  ;;  %v14397_v62 = vmax.f32 %v14281_v18, %v12159_v26  ;;  %v14400_v17 = vmax.f32 %v14269_v56, %v12158_v55 }
 0x933   :  { %12336 = vrot.lane.b32.xlu0 %v12335_v16, %s12620_s4  ;;  %12331 = vrot.lane.b32.xlu1 %v12330_v59, %s12620_s4  ;;  %v12172_v2 = vpop.permute.xlu1 %12171  ;;  %v12167_v52 = vpop.permute.xlu0 %12166 }
 0x934   :  { %v12174_v49 = vunpack.i.h.bf16 %v12172_v2  ;;  %v12173_v21 = vunpack.i.l.bf16 %v12172_v2  ;;  %v12169_v44 = vunpack.i.h.bf16 %v12167_v52  ;;  %v12168_v22 = vunpack.i.l.bf16 %v12167_v52 }
 0x935   :  { %v12345_v39 = vpack.i.bf16 %v14391_v30, %v14394_v63  ;;  %v12340_v18 = vpack.i.bf16 %v14397_v62, %v14400_v17 }
 0x936   :  { %v14409_v23 = vmax.f32 %v14283_v19, %v12174_v49  ;;  %v14412_v56 = vmax.f32 %v14271_v61, %v12173_v21  ;;  %v14415_v5 = vmax.f32 %v14283_v19, %v12169_v44  ;;  %v14418_v43 = vmax.f32 %v14271_v61, %v12168_v22 }
 0x937   :  { %12346 = vrot.lane.b32.xlu0 %v12345_v39, %s12620_s4  ;;  %12341 = vrot.lane.b32.xlu1 %v12340_v18, %s12620_s4  ;;  %v12182_v6 = vpop.permute.xlu1 %12181  ;;  %v12177_v24 = vpop.permute.xlu0 %12176 }
 0x938   :  { %v12184_v27 = vunpack.i.h.bf16 %v12182_v6  ;;  %v12179_v33 = vunpack.i.h.bf16 %v12177_v24  ;;  %v12178_v58 = vunpack.i.l.bf16 %v12177_v24  ;;  %v12183_v9 = vunpack.i.l.bf16 %v12182_v6 }
 0x939   :  { %v12350_v3 = vpack.i.bf16 %v14415_v5, %v14418_v43  ;;  %v12355_v37 = vpack.i.bf16 %v14409_v23, %v14412_v56 }
 0x93a   :  { %v14427_v38 = vmax.f32 %v14283_v19, %v12179_v33  ;;  %v14430_v40 = vmax.f32 %v14271_v61, %v12178_v58  ;;  %v14435_v41 = vmax.f32 %v14283_v19, %v12184_v27  ;;  %v14438_v1 = vmax.f32 %v14271_v61, %v12183_v9 }
 0x93b   :  { %12351 = vrot.lane.b32.xlu0 %v12350_v3, %s12620_s4  ;;  %12356 = vrot.lane.b32.xlu1 %v12355_v37, %s12620_s4  ;;  %v12192_v51 = vpop.permute.xlu1 %12191  ;;  %v12187_v60 = vpop.permute.xlu0 %12186 }
 0x93c   :  { %v12189_v11 = vunpack.i.h.bf16 %v12187_v60  ;;  %v12188_v45 = vunpack.i.l.bf16 %v12187_v60  ;;  %v12360_v34 = vpack.i.bf16 %v14427_v38, %v14430_v40  ;;  %v12194_v46 = vunpack.i.h.bf16 %v12192_v51 }
 0x93d   :  { %v12193_v50 = vunpack.i.l.bf16 %v12192_v51  ;;  %v12365_v16 = vpack.i.bf16 %v14435_v41, %v14438_v1 }
 0x93e   :  { %v8125_v26 = vmax.f32 %v14285_v20, %v12189_v11  ;;  %v8124_v55 = vmax.f32 %v14273_v10, %v12188_v45  ;;  %v8166_v18 = vmax.f32 %v14285_v20, %v12194_v46 }
 0x93f   :  { %12361 = vrot.lane.b32.xlu0 %v12360_v34, %s12620_s4  ;;  %v12202_v0 = vpop.permute.xlu1 %12201  ;;  %v12197_v12 = vpop.permute.xlu0 %12196  ;;  %v8165_v6 = vmax.f32 %v14273_v10, %v12193_v50 }
 0x940   :  { %v12199_v54 = vunpack.i.h.bf16 %v12197_v12  ;;  %v12198_v25 = vunpack.i.l.bf16 %v12197_v12  ;;  %v12204_v52 = vunpack.i.h.bf16 %v12202_v0  ;;  %v12203_v44 = vunpack.i.l.bf16 %v12202_v0 }
 0x941   :  { %v12370_v24 = vpack.i.bf16 %v8125_v26, %v8124_v55  ;;  %v12375_v0 = vpack.i.bf16 %v8166_v18, %v8165_v6 }
 0x942   :  { %v8207_v59 = vmax.f32 %v14285_v20, %v12199_v54  ;;  %v8206_v2 = vmax.f32 %v14273_v10, %v12198_v25  ;;  %v14459_v9 = vmax.f32 %v14285_v20, %v12204_v52  ;;  %v14464_v51 = vmax.f32 %v14273_v10, %v12203_v44 }
 0x943   :  { %12366 = vrot.lane.b32.xlu0 %v12365_v16, %s12620_s4  ;;  %v12212_v49 = vpop.permute.xlu1 %12211  ;;  %v12207_v21 = vpop.permute.xlu0 %12206 }
 0x944   :  { %v12209_v22 = vunpack.i.h.bf16 %v12207_v21  ;;  %v12208_v39 = vunpack.i.l.bf16 %v12207_v21  ;;  %v12380_v27 = vpack.i.bf16 %v8207_v59, %v8206_v2  ;;  %v12214_v60 = vunpack.i.h.bf16 %v12212_v49 }
 0x945   :  { %v12213_v34 = vunpack.i.l.bf16 %v12212_v49  ;;  %v12385_v59 = vpack.i.bf16 %v14459_v9, %v14464_v51 }
 0x946   :  { %v14453_v33 = vmax.f32 %v14285_v20, %v12209_v22  ;;  %v14456_v58 = vmax.f32 %v14273_v10, %v12208_v39  ;;  %12381 = vrot.lane.b32.xlu1 %v12380_v27, %s12620_s4  ;;  %v14477_v26 = vmax.f32 %v14285_v20, %v12214_v60 }
 0x947   :  { %12371 = vrot.lane.b32.xlu0 %v12370_v24, %s12620_s4  ;;  %v12222_v3 = vpop.permute.xlu1 %12221  ;;  %v12217_v37 = vpop.permute.xlu0 %12216  ;;  %v14482_v2 = vmax.f32 %v14273_v10, %v12213_v34 }
 0x948   :  { %v12219_v11 = vunpack.i.h.bf16 %v12217_v37  ;;  %v12218_v45 = vunpack.i.l.bf16 %v12217_v37  ;;  %v12390_v12 = vpack.i.bf16 %v14453_v33, %v14456_v58  ;;  %v12224_v52 = vunpack.i.h.bf16 %v12222_v3 }
 0x949   :  { %v12223_v49 = vunpack.i.l.bf16 %v12222_v3  ;;  %v12395_v37 = vpack.i.bf16 %v14477_v26, %v14482_v2 }
 0x94a   :  { %v14469_v46 = vmax.f32 %v14285_v20, %v12219_v11  ;;  %v14472_v54 = vmax.f32 %v14273_v10, %v12218_v45  ;;  %12391 = vrot.lane.b32.xlu1 %v12390_v12, %s12620_s4  ;;  %v14495_v27 = vmax.f32 %v14287_v57, %v12224_v52 }
 0x94b   :  { %12376 = vrot.lane.b32.xlu0 %v12375_v0, %s12620_s4  ;;  %v12232_v25 = vpop.permute.xlu1 %12231  ;;  %v12227_v50 = vpop.permute.xlu0 %12226  ;;  %v14498_v3 = vmax.f32 %v14275_v4, %v12223_v49 }
 0x94c   :  { %v12229_v55 = vunpack.i.h.bf16 %v12227_v50  ;;  %v12228_v16 = vunpack.i.l.bf16 %v12227_v50  ;;  %v12400_v21 = vpack.i.bf16 %v14469_v46, %v14472_v54  ;;  %v12234_v18 = vunpack.i.h.bf16 %v12232_v25 }
 0x94d   :  { %v12233_v10 = vunpack.i.l.bf16 %v12232_v25 }
 0x94e   :  { %v14487_v44 = vmax.f32 %v14287_v57, %v12229_v55  ;;  %v14490_v22 = vmax.f32 %v14275_v4, %v12228_v16  ;;  %12401 = vrot.lane.b32.xlu1 %v12400_v21, %s12620_s4  ;;  %v14513_v0 = vmax.f32 %v14287_v57, %v12234_v18  ;;  %v12405_v16 = vpack.i.bf16 %v14495_v27, %v14498_v3 }
 0x94f   :  { %12386 = vrot.lane.b32.xlu0 %v12385_v59, %s12620_s4  ;;  %v12242_v20 = vpop.permute.xlu1 %12241  ;;  %v12237_v39 = vpop.permute.xlu0 %12236  ;;  %v14516_v12 = vmax.f32 %v14275_v4, %v12233_v10 }
 0x950   :  { %v12239_v6 = vunpack.i.h.bf16 %v12237_v39  ;;  %v12238_v24 = vunpack.i.l.bf16 %v12237_v39  ;;  %v12410_v60 = vpack.i.bf16 %v14487_v44, %v14490_v22  ;;  %15441 = vst [vmem:[#allocation11_spill] sm:$0xff] %v14513_v0  ;;  %v12244_v50 = vunpack.i.h.bf16 %v12242_v20 }
 0x951   :  { %15442 = vst [vmem:[#allocation12_spill] sm:$0xff] %v14516_v12  ;;  %v12243_v55 = vunpack.i.l.bf16 %v12242_v20  ;;  %v12415_v39 = vpack.i.bf16 %v14513_v0, %v14516_v12 }
 0x952   :  { %v14505_v11 = vmax.f32 %v14287_v57, %v12239_v6  ;;  %v14508_v45 = vmax.f32 %v14275_v4, %v12238_v24  ;;  %12411 = vrot.lane.b32.xlu1 %v12410_v60, %s12620_s4  ;;  %v14527_v18 = vmax.f32 %v14287_v57, %v12244_v50 }
 0x953   :  { %12396 = vrot.lane.b32.xlu0 %v12395_v37, %s12620_s4  ;;  %v12247_v34 = vpop.permute.xlu0 %12246  ;;  %v12252_v25 = vpop.permute.xlu1 %12251  ;;  %v14530_v20 = vmax.f32 %v14275_v4, %v12243_v55 }
 0x954   :  { %v12420_v59 = vpack.i.bf16 %v14505_v11, %v14508_v45  ;;  %v12249_v10 = vunpack.i.h.bf16 %v12247_v34  ;;  %v12248_v6 = vunpack.i.l.bf16 %v12247_v34 }
 0x955   :  { %v12425_v34 = vpack.i.bf16 %v14527_v18, %v14530_v20 }
 0x956   :  { %12421 = vrot.lane.b32.xlu1 %v12420_v59, %s12620_s4  ;;  %v12254_v59 = vunpack.i.h.bf16 %v12252_v25  ;;  %v14536_v50 = vmax.f32 %v14287_v57, %v12249_v10  ;;  %v14539_v55 = vmax.f32 %v14275_v4, %v12248_v6 }
 0x957   :  { %12406 = vrot.lane.b32.xlu0 %v12405_v16, %s12620_s4  ;;  %v12257_v52 = vpop.permute.xlu0 %12256  ;;  %v12262_v24 = vpop.permute.xlu1 %12261 }
 0x958   :  { %v12259_v49 = vunpack.i.h.bf16 %v12257_v52  ;;  %v12258_v21 = vunpack.i.l.bf16 %v12257_v52  ;;  %v12253_v52 = vunpack.i.l.bf16 %v12252_v25  ;;  %15443 = vst [vmem:[#allocation13_spill] sm:$0xff] %v14536_v50  ;;  %15444 = vst [vmem:[#allocation14_spill] sm:$0xff] %v14539_v55  ;;  %v12263_v10 = vunpack.i.l.bf16 %v12262_v24 }
 0x959   :  { %v8538_v57 = vmax.f32 %v14289_v14, %v12254_v59 }
 0x95a   :  { %v8579_v37 = vmax.f32 %v14289_v14, %v12259_v49  ;;  %v8578_v60 = vmax.f32 %v14278_v53, %v12258_v21  ;;  %v14569_v59 = vmax.f32 %v14278_v53, %v12263_v10 }
 0x95b   :  { %12416 = vrot.lane.b32.xlu0 %v12415_v39, %s12620_s4  ;;  %v12267_v16 = vpop.permute.xlu0 %12266  ;;  %v12264_v39 = vunpack.i.h.bf16 %v12262_v24 }
 0x95c   :  { %v12269_v7 = vunpack.i.h.bf16 %v12267_v16  ;;  %v12268_v12 = vunpack.i.l.bf16 %v12267_v16  ;;  %v12440_v0 = vpack.i.bf16 %v8579_v37, %v8578_v60  ;;  %v12272_v16 = vpop.permute.xlu1 %12271  ;;  %v8537_v37 = vmax.f32 %v14278_v53, %v12253_v52  ;;  %15450 = vst [vmem:[#allocation20_spill] sm:$0xff] %v14569_v59 }
 0x95d   :  { %v14566_v24 = vmax.f32 %v14289_v14, %v12264_v39 }
 0x95e   :  { %v14544_v49 = vmax.f32 %v14289_v14, %v12269_v7  ;;  %v14547_v21 = vmax.f32 %v14278_v53, %v12268_v12  ;;  %12441 = vrot.lane.b32.xlu1 %v12440_v0, %s12620_s4  ;;  %v12430_v7 = vpack.i.bf16 %v14536_v50, %v14539_v55 }
 0x95f   :  { %12426 = vrot.lane.b32.xlu0 %v12425_v34, %s12620_s4  ;;  %v12277_v25 = vpop.permute.xlu0 %12276  ;;  %15449 = vst [vmem:[#allocation19_spill] sm:$0xff] %v14566_v24  ;;  %v12274_v34 = vunpack.i.h.bf16 %v12272_v16 }
 0x960   :  { %15445 = vst [vmem:[#allocation15_spill] sm:$0xff] %v14544_v49  ;;  %15446 = vst [vmem:[#allocation16_spill] sm:$0xff] %v14547_v21  ;;  %v12279_v6 = vunpack.i.h.bf16 %v12277_v25  ;;  %v12278_v4 = vunpack.i.l.bf16 %v12277_v25  ;;  %v12450_v12 = vpack.i.bf16 %v14544_v49, %v14547_v21  ;;  %v12273_v25 = vunpack.i.l.bf16 %v12272_v16  ;;  %v12282_v21 = vpop.permute.xlu1 %12281 }
 0x961   :  { %v14578_v39 = vmax.f32 %v14289_v14, %v12274_v34 }
 0x962   :  { %v14558_v60 = vmax.f32 %v14289_v14, %v12279_v6  ;;  %v14561_v0 = vmax.f32 %v14278_v53, %v12278_v4  ;;  %12451 = vrot.lane.b32.xlu1 %v12450_v12, %s12620_s4  ;;  %v12435_v6 = vpack.i.bf16 %v8538_v57, %v8537_v37  ;;  %v12445_v4 = vpack.i.bf16 %v14566_v24, %v14569_v59 }
 0x963   :  { %12431 = vrot.lane.b32.xlu0 %v12430_v7, %s12620_s4  ;;  %15451 = vst [vmem:[#allocation21_spill] sm:$0xff] %v14578_v39  ;;  %v14581_v10 = vmax.f32 %v14278_v53, %v12273_v25  ;;  %v12284_v7 = vunpack.i.h.bf16 %v12282_v21  ;;  %v12283_v12 = vunpack.i.l.bf16 %v12282_v21  ;;  %v15456_v25 = vmov 0  }
 0x964   :  { %15447 = vst [vmem:[#allocation17_spill] sm:$0xff] %v14558_v60  ;;  %15448 = vst [vmem:[#allocation18_spill] sm:$0xff] %v14561_v0  ;;  %v12460_v52 = vpack.i.bf16 %v14558_v60, %v14561_v0  ;;  %v14596_v53 = vpop.permute.xlu1 %12286 }
 0x965   :  { %15452 = vst [vmem:[#allocation22_spill] sm:$0xff] %v14581_v10  ;;  %v14585_v57 = vmax.f32 %v14283_v19, %v12284_v7  ;;  %v14588_v16 = vmax.f32 %v14271_v61, %v12283_v12  ;;  %v12455_v37 = vpack.i.bf16 %v14578_v39, %v14581_v10  ;;  %90 = vst.msk [vmem:[#allocation4] sm:$0xff] %vm89_vm5, %v15456_v25  ;;  %vm8223_vm5 = vcmask 236768  }
 0x966   :  { %12461 = vrot.lane.b32.xlu1 %v12460_v52, %s12620_s4 }
 0x967   :  { %12436 = vrot.lane.b32.xlu0 %v12435_v6, %s12620_s4  ;;  %15453 = vst [vmem:[#allocation23_spill] sm:$0xff] %v14585_v57  ;;  %15454 = vst [vmem:[#allocation24_spill] sm:$0xff] %v14588_v16  ;;  %v12465_v14 = vpack.i.bf16 %v14585_v57, %v14588_v16 }
 0x968   :  { %v14598_v21 = vpop.permute.xlu1 %12291 }
 0x96b   :  { %12446 = vrot.lane.b32.xlu0 %v12445_v4, %s12620_s4 }
 0x96c   :  { %v14600_v52 = vpop.permute.xlu1 %12296 }
 0x96f   :  { %12456 = vrot.lane.b32.xlu0 %v12455_v37, %s12620_s4 }
 0x970   :  { %v14602_v34 = vpop.permute.xlu1 %12301 }
 0x971   :  { %15455 = vst [vmem:[#allocation25_spill] sm:$0xff] %v14602_v34 }
 0x973   :  { %12466 = vrot.lane.b32.xlu0 %v12465_v14, %s12620_s4  ;;  %s12627_s4 = smov 1  }
 0x974   :  { %v14605_v6 = vpop.permute.xlu1 %12306 }
 0x99d   :  { %v12317_v4 = vpop.permute.xlu0 %12316  ;;  %v12312_v7 = vpop.permute.xlu1 %12311 }
 0x99e   :  { %v12319_v12 = vunpack.i.h.bf16 %v12317_v4  ;;  %v12318_v37 = vunpack.i.l.bf16 %v12317_v4  ;;  %v12314_v16 = vunpack.i.h.bf16 %v12312_v7  ;;  %v12313_v57 = vunpack.i.l.bf16 %v12312_v7 }
 0x9a0   :  { %v7779_v14 = vmax.f32 %v14339_v36, %v12319_v12  ;;  %v7778_v10 = vmax.f32 %v14342_v28, %v12318_v37  ;;  %v7750_v39 = vmax.f32 %v14345_v29, %v12314_v16  ;;  %v7749_v0 = vmax.f32 %v14348_v32, %v12313_v57 }
 0x9a1   :  { %v12327_v60 = vpop.permute.xlu0 %12326  ;;  %v12322_v59 = vpop.permute.xlu1 %12321 }
 0x9a2   :  { %v12329_v24 = vunpack.i.h.bf16 %v12327_v60  ;;  %v12328_v25 = vunpack.i.l.bf16 %v12327_v60  ;;  %v12324_v49 = vunpack.i.h.bf16 %v12322_v59  ;;  %v12323_v55 = vunpack.i.l.bf16 %v12322_v59 }
 0x9a3   :  { %v7780_v50 = vpack.c.bf16 %v7779_v14, %v7778_v10  ;;  %v7751_v34 = vpack.c.bf16 %v7750_v39, %v7749_v0 }
 0x9a4   :  { %v7837_v4 = vmax.f32 %v14355_v47, %v12329_v24  ;;  %v7836_v7 = vmax.f32 %v14358_v8, %v12328_v25  ;;  %v7808_v36 = vmax.f32 %v14361_v31, %v12324_v49  ;;  %v7807_v28 = vmax.f32 %v14364_v35, %v12323_v55 }
 0x9a5   :  { %7782 = vrot.lane.b32.xlu1 %v7780_v50, %s12625_s8  ;;  %7753 = vrot.lane.b32.xlu0 %v7751_v34, %s12626_s9  ;;  %v12337_v29 = vpop.permute.xlu0 %12336  ;;  %v12332_v32 = vpop.permute.xlu1 %12331  ;;  %s12642_s9 = smov 97  }
 0x9a6   :  { %v12339_v60 = vunpack.i.h.bf16 %v12337_v29  ;;  %v12338_v57 = vunpack.i.l.bf16 %v12337_v29  ;;  %v12334_v59 = vunpack.i.h.bf16 %v12332_v32  ;;  %v12333_v10 = vunpack.i.l.bf16 %v12332_v32 }
 0x9a7   :  { %v7838_v0 = vpack.c.bf16 %v7837_v4, %v7836_v7  ;;  %v7809_v39 = vpack.c.bf16 %v7808_v36, %v7807_v28 }
 0x9a8   :  { %v7895_v47 = vmax.f32 %v14373_v48, %v12339_v60  ;;  %v7894_v8 = vmax.f32 %v14376_v13, %v12338_v57  ;;  %v7866_v31 = vmax.f32 %v14379_v15, %v12334_v59  ;;  %v7865_v35 = vmax.f32 %v14382_v42, %v12333_v10 }
 0x9a9   :  { %7840 = vrot.lane.b32.xlu1 %v7838_v0, %s12616_s23  ;;  %7811 = vrot.lane.b32.xlu0 %v7809_v39, %s12627_s4  ;;  %v12347_v50 = vpop.permute.xlu0 %12346  ;;  %v12342_v55 = vpop.permute.xlu1 %12341  ;;  %s12643_s4 = smov 34  }
 0x9aa   :  { %v12349_v49 = vunpack.i.h.bf16 %v12347_v50  ;;  %v12348_v24 = vunpack.i.l.bf16 %v12347_v50  ;;  %v12344_v16 = vunpack.i.h.bf16 %v12342_v55  ;;  %v12343_v34 = vunpack.i.l.bf16 %v12342_v55 }
 0x9ab   :  { %v7896_v25 = vpack.c.bf16 %v7895_v47, %v7894_v8  ;;  %v7867_v12 = vpack.c.bf16 %v7866_v31, %v7865_v35  ;;  %v12299_v35 = vunpack.i.h.bf16 %v14600_v52 }
 0x9ac   :  { %v7953_v48 = vmax.f32 %v14391_v30, %v12349_v49  ;;  %v7952_v13 = vmax.f32 %v14394_v63, %v12348_v24  ;;  %v7924_v15 = vmax.f32 %v14397_v62, %v12344_v16  ;;  %v7923_v42 = vmax.f32 %v14400_v17, %v12343_v34 }
 0x9ad   :  { %7898 = vrot.lane.b32.xlu1 %v7896_v25, %s12628_s27  ;;  %7869 = vrot.lane.b32.xlu0 %v7867_v12, %s12629_s7  ;;  %v12352_v37 = vpop.permute.xlu0 %12351  ;;  %v12357_v14 = vpop.permute.xlu1 %12356  ;;  %v12298_v49 = vunpack.i.l.bf16 %v14600_v52  ;;  %v12293_v34 = vunpack.i.l.bf16 %v14598_v21  ;;  %s12644_s27 = smov 37   ;;  %s12645_s7 = smov 28  }
 0x9ae   :  { %v12354_v4 = vunpack.i.h.bf16 %v12352_v37  ;;  %v12353_v7 = vunpack.i.l.bf16 %v12352_v37  ;;  %v12359_v36 = vunpack.i.h.bf16 %v12357_v14  ;;  %v12358_v28 = vunpack.i.l.bf16 %v12357_v14 }
 0x9af   :  { %v7925_v29 = vpack.c.bf16 %v7924_v15, %v7923_v42  ;;  %v7954_v32 = vpack.c.bf16 %v7953_v48, %v7952_v13  ;;  %v8195_v13 = vmax.f32 %v14283_v19, %v12299_v35  ;;  %v8194_v52 = vmax.f32 %v14271_v61, %v12298_v49 }
 0x9b0   :  { %v7982_v30 = vmax.f32 %v14415_v5, %v12354_v4  ;;  %v7981_v63 = vmax.f32 %v14418_v43, %v12353_v7  ;;  %v8036_v62 = vmax.f32 %v14409_v23, %v12359_v36  ;;  %v8035_v17 = vmax.f32 %v14412_v56, %v12358_v28 }
 0x9b1   :  { %7927 = vrot.lane.b32.xlu1 %v7925_v29, %s12630_s29  ;;  %7956 = vrot.lane.b32.xlu0 %v7954_v32, %s12631_s3  ;;  %v12362_v60 = vpop.permute.xlu0 %12361  ;;  %v12289_v5 = vunpack.i.h.bf16 %v14596_v53  ;;  %v12288_v43 = vunpack.i.l.bf16 %v14596_v53  ;;  %v12294_v53 = vunpack.i.h.bf16 %v14598_v21  ;;  %v8153_v7 = vmax.f32 %v14271_v61, %v12293_v34  ;;  %s12646_s29 = smov 31   ;;  %s12647_s3 = smov 99  }
 0x9b2   :  { %v12364_v57 = vunpack.i.h.bf16 %v12362_v60  ;;  %v12363_v59 = vunpack.i.l.bf16 %v12362_v60  ;;  %v7983_v10 = vpack.c.bf16 %v7982_v30, %v7981_v63  ;;  %v8037_v0 = vpack.c.bf16 %v8036_v62, %v8035_v17 }
 0x9b3   :  { %v8112_v55 = vmax.f32 %v14271_v61, %v12288_v43  ;;  %v8154_v37 = vmax.f32 %v14283_v19, %v12294_v53 }
 0x9b4   :  { %v8065_v39 = vmax.f32 %v14427_v38, %v12364_v57  ;;  %v8064_v47 = vmax.f32 %v14430_v40, %v12363_v59  ;;  %v8113_v40 = vmax.f32 %v14283_v19, %v12289_v5 }
 0x9b5   :  { %7985 = vrot.lane.b32.xlu1 %v7983_v10, %s12632_s6  ;;  %8039 = vrot.lane.b32.xlu0 %v8037_v0, %s12633_s18  ;;  %v12367_v23 = vpop.permute.xlu0 %12366  ;;  %s12648_s6 = smov 96  }
 0x9b6   :  { %v12369_v56 = vunpack.i.h.bf16 %v12367_v23  ;;  %v12368_v8 = vunpack.i.l.bf16 %v12367_v23  ;;  %v8066_v31 = vpack.c.bf16 %v8065_v39, %v8064_v47 }
 0x9b8   :  { %v8094_v50 = vmax.f32 %v14435_v41, %v12369_v56  ;;  %v8093_v38 = vmax.f32 %v14438_v1, %v12368_v8  ;;  %v12382_v16 = vpop.permute.xlu1 %12381 }
 0x9b9   :  { %8068 = vrot.lane.b32.xlu1 %v8066_v31, %s12634_s19  ;;  %v12372_v24 = vpop.permute.xlu0 %12371  ;;  %v12384_v41 = vunpack.i.h.bf16 %v12382_v16  ;;  %v12383_v48 = vunpack.i.l.bf16 %v12382_v16 }
 0x9ba   :  { %v12374_v25 = vunpack.i.h.bf16 %v12372_v24  ;;  %v12373_v12 = vunpack.i.l.bf16 %v12372_v24  ;;  %v8095_v1 = vpack.c.bf16 %v8094_v50, %v8093_v38 }
 0x9bb   :  { %v8217_v21 = vmax.f32 %v8195_v13, %v12384_v41  ;;  %v8216_v29 = vmax.f32 %v8194_v52, %v12383_v48 }
 0x9bc   :  { %v8135_v15 = vmax.f32 %v8113_v40, %v12374_v25  ;;  %v8134_v42 = vmax.f32 %v8112_v55, %v12373_v12  ;;  %8097 = vrot.lane.b32.xlu0 %v8095_v1, %s12635_s0  ;;  %v12392_v4 = vpop.permute.xlu1 %12391  ;;  %s12649_s0 = smov 93  }
 0x9bd   :  { %v12377_v14 = vpop.permute.xlu0 %12376  ;;  %v12394_v32 = vunpack.i.h.bf16 %v12392_v4  ;;  %v12393_v30 = vunpack.i.l.bf16 %v12392_v4  ;;  %v8218_v47 = vpack.c.bf16 %v8217_v21, %v8216_v29  ;;  %v12309_v29 = vunpack.i.h.bf16 %v14605_v6 }
 0x9be   :  { %v12379_v36 = vunpack.i.h.bf16 %v12377_v14  ;;  %v12378_v28 = vunpack.i.l.bf16 %v12377_v14  ;;  %v8136_v63 = vpack.c.bf16 %v8135_v15, %v8134_v42  ;;  %v15458_v14 = vld [vmem:[#allocation12_spill] sm:$0xff] }
 0x9bf   :  { %v8275_v39 = vmax.f32 %v14453_v33, %v12394_v32  ;;  %v8274_v61 = vmax.f32 %v14456_v58, %v12393_v30  ;;  %v15459_v30 = vld [vmem:[#allocation25_spill] sm:$0xff] }
 0x9c0   :  { %v8176_v62 = vmax.f32 %v8154_v37, %v12379_v36  ;;  %v8175_v17 = vmax.f32 %v8153_v7, %v12378_v28  ;;  %8138 = vrot.lane.b32.xlu1 %v8136_v63, %s12636_s2  ;;  %v12402_v60 = vpop.permute.xlu1 %12401  ;;  %v15457_v37 = vld [vmem:[#allocation11_spill] sm:$0xff]  ;;  %v12304_v63 = vunpack.i.h.bf16 %v15459_v30  ;;  %s12650_s2 = smov 33  }
 0x9c1   :  { %v12387_v19 = vpop.permute.xlu0 %12386  ;;  %v12404_v10 = vunpack.i.h.bf16 %v12402_v60  ;;  %v12403_v0 = vunpack.i.l.bf16 %v12402_v60  ;;  %v8276_v40 = vpack.c.bf16 %v8275_v39, %v8274_v61 }
 0x9c2   :  { %v12389_v57 = vunpack.i.h.bf16 %v12387_v19  ;;  %v12388_v59 = vunpack.i.l.bf16 %v12387_v19  ;;  %v8177_v5 = vpack.c.bf16 %v8176_v62, %v8175_v17  ;;  %v12303_v62 = vunpack.i.l.bf16 %v15459_v30 }
 0x9c3   :  { %v8333_v56 = vmax.f32 %v14469_v46, %v12404_v10  ;;  %v8332_v35 = vmax.f32 %v14472_v54, %v12403_v0 }
 0x9c4   :  { %v8246_v43 = vmax.f32 %v14459_v9, %v12389_v57  ;;  %v8245_v23 = vmax.f32 %v14464_v51, %v12388_v59  ;;  %8220 = vrot.lane.b32.xlu1 %v8218_v47, %s12637_s5  ;;  %8179 = vrot.lane.b32.xlu0 %v8177_v5, %s12638_s24  ;;  %v12412_v31 = vpop.permute.xlu1 %12411  ;;  %v15463_v5 = vld [vmem:[#allocation14_spill] sm:$0xff]  ;;  %s12651_s5 = smov 30   ;;  %s12653_s24 = smov 24  }
 0x9c5   :  { %v12397_v8 = vpop.permute.xlu0 %12396  ;;  %v12414_v38 = vunpack.i.h.bf16 %v12412_v31  ;;  %v12413_v58 = vunpack.i.l.bf16 %v12412_v31  ;;  %v8334_v16 = vpack.c.bf16 %v8333_v56, %v8332_v35  ;;  %v12612_v56 = vld [vmem:[#allocation6 + $0x18] sm:$0xff] }
 0x9c6   :  { %v12399_v50 = vunpack.i.h.bf16 %v12397_v8  ;;  %v12398_v33 = vunpack.i.l.bf16 %v12397_v8  ;;  %v8247_v55 = vpack.c.bf16 %v8246_v43, %v8245_v23  ;;  %v8525_v8 = vmax.f32 %v12612_v56, %v12303_v62 }
 0x9c7   :  { %v8391_v49 = vmax.f32 %v14487_v44, %v12414_v38  ;;  %v8390_v34 = vmax.f32 %v14490_v22, %v12413_v58 }
 0x9c8   :  { %v8304_v9 = vmax.f32 %v14477_v26, %v12399_v50  ;;  %v8303_v51 = vmax.f32 %v14482_v2, %v12398_v33  ;;  %8278 = vrot.lane.b32.xlu1 %v8276_v40, %s12639_s25  ;;  %8249 = vrot.lane.b32.xlu0 %v8247_v55, %s12640_s28  ;;  %v12422_v53 = vpop.permute.xlu1 %12421 }
 0x9c9   :  { %v12407_v46 = vpop.permute.xlu0 %12406  ;;  %v12424_v25 = vunpack.i.h.bf16 %v12422_v53  ;;  %v12423_v12 = vunpack.i.l.bf16 %v12422_v53  ;;  %v8392_v22 = vpack.c.bf16 %v8391_v49, %v8390_v34  ;;  %v15464_v34 = vld [vmem:[#allocation15_spill] sm:$0xff] }
 0x9ca   :  { %v12409_v24 = vunpack.i.h.bf16 %v12407_v46  ;;  %v12408_v54 = vunpack.i.l.bf16 %v12407_v46  ;;  %v8305_v41 = vpack.c.bf16 %v8304_v9, %v8303_v51 }
 0x9cb   :  { %v8449_v15 = vmax.f32 %v14505_v11, %v12424_v25  ;;  %v8448_v42 = vmax.f32 %v14508_v45, %v12423_v12  ;;  %v12308_v11 = vunpack.i.l.bf16 %v14605_v6  ;;  %v15460_v6 = vld [vmem:[#allocation10_spill] sm:$0xff]  ;;  %v15465_v12 = vld [vmem:[#allocation16_spill] sm:$0xff] }
 0x9cc   :  { %v8362_v26 = vmax.f32 %v14495_v27, %v12409_v24  ;;  %v8361_v2 = vmax.f32 %v14498_v3, %v12408_v54  ;;  %8336 = vrot.lane.b32.xlu1 %v8334_v16, %s12641_s1  ;;  %8307 = vrot.lane.b32.xlu0 %v8305_v41, %s12642_s9  ;;  %v8567_v39 = vmax.f32 %v15460_v6, %v12309_v29  ;;  %s12654_s1 = smov 121   ;;  %s12655_s9 = smov 116  }
 0x9cd   :  { %v12417_v48 = vpop.permute.xlu0 %12416  ;;  %v8450_v36 = vpack.c.bf16 %v8449_v15, %v8448_v42  ;;  %v8526_v23 = vmax.f32 %v15460_v6, %v12304_v63 }
 0x9ce   :  { %v12419_v1 = vunpack.i.h.bf16 %v12417_v48  ;;  %v12418_v13 = vunpack.i.l.bf16 %v12417_v48  ;;  %v8363_v44 = vpack.c.bf16 %v8362_v26, %v8361_v2  ;;  %v15466_v48 = vld [vmem:[#allocation19_spill] sm:$0xff] }
 0x9d0   :  { %v8420_v52 = vmax.f32 %v15457_v37, %v12419_v1  ;;  %v8419_v4 = vmax.f32 %v15458_v14, %v12418_v13  ;;  %8394 = vrot.lane.b32.xlu1 %v8392_v22, %s12643_s4  ;;  %8365 = vrot.lane.b32.xlu0 %v8363_v44, %s12644_s27  ;;  %v12442_v3 = vpop.permute.xlu1 %12441  ;;  %v15467_v13 = vld [vmem:[#allocation20_spill] sm:$0xff]  ;;  %s12656_s4 = smov 120   ;;  %s12657_s27 = smov 114  }
 0x9d1   :  { %v12427_v27 = vpop.permute.xlu0 %12426  ;;  %v12444_v19 = vunpack.i.h.bf16 %v12442_v3  ;;  %v12443_v60 = vunpack.i.l.bf16 %v12442_v3 }
 0x9d2   :  { %v12429_v7 = vunpack.i.h.bf16 %v12427_v27  ;;  %v12428_v21 = vunpack.i.l.bf16 %v12427_v27  ;;  %v8421_v28 = vpack.c.bf16 %v8420_v52, %v8419_v4  ;;  %v15468_v52 = vld [vmem:[#allocation17_spill] sm:$0xff]  ;;  %v15469_v4 = vld [vmem:[#allocation18_spill] sm:$0xff] }
 0x9d3   :  { %v8589_v35 = vmax.f32 %v8567_v39, %v12444_v19 }
 0x9d4   :  { %v8478_v45 = vmax.f32 %v14527_v18, %v12429_v7  ;;  %v8477_v32 = vmax.f32 %v14530_v20, %v12428_v21  ;;  %8452 = vrot.lane.b32.xlu1 %v8450_v36, %s12645_s7  ;;  %8423 = vrot.lane.b32.xlu0 %v8421_v28, %s12646_s29  ;;  %v12452_v10 = vpop.permute.xlu1 %12451  ;;  %v15461_v18 = vld [vmem:[#allocation9_spill] sm:$0xff]  ;;  %v15471_v36 = vld [vmem:[#allocation22_spill] sm:$0xff]  ;;  %s12658_s7 = smov 115  }
 0x9d5   :  { %v12432_v17 = vpop.permute.xlu0 %12431  ;;  %v8566_v61 = vmax.f32 %v15461_v18, %v12308_v11  ;;  %v15462_v20 = vld [vmem:[#allocation13_spill] sm:$0xff]  ;;  %v12454_v58 = vunpack.i.h.bf16 %v12452_v10  ;;  %v12453_v40 = vunpack.i.l.bf16 %v12452_v10 }
 0x9d6   :  { %v12434_v57 = vunpack.i.h.bf16 %v12432_v17  ;;  %v12433_v59 = vunpack.i.l.bf16 %v12432_v17  ;;  %v8479_v0 = vpack.c.bf16 %v8478_v45, %v8477_v32  ;;  %v15470_v7 = vld [vmem:[#allocation21_spill] sm:$0xff] }
 0x9d7   :  { %v8588_v50 = vmax.f32 %v8566_v61, %v12443_v60  ;;  %v8647_v25 = vmax.f32 %v15464_v34, %v12454_v58  ;;  %v8646_v41 = vmax.f32 %v15465_v12, %v12453_v40  ;;  %v9398_v12 = vld [vmem:[%s15307_s11 + $0x8] sm:$0xff] }
 0x9d8   :  { %v8507_v47 = vmax.f32 %v15462_v20, %v12434_v57  ;;  %v8506_v43 = vmax.f32 %v15463_v5, %v12433_v59  ;;  %8481 = vrot.lane.b32.xlu0 %v8479_v0, %s12647_s3  ;;  %v12462_v46 = vpop.permute.xlu1 %12461  ;;  %v15472_v59 = vld [vmem:[#allocation23_spill] sm:$0xff]  ;;  %v15473_v0 = vld [vmem:[#allocation24_spill] sm:$0xff] }
 0x9d9   :  { %v12437_v31 = vpop.permute.xlu0 %12436  ;;  %v8590_v54 = vpack.c.bf16 %v8589_v35, %v8588_v50  ;;  %v12464_v26 = vunpack.i.h.bf16 %v12462_v46  ;;  %v12463_v2 = vunpack.i.l.bf16 %v12462_v46  ;;  %v8648_v3 = vpack.c.bf16 %v8647_v25, %v8646_v41  ;;  %v9397_v41 = vld [vmem:[%s15307_s11] sm:$0xff] }
 0x9da   :  { %v12439_v33 = vunpack.i.h.bf16 %v12437_v31  ;;  %v12438_v38 = vunpack.i.l.bf16 %v12437_v31  ;;  %v8508_v55 = vpack.c.bf16 %v8507_v47, %v8506_v43 }
 0x9db   :  { %v8705_v14 = vmax.f32 %v15468_v52, %v12464_v26  ;;  %v8704_v27 = vmax.f32 %v15469_v4, %v12463_v2  ;;  %v9400_v26 = vld [vmem:[%s15307_s11 + $0x18] sm:$0xff]  ;;  %v9399_v2 = vld [vmem:[%s15307_s11 + $0x10] sm:$0xff] }
 0x9dc   :  { %v8548_v9 = vmax.f32 %v8526_v23, %v12439_v33  ;;  %v8547_v51 = vmax.f32 %v8525_v8, %v12438_v38  ;;  %8510 = vrot.lane.b32.xlu1 %v8508_v55, %s12648_s6  ;;  %v12536_v52 = vld [vmem:[%s15306_s10 + $0x30] sm:$0xff]   ;;  %v12537_v4 = vld [vmem:[%s15306_s10 + $0x38] sm:$0xff]  }
 0x9dd   :  { %v12447_v53 = vpop.permute.xlu0 %12446  ;;  %v8706_v11 = vpack.c.bf16 %v8705_v14, %v8704_v27  ;;  %v12538_v27 = vld [vmem:[%s15306_s10 + $0x40] sm:$0xff]  }
 0x9de   :  { %v12449_v49 = vunpack.i.h.bf16 %v12447_v53  ;;  %v12448_v24 = vunpack.i.l.bf16 %v12447_v53  ;;  %v8549_v16 = vpack.c.bf16 %v8548_v9, %v8547_v51 }
 0x9e0   :  { %v8618_v1 = vmax.f32 %v15466_v48, %v12449_v49  ;;  %v8617_v44 = vmax.f32 %v15467_v13, %v12448_v24  ;;  %8551 = vrot.lane.b32.xlu0 %v8549_v16, %s12649_s0  ;;  %8592 = vrot.lane.b32.xlu1 %v8590_v54, %s12622_s26  ;;  %s12652_s26 = smov 27   ;;  %v12530_v16 = vld [vmem:[%s15306_s10 + $0x10] sm:$0xff]   ;;  %v12532_v13 = vld [vmem:[%s15306_s10] sm:$0xff]  }
 0x9e1   :  { %v12457_v15 = vpop.permute.xlu0 %12456 }
 0x9e2   :  { %v12459_v42 = vunpack.i.h.bf16 %v12457_v15  ;;  %v12458_v22 = vunpack.i.l.bf16 %v12457_v15  ;;  %v8619_v37 = vpack.c.bf16 %v8618_v1, %v8617_v44  ;;  %v12531_v1 = vld [vmem:[%s15306_s10 + $0x18] sm:$0xff]   ;;  %v12533_v15 = vld [vmem:[%s15306_s10 + $0x8] sm:$0xff]  }
 0x9e4   :  { %v8676_v21 = vmax.f32 %v15470_v7, %v12459_v42  ;;  %v8675_v28 = vmax.f32 %v15471_v36, %v12458_v22  ;;  %8621 = vrot.lane.b32.xlu0 %v8619_v37, %s12650_s2  ;;  %8650 = vrot.lane.b32.xlu1 %v8648_v3, %s12651_s5  ;;  %v12534_v42 = vld [vmem:[%s15306_s10 + $0x20] sm:$0xff]   ;;  %v12535_v37 = vld [vmem:[%s15306_s10 + $0x28] sm:$0xff]   ;;  %s12660_s5 = smov 124  }
 0x9e5   :  { %v12467_v45 = vpop.permute.xlu0 %12466  ;;  %v12539_v7 = vld [vmem:[%s15306_s10 + $0x48] sm:$0xff]  }
 0x9e6   :  { %v8677_v29 = vpack.c.bf16 %v8676_v21, %v8675_v28  ;;  %v12469_v17 = vunpack.i.h.bf16 %v12467_v45  ;;  %v12468_v19 = vunpack.i.l.bf16 %v12467_v45  ;;  %v12540_v21 = vld [vmem:[%s15306_s10 + $0x50] sm:$0xff]   ;;  %v12541_v28 = vld [vmem:[%s15306_s10 + $0x58] sm:$0xff]   ;;  %v12543_v45 = vld [vmem:[%s15306_s10 + $0x68] sm:$0xff]  }
 0x9e8   :  { %8679 = vrot.lane.b32.xlu0 %v8677_v29, %s12652_s26  ;;  %8708 = vrot.lane.b32.xlu1 %v8706_v11, %s12653_s24  ;;  %v8011_v10 = vmax.f32 %v15472_v59, %v12469_v17  ;;  %v8010_v6 = vmax.f32 %v15473_v0, %v12468_v19  ;;  %v12542_v29 = vld [vmem:[%s15306_s10 + $0x60] sm:$0xff]   ;;  %v12547_v17 = vld [vmem:[%s15306_s10 + $0x88] sm:$0xff]   ;;  %s12661_s26 = smov 123  }
 0x9e9   :  { %v11501_v0 = vld [vmem:[%s15308_s20] ss:$0 sm:$0xff] }
 0x9ea   :  { %v8012_v61 = vpack.c.bf16 %v8011_v10, %v8010_v6 }
 0xa17   :  { %v7783_v32 = vpop.permute.xlu1 %7782  ;;  %v7754_v30 = vpop.permute.xlu0 %7753 }
 0xa18   :  { %7757 = vst.msk [vmem:[#allocation4] sm:$0xff] %vm7756_vm7, %v7754_v30  ;;  %vm8252_vm7 = vcmask 359768  }
 0xa19   :  { %7786 = vst.msk [vmem:[#allocation4] sm:$0xff] %vm7785_vm8, %v7783_v32  ;;  %vm8281_vm8 = vcmask 367968   ;;  %v12544_v32 = vld [vmem:[%s15306_s10 + $0x70] sm:$0xff]  }
 0xa1b   :  { %v7841_v63 = vpop.permute.xlu1 %7840  ;;  %v7812_v62 = vpop.permute.xlu0 %7811 }
 0xa1c   :  { %7815 = vst.msk [vmem:[#allocation4] sm:$0xff] %vm7814_vm12, %v7812_v62  ;;  %vm8310_vm12 = vcmask 376168   ;;  %v12546_v62 = vld [vmem:[%s15306_s10 + $0x80] sm:$0xff]  }
 0xa1d   :  { %7844 = vst.msk [vmem:[#allocation4] sm:$0xff] %vm7843_vm14, %v7841_v63  ;;  %vm8339_vm14 = vcmask 384368   ;;  %v12545_v63 = vld [vmem:[%s15306_s10 + $0x78] sm:$0xff]  }
 0xa1f   :  { %v7899_v60 = vpop.permute.xlu1 %7898  ;;  %v7870_v57 = vpop.permute.xlu0 %7869 }
 0xa20   :  { %7873 = vst.msk [vmem:[#allocation4] sm:$0xff] %vm7872_vm11, %v7870_v57 }
 0xa21   :  { %7902 = vst.msk [vmem:[#allocation4] sm:$0xff] %vm7901_vm3, %v7899_v60  ;;  %vm8368_vm3 = vcmask 408968  }
 0xa23   :  { %v7928_v39 = vpop.permute.xlu1 %7927  ;;  %v7957_v18 = vpop.permute.xlu0 %7956 }
 0xa24   :  { %7931 = vst.msk [vmem:[#allocation4] sm:$0xff] %vm7930_vm4, %v7928_v39  ;;  %vm8397_vm4 = vcmask 417168  }
 0xa25   :  { %7960 = vst.msk [vmem:[#allocation4] sm:$0xff] %vm7959_vm0, %v7957_v18  ;;  %vm8426_vm0 = vcmask 425368  }
 0xa27   :  { %v7986_v20 = vpop.permute.xlu1 %7985  ;;  %v8040_v47 = vpop.permute.xlu0 %8039 }
 0xa28   :  { %7989 = vst.msk [vmem:[#allocation4] sm:$0xff] %vm7988_vm9, %v7986_v20  ;;  %vm8455_vm9 = vcmask 433568  }
 0xa29   :  { %8014 = vst.msk [vmem:[#allocation4] sm:$0xff] %vm8013_vm2, %v8012_v61  ;;  %vm8484_vm2 = vcmask 458168  }
 0xa2a   :  { %8043 = vst.msk [vmem:[#allocation4] sm:$0xff] %vm8042_vm13, %v8040_v47  ;;  %vm8513_vm13 = vcmask 466368  }
 0xa2b   :  { %v8069_v5 = vpop.permute.xlu1 %8068 }
 0xa2c   :  { %8072 = vst.msk [vmem:[#allocation4] sm:$0xff] %vm8071_vm15, %v8069_v5  ;;  %vm8554_vm15 = vcmask 474568  }
 0xa2e   :  { %v8098_v43 = vpop.permute.xlu0 %8097 }
 0xa2f   :  { %8101 = vst.msk [vmem:[#allocation4] sm:$0xff] %vm8100_vm10, %v8098_v43  ;;  %vm8595_vm10 = vcmask 482768  }
 0xa32   :  { %v8139_v23 = vpop.permute.xlu1 %8138 }
 0xa33   :  { %8142 = vst.msk [vmem:[#allocation4] sm:$0xff] %vm8141_vm6, %v8139_v23  ;;  %vm8624_vm6 = vcmask 507368  }
 0xa36   :  { %v8221_v56 = vpop.permute.xlu1 %8220  ;;  %v8180_v8 = vpop.permute.xlu0 %8179 }
 0xa37   :  { %8183 = vst.msk [vmem:[#allocation4] sm:$0xff] %vm8182_vm1, %v8180_v8  ;;  %vm8653_vm1 = vcmask 515568  }
 0xa38   :  { %8224 = vst.msk [vmem:[#allocation4] sm:$0xff] %vm8223_vm5, %v8221_v56  ;;  %vm8682_vm5 = vcmask 523768  }
 0xa3a   :  { %v8279_v31 = vpop.permute.xlu1 %8278  ;;  %v8250_v35 = vpop.permute.xlu0 %8249 }
 0xa3b   :  { %8253 = vst.msk [vmem:[#allocation4] sm:$0xff] %vm8252_vm7, %v8250_v35  ;;  %vm8711_vm7 = vcmask 531968  }
 0xa3c   :  { %8282 = vst.msk [vmem:[#allocation4] sm:$0xff] %vm8281_vm8, %v8279_v31  ;;  %vm8737_vm8 = vcmask 130048  }
 0xa3d   :  { %11722 = vmatprep.mubr.msk.bf16.mxu0 %vm8737_vm8, %v12530_v16 }
 0xa3e   :  { %v8337_v50 = vpop.permute.xlu1 %8336  ;;  %v8308_v33 = vpop.permute.xlu0 %8307 }
 0xa3f   :  { %8311 = vst.msk [vmem:[#allocation4] sm:$0xff] %vm8310_vm12, %v8308_v33  ;;  %vm9444_vm12 = vcmask 588800  }
 0xa40   :  { %8340 = vst.msk [vmem:[#allocation4] sm:$0xff] %vm8339_vm14, %v8337_v50  ;;  %vm91_vm14 = vcmask 211968  }
 0xa42   :  { %v8395_v38 = vpop.permute.xlu1 %8394  ;;  %v8366_v58 = vpop.permute.xlu0 %8365 }
 0xa43   :  { %8369 = vst.msk [vmem:[#allocation4] sm:$0xff] %vm8368_vm3, %v8366_v58  ;;  %vm9619_vm3 = vcmask 39968  }
 0xa44   :  { %8398 = vst.msk [vmem:[#allocation4] sm:$0xff] %vm8397_vm4, %v8395_v38  ;;  %vm9725_vm4 = vcmask 261120  }
 0xa46   :  { %v8453_v40 = vpop.permute.xlu1 %8452  ;;  %v8424_v55 = vpop.permute.xlu0 %8423 }
 0xa47   :  { %8427 = vst.msk [vmem:[#allocation4] sm:$0xff] %vm8426_vm0, %v8424_v55  ;;  %vm11076_vm0 = vcmask 7168  }
 0xa48   :  { %8456 = vst.msk [vmem:[#allocation4] sm:$0xff] %vm8455_vm9, %v8453_v40  ;;  %vm11125_vm9 = vcmask 15368  }
 0xa4a   :  { %v8482_v9 = vpop.permute.xlu0 %8481 }
 0xa4b   :  { %8485 = vst.msk [vmem:[#allocation4] sm:$0xff] %vm8484_vm2, %v8482_v9 }
 0xa4e   :  { %v8511_v51 = vpop.permute.xlu1 %8510 }
 0xa4f   :  { %8514 = vst.msk [vmem:[#allocation4] sm:$0xff] %vm8513_vm13, %v8511_v51 }
 0xa52   :  { %v8552_v46 = vpop.permute.xlu0 %8551  ;;  %v8593_v53 = vpop.permute.xlu1 %8592 }
 0xa53   :  { %8555 = vst.msk [vmem:[#allocation4] sm:$0xff] %vm8554_vm15, %v8552_v46 }
 0xa54   :  { %8596 = vst.msk [vmem:[#allocation4] sm:$0xff] %vm8595_vm10, %v8593_v53 }
 0xa56   :  { %v8622_v49 = vpop.permute.xlu0 %8621  ;;  %v8651_v24 = vpop.permute.xlu1 %8650 }
 0xa57   :  { %8625 = vst.msk [vmem:[#allocation4] sm:$0xff] %vm8624_vm6, %v8622_v49 }
 0xa58   :  { %8654 = vst.msk [vmem:[#allocation4] sm:$0xff] %vm8653_vm1, %v8651_v24 }
 0xa5a   :  { %v8680_v54 = vpop.permute.xlu0 %8679  ;;  %v8709_v34 = vpop.permute.xlu1 %8708 }
 0xa5b   :  { %8683 = vst.msk [vmem:[#allocation4] sm:$0xff] %vm8682_vm5, %v8680_v54 }
 0xa5c   :  { %8712 = vst.msk [vmem:[#allocation4] sm:$0xff] %vm8711_vm7, %v8709_v34 }
 0xa63   :  { %v8717_v25 = vld [vmem:[#allocation4] sm:$0xff] }
 0xa64   :  { %8873 = vrot.lane.b32.xlu1 %v8717_v25, %s12616_s23  ;;  %8734 = vrot.lane.b32.xlu0 %v8717_v25, %s12615_s30 }
 0xa68   :  { %9027 = vrot.lane.b32.xlu1 %v8717_v25, %s12654_s1  ;;  %8950 = vrot.lane.b32.xlu0 %v8717_v25, %s12634_s19 }
 0xa6c   :  { %9181 = vrot.lane.b32.xlu1 %v8717_v25, %s12655_s9  ;;  %9104 = vrot.lane.b32.xlu0 %v8717_v25, %s12656_s4 }
 0xa70   :  { %9335 = vrot.lane.b32.xlu1 %v8717_v25, %s12657_s27  ;;  %9258 = vrot.lane.b32.xlu0 %v8717_v25, %s12658_s7 }
 0xa74   :  { %9408 = vperm.xlu1 %12124, %v9398_v12   ;;  %9403 = vperm.xlu0 %12123, %v9397_v41  }
 0xa78   :  { %9418 = vperm.xlu1 %12124, %v9400_v26   ;;  %9413 = vperm.xlu0 %12123, %v9399_v2  }
 0xad6   :  { %v8735_v48 = vpop.permute.xlu0 %8734  ;;  %v8874_v44 = vpop.permute.xlu1 %8873 }
 0xad7   :  { %11720 = vmatprep.subr.bf16.mxu0 %v8735_v48 }
 0xad8   :  { %11721 = vmatpush3.bf16.msra.mxu0 %v8735_v48 }
 0xad9   :  { %11726 = vmatprep.subr.bf16.mxu0 %v8717_v25 }
 0xada   :  { %v8951_v22 = vpop.permute.xlu0 %8950  ;;  %v9028_v14 = vpop.permute.xlu1 %9027 }
 0xadb   :  { %11723 = vmatmul.mubr.msk.bf16.vlgmr.msra.gmra.mrb[168].mxu0 %vm8737_vm8, %v12531_v1 }
 0xadc   :  { %11727 = vmatpush3.bf16.msra.mxu0 %v8717_v25  ;;  %11728 = vmatprep.mubr.msk.bf16.mxu0 %vm8737_vm8, %v12532_v13 }
 0xadd   :  { %11732 = vmatprep.subr.bf16.mxu0 %v8874_v44 }
 0xade   :  { %v9105_v3 = vpop.permute.xlu0 %9104  ;;  %v9182_v36 = vpop.permute.xlu1 %9181 }
 0xae2   :  { %v9259_v11 = vpop.permute.xlu0 %9258  ;;  %v9336_v30 = vpop.permute.xlu1 %9335 }
 0xae7   :  { %11729 = vmatmul.mubr.msk.bf16.vlgmr.msra.gmra.mrb[168].mxu0 %vm8737_vm8, %v12533_v15 }
 0xae8   :  { %11733 = vmatpush3.bf16.msra.mxu0 %v8874_v44  ;;  %11734 = vmatprep.mubr.msk.bf16.mxu0 %vm8737_vm8, %v12534_v42 }
 0xae9   :  { %11738 = vmatprep.subr.bf16.mxu0 %v8951_v22 }
 0xaf3   :  { %11735 = vmatmul.mubr.msk.bf16.vlgmr.msra.gmra.mrb[168].mxu0 %vm8737_vm8, %v12535_v37  ;;  %v9404_v19 = vpop.permute.xlu0 %9403  ;;  %v9409_v60 = vpop.permute.xlu1 %9408 }
 0xaf4   :  { %11739 = vmatpush3.bf16.msra.mxu0 %v8951_v22  ;;  %11740 = vmatprep.mubr.msk.bf16.mxu0 %vm8737_vm8, %v12536_v52 }
 0xaf5   :  { %11744 = vmatprep.subr.bf16.mxu0 %v9028_v14 }
 0xaf7   :  { %v9414_v59 = vpop.permute.xlu0 %9413  ;;  %v9419_v5 = vpop.permute.xlu1 %9418 }
 0xaff   :  { %11741 = vmatmul.mubr.msk.bf16.vlgmr.msra.gmra.mrb[168].mxu0 %vm8737_vm8, %v12537_v4 }
 0xb00   :  { %11745 = vmatpush3.bf16.msra.mxu0 %v9028_v14  ;;  %11746 = vmatprep.mubr.msk.bf16.mxu0 %vm8737_vm8, %v12538_v27 }
 0xb01   :  { %11750 = vmatprep.subr.bf16.mxu0 %v9105_v3 }
 0xb0b   :  { %11747 = vmatmul.mubr.msk.bf16.vlgmr.msra.gmra.mrb[168].mxu0 %vm8737_vm8, %v12539_v7 }
 0xb0c   :  { %11751 = vmatpush3.bf16.msra.mxu0 %v9105_v3  ;;  %11752 = vmatprep.mubr.msk.bf16.mxu0 %vm8737_vm8, %v12540_v21 }
 0xb0d   :  { %11756 = vmatprep.subr.bf16.mxu0 %v9182_v36 }
 0xb17   :  { %11753 = vmatmul.mubr.msk.bf16.vlgmr.msra.gmra.mrb[168].mxu0 %vm8737_vm8, %v12541_v28 }
 0xb18   :  { %11757 = vmatpush3.bf16.msra.mxu0 %v9182_v36  ;;  %11758 = vmatprep.mubr.msk.bf16.mxu0 %vm8737_vm8, %v12542_v29 }
 0xb19   :  { %11762 = vmatprep.subr.bf16.mxu0 %v9259_v11 }
 0xb23   :  { %11759 = vmatmul.mubr.msk.bf16.vlgmr.msra.gmra.mrb[168].mxu0 %vm8737_vm8, %v12543_v45 }
 0xb24   :  { %11763 = vmatpush3.bf16.msra.mxu0 %v9259_v11  ;;  %11764 = vmatprep.mubr.msk.bf16.mxu0 %vm8737_vm8, %v12544_v32  ;;  %v9426_v11 = vld [vmem:[%s15309_s12] sm:$0xff]  ;;  %v9427_v32 = vld [vmem:[%s15309_s12 + $0x8] sm:$0xff] }
 0xb25   :  { %11768 = vmatprep.subr.bf16.mxu0 %v9336_v30 }
 0xb2f   :  { %11765 = vmatmul.mubr.msk.bf16.vlgmr.msra.gmra.mrb[168].mxu0 %vm8737_vm8, %v12545_v63 }
 0xb30   :  { %11769 = vmatpush3.bf16.msra.mxu0 %v9336_v30  ;;  %11770 = vmatprep.mubr.msk.bf16.mxu0 %vm8737_vm8, %v12546_v62  ;;  %v9428_v62 = vld [vmem:[%s15309_s12 + $0x10] sm:$0xff] }
 0xb3b   :  { %11771 = vmatmul.mubr.msk.bf16.vlgmr.msra.gmra.mrb[168].mxu0 %vm8737_vm8, %v12547_v17 }
 0xc0e   :  { %v11772_v57 = vpop.f32.mrb[168].mxu0 }
 0xc0f   :  { %v9378_v10 = vpop.f32.mrb[169].mxu0  ;;  %v14779_v6 = vadd.f32 %v11772_v57, %v9414_v59  ;;  %v9429_v57 = vld [vmem:[%s15309_s12 + $0x18] sm:$0xff] }
 0xc10   :  { %v14781_v39 = vadd.f32 %v9404_v19, %v9378_v10  ;;  %v11773_v18 = vpop.f32.mrb[170].mxu0 }
 0xc11   :  { %v9381_v61 = vpop.f32.mrb[171].mxu0  ;;  %v14786_v43 = vadd.f32 %v11773_v18, %v9419_v5  ;;  %v9442_v8 = vmul.f32 %v11501_v0, %v14779_v6 }
 0xc12   :  { %v14783_v20 = vadd.f32 %v9409_v60, %v9381_v61  ;;  %v9440_v47 = vmul.f32 %v11501_v0, %v14781_v39 }
 0xc13   :  { %v9451_v35 = vsel %vm9444_vm12, %v9442_v8, 0.0  ;;  %v9443_v50 = vmul.f32 %v11501_v0, %v14786_v43  ;;  %v9431_v8 = vld [vmem:[%s15310_s13 + $0x8] sm:$0xff] }
 0xc14   :  { %v9445_v23 = vsel %vm9444_vm12, %v9440_v47, 0.0  ;;  %v9441_v56 = vmul.f32 %v11501_v0, %v14783_v20  ;;  %v9430_v47 = vld [vmem:[%s15310_s13] sm:$0xff] }
 0xc15   :  { %9446 = vadd.xlane.f32.xlu0 %v9445_v23  ;;  %v9454_v33 = vsel %vm9444_vm12, %v9443_v50, 0.0  ;;  %v9433_v50 = vld [vmem:[%s15310_s13 + $0x18] sm:$0xff] }
 0xc16   :  { %v9448_v31 = vsel %vm9444_vm12, %v9441_v56, 0.0 }
 0xc17   :  { %9449 = vadd.xlane.f32.xlu1 %v9448_v31 }
 0xc19   :  { %9452 = vadd.xlane.f32.xlu0 %v9451_v35 }
 0xc1d   :  { %9455 = vadd.xlane.f32.xlu0 %v9454_v33 }
 0xca2   :  { %v9447_v38 = vpop.xlane.xlu0 %9446 }
 0xca3   :  { %v9457_v58 = vmul.f32 0.125, %v9447_v38 }
 0xca4   :  { %v9450_v40 = vpop.xlane.xlu1 %9449 }
 0xca5   :  { %v9461_v55 = vsub.f32 %v14781_v39, %v9457_v58  ;;  %v14796_v9 = vmul.f32 0.125, %v9450_v40 }
 0xca6   :  { %v9453_v51 = vpop.xlane.xlu0 %9452 }
 0xca7   :  { %v9465_v46 = vmul.f32 %v9461_v55, %v9461_v55  ;;  %v9462_v53 = vsub.f32 %v14783_v20, %v14796_v9  ;;  %v9459_v49 = vmul.f32 0.125, %v9453_v51 }
 0xca9   :  { %v9466_v24 = vmul.f32 %v9462_v53, %v9462_v53  ;;  %v9463_v54 = vsub.f32 %v14779_v6, %v9459_v49  ;;  %v9469_v16 = vmul.f32 %v11501_v0, %v9465_v46 }
 0xcaa   :  { %v9456_v34 = vpop.xlane.xlu0 %9455 }
 0xcab   :  { %v9467_v25 = vmul.f32 %v9463_v54, %v9463_v54  ;;  %v9460_v12 = vmul.f32 0.125, %v9456_v34  ;;  %v9473_v41 = vsel %vm9444_vm12, %v9469_v16, 0.0  ;;  %v9470_v26 = vmul.f32 %v11501_v0, %v9466_v24 }
 0xcac   :  { %9474 = vadd.xlane.f32.xlu1 %v9473_v41 }
 0xcad   :  { %v9464_v2 = vsub.f32 %v14786_v43, %v9460_v12  ;;  %v9476_v48 = vsel %vm9444_vm12, %v9470_v26, 0.0  ;;  %v9471_v1 = vmul.f32 %v11501_v0, %v9467_v25 }
 0xcae   :  { %9477 = vadd.xlane.f32.xlu0 %v9476_v48 }
 0xcaf   :  { %v9468_v13 = vmul.f32 %v9464_v2, %v9464_v2  ;;  %v9479_v44 = vsel %vm9444_vm12, %v9471_v1, 0.0 }
 0xcb0   :  { %9480 = vadd.xlane.f32.xlu1 %v9479_v44 }
 0xcb1   :  { %v9472_v15 = vmul.f32 %v11501_v0, %v9468_v13  ;;  %v9432_v0 = vld [vmem:[%s15310_s13 + $0x10] sm:$0xff]  ;;  %s12659_s13 = smov 105  }
 0xcb3   :  { %v9482_v42 = vsel %vm9444_vm12, %v9472_v15, 0.0 }
 0xcb4   :  { %9483 = vadd.xlane.f32.xlu0 %v9482_v42 }
 0xd39   :  { %v9475_v22 = vpop.xlane.xlu1 %9474 }
 0xd3a   :  { %v9485_v37 = vmul.f32 0.125, %v9475_v22 }
 0xd3b   :  { %v9478_v52 = vpop.xlane.xlu0 %9477 }
 0xd3c   :  { %v9489_v14 = vadd.f32 1e-05, %v9485_v37  ;;  %v9486_v4 = vmul.f32 0.125, %v9478_v52 }
 0xd3d   :  { %v9481_v27 = vpop.xlane.xlu1 %9480 }
 0xd3e   :  { %12588 = vrsqrt.f32 %v9489_v14  ;;  %v9490_v3 = vadd.f32 1e-05, %v9486_v4  ;;  %v9487_v7 = vmul.f32 0.125, %v9481_v27 }
 0xd40   :  { %12590 = vrsqrt.f32 %v9490_v3  ;;  %v9491_v21 = vadd.f32 1e-05, %v9487_v7 }
 0xd41   :  { %v9484_v36 = vpop.xlane.xlu0 %9483 }
 0xd42   :  { %12592 = vrsqrt.f32 %v9491_v21  ;;  %v9488_v28 = vmul.f32 0.125, %v9484_v36 }
 0xd44   :  { %v9492_v29 = vadd.f32 1e-05, %v9488_v28 }
 0xd46   :  { %12594 = vrsqrt.f32 %v9492_v29 }
 0xd48   :  { %v12589_v45 = vpop.eup %12588 }
 0xd49   :  { %v9497_v30 = vmul.f32 %v12589_v45, %v9426_v11 }
 0xd4a   :  { %v12591_v63 = vpop.eup %12590 }
 0xd4b   :  { %9511 = vperm.xlu1 %12124, %v9497_v30   ;;  %v9498_v17 = vmul.f32 %v12591_v63, %v9427_v32  ;;  %v9501_v61 = vmul.f32 %v9497_v30, %v9457_v58 }
 0xd4c   :  { %v12593_v19 = vpop.eup %12592 }
 0xd4d   :  { %9516 = vperm.xlu0 %12123, %v9498_v17   ;;  %v9499_v60 = vmul.f32 %v12593_v19, %v9428_v62  ;;  %v9505_v23 = vsub.f32 %v9430_v47, %v9501_v61  ;;  %v9502_v56 = vmul.f32 %v9498_v17, %v14796_v9 }
 0xd4f   :  { %v9503_v59 = vmul.f32 %v9499_v60, %v9459_v49  ;;  %v9506_v31 = vsub.f32 %v9431_v8, %v9502_v56 }
 0xd50   :  { %v12595_v10 = vpop.eup %12594 }
 0xd51   :  { %9521 = vperm.xlu0 %12123, %v9499_v60   ;;  %v9500_v18 = vmul.f32 %v12595_v10, %v9429_v57  ;;  %v9507_v5 = vsub.f32 %v9432_v0, %v9503_v59  ;;  %v15474_v59 = vmov 0  }
 0xd52   :  { %92 = vst.msk [vmem:[#allocation5] sm:$0xff] %vm91_vm14, %v15474_v59  ;;  %93 = vst.msk [vmem:[#allocation5 + $0x8] sm:$0xff] %vm91_vm14, %v15474_v59 }
 0xd53   :  { %9526 = vperm.xlu1 %12124, %v9500_v18   ;;  %v9504_v35 = vmul.f32 %v9500_v18, %v9460_v12 }
 0xd55   :  { %9545 = vperm.xlu0 %12123, %v9507_v5   ;;  %v9508_v33 = vsub.f32 %v9433_v50, %v9504_v35 }
 0xd57   :  { %9535 = vperm.xlu1 %12124, %v9505_v23  }
 0xd5b   :  { %9540 = vperm.xlu1 %12124, %v9506_v31  }
 0xd5f   :  { %9550 = vperm.xlu1 %12124, %v9508_v33  }
 0xdca   :  { %v9512_v58 = vpop.permute.xlu1 %9511 }
 0xdcb   :  { %v9529_v46 = vmul.f32 %v9512_v58, %v14781_v39 }
 0xdcc   :  { %v9517_v38 = vpop.permute.xlu0 %9516 }
 0xdcd   :  { %v9530_v16 = vmul.f32 %v9517_v38, %v14783_v20 }
 0xdd0   :  { %v9522_v40 = vpop.permute.xlu0 %9521 }
 0xdd1   :  { %v9531_v9 = vmul.f32 %v9522_v40, %v14779_v6 }
 0xdd2   :  { %v9527_v55 = vpop.permute.xlu1 %9526 }
 0xdd3   :  { %v9532_v41 = vmul.f32 %v9527_v55, %v14786_v43 }
 0xdd4   :  { %v9546_v51 = vpop.permute.xlu0 %9545 }
 0xdd5   :  { %v9555_v53 = vadd.f32 %v9546_v51, %v9531_v9 }
 0xdd6   :  { %v9536_v49 = vpop.permute.xlu1 %9535 }
 0xdd7   :  { %v9559_v24 = vmax.f32 %v9555_v53, 0.0  ;;  %v9553_v54 = vadd.f32 %v9536_v49, %v9529_v46 }
 0xdd9   :  { %9563 = vst.msk [vmem:[#allocation7 + $0x10] sm:$0xff] %vm9444_vm12, %v9559_v24  ;;  %v9557_v34 = vmax.f32 %v9553_v54, 0.0 }
 0xdda   :  { %v9541_v25 = vpop.permute.xlu1 %9540 }
 0xddb   :  { %9561 = vst.msk [vmem:[#allocation7] sm:$0xff] %vm9444_vm12, %v9557_v34  ;;  %v9554_v12 = vadd.f32 %v9541_v25, %v9530_v16 }
 0xddd   :  { %v9558_v26 = vmax.f32 %v9554_v12, 0.0  ;;  %v12548_v12 = vld [vmem:[%s15311_s14 + $0x80] sm:$0xff]  }
 0xdde   :  { %v9551_v6 = vpop.permute.xlu1 %9550  ;;  %11826 = vmatprep.mubr.msk.bf16.mxu1 %vm9725_vm4, %v12548_v12 }
 0xddf   :  { %9562 = vst.msk [vmem:[#allocation7 + $0x8] sm:$0xff] %vm9444_vm12, %v9558_v26  ;;  %v9556_v39 = vadd.f32 %v9551_v6, %v9532_v41  ;;  %v12550_v26 = vld [vmem:[%s15311_s14 + $0x20] sm:$0xff]  }
 0xde0   :  { %v9624_v13 = vld [vmem:[#allocation7 + $0x10] sm:$0xff]  ;;  %11778 = vmatprep.mubr.msk.bf16.mxu0 %vm9725_vm4, %v12550_v26 }
 0xde1   :  { %v9560_v2 = vmax.f32 %v9556_v39, 0.0 }
 0xde2   :  { %v9622_v48 = vld [vmem:[#allocation7] sm:$0xff] }
 0xde3   :  { %9564 = vst.msk [vmem:[#allocation7 + $0x18] sm:$0xff] %vm9444_vm12, %v9560_v2  ;;  %v10740_v2 = vld [vmem:[%s15312_s15] sm:$0xff] }
 0xde6   :  { %v9623_v1 = vld [vmem:[#allocation7 + $0x8] sm:$0xff] }
 0xde7   :  { %v12480_v20 = vpack.i.bf16 %v9623_v1, %v9622_v48 }
 0xde9   :  { %12481 = vrot.lane.b32.xlu1 %v12480_v20, %s12616_s23  ;;  %12471 = vrot.lane.b32.xlu0 %v12480_v20, %s12616_s23  ;;  %v10744_v20 = vld [vmem:[%s15312_s15 + $0x20] sm:$0xff] }
 0xdea   :  { %v9625_v44 = vld [vmem:[#allocation7 + $0x18] sm:$0xff] }
 0xdeb   :  { %v12485_v15 = vpack.i.bf16 %v9625_v44, %v9624_v13 }
 0xded   :  { %12486 = vrot.lane.b32.xlu1 %v12485_v15, %s12616_s23  ;;  %12476 = vrot.lane.b32.xlu0 %v12485_v15, %s12616_s23  ;;  %v10745_v15 = vld [vmem:[%s15312_s15 + $0x28] sm:$0xff] }
 0xe5b   :  { %v12482_v43 = vpop.permute.xlu1 %12481  ;;  %v12472_v42 = vpop.permute.xlu0 %12471 }
 0xe5c   :  { %v12484_v22 = vunpack.i.h.bf16 %v12482_v43  ;;  %v12483_v37 = vunpack.i.l.bf16 %v12482_v43  ;;  %v12474_v52 = vunpack.i.h.bf16 %v12472_v42  ;;  %v12473_v14 = vunpack.i.l.bf16 %v12472_v42  ;;  %v10747_v43 = vld [vmem:[%s15312_s15 + $0x38] sm:$0xff] }
 0xe5e   :  { %v9643_v4 = vmax.f32 %v9623_v1, %v12484_v22  ;;  %v9642_v27 = vmax.f32 %v9622_v48, %v12483_v37  ;;  %v9586_v3 = vmax.f32 %v9623_v1, %v12474_v52  ;;  %v9585_v7 = vmax.f32 %v9622_v48, %v12473_v14  ;;  %v10742_v48 = vld [vmem:[%s15312_s15 + $0x10] sm:$0xff]  ;;  %v10741_v1 = vld [vmem:[%s15312_s15 + $0x8] sm:$0xff] }
 0xe5f   :  { %v12487_v21 = vpop.permute.xlu1 %12486  ;;  %v12477_v36 = vpop.permute.xlu0 %12476  ;;  %v12549_v52 = vld [vmem:[%s15311_s14 + $0x88] sm:$0xff]  }
 0xe60   :  { %v12500_v28 = vpack.i.bf16 %v9643_v4, %v9642_v27  ;;  %v12490_v29 = vpack.i.bf16 %v9586_v3, %v9585_v7  ;;  %v12489_v11 = vunpack.i.h.bf16 %v12487_v21  ;;  %v12488_v45 = vunpack.i.l.bf16 %v12487_v21 }
 0xe61   :  { %v12479_v32 = vunpack.i.h.bf16 %v12477_v36  ;;  %v12478_v30 = vunpack.i.l.bf16 %v12477_v36  ;;  %v12554_v36 = vld [vmem:[%s15311_s14 + $0x30] sm:$0xff]  }
 0xe62   :  { %v9645_v63 = vmax.f32 %v9625_v44, %v12489_v11  ;;  %v9644_v62 = vmax.f32 %v9624_v13, %v12488_v45  ;;  %12501 = vrot.lane.b32.xlu1 %v12500_v28, %s12655_s9  ;;  %12491 = vrot.lane.b32.xlu0 %v12490_v29, %s12655_s9  ;;  %v12553_v28 = vld [vmem:[%s15311_s14 + $0x98] sm:$0xff]   ;;  %v12556_v29 = vld [vmem:[%s15311_s14 + $0xa0] sm:$0xff]  }
 0xe63   :  { %v9588_v17 = vmax.f32 %v9625_v44, %v12479_v32  ;;  %v9587_v19 = vmax.f32 %v9624_v13, %v12478_v30  ;;  %v10743_v13 = vld [vmem:[%s15312_s15 + $0x18] sm:$0xff]  ;;  %v10746_v44 = vld [vmem:[%s15312_s15 + $0x30] sm:$0xff]  ;;  %v12558_v32 = vld [vmem:[%s15311_s14] sm:$0xff]  }
 0xe64   :  { %v12505_v60 = vpack.i.bf16 %v9645_v63, %v9644_v62  ;;  %v12555_v11 = vld [vmem:[%s15311_s14 + $0x38] sm:$0xff]   ;;  %v12557_v30 = vld [vmem:[%s15311_s14 + $0xa8] sm:$0xff]  }
 0xe65   :  { %v12495_v57 = vpack.i.bf16 %v9588_v17, %v9587_v19 }
 0xe66   :  { %12506 = vrot.lane.b32.xlu1 %v12505_v60, %s12655_s9  ;;  %v12562_v60 = vld [vmem:[%s15311_s14 + $0x10] sm:$0xff]  }
 0xe67   :  { %12496 = vrot.lane.b32.xlu0 %v12495_v57, %s12655_s9  ;;  %v12561_v57 = vld [vmem:[%s15311_s14 + $0xb8] sm:$0xff]  }
 0xed4   :  { %v12502_v10 = vpop.permute.xlu1 %12501  ;;  %v12492_v0 = vpop.permute.xlu0 %12491 }
 0xed5   :  { %v12504_v18 = vunpack.i.h.bf16 %v12502_v10  ;;  %v12503_v61 = vunpack.i.l.bf16 %v12502_v10  ;;  %v12494_v47 = vunpack.i.h.bf16 %v12492_v0  ;;  %v12493_v5 = vunpack.i.l.bf16 %v12492_v0  ;;  %v12564_v10 = vld [vmem:[%s15311_s14 + $0xc0] sm:$0xff]   ;;  %v12563_v0 = vld [vmem:[%s15311_s14 + $0x18] sm:$0xff]  }
 0xed7   :  { %v9663_v23 = vmax.f32 %v9643_v4, %v12504_v18  ;;  %v9662_v56 = vmax.f32 %v9642_v27, %v12503_v61  ;;  %v9606_v8 = vmax.f32 %v9586_v3, %v12494_v47  ;;  %v9605_v31 = vmax.f32 %v9585_v7, %v12493_v5  ;;  %v12552_v4 = vld [vmem:[%s15311_s14 + $0x90] sm:$0xff]   ;;  %v12551_v3 = vld [vmem:[%s15311_s14 + $0x28] sm:$0xff]   ;;  %v12566_v61 = vld [vmem:[%s15311_s14 + $0x40] sm:$0xff]  }
 0xed8   :  { %v12507_v35 = vpop.permute.xlu1 %12506  ;;  %v12565_v47 = vld [vmem:[%s15311_s14 + $0xc8] sm:$0xff]   ;;  %v12568_v5 = vld [vmem:[%s15311_s14 + $0xd0] sm:$0xff]  }
 0xed9   :  { %v9666_v50 = vpack.c.bf16 %v9663_v23, %v9662_v56  ;;  %v9609_v33 = vpack.c.bf16 %v9606_v8, %v9605_v31  ;;  %v12509_v38 = vunpack.i.h.bf16 %v12507_v35  ;;  %v12508_v58 = vunpack.i.l.bf16 %v12507_v35  ;;  %v12497_v40 = vpop.permute.xlu0 %12496  ;;  %v12567_v56 = vld [vmem:[%s15311_s14 + $0x48] sm:$0xff]   ;;  %v12570_v8 = vld [vmem:[%s15311_s14 + $0x50] sm:$0xff]   ;;  %v12569_v31 = vld [vmem:[%s15311_s14 + $0xd8] sm:$0xff]  }
 0xeda   :  { %v12499_v55 = vunpack.i.h.bf16 %v12497_v40  ;;  %v12498_v9 = vunpack.i.l.bf16 %v12497_v40  ;;  %v12573_v40 = vld [vmem:[%s15311_s14 + $0xe8] sm:$0xff]  }
 0xedb   :  { %v9665_v51 = vmax.f32 %v9645_v63, %v12509_v38  ;;  %v9664_v46 = vmax.f32 %v9644_v62, %v12508_v58  ;;  %9670 = vrot.lane.b32.xlu1 %v9666_v50, %s12659_s13  ;;  %9613 = vrot.lane.b32.xlu0 %v9609_v33, %s12625_s8  ;;  %v12560_v63 = vld [vmem:[%s15311_s14 + $0xb0] sm:$0xff]   ;;  %v12572_v33 = vld [vmem:[%s15311_s14 + $0xe0] sm:$0xff]  }
 0xedc   :  { %v9608_v53 = vmax.f32 %v9588_v17, %v12499_v55  ;;  %v9607_v49 = vmax.f32 %v9587_v19, %v12498_v9  ;;  %v12559_v17 = vld [vmem:[%s15311_s14 + $0x8] sm:$0xff]   ;;  %v12571_v38 = vld [vmem:[%s15311_s14 + $0x58] sm:$0xff]   ;;  %v12574_v58 = vld [vmem:[%s15311_s14 + $0x60] sm:$0xff]  }
 0xedd   :  { %v9667_v24 = vpack.c.bf16 %v9665_v51, %v9664_v46  ;;  %v12576_v55 = vld [vmem:[%s15311_s14 + $0xf0] sm:$0xff]   ;;  %v12575_v9 = vld [vmem:[%s15311_s14 + $0x68] sm:$0xff]  }
 0xede   :  { %v9610_v54 = vpack.c.bf16 %v9608_v53, %v9607_v49  ;;  %v12578_v46 = vld [vmem:[%s15311_s14 + $0x70] sm:$0xff]   ;;  %v12577_v53 = vld [vmem:[%s15311_s14 + $0xf8] sm:$0xff]   ;;  %v12580_v49 = vld [vmem:[%s15311_s14 + $0x100] sm:$0xff]  }
 0xedf   :  { %9672 = vrot.lane.b32.xlu1 %v9667_v24, %s12659_s13  ;;  %v12579_v24 = vld [vmem:[%s15311_s14 + $0x78] sm:$0xff]  }
 0xee0   :  { %9615 = vrot.lane.b32.xlu0 %v9610_v54, %s12625_s8  ;;  %v12581_v54 = vld [vmem:[%s15311_s14 + $0x108] sm:$0xff]  }
 0xf4d   :  { %v9671_v16 = vpop.permute.xlu1 %9670  ;;  %v9614_v34 = vpop.permute.xlu0 %9613 }
 0xf4e   :  { %9620 = vst.msk [vmem:[#allocation5] sm:$0xff] %vm9619_vm3, %v9614_v34  ;;  %v12583_v34 = vld [vmem:[%s15311_s14 + $0x118] sm:$0xff]  }
 0xf4f   :  { %9676 = vst.msk [vmem:[#allocation5] sm:$0xff] %vm7872_vm11, %v9671_v16  ;;  %v12582_v16 = vld [vmem:[%s15311_s14 + $0x110] sm:$0xff]  }
 0xf51   :  { %v9673_v25 = vpop.permute.xlu1 %9672 }
 0xf52   :  { %v9616_v41 = vpop.permute.xlu0 %9615 }
 0xf53   :  { %9621 = vst.msk [vmem:[#allocation5 + $0x8] sm:$0xff] %vm9619_vm3, %v9616_v41 }
 0xf54   :  { %9677 = vst.msk [vmem:[#allocation5 + $0x8] sm:$0xff] %vm7872_vm11, %v9673_v25  ;;  %vm10827_vm11 = vcmask 146432  }
 0xf56   :  { %v14860_v6 = vld [vmem:[#allocation5] sm:$0xff] }
 0xf57   :  { %10169 = vrot.lane.b32.xlu0 %v14860_v6, %s12660_s5 }
 0xf5b   :  { %9719 = vrot.lane.b32.xlu0 %v14860_v6, %s12615_s30  ;;  %v14866_v39 = vld [vmem:[#allocation5 + $0x8] sm:$0xff] }
 0xf5c   :  { %10171 = vrot.lane.b32.xlu1 %v14866_v39, %s12660_s5 }
 0xf5f   :  { %9721 = vrot.lane.b32.xlu0 %v14866_v39, %s12615_s30 }
 0xf60   :  { %10289 = vrot.lane.b32.xlu1 %v14860_v6, %s12661_s26 }
 0xf63   :  { %10409 = vrot.lane.b32.xlu0 %v14860_v6, %s12634_s19 }
 0xf64   :  { %10291 = vrot.lane.b32.xlu1 %v14866_v39, %s12661_s26 }
 0xf67   :  { %9929 = vrot.lane.b32.xlu0 %v14860_v6, %s12616_s23 }
 0xf68   :  { %10411 = vrot.lane.b32.xlu1 %v14866_v39, %s12634_s19 }
 0xf6b   :  { %9931 = vrot.lane.b32.xlu0 %v14866_v39, %s12616_s23 }
 0xf6c   :  { %10529 = vrot.lane.b32.xlu1 %v14860_v6, %s12654_s1 }
 0xf6f   :  { %10049 = vrot.lane.b32.xlu0 %v14860_v6, %s12633_s18 }
 0xf70   :  { %10531 = vrot.lane.b32.xlu1 %v14866_v39, %s12654_s1 }
 0xf73   :  { %10051 = vrot.lane.b32.xlu0 %v14866_v39, %s12633_s18 }
 0xf74   :  { %10649 = vrot.lane.b32.xlu1 %v14860_v6, %s12656_s4 }
 0xf77   :  { %10750 = vperm.xlu0 %12123, %v10740_v2  }
 0xf78   :  { %10651 = vrot.lane.b32.xlu1 %v14866_v39, %s12656_s4 }
 0xf7b   :  { %10760 = vperm.xlu0 %12123, %v10742_v48  }
 0xf7c   :  { %10755 = vperm.xlu1 %12124, %v10741_v1  }
 0xf7f   :  { %10770 = vperm.xlu0 %12123, %v10744_v20  }
 0xf80   :  { %10765 = vperm.xlu1 %12124, %v10743_v13  }
 0xf83   :  { %10780 = vperm.xlu0 %12123, %v10746_v44  }
 0xf84   :  { %10775 = vperm.xlu1 %12124, %v10745_v15  }
 0xf88   :  { %10785 = vperm.xlu1 %12124, %v10747_v43  }
 0xfc9   :  { %v10170_v42 = vpop.permute.xlu0 %10169 }
 0xfca   :  { %11822 = vmatprep.subr.bf16.mxu1 %v10170_v42 }
 0xfcb   :  { %11823 = vmatpush3.bf16.msra.mxu1 %v10170_v42 }
 0xfcd   :  { %v9720_v22 = vpop.permute.xlu0 %9719 }
 0xfce   :  { %v10172_v37 = vpop.permute.xlu1 %10171  ;;  %11774 = vmatprep.subr.bf16.mxu0 %v9720_v22 }
 0xfcf   :  { %11824 = vmatprep.subr.bf16.mxu1 %v10172_v37  ;;  %11775 = vmatpush3.bf16.msra.mxu0 %v9720_v22 }
 0xfd0   :  { %11825 = vmatpush3.bf16.msra.mxu1 %v10172_v37 }
 0xfd1   :  { %v9722_v14 = vpop.permute.xlu0 %9721 }
 0xfd2   :  { %v10290_v27 = vpop.permute.xlu1 %10289  ;;  %11776 = vmatprep.subr.bf16.mxu0 %v9722_v14 }
 0xfd3   :  { %11827 = vmatmul.mubr.msk.bf16.vlgmr.msra.gmra.mrb[168].mxu1 %vm9725_vm4, %v12549_v52  ;;  %11834 = vmatprep.subr.bf16.mxu1 %v10290_v27  ;;  %v15060_v52 = vld [vmem:[%s15313_s21] ss:$0 sm:$0xff] }
 0xfd4   :  { %11777 = vmatpush3.bf16.msra.mxu0 %v9722_v14  ;;  %11835 = vmatpush3.bf16.msra.mxu1 %v10290_v27 }
 0xfd5   :  { %11786 = vmatprep.subr.bf16.mxu0 %v14860_v6  ;;  %11830 = vmatprep.mubr.msk.bf16.mxu1 %vm9725_vm4, %v12552_v4  ;;  %v10410_v21 = vpop.permute.xlu0 %10409 }
 0xfd6   :  { %v10292_v7 = vpop.permute.xlu1 %10291 }
 0xfd7   :  { %11779 = vmatmul.mubr.msk.bf16.vlgmr.msra.gmra.mrb[172].mxu0 %vm9725_vm4, %v12551_v3  ;;  %11836 = vmatprep.subr.bf16.mxu1 %v10292_v7 }
 0xfd8   :  { %11787 = vmatpush3.bf16.msra.mxu0 %v14860_v6  ;;  %11837 = vmatpush3.bf16.msra.mxu1 %v10292_v7 }
 0xfd9   :  { %11788 = vmatprep.subr.bf16.mxu0 %v14866_v39  ;;  %11846 = vmatprep.subr.bf16.mxu1 %v10410_v21  ;;  %v9930_v45 = vpop.permute.xlu0 %9929 }
 0xfda   :  { %11782 = vmatprep.mubr.msk.bf16.mxu0 %vm9725_vm4, %v12554_v36  ;;  %v10412_v62 = vpop.permute.xlu1 %10411 }
 0xfdb   :  { %11831 = vmatmul.mubr.msk.bf16.gmra.mrb[172].mxu1 %vm9725_vm4, %v12553_v28 }
 0xfdc   :  { %11789 = vmatpush3.bf16.msra.mxu0 %v14866_v39  ;;  %11838 = vmatprep.mubr.msk.bf16.mxu1 %vm9725_vm4, %v12556_v29 }
 0xfdd   :  { %11798 = vmatprep.subr.bf16.mxu0 %v9930_v45  ;;  %v9932_v19 = vpop.permute.xlu0 %9931 }
 0xfde   :  { %v10530_v59 = vpop.permute.xlu1 %10529 }
 0xfdf   :  { %11783 = vmatmul.mubr.msk.bf16.gmra.mrb[176].mxu0 %vm9725_vm4, %v12555_v11 }
 0xfe0   :  { %11790 = vmatprep.mubr.msk.bf16.mxu0 %vm9725_vm4, %v12558_v32 }
 0xfe1   :  { %v10050_v18 = vpop.permute.xlu0 %10049 }
 0xfe2   :  { %v10532_v23 = vpop.permute.xlu1 %10531 }
 0xfe3   :  { %11839 = vmatmul.mubr.msk.bf16.vlgmr.msra.gmra.mrb[168].mxu1 %vm9725_vm4, %v12557_v30 }
 0xfe4   :  { %11847 = vmatpush3.bf16.msra.mxu1 %v10410_v21  ;;  %11842 = vmatprep.mubr.msk.bf16.mxu1 %vm9725_vm4, %v12560_v63 }
 0xfe5   :  { %11848 = vmatprep.subr.bf16.mxu1 %v10412_v62  ;;  %v10052_v50 = vpop.permute.xlu0 %10051 }
 0xfe6   :  { %v10650_v35 = vpop.permute.xlu1 %10649 }
 0xfe7   :  { %11791 = vmatmul.mubr.msk.bf16.vlgmr.msra.gmra.mrb[172].mxu0 %vm9725_vm4, %v12559_v17 }
 0xfe8   :  { %11799 = vmatpush3.bf16.msra.mxu0 %v9930_v45  ;;  %11849 = vmatpush3.bf16.msra.mxu1 %v10412_v62 }
 0xfe9   :  { %11800 = vmatprep.subr.bf16.mxu0 %v9932_v19  ;;  %11858 = vmatprep.subr.bf16.mxu1 %v10530_v59 }
 0xfea   :  { %11794 = vmatprep.mubr.msk.bf16.mxu0 %vm9725_vm4, %v12562_v60  ;;  %v10652_v51 = vpop.permute.xlu1 %10651 }
 0xfeb   :  { %11843 = vmatmul.mubr.msk.bf16.gmra.mrb[172].mxu1 %vm9725_vm4, %v12561_v57 }
 0xfec   :  { %11801 = vmatpush3.bf16.msra.mxu0 %v9932_v19  ;;  %11850 = vmatprep.mubr.msk.bf16.mxu1 %vm9725_vm4, %v12564_v10 }
 0xfed   :  { %11810 = vmatprep.subr.bf16.mxu0 %v10050_v18 }
 0xfef   :  { %11795 = vmatmul.mubr.msk.bf16.gmra.mrb[176].mxu0 %vm9725_vm4, %v12563_v0 }
 0xff0   :  { %11802 = vmatprep.mubr.msk.bf16.mxu0 %vm9725_vm4, %v12566_v61 }
 0xff3   :  { %11851 = vmatmul.mubr.msk.bf16.vlgmr.msra.gmra.mrb[168].mxu1 %vm9725_vm4, %v12565_v47 }
 0xff4   :  { %11859 = vmatpush3.bf16.msra.mxu1 %v10530_v59  ;;  %11854 = vmatprep.mubr.msk.bf16.mxu1 %vm9725_vm4, %v12568_v5 }
 0xff5   :  { %11860 = vmatprep.subr.bf16.mxu1 %v10532_v23 }
 0xff6   :  { %v10751_v6 = vpop.permute.xlu0 %10750 }
 0xff7   :  { %11803 = vmatmul.mubr.msk.bf16.vlgmr.msra.gmra.mrb[172].mxu0 %vm9725_vm4, %v12567_v56 }
 0xff8   :  { %11811 = vmatpush3.bf16.msra.mxu0 %v10050_v18  ;;  %11861 = vmatpush3.bf16.msra.mxu1 %v10532_v23 }
 0xff9   :  { %11812 = vmatprep.subr.bf16.mxu0 %v10052_v50  ;;  %11870 = vmatprep.subr.bf16.mxu1 %v10650_v35 }
 0xffa   :  { %11806 = vmatprep.mubr.msk.bf16.mxu0 %vm9725_vm4, %v12570_v8  ;;  %v10761_v20 = vpop.permute.xlu0 %10760 }
 0xffb   :  { %11855 = vmatmul.mubr.msk.bf16.gmra.mrb[172].mxu1 %vm9725_vm4, %v12569_v31  ;;  %v10756_v39 = vpop.permute.xlu1 %10755 }
 0xffc   :  { %11813 = vmatpush3.bf16.msra.mxu0 %v10052_v50  ;;  %11862 = vmatprep.mubr.msk.bf16.mxu1 %vm9725_vm4, %v12572_v33 }
 0xffe   :  { %v10771_v21 = vpop.permute.xlu0 %10770 }
 0xfff   :  { %11807 = vmatmul.mubr.msk.bf16.gmra.mrb[176].mxu0 %vm9725_vm4, %v12571_v38  ;;  %v10766_v42 = vpop.permute.xlu1 %10765 }
0x1000   :  { %11814 = vmatprep.mubr.msk.bf16.mxu0 %vm9725_vm4, %v12574_v58 }
0x1002   :  { %v10781_v59 = vpop.permute.xlu0 %10780 }
0x1003   :  { %11863 = vmatmul.mubr.msk.bf16.vlgmr.msra.gmra.mrb[168].mxu1 %vm9725_vm4, %v12573_v40  ;;  %v10776_v32 = vpop.permute.xlu1 %10775 }
0x1004   :  { %11871 = vmatpush3.bf16.msra.mxu1 %v10650_v35  ;;  %11866 = vmatprep.mubr.msk.bf16.mxu1 %vm9725_vm4, %v12576_v55 }
0x1005   :  { %11872 = vmatprep.subr.bf16.mxu1 %v10652_v51 }
0x1007   :  { %11815 = vmatmul.mubr.msk.bf16.vlgmr.msra.gmra.mrb[172].mxu0 %vm9725_vm4, %v12575_v9  ;;  %v10786_v56 = vpop.permute.xlu1 %10785 }
0x1008   :  { %11873 = vmatpush3.bf16.msra.mxu1 %v10652_v51  ;;  %11818 = vmatprep.mubr.msk.bf16.mxu0 %vm9725_vm4, %v12578_v46 }
0x100b   :  { %11867 = vmatmul.mubr.msk.bf16.gmra.mrb[172].mxu1 %vm9725_vm4, %v12577_v53 }
0x100c   :  { %11874 = vmatprep.mubr.msk.bf16.mxu1 %vm9725_vm4, %v12580_v49 }
0x100f   :  { %11819 = vmatmul.mubr.msk.bf16.gmra.mrb[176].mxu0 %vm9725_vm4, %v12579_v24 }
0x1013   :  { %11875 = vmatmul.mubr.msk.bf16.vlgmr.msra.gmra.mrb[168].mxu1 %vm9725_vm4, %v12581_v54 }
0x1014   :  { %11878 = vmatprep.mubr.msk.bf16.mxu1 %vm9725_vm4, %v12582_v16 }
0x101b   :  { %11879 = vmatmul.mubr.msk.bf16.gmra.mrb[172].mxu1 %vm9725_vm4, %v12583_v34 }
0x10da   :  { %v11816_v25 = vpop.f32.mrb[172].mxu0 }
0x10db   :  { %v10101_v12 = vpop.f32.mrb[173].mxu0 }
0x10dc   :  { %v11817_v41 = vpop.f32.mrb[174].mxu0 }
0x10dd   :  { %v10104_v26 = vpop.f32.mrb[175].mxu0 }
0x10e2   :  { %v11820_v2 = vpop.f32.mrb[176].mxu0 }
0x10e3   :  { %v10117_v48 = vpop.f32.mrb[177].mxu0 }
0x10e4   :  { %v11821_v1 = vpop.f32.mrb[178].mxu0 }
0x10e5   :  { %v10120_v13 = vpop.f32.mrb[179].mxu0 }
0x10e6   :  { %v11876_v44 = vpop.f32.mrb[168].mxu1 }
0x10e7   :  { %v11882_v15 = vadd.f32 %v11876_v44, %v11816_v25  ;;  %v10701_v43 = vpop.f32.mrb[169].mxu1 }
0x10e8   :  { %v11883_v22 = vadd.f32 %v10701_v43, %v10101_v12  ;;  %v11877_v37 = vpop.f32.mrb[170].mxu1 }
0x10e9   :  { %v15062_v14 = vadd.f32 %v11882_v15, %v10761_v20  ;;  %v11884_v4 = vadd.f32 %v11877_v37, %v11817_v41  ;;  %v10704_v27 = vpop.f32.mrb[171].mxu1 }
0x10ea   :  { %v15064_v3 = vadd.f32 %v11883_v22, %v10751_v6  ;;  %v11885_v7 = vadd.f32 %v10704_v27, %v10104_v26 }
0x10eb   :  { %v10821_v36 = vmul.f32 %v15060_v52, %v15062_v14  ;;  %v15070_v29 = vadd.f32 %v11884_v4, %v10766_v42 }
0x10ec   :  { %v15068_v28 = vadd.f32 %v11885_v7, %v10756_v39  ;;  %v10819_v45 = vmul.f32 %v15060_v52, %v15064_v3 }
0x10ed   :  { %v10834_v11 = vsel %vm10827_vm11, %v10821_v36, 0.0  ;;  %v10822_v61 = vmul.f32 %v15060_v52, %v15070_v29 }
0x10ee   :  { %v11880_v30 = vpop.f32.mrb[172].mxu1  ;;  %10835 = vadd.xlane.f32.xlu0 %v10834_v11  ;;  %v10820_v63 = vmul.f32 %v15060_v52, %v15068_v28  ;;  %v10828_v18 = vsel %vm10827_vm11, %v10819_v45, 0.0 }
0x10ef   :  { %v11886_v62 = vadd.f32 %v11880_v30, %v11820_v2  ;;  %v10717_v17 = vpop.f32.mrb[173].mxu1  ;;  %v10837_v50 = vsel %vm10827_vm11, %v10822_v61, 0.0 }
0x10f0   :  { %v11887_v19 = vadd.f32 %v10717_v17, %v10117_v48  ;;  %v11881_v60 = vpop.f32.mrb[174].mxu1  ;;  %v10831_v57 = vsel %vm10827_vm11, %v10820_v63, 0.0 }
0x10f1   :  { %v11888_v10 = vadd.f32 %v11881_v60, %v11821_v1  ;;  %v10720_v0 = vpop.f32.mrb[175].mxu1  ;;  %10832 = vadd.xlane.f32.xlu1 %v10831_v57  ;;  %v15081_v47 = vadd.f32 %v11886_v62, %v10781_v59 }
0x10f2   :  { %v15083_v5 = vadd.f32 %v11887_v19, %v10771_v21  ;;  %v11889_v23 = vadd.f32 %v10720_v0, %v10120_v13  ;;  %10829 = vadd.xlane.f32.xlu0 %v10828_v18 }
0x10f3   :  { %v15089_v35 = vadd.f32 %v11888_v10, %v10786_v56  ;;  %v10825_v58 = vmul.f32 %v15060_v52, %v15081_v47 }
0x10f4   :  { %v15085_v8 = vadd.f32 %v11889_v23, %v10776_v32  ;;  %v10823_v31 = vmul.f32 %v15060_v52, %v15083_v5 }
0x10f5   :  { %v10826_v55 = vmul.f32 %v15060_v52, %v15089_v35  ;;  %v10846_v9 = vsel %vm10827_vm11, %v10825_v58, 0.0 }
0x10f6   :  { %10838 = vadd.xlane.f32.xlu0 %v10837_v50  ;;  %v10840_v33 = vsel %vm10827_vm11, %v10823_v31, 0.0  ;;  %v10824_v38 = vmul.f32 %v15060_v52, %v15085_v8 }
0x10f7   :  { %10841 = vadd.xlane.f32.xlu1 %v10840_v33  ;;  %v10849_v51 = vsel %vm10827_vm11, %v10826_v55, 0.0 }
0x10f8   :  { %v10843_v40 = vsel %vm10827_vm11, %v10824_v38, 0.0 }
0x10fa   :  { %10844 = vadd.xlane.f32.xlu0 %v10843_v40 }
0x10fb   :  { %10847 = vadd.xlane.f32.xlu1 %v10846_v9 }
0x10fe   :  { %10850 = vadd.xlane.f32.xlu0 %v10849_v51 }
0x117b   :  { %v10836_v46 = vpop.xlane.xlu0 %10835 }
0x117c   :  { %v15102_v53 = vmul.f32 0.5, %v10836_v46 }
0x117e   :  { %v10862_v49 = vsub.f32 %v15062_v14, %v15102_v53  ;;  %v10833_v24 = vpop.xlane.xlu1 %10832 }
0x117f   :  { %v10830_v54 = vpop.xlane.xlu0 %10829  ;;  %v15106_v34 = vmul.f32 0.5, %v10833_v24 }
0x1180   :  { %v10870_v16 = vmul.f32 %v10862_v49, %v10862_v49  ;;  %v15108_v25 = vmul.f32 0.5, %v10830_v54 }
0x1181   :  { %v10861_v6 = vsub.f32 %v15068_v28, %v15106_v34 }
0x1182   :  { %v10860_v12 = vsub.f32 %v15064_v3, %v15108_v25  ;;  %v10878_v41 = vmul.f32 %v15060_v52, %v10870_v16 }
0x1183   :  { %v10839_v26 = vpop.xlane.xlu0 %10838  ;;  %v10869_v42 = vmul.f32 %v10861_v6, %v10861_v6 }
0x1184   :  { %v10868_v39 = vmul.f32 %v10860_v12, %v10860_v12  ;;  %v15115_v2 = vmul.f32 0.5, %v10839_v26  ;;  %v10842_v48 = vpop.xlane.xlu1 %10841  ;;  %v10890_v1 = vsel %vm10827_vm11, %v10878_v41, 0.0 }
0x1185   :  { %v15118_v20 = vmul.f32 0.5, %v10842_v48  ;;  %10891 = vadd.xlane.f32.xlu1 %v10890_v1  ;;  %v10877_v19 = vmul.f32 %v15060_v52, %v10869_v42  ;;  %v10797_v1 = vld [vmem:[%s15314_s16] sm:$0xff] }
0x1186   :  { %v10863_v13 = vsub.f32 %v15070_v29, %v15115_v2  ;;  %v10876_v44 = vmul.f32 %v15060_v52, %v10868_v39 }
0x1187   :  { %v10864_v15 = vsub.f32 %v15083_v5, %v15118_v20  ;;  %v10845_v43 = vpop.xlane.xlu0 %10844  ;;  %v10887_v18 = vsel %vm10827_vm11, %v10877_v19, 0.0 }
0x1188   :  { %v10871_v22 = vmul.f32 %v10863_v13, %v10863_v13  ;;  %v15125_v37 = vmul.f32 0.5, %v10845_v43  ;;  %v10848_v4 = vpop.xlane.xlu1 %10847  ;;  %v10884_v27 = vsel %vm10827_vm11, %v10876_v44, 0.0 }
0x1189   :  { %v10872_v7 = vmul.f32 %v10864_v15, %v10864_v15  ;;  %v15128_v21 = vmul.f32 0.5, %v10848_v4  ;;  %10885 = vadd.xlane.f32.xlu1 %v10884_v27  ;;  %v10800_v27 = vld [vmem:[%s15314_s16 + $0x18] sm:$0xff] }
0x118a   :  { %v10865_v36 = vsub.f32 %v15085_v8, %v15125_v37  ;;  %v10879_v11 = vmul.f32 %v15060_v52, %v10871_v22 }
0x118b   :  { %v10866_v45 = vsub.f32 %v15081_v47, %v15128_v21  ;;  %v10851_v32 = vpop.xlane.xlu0 %10850  ;;  %v10880_v30 = vmul.f32 %v15060_v52, %v10872_v7 }
0x118c   :  { %v10873_v63 = vmul.f32 %v10865_v36, %v10865_v36  ;;  %v15136_v62 = vmul.f32 0.5, %v10851_v32  ;;  %v10893_v17 = vsel %vm10827_vm11, %v10879_v11, 0.0 }
0x118d   :  { %v10874_v60 = vmul.f32 %v10866_v45, %v10866_v45  ;;  %10894 = vadd.xlane.f32.xlu0 %v10893_v17  ;;  %v10896_v57 = vsel %vm10827_vm11, %v10880_v30, 0.0  ;;  %v10808_v30 = vld [vmem:[%s15315_s17 + $0x18] sm:$0xff] }
0x118e   :  { %v10867_v59 = vsub.f32 %v15089_v35, %v15136_v62  ;;  %10897 = vadd.xlane.f32.xlu1 %v10896_v57  ;;  %v10881_v61 = vmul.f32 %v15060_v52, %v10873_v63  ;;  %v10798_v63 = vld [vmem:[%s15314_s16 + $0x8] sm:$0xff] }
0x118f   :  { %v10882_v10 = vmul.f32 %v15060_v52, %v10874_v60 }
0x1190   :  { %v10875_v0 = vmul.f32 %v10867_v59, %v10867_v59  ;;  %v10899_v56 = vsel %vm10827_vm11, %v10881_v61, 0.0 }
0x1191   :  { %10888 = vadd.xlane.f32.xlu0 %v10887_v18  ;;  %v10902_v23 = vsel %vm10827_vm11, %v10882_v10, 0.0  ;;  %v10807_v10 = vld [vmem:[%s15315_s17 + $0x10] sm:$0xff] }
0x1192   :  { %10903 = vadd.xlane.f32.xlu1 %v10902_v23  ;;  %v10883_v31 = vmul.f32 %v15060_v52, %v10875_v0  ;;  %v10799_v52 = vld [vmem:[%s15314_s16 + $0x10] sm:$0xff]  ;;  %v10806_v0 = vld [vmem:[%s15315_s17 + $0x8] sm:$0xff] }
0x1194   :  { %v10905_v50 = vsel %vm10827_vm11, %v10883_v31, 0.0  ;;  %v10804_v31 = vld [vmem:[%s15314_s16 + $0x38] sm:$0xff] }
0x1195   :  { %10900 = vadd.xlane.f32.xlu0 %v10899_v56 }
0x1199   :  { %10906 = vadd.xlane.f32.xlu0 %v10905_v50  ;;  %v10802_v50 = vld [vmem:[%s15314_s16 + $0x28] sm:$0xff] }
0x1212   :  { %v10892_v33 = vpop.xlane.xlu1 %10891 }
0x1213   :  { %v10910_v38 = vmul.f32 0.5, %v10892_v33 }
0x1215   :  { %v10918_v58 = vadd.f32 1e-05, %v10910_v38 }
0x1216   :  { %v10886_v40 = vpop.xlane.xlu1 %10885 }
0x1217   :  { %12596 = vrsqrt.f32 %v10918_v58  ;;  %v10908_v55 = vmul.f32 0.5, %v10886_v40 }
0x1219   :  { %v10916_v9 = vadd.f32 1e-05, %v10908_v55  ;;  %v10803_v55 = vld [vmem:[%s15314_s16 + $0x30] sm:$0xff] }
0x121a   :  { %v10895_v51 = vpop.xlane.xlu0 %10894 }
0x121b   :  { %12598 = vrsqrt.f32 %v10916_v9  ;;  %v10911_v46 = vmul.f32 0.5, %v10895_v51  ;;  %v10898_v49 = vpop.xlane.xlu1 %10897  ;;  %v10801_v9 = vld [vmem:[%s15314_s16 + $0x20] sm:$0xff] }
0x121c   :  { %v10912_v13 = vmul.f32 0.5, %v10898_v49 }
0x121d   :  { %v10919_v24 = vadd.f32 1e-05, %v10911_v46 }
0x121e   :  { %v10889_v54 = vpop.xlane.xlu0 %10888  ;;  %v10920_v7 = vadd.f32 1e-05, %v10912_v13 }
0x121f   :  { %12600 = vrsqrt.f32 %v10919_v24  ;;  %v10909_v16 = vmul.f32 0.5, %v10889_v54  ;;  %v10904_v26 = vpop.xlane.xlu1 %10903  ;;  %v10810_v24 = vld [vmem:[%s15315_s17 + $0x28] sm:$0xff] }
0x1220   :  { %v10914_v15 = vmul.f32 0.5, %v10904_v26 }
0x1221   :  { %v12597_v12 = vpop.eup %12596  ;;  %v10917_v41 = vadd.f32 1e-05, %v10909_v16 }
0x1222   :  { %v10901_v6 = vpop.xlane.xlu0 %10900  ;;  %v10934_v39 = vmul.f32 %v12597_v12, %v10799_v52  ;;  %v10922_v11 = vadd.f32 1e-05, %v10914_v15  ;;  %v10809_v12 = vld [vmem:[%s15315_s17 + $0x20] sm:$0xff] }
0x1223   :  { %12602 = vrsqrt.f32 %v10917_v41  ;;  %v10913_v48 = vmul.f32 0.5, %v10901_v6  ;;  %v10812_v41 = vld [vmem:[%s15315_s17 + $0x38] sm:$0xff] }
0x1224   :  { %10968 = vperm.xlu1 %12124, %v10934_v39   ;;  %v10942_v59 = vmul.f32 %v10934_v39, %v15102_v53  ;;  %v10805_v53 = vld [vmem:[%s15315_s17] sm:$0xff] }
0x1225   :  { %v12599_v44 = vpop.eup %12598  ;;  %v10921_v43 = vadd.f32 1e-05, %v10913_v48 }
0x1226   :  { %v10907_v42 = vpop.xlane.xlu0 %10906  ;;  %v10932_v22 = vmul.f32 %v12599_v44, %v10797_v1  ;;  %v10950_v61 = vsub.f32 %v10807_v10, %v10942_v59 }
0x1227   :  { %v10915_v4 = vmul.f32 0.5, %v10907_v42  ;;  %12604 = vrsqrt.f32 %v10921_v43 }
0x1228   :  { %10958 = vperm.xlu1 %12124, %v10932_v22   ;;  %v10940_v23 = vmul.f32 %v10932_v22, %v15108_v25 }
0x1229   :  { %v12601_v36 = vpop.eup %12600  ;;  %v10923_v45 = vadd.f32 1e-05, %v10915_v4 }
0x122a   :  { %v10935_v32 = vmul.f32 %v12601_v36, %v10800_v27  ;;  %v10948_v38 = vsub.f32 %v10805_v53, %v10940_v23 }
0x122b   :  { %12606 = vrsqrt.f32 %v10923_v45 }
0x122c   :  { %12608 = vrsqrt.f32 %v10920_v7  ;;  %10973 = vperm.xlu1 %12124, %v10935_v32   ;;  %v10943_v17 = vmul.f32 %v10935_v32, %v15115_v2 }
0x122d   :  { %v12603_v19 = vpop.eup %12602  ;;  %12610 = vrsqrt.f32 %v10922_v11 }
0x122e   :  { %v10951_v60 = vsub.f32 %v10808_v30, %v10943_v17  ;;  %v10933_v57 = vmul.f32 %v12603_v19, %v10798_v63 }
0x1230   :  { %11021 = vperm.xlu1 %12124, %v10951_v60   ;;  %10963 = vperm.xlu0 %12123, %v10933_v57   ;;  %v10941_v18 = vmul.f32 %v10933_v57, %v15106_v34 }
0x1231   :  { %v12605_v56 = vpop.eup %12604 }
0x1232   :  { %v10949_v2 = vsub.f32 %v10806_v0, %v10941_v18  ;;  %v10937_v25 = vmul.f32 %v12605_v56, %v10802_v50 }
0x1234   :  { %11016 = vperm.xlu0 %12123, %v10950_v61   ;;  %11011 = vperm.xlu1 %12124, %v10949_v2   ;;  %v10945_v49 = vmul.f32 %v10937_v25, %v15125_v37 }
0x1235   :  { %v12607_v34 = vpop.eup %12606 }
0x1236   :  { %v12609_v33 = vpop.eup %12608  ;;  %v10939_v58 = vmul.f32 %v12607_v34, %v10804_v31  ;;  %v10953_v54 = vsub.f32 %v10810_v24, %v10945_v49 }
0x1237   :  { %v12611_v40 = vpop.eup %12610  ;;  %v10936_v46 = vmul.f32 %v12609_v33, %v10801_v9 }
0x1238   :  { %11006 = vperm.xlu0 %12123, %v10948_v38   ;;  %10993 = vperm.xlu1 %12124, %v10939_v58   ;;  %v10938_v51 = vmul.f32 %v12611_v40, %v10803_v55  ;;  %v10947_v52 = vmul.f32 %v10939_v58, %v15136_v62 }
0x1239   :  { %v10944_v16 = vmul.f32 %v10936_v46, %v15118_v20  ;;  %v10811_v20 = vld [vmem:[%s15315_s17 + $0x30] sm:$0xff] }
0x123a   :  { %v10955_v26 = vsub.f32 %v10812_v41, %v10947_v52  ;;  %v10946_v6 = vmul.f32 %v10938_v51, %v15128_v21 }
0x123b   :  { %v10952_v37 = vsub.f32 %v10809_v12, %v10944_v16 }
0x123c   :  { %10988 = vperm.xlu0 %12123, %v10938_v51   ;;  %10983 = vperm.xlu1 %12124, %v10937_v25   ;;  %v10954_v62 = vsub.f32 %v10811_v20, %v10946_v6 }
0x1240   :  { %10978 = vperm.xlu0 %12123, %v10936_v46   ;;  %11031 = vperm.xlu1 %12124, %v10953_v54  }
0x1244   :  { %11026 = vperm.xlu0 %12123, %v10952_v37   ;;  %11041 = vperm.xlu1 %12124, %v10955_v26  }
0x1248   :  { %11036 = vperm.xlu0 %12123, %v10954_v62  }
0x12a3   :  { %v10969_v39 = vpop.permute.xlu1 %10968 }
0x12a4   :  { %v10998_v42 = vmul.f32 %v10969_v39, %v15062_v14 }
0x12a7   :  { %v10959_v48 = vpop.permute.xlu1 %10958 }
0x12a8   :  { %v10996_v11 = vmul.f32 %v10959_v48, %v15064_v3 }
0x12ab   :  { %v10974_v1 = vpop.permute.xlu1 %10973 }
0x12ac   :  { %v10999_v13 = vmul.f32 %v10974_v1, %v15070_v29 }
0x12af   :  { %v11022_v44 = vpop.permute.xlu1 %11021  ;;  %v10964_v15 = vpop.permute.xlu0 %10963 }
0x12b0   :  { %v11047_v43 = vadd.f32 %v11022_v44, %v10999_v13  ;;  %v10997_v21 = vmul.f32 %v10964_v15, %v15068_v28 }
0x12b2   :  { %v11055_v22 = vmax.f32 %v11047_v43, 0.0 }
0x12b3   :  { %v11012_v4 = vpop.permute.xlu1 %11011  ;;  %v11017_v27 = vpop.permute.xlu0 %11016 }
0x12b4   :  { %11063 = vst.msk [vmem:[#allocation8 + $0x18] sm:$0xff] %vm10827_vm11, %v11055_v22  ;;  %v11045_v7 = vadd.f32 %v11012_v4, %v10997_v21  ;;  %v11046_v36 = vadd.f32 %v11017_v27, %v10998_v42 }
0x12b6   :  { %v11053_v45 = vmax.f32 %v11045_v7, 0.0  ;;  %v11054_v32 = vmax.f32 %v11046_v36, 0.0 }
0x12b7   :  { %v10994_v30 = vpop.permute.xlu1 %10993  ;;  %v11007_v29 = vpop.permute.xlu0 %11006 }
0x12b8   :  { %11061 = vst.msk [vmem:[#allocation8 + $0x8] sm:$0xff] %vm10827_vm11, %v11053_v45  ;;  %11062 = vst.msk [vmem:[#allocation8 + $0x10] sm:$0xff] %vm10827_vm11, %v11054_v32  ;;  %v11044_v14 = vadd.f32 %v11007_v29, %v10996_v11 }
0x12ba   :  { %v11052_v63 = vmax.f32 %v11044_v14, 0.0 }
0x12bb   :  { %v10984_v28 = vpop.permute.xlu1 %10983  ;;  %v10989_v17 = vpop.permute.xlu0 %10988  ;;  %v11088_v19 = vld [vmem:[#allocation8 + $0x18] sm:$0xff] }
0x12bc   :  { %11060 = vst.msk [vmem:[#allocation8] sm:$0xff] %vm10827_vm11, %v11052_v63  ;;  %11107 = vrot.lane.b32.xlu1 %v11088_v19, %s12656_s4  ;;  %v11001_v3 = vmul.f32 %v10984_v28, %v15085_v8  ;;  %v11003_v8 = vmul.f32 %v10994_v30, %v15089_v35  ;;  %v11002_v50 = vmul.f32 %v10989_v17, %v15081_v47 }
0x12bd   :  { %11080 = vst.msk [vmem:[%s15316_s22 + $0x18] sm:$0xff] %vm11076_vm0, %v11088_v19 }
0x12bf   :  { %v11032_v60 = vpop.permute.xlu1 %11031  ;;  %v10979_v57 = vpop.permute.xlu0 %10978  ;;  %v11086_v59 = vld [vmem:[#allocation8 + $0x8] sm:$0xff]  ;;  %v11087_v10 = vld [vmem:[#allocation8 + $0x10] sm:$0xff] }
0x12c0   :  { %v11049_v0 = vadd.f32 %v11032_v60, %v11001_v3  ;;  %11103 = vrot.lane.b32.xlu1 %v11086_v59, %s12656_s4  ;;  %11105 = vrot.lane.b32.xlu0 %v11087_v10, %s12656_s4  ;;  %11078 = vst.msk [vmem:[%s15316_s22 + $0x8] sm:$0xff] %vm11076_vm0, %v11086_v59  ;;  %11079 = vst.msk [vmem:[%s15316_s22 + $0x10] sm:$0xff] %vm11076_vm0, %v11087_v10  ;;  %v11000_v61 = vmul.f32 %v10979_v57, %v15083_v5 }
0x12c2   :  { %v11057_v18 = vmax.f32 %v11049_v0, 0.0 }
0x12c3   :  { %v11042_v2 = vpop.permute.xlu1 %11041  ;;  %v11027_v23 = vpop.permute.xlu0 %11026  ;;  %v11085_v56 = vld [vmem:[#allocation8] sm:$0xff] }
0x12c4   :  { %11065 = vst.msk [vmem:[#allocation8 + $0x28] sm:$0xff] %vm10827_vm11, %v11057_v18  ;;  %v11051_v53 = vadd.f32 %v11042_v2, %v11003_v8  ;;  %v11048_v31 = vadd.f32 %v11027_v23, %v11000_v61  ;;  %11101 = vrot.lane.b32.xlu0 %v11085_v56, %s12656_s4 }
0x12c5   :  { %11077 = vst.msk [vmem:[%s15316_s22] sm:$0xff] %vm11076_vm0, %v11085_v56 }
0x12c6   :  { %v11059_v35 = vmax.f32 %v11051_v53, 0.0  ;;  %v11056_v34 = vmax.f32 %v11048_v31, 0.0 }
0x12c7   :  { %v11037_v33 = vpop.permute.xlu0 %11036 }
0x12c8   :  { %11067 = vst.msk [vmem:[#allocation8 + $0x38] sm:$0xff] %vm10827_vm11, %v11059_v35  ;;  %11064 = vst.msk [vmem:[#allocation8 + $0x20] sm:$0xff] %vm10827_vm11, %v11056_v34  ;;  %v11050_v5 = vadd.f32 %v11037_v33, %v11002_v50 }
0x12ca   :  { %v11058_v38 = vmax.f32 %v11050_v5, 0.0 }
0x12cb   :  { %v11090_v58 = vld [vmem:[#allocation8 + $0x28] sm:$0xff] }
0x12cc   :  { %11066 = vst.msk [vmem:[#allocation8 + $0x30] sm:$0xff] %vm10827_vm11, %v11058_v38  ;;  %11111 = vrot.lane.b32.xlu1 %v11090_v58, %s12656_s4 }
0x12cd   :  { %11082 = vst.msk [vmem:[%s15316_s22 + $0x28] sm:$0xff] %vm11076_vm0, %v11090_v58 }
0x12cf   :  { %v11092_v47 = vld [vmem:[#allocation8 + $0x38] sm:$0xff]  ;;  %v11089_v25 = vld [vmem:[#allocation8 + $0x20] sm:$0xff] }
0x12d0   :  { %11115 = vrot.lane.b32.xlu1 %v11092_v47, %s12656_s4  ;;  %11109 = vrot.lane.b32.xlu0 %v11089_v25, %s12656_s4  ;;  %11084 = vst.msk [vmem:[%s15316_s22 + $0x38] sm:$0xff] %vm11076_vm0, %v11092_v47  ;;  %11081 = vst.msk [vmem:[%s15316_s22 + $0x20] sm:$0xff] %vm11076_vm0, %v11089_v25 }
0x12d3   :  { %v11091_v40 = vld [vmem:[#allocation8 + $0x30] sm:$0xff] }
0x12d4   :  { %11113 = vrot.lane.b32.xlu0 %v11091_v40, %s12656_s4  ;;  %11083 = vst.msk [vmem:[%s15316_s22 + $0x30] sm:$0xff] %vm11076_vm0, %v11091_v40 }
0x132e   :  { %v11108_v55 = vpop.permute.xlu1 %11107 }
0x132f   :  { %11129 = vst.msk [vmem:[%s15316_s22 + $0x18] sm:$0xff] %vm11125_vm9, %v11108_v55 }
0x1332   :  { %v11104_v9 = vpop.permute.xlu1 %11103  ;;  %v11106_v51 = vpop.permute.xlu0 %11105 }
0x1333   :  { %11127 = vst.msk [vmem:[%s15316_s22 + $0x8] sm:$0xff] %vm11125_vm9, %v11104_v9  ;;  %11128 = vst.msk [vmem:[%s15316_s22 + $0x10] sm:$0xff] %vm11125_vm9, %v11106_v51 }
0x1336   :  { %v11102_v46 = vpop.permute.xlu0 %11101 }
0x1337   :  { %11126 = vst.msk [vmem:[%s15316_s22] sm:$0xff] %vm11125_vm9, %v11102_v46 }
0x133e   :  { %v11112_v49 = vpop.permute.xlu1 %11111 }
0x133f   :  { %11131 = vst.msk [vmem:[%s15316_s22 + $0x28] sm:$0xff] %vm11125_vm9, %v11112_v49 }
0x1342   :  { %v11116_v24 = vpop.permute.xlu1 %11115  ;;  %v11110_v54 = vpop.permute.xlu0 %11109 }
0x1343   :  { %11133 = vst.msk [vmem:[%s15316_s22 + $0x38] sm:$0xff] %vm11125_vm9, %v11116_v24  ;;  %11130 = vst.msk [vmem:[%s15316_s22 + $0x20] sm:$0xff] %vm11125_vm9, %v11110_v54 }
0x1346   :  { %v11114_v16 = vpop.permute.xlu0 %11113 }
0x1347   :  { %11132 = vst.msk [vmem:[%s15316_s22 + $0x30] sm:$0xff] %vm11125_vm9, %v11114_v16 }

</bundles_post_ra>
